<compile_context>
chip_gen: v7x
topology: tpu7x:2x2x1
jax: 0.10.0
libtpu: 0.0.40
codegen_flags: <defaults>
</compile_context>

<pallas_src>
import functools

import numpy as np
import jax
import jax.numpy as jnp
from jax.experimental import pallas as pl
from jax.experimental.pallas import tpu as pltpu


# --------------------------------------------------------------------------------
# in-kernel building blocks (operate on values already resident in VMEM)
# --------------------------------------------------------------------------------
def _conv3x3_c1(xpad, w, b, H, W):
    """3x3 SAME conv for Cin=1 + bias + ReLU, as 9 VPU broadcast-FMAs.

    xpad: (H+2, W+2, 1), w: (3, 3, 1, Cout), b: (1, Cout) -> (H, W, Cout).
    """
    Cout = w.shape[-1]
    acc = jnp.zeros((H, W, Cout), jnp.float32)
    for dy in range(3):
        for dx in range(3):
            patch = xpad[dy:dy + H, dx:dx + W, :]      # (H, W, 1)
            acc = acc + patch * w[dy, dx][None]        # (1, 1, Cout) broadcast
    acc = acc + b[None]
    return jnp.maximum(acc, 0.0)


def _conv3x3_mxu(xpad, w, b, act, H, W, Cin, Cout):
    """3x3 SAME conv + bias + activation as shift-and-matmul on the MXU.

    xpad: (H+2, W+2, Cin), w: (3, 3, Cin, Cout), b: (1, Cout) -> flat (H*W, Cout).
    The 3 dx-shifted views are staged once; per-dy slicing + the (H,W)->H*W merge
    are layout preserving (W % 8 == 0), so the 9 matmul operands need no relayout.
    """
    xs = [xpad[:, dx:dx + W, :] for dx in range(3)]    # 3 x (H+2, W, Cin)
    acc = jnp.zeros((H * W, Cout), jnp.float32)
    for dy in range(3):
        for dx in range(3):
            patch = xs[dx][dy:dy + H].reshape(H * W, Cin)
            acc = acc + jnp.dot(patch, w[dy, dx],
                                preferred_element_type=jnp.float32)
    acc = acc + b
    if act == "relu":
        return jnp.maximum(acc, 0.0)
    return jax.nn.sigmoid(acc)


def _maxpool2x2(h_flat, H, W):
    """2x2 / stride-2 max pool on a row-major-flattened (H*W, C) activation.

    Four exact one-hot gather matmuls (MXU) + 3 elementwise maxima; avoids
    sublane-interleaving reshapes.  W must be a power of two (shift/mask decode).
    """
    Hp, Wp = H // 2, W // 2
    r = jax.lax.broadcasted_iota(jnp.int32, (Hp * Wp, H * W), 0)
    c = jax.lax.broadcasted_iota(jnp.int32, (Hp * Wp, H * W), 1)
    i = r >> (Wp.bit_length() - 1)                     # r // Wp
    k = r & (Wp - 1)                                   # r %  Wp
    base = 2 * W * i + 2 * k

    def tap(jy, jx):
        sel = (c == base + W * jy + jx).astype(jnp.float32)
        return jnp.dot(sel, h_flat, preferred_element_type=jnp.float32)

    return jnp.maximum(jnp.maximum(tap(0, 0), tap(0, 1)),
                       jnp.maximum(tap(1, 0), tap(1, 1)))


def _upsample2x(h_flat, Hp, Wp):
    """Nearest-neighbour 2x upsample of a flattened (Hp*Wp, C) activation.

    One exact one-hot gather matmul: out[y*W + x] = in[(y//2)*Wp + x//2].
    """
    H, W = 2 * Hp, 2 * Wp
    r = jax.lax.broadcasted_iota(jnp.int32, (H * W, Hp * Wp), 0)
    c = jax.lax.broadcasted_iota(jnp.int32, (H * W, Hp * Wp), 1)
    y_half = r >> (2 * W).bit_length() - 1             # (r // W) // 2
    x_half = (r & (W - 1)) >> 1                        # (r %  W) // 2
    sel = (c == Wp * y_half + x_half).astype(jnp.float32)
    return jnp.dot(sel, h_flat, preferred_element_type=jnp.float32)


# --------------------------------------------------------------------------------
# fused kernel: one grid step == one batch element, everything VMEM-resident
# --------------------------------------------------------------------------------
def _colorization_kernel(x_ref, w1_ref, b1_ref, w2_ref, b2_ref, w3_ref, b3_ref,
                         w4_ref, b4_ref, o_ref, pad1, pad2, pad3, pad4, *, H, W):
    Hp, Wp = H // 2, W // 2

    # SAME padding in VMEM: zero the halo slabs, write interiors at offset (1,1).
    # (Re-zeroed every step so each step is self-contained even when the
    # "parallel" batch grid is split across TensorCores.)
    pad1[...] = jnp.zeros_like(pad1)
    pad2[...] = jnp.zeros_like(pad2)
    pad3[...] = jnp.zeros_like(pad3)
    pad4[...] = jnp.zeros_like(pad4)

    # ---------------- encoder ----------------
    pad1[1:H + 1, 1:W + 1, :] = x_ref[0]                                    # stage input
    h1 = _conv3x3_c1(pad1[...], w1_ref[...], b1_ref[...], H, W)             # (H, W, 64)
    pad2[1:H + 1, 1:W + 1, :] = h1

    h2 = _conv3x3_mxu(pad2[...], w2_ref[...], b2_ref[...], "relu",
                      H, W, 64, 128)                                        # (H*W, 128)
    pooled = _maxpool2x2(h2, H, W)                                          # (Hp*Wp, 128)
    pad3[1:Hp + 1, 1:Wp + 1, :] = pooled.reshape(Hp, Wp, 128)

    # ---------------- decoder ----------------
    h3 = _conv3x3_mxu(pad3[...], w3_ref[...], b3_ref[...], "relu",
                      Hp, Wp, 128, 64)                                      # (Hp*Wp, 64)
    up = _upsample2x(h3, Hp, Wp)                                            # (H*W, 64)
    pad4[1:H + 1, 1:W + 1, :] = up.reshape(H, W, 64)

    h4 = _conv3x3_mxu(pad4[...], w4_ref[...], b4_ref[...], "sigmoid",
                      H, W, 64, 3)                                          # (H*W, 3)
    o_ref[0] = h4.reshape(H, W, 3)


def _full_spec(shape):
    return pl.BlockSpec(shape, lambda n: (0,) * len(shape))


def colorization_cnn(x_nchw, params):
    """x_nchw: (N, 1, H, W) f32 -> (N, 3, H, W) f32."""
    (w1, b1), (w2, b2), (w3, b3), (w4, b4) = params
    N, Cin, H, W = x_nchw.shape
    assert Cin == 1 and H % 2 == 0 and W & (W - 1) == 0, (N, Cin, H, W)
    Hp, Wp = H // 2, W // 2

    # NCHW with C=1 -> NHWC is a pure-metadata reshape (no data movement).
    x = x_nchw.reshape(N, H, W, 1).astype(jnp.float32)

    kernel = functools.partial(_colorization_kernel, H=H, W=W)
    out_nhwc = pl.pallas_call(
        kernel,
        out_shape=jax.ShapeDtypeStruct((N, H, W, 3), jnp.float32),
        grid=(N,),
        in_specs=[
            pl.BlockSpec((1, H, W, 1), lambda n: (n, 0, 0, 0)),
            _full_spec((3, 3, 1, 64)), _full_spec((1, 64)),
            _full_spec((3, 3, 64, 128)), _full_spec((1, 128)),
            _full_spec((3, 3, 128, 64)), _full_spec((1, 64)),
            _full_spec((3, 3, 64, 3)), _full_spec((1, 3)),
        ],
        out_specs=pl.BlockSpec((1, H, W, 3), lambda n: (n, 0, 0, 0)),
        scratch_shapes=[
            pltpu.VMEM((H + 2, W + 2, 1), jnp.float32),     # padded input
            pltpu.VMEM((H + 2, W + 2, 64), jnp.float32),    # padded conv1 out
            pltpu.VMEM((Hp + 2, Wp + 2, 128), jnp.float32), # padded pooled conv2 out
            pltpu.VMEM((H + 2, W + 2, 64), jnp.float32),    # padded upsampled conv3 out
        ],
        compiler_params=pltpu.CompilerParams(dimension_semantics=("parallel",)),
    )(x, w1, b1.reshape(1, -1), w2, b2.reshape(1, -1),
      w3, b3.reshape(1, -1), w4, b4.reshape(1, -1))

    # Single tiny (N, H, W, 3) -> (N, 3, H, W) transpose at the boundary.
    return jnp.transpose(out_nhwc, (0, 3, 1, 2))


# --------------------------------------------------------------------------------
# pure-JAX reference for verification (f32, HIGHEST precision)
# --------------------------------------------------------------------------------
def _ref_conv(x, w, b):
    y = jax.lax.conv_general_dilated(
        x, w, window_strides=(1, 1), padding="SAME",
        dimension_numbers=("NHWC", "HWIO", "NHWC"),
        precision=jax.lax.Precision.HIGHEST)
    return y + b[None, None, None, :]


def _ref_maxpool(x):
    N, H, W, C = x.shape
    return x.reshape(N, H // 2, 2, W // 2, 2, C).max(axis=(2, 4))


def _ref_upsample(x):
    return jnp.repeat(jnp.repeat(x, 2, axis=1), 2, axis=2)


def ref_forward(x_nchw, params):
    (w1, b1), (w2, b2), (w3, b3), (w4, b4) = params
    x = jnp.transpose(x_nchw, (0, 2, 3, 1)).astype(jnp.float32)
    h = jax.nn.relu(_ref_conv(x, w1, b1))
    h = jax.nn.relu(_ref_conv(h, w2, b2))
    h = _ref_maxpool(h)
    h = jax.nn.relu(_ref_conv(h, w3, b3))
    h = _ref_upsample(h)
    h = jax.nn.sigmoid(_ref_conv(h, w4, b4))
    return jnp.transpose(h, (0, 3, 1, 2))


if __name__ == "__main__":
    key = jax.random.PRNGKey(0)
    kx, kp = jax.random.split(key)
    # PyTorch module expects 1 input channel (grayscale): NCHW = (2, 1, 16, 16)
    x = jax.random.normal(kx, (2, 1, 16, 16), jnp.float32)

    def init_conv(k, cin, cout):
        kw, kb = jax.random.split(k)
        fan_in = cin * 9
        w = jax.random.normal(kw, (3, 3, cin, cout), jnp.float32) / np.sqrt(fan_in)
        b = 0.01 * jax.random.normal(kb, (cout,), jnp.float32)
        return w, b

    keys = jax.random.split(kp, 4)
    params = (
        init_conv(keys[0], 1, 64),     # encoder conv1
        init_conv(keys[1], 64, 128),   # encoder conv2
        init_conv(keys[2], 128, 64),   # decoder conv1
        init_conv(keys[3], 64, 3),     # decoder conv2
    )

    out = jax.block_until_ready(jax.jit(colorization_cnn)(x, params))
    assert out.shape == (2, 3, 16, 16), out.shape

    ref = jax.block_until_ready(jax.jit(ref_forward)(x, params))
    np.testing.assert_allclose(np.asarray(out), np.asarray(ref), atol=1e-4, rtol=1e-4)

    print("KERNEL_OK")
</pallas_src>

<mosaic_0001>
module attributes {stable_mosaic.version = 11 : i64} {
  func.func @_colorization_kernel(%arg0: i32, %arg1: memref<1x16x16x1xf32, #tpu.memory_space<vmem>>, %arg2: memref<3x3x1x64xf32, #tpu.memory_space<vmem>>, %arg3: memref<1x64xf32, #tpu.memory_space<vmem>>, %arg4: memref<3x3x64x128xf32, #tpu.memory_space<vmem>>, %arg5: memref<1x128xf32, #tpu.memory_space<vmem>>, %arg6: memref<3x3x128x64xf32, #tpu.memory_space<vmem>>, %arg7: memref<1x64xf32, #tpu.memory_space<vmem>>, %arg8: memref<3x3x64x3xf32, #tpu.memory_space<vmem>>, %arg9: memref<1x3xf32, #tpu.memory_space<vmem>>, %arg10: memref<1x16x16x3xf32, #tpu.memory_space<vmem>>, %arg11: memref<18x18x1xf32, #tpu.memory_space<vmem>>, %arg12: memref<18x18x64xf32, #tpu.memory_space<vmem>>, %arg13: memref<10x10x128xf32, #tpu.memory_space<vmem>>, %arg14: memref<18x18x64xf32, #tpu.memory_space<vmem>>) attributes {dimension_semantics = [#tpu.dimension_semantics<parallel>], iteration_bounds = array<i64: 2>, scalar_prefetch = 0 : i64, scratch_operands = 4 : i64, tpu.core_type = #tpu.core_type<tc>, window_params = [{transform_indices = @transform_0, window_bounds = array<i64: 1, 16, 16, 1>}, {pipeline_mode = #tpu.pipeline_mode<synchronous>, transform_indices = @transform_1, window_bounds = array<i64: 3, 3, 1, 64>}, {pipeline_mode = #tpu.pipeline_mode<synchronous>, transform_indices = @transform_2, window_bounds = array<i64: 1, 64>}, {pipeline_mode = #tpu.pipeline_mode<synchronous>, transform_indices = @transform_3, window_bounds = array<i64: 3, 3, 64, 128>}, {pipeline_mode = #tpu.pipeline_mode<synchronous>, transform_indices = @transform_4, window_bounds = array<i64: 1, 128>}, {pipeline_mode = #tpu.pipeline_mode<synchronous>, transform_indices = @transform_5, window_bounds = array<i64: 3, 3, 128, 64>}, {pipeline_mode = #tpu.pipeline_mode<synchronous>, transform_indices = @transform_6, window_bounds = array<i64: 1, 64>}, {pipeline_mode = #tpu.pipeline_mode<synchronous>, transform_indices = @transform_7, window_bounds = array<i64: 3, 3, 64, 3>}, {pipeline_mode = #tpu.pipeline_mode<synchronous>, transform_indices = @transform_8, window_bounds = array<i64: 1, 3>}, {transform_indices = @transform_9, window_bounds = array<i64: 1, 16, 16, 3>}]} {
    %cst = arith.constant 0.000000e+00 : f32
    %0 = vector.broadcast %cst : f32 to vector<18x18x1xf32>
    %c0 = arith.constant 0 : index
    %c0_0 = arith.constant 0 : index
    %c0_1 = arith.constant 0 : index
    %1 = vector.load %arg11[%c0, %c0_0, %c0_1] : memref<18x18x1xf32, #tpu.memory_space<vmem>>, vector<18x18x1xf32>
    tpu.vector_store %arg11[%c0, %c0_0, %c0_1], %0 {strides = array<i32>} : memref<18x18x1xf32, #tpu.memory_space<vmem>>, vector<18x18x1xf32>,
    %cst_2 = arith.constant 0.000000e+00 : f32
    %2 = vector.broadcast %cst_2 : f32 to vector<18x18x64xf32>
    %c0_3 = arith.constant 0 : index
    %c0_4 = arith.constant 0 : index
    %c0_5 = arith.constant 0 : index
    %3 = vector.load %arg12[%c0_3, %c0_4, %c0_5] : memref<18x18x64xf32, #tpu.memory_space<vmem>>, vector<18x18x64xf32>
    tpu.vector_store %arg12[%c0_3, %c0_4, %c0_5], %2 {strides = array<i32>} : memref<18x18x64xf32, #tpu.memory_space<vmem>>, vector<18x18x64xf32>,
    %cst_6 = arith.constant 0.000000e+00 : f32
    %4 = vector.broadcast %cst_6 : f32 to vector<10x10x128xf32>
    %c0_7 = arith.constant 0 : index
    %c0_8 = arith.constant 0 : index
    %c0_9 = arith.constant 0 : index
    %5 = vector.load %arg13[%c0_7, %c0_8, %c0_9] : memref<10x10x128xf32, #tpu.memory_space<vmem>>, vector<10x10x128xf32>
    tpu.vector_store %arg13[%c0_7, %c0_8, %c0_9], %4 {strides = array<i32>} : memref<10x10x128xf32, #tpu.memory_space<vmem>>, vector<10x10x128xf32>,
    %cst_10 = arith.constant 0.000000e+00 : f32
    %6 = vector.broadcast %cst_10 : f32 to vector<18x18x64xf32>
    %c0_11 = arith.constant 0 : index
    %c0_12 = arith.constant 0 : index
    %c0_13 = arith.constant 0 : index
    %7 = vector.load %arg14[%c0_11, %c0_12, %c0_13] : memref<18x18x64xf32, #tpu.memory_space<vmem>>, vector<18x18x64xf32>
    tpu.vector_store %arg14[%c0_11, %c0_12, %c0_13], %6 {strides = array<i32>} : memref<18x18x64xf32, #tpu.memory_space<vmem>>, vector<18x18x64xf32>,
    %c0_14 = arith.constant 0 : index
    %c0_15 = arith.constant 0 : index
    %c0_16 = arith.constant 0 : index
    %c0_17 = arith.constant 0 : index
    %8 = vector.load %arg1[%c0_14, %c0_15, %c0_16, %c0_17] : memref<1x16x16x1xf32, #tpu.memory_space<vmem>>, vector<1x16x16x1xf32>
    %9 = vector.shape_cast %8 : vector<1x16x16x1xf32> to vector<16x16x1xf32>
    %c1 = arith.constant 1 : index
    %c1_18 = arith.constant 1 : index
    %c0_19 = arith.constant 0 : index
    %10 = vector.load %arg11[%c1, %c1_18, %c0_19] : memref<18x18x1xf32, #tpu.memory_space<vmem>>, vector<16x16x1xf32>
    tpu.vector_store %arg11[%c1, %c1_18, %c0_19], %9 {strides = array<i32>} : memref<18x18x1xf32, #tpu.memory_space<vmem>>, vector<16x16x1xf32>,
    %c0_20 = arith.constant 0 : index
    %c0_21 = arith.constant 0 : index
    %c0_22 = arith.constant 0 : index
    %11 = vector.load %arg11[%c0_20, %c0_21, %c0_22] : memref<18x18x1xf32, #tpu.memory_space<vmem>>, vector<18x18x1xf32>
    %c0_23 = arith.constant 0 : index
    %c0_24 = arith.constant 0 : index
    %c0_25 = arith.constant 0 : index
    %c0_26 = arith.constant 0 : index
    %12 = vector.load %arg2[%c0_23, %c0_24, %c0_25, %c0_26] : memref<3x3x1x64xf32, #tpu.memory_space<vmem>>, vector<3x3x1x64xf32>
    %c0_27 = arith.constant 0 : index
    %c0_28 = arith.constant 0 : index
    %13 = vector.load %arg3[%c0_27, %c0_28] : memref<1x64xf32, #tpu.memory_space<vmem>>, vector<1x64xf32>
    %cst_29 = arith.constant 0.000000e+00 : f32
    %14 = vector.broadcast %cst_29 : f32 to vector<16x16x64xf32>
    %15 = vector.extract_strided_slice %11 {offsets = [0, 0, 0], sizes = [16, 16, 1], strides = [1, 1, 1]} : vector<18x18x1xf32> to vector<16x16x1xf32>
    %16 = vector.extract_strided_slice %12 {offsets = [0, 0, 0, 0], sizes = [1, 1, 1, 64], strides = [1, 1, 1, 1]} : vector<3x3x1x64xf32> to vector<1x1x1x64xf32>
    %17 = vector.shape_cast %16 : vector<1x1x1x64xf32> to vector<1x64xf32>
    %18 = vector.shape_cast %17 : vector<1x64xf32> to vector<1x1x64xf32>
    %19 = vector.broadcast %15 : vector<16x16x1xf32> to vector<16x16x64xf32>
    %20 = vector.broadcast %18 : vector<1x1x64xf32> to vector<16x16x64xf32>
    %21 = arith.mulf %19, %20 : vector<16x16x64xf32>
    %22 = arith.addf %14, %21 : vector<16x16x64xf32>
    %23 = vector.extract_strided_slice %11 {offsets = [0, 1, 0], sizes = [16, 16, 1], strides = [1, 1, 1]} : vector<18x18x1xf32> to vector<16x16x1xf32>
    %24 = vector.extract_strided_slice %12 {offsets = [0, 1, 0, 0], sizes = [1, 1, 1, 64], strides = [1, 1, 1, 1]} : vector<3x3x1x64xf32> to vector<1x1x1x64xf32>
    %25 = vector.shape_cast %24 : vector<1x1x1x64xf32> to vector<1x64xf32>
    %26 = vector.shape_cast %25 : vector<1x64xf32> to vector<1x1x64xf32>
    %27 = vector.broadcast %23 : vector<16x16x1xf32> to vector<16x16x64xf32>
    %28 = vector.broadcast %26 : vector<1x1x64xf32> to vector<16x16x64xf32>
    %29 = arith.mulf %27, %28 : vector<16x16x64xf32>
    %30 = arith.addf %22, %29 : vector<16x16x64xf32>
    %31 = vector.extract_strided_slice %11 {offsets = [0, 2, 0], sizes = [16, 16, 1], strides = [1, 1, 1]} : vector<18x18x1xf32> to vector<16x16x1xf32>
    %32 = vector.extract_strided_slice %12 {offsets = [0, 2, 0, 0], sizes = [1, 1, 1, 64], strides = [1, 1, 1, 1]} : vector<3x3x1x64xf32> to vector<1x1x1x64xf32>
    %33 = vector.shape_cast %32 : vector<1x1x1x64xf32> to vector<1x64xf32>
    %34 = vector.shape_cast %33 : vector<1x64xf32> to vector<1x1x64xf32>
    %35 = vector.broadcast %31 : vector<16x16x1xf32> to vector<16x16x64xf32>
    %36 = vector.broadcast %34 : vector<1x1x64xf32> to vector<16x16x64xf32>
    %37 = arith.mulf %35, %36 : vector<16x16x64xf32>
    %38 = arith.addf %30, %37 : vector<16x16x64xf32>
    %39 = vector.extract_strided_slice %11 {offsets = [1, 0, 0], sizes = [16, 16, 1], strides = [1, 1, 1]} : vector<18x18x1xf32> to vector<16x16x1xf32>
    %40 = vector.extract_strided_slice %12 {offsets = [1, 0, 0, 0], sizes = [1, 1, 1, 64], strides = [1, 1, 1, 1]} : vector<3x3x1x64xf32> to vector<1x1x1x64xf32>
    %41 = vector.shape_cast %40 : vector<1x1x1x64xf32> to vector<1x64xf32>
    %42 = vector.shape_cast %41 : vector<1x64xf32> to vector<1x1x64xf32>
    %43 = vector.broadcast %39 : vector<16x16x1xf32> to vector<16x16x64xf32>
    %44 = vector.broadcast %42 : vector<1x1x64xf32> to vector<16x16x64xf32>
    %45 = arith.mulf %43, %44 : vector<16x16x64xf32>
    %46 = arith.addf %38, %45 : vector<16x16x64xf32>
    %47 = vector.extract_strided_slice %11 {offsets = [1, 1, 0], sizes = [16, 16, 1], strides = [1, 1, 1]} : vector<18x18x1xf32> to vector<16x16x1xf32>
    %48 = vector.extract_strided_slice %12 {offsets = [1, 1, 0, 0], sizes = [1, 1, 1, 64], strides = [1, 1, 1, 1]} : vector<3x3x1x64xf32> to vector<1x1x1x64xf32>
    %49 = vector.shape_cast %48 : vector<1x1x1x64xf32> to vector<1x64xf32>
    %50 = vector.shape_cast %49 : vector<1x64xf32> to vector<1x1x64xf32>
    %51 = vector.broadcast %47 : vector<16x16x1xf32> to vector<16x16x64xf32>
    %52 = vector.broadcast %50 : vector<1x1x64xf32> to vector<16x16x64xf32>
    %53 = arith.mulf %51, %52 : vector<16x16x64xf32>
    %54 = arith.addf %46, %53 : vector<16x16x64xf32>
    %55 = vector.extract_strided_slice %11 {offsets = [1, 2, 0], sizes = [16, 16, 1], strides = [1, 1, 1]} : vector<18x18x1xf32> to vector<16x16x1xf32>
    %56 = vector.extract_strided_slice %12 {offsets = [1, 2, 0, 0], sizes = [1, 1, 1, 64], strides = [1, 1, 1, 1]} : vector<3x3x1x64xf32> to vector<1x1x1x64xf32>
    %57 = vector.shape_cast %56 : vector<1x1x1x64xf32> to vector<1x64xf32>
    %58 = vector.shape_cast %57 : vector<1x64xf32> to vector<1x1x64xf32>
    %59 = vector.broadcast %55 : vector<16x16x1xf32> to vector<16x16x64xf32>
    %60 = vector.broadcast %58 : vector<1x1x64xf32> to vector<16x16x64xf32>
    %61 = arith.mulf %59, %60 : vector<16x16x64xf32>
    %62 = arith.addf %54, %61 : vector<16x16x64xf32>
    %63 = vector.extract_strided_slice %11 {offsets = [2, 0, 0], sizes = [16, 16, 1], strides = [1, 1, 1]} : vector<18x18x1xf32> to vector<16x16x1xf32>
    %64 = vector.extract_strided_slice %12 {offsets = [2, 0, 0, 0], sizes = [1, 1, 1, 64], strides = [1, 1, 1, 1]} : vector<3x3x1x64xf32> to vector<1x1x1x64xf32>
    %65 = vector.shape_cast %64 : vector<1x1x1x64xf32> to vector<1x64xf32>
    %66 = vector.shape_cast %65 : vector<1x64xf32> to vector<1x1x64xf32>
    %67 = vector.broadcast %63 : vector<16x16x1xf32> to vector<16x16x64xf32>
    %68 = vector.broadcast %66 : vector<1x1x64xf32> to vector<16x16x64xf32>
    %69 = arith.mulf %67, %68 : vector<16x16x64xf32>
    %70 = arith.addf %62, %69 : vector<16x16x64xf32>
    %71 = vector.extract_strided_slice %11 {offsets = [2, 1, 0], sizes = [16, 16, 1], strides = [1, 1, 1]} : vector<18x18x1xf32> to vector<16x16x1xf32>
    %72 = vector.extract_strided_slice %12 {offsets = [2, 1, 0, 0], sizes = [1, 1, 1, 64], strides = [1, 1, 1, 1]} : vector<3x3x1x64xf32> to vector<1x1x1x64xf32>
    %73 = vector.shape_cast %72 : vector<1x1x1x64xf32> to vector<1x64xf32>
    %74 = vector.shape_cast %73 : vector<1x64xf32> to vector<1x1x64xf32>
    %75 = vector.broadcast %71 : vector<16x16x1xf32> to vector<16x16x64xf32>
    %76 = vector.broadcast %74 : vector<1x1x64xf32> to vector<16x16x64xf32>
    %77 = arith.mulf %75, %76 : vector<16x16x64xf32>
    %78 = arith.addf %70, %77 : vector<16x16x64xf32>
    %79 = vector.extract_strided_slice %11 {offsets = [2, 2, 0], sizes = [16, 16, 1], strides = [1, 1, 1]} : vector<18x18x1xf32> to vector<16x16x1xf32>
    %80 = vector.extract_strided_slice %12 {offsets = [2, 2, 0, 0], sizes = [1, 1, 1, 64], strides = [1, 1, 1, 1]} : vector<3x3x1x64xf32> to vector<1x1x1x64xf32>
    %81 = vector.shape_cast %80 : vector<1x1x1x64xf32> to vector<1x64xf32>
    %82 = vector.shape_cast %81 : vector<1x64xf32> to vector<1x1x64xf32>
    %83 = vector.broadcast %79 : vector<16x16x1xf32> to vector<16x16x64xf32>
    %84 = vector.broadcast %82 : vector<1x1x64xf32> to vector<16x16x64xf32>
    %85 = arith.mulf %83, %84 : vector<16x16x64xf32>
    %86 = arith.addf %78, %85 : vector<16x16x64xf32>
    %87 = vector.shape_cast %13 : vector<1x64xf32> to vector<1x1x64xf32>
    %88 = vector.broadcast %87 : vector<1x1x64xf32> to vector<16x16x64xf32>
    %89 = arith.addf %86, %88 : vector<16x16x64xf32>
    %cst_30 = arith.constant 0.000000e+00 : f32
    %90 = vector.broadcast %cst_30 : f32 to vector<16x16x64xf32>
    %91 = arith.maximumf %89, %90 : vector<16x16x64xf32>
    %c1_31 = arith.constant 1 : index
    %c1_32 = arith.constant 1 : index
    %c0_33 = arith.constant 0 : index
    %92 = vector.load %arg12[%c1_31, %c1_32, %c0_33] : memref<18x18x64xf32, #tpu.memory_space<vmem>>, vector<16x16x64xf32>
    tpu.vector_store %arg12[%c1_31, %c1_32, %c0_33], %91 {strides = array<i32>} : memref<18x18x64xf32, #tpu.memory_space<vmem>>, vector<16x16x64xf32>,
    %c0_34 = arith.constant 0 : index
    %c0_35 = arith.constant 0 : index
    %c0_36 = arith.constant 0 : index
    %93 = vector.load %arg12[%c0_34, %c0_35, %c0_36] : memref<18x18x64xf32, #tpu.memory_space<vmem>>, vector<18x18x64xf32>
    %c0_37 = arith.constant 0 : index
    %c0_38 = arith.constant 0 : index
    %c0_39 = arith.constant 0 : index
    %c0_40 = arith.constant 0 : index
    %94 = vector.load %arg4[%c0_37, %c0_38, %c0_39, %c0_40] : memref<3x3x64x128xf32, #tpu.memory_space<vmem>>, vector<3x3x64x128xf32>
    %c0_41 = arith.constant 0 : index
    %c0_42 = arith.constant 0 : index
    %95 = vector.load %arg5[%c0_41, %c0_42] : memref<1x128xf32, #tpu.memory_space<vmem>>, vector<1x128xf32>
    %96 = vector.extract_strided_slice %93 {offsets = [0, 0, 0], sizes = [18, 16, 64], strides = [1, 1, 1]} : vector<18x18x64xf32> to vector<18x16x64xf32>
    %97 = vector.extract_strided_slice %93 {offsets = [0, 1, 0], sizes = [18, 16, 64], strides = [1, 1, 1]} : vector<18x18x64xf32> to vector<18x16x64xf32>
    %98 = vector.extract_strided_slice %93 {offsets = [0, 2, 0], sizes = [18, 16, 64], strides = [1, 1, 1]} : vector<18x18x64xf32> to vector<18x16x64xf32>
    %cst_43 = arith.constant 0.000000e+00 : f32
    %99 = vector.broadcast %cst_43 : f32 to vector<256x128xf32>
    %100 = vector.extract_strided_slice %96 {offsets = [0, 0, 0], sizes = [16, 16, 64], strides = [1, 1, 1]} : vector<18x16x64xf32> to vector<16x16x64xf32>
    %101 = vector.shape_cast %100 : vector<16x16x64xf32> to vector<256x64xf32>
    %102 = vector.extract_strided_slice %94 {offsets = [0, 0, 0, 0], sizes = [1, 1, 64, 128], strides = [1, 1, 1, 1]} : vector<3x3x64x128xf32> to vector<1x1x64x128xf32>
    %103 = vector.shape_cast %102 : vector<1x1x64x128xf32> to vector<64x128xf32>
    %cst_44 = arith.constant dense<0.000000e+00> : vector<256x128xf32>
    %104 = tpu.matmul %101, %103, %cst_44 {dimension_numbers = #tpu.dot_dimension_numbers<[1], [0], [0], [1], [0, 0, 1, 1], [], []>} : vector<256x64xf32>, vector<64x128xf32>, vector<256x128xf32> -> vector<256x128xf32>
    %105 = arith.addf %99, %104 : vector<256x128xf32>
    %106 = vector.extract_strided_slice %97 {offsets = [0, 0, 0], sizes = [16, 16, 64], strides = [1, 1, 1]} : vector<18x16x64xf32> to vector<16x16x64xf32>
    %107 = vector.shape_cast %106 : vector<16x16x64xf32> to vector<256x64xf32>
    %108 = vector.extract_strided_slice %94 {offsets = [0, 1, 0, 0], sizes = [1, 1, 64, 128], strides = [1, 1, 1, 1]} : vector<3x3x64x128xf32> to vector<1x1x64x128xf32>
    %109 = vector.shape_cast %108 : vector<1x1x64x128xf32> to vector<64x128xf32>
    %cst_45 = arith.constant dense<0.000000e+00> : vector<256x128xf32>
    %110 = tpu.matmul %107, %109, %cst_45 {dimension_numbers = #tpu.dot_dimension_numbers<[1], [0], [0], [1], [0, 0, 1, 1], [], []>} : vector<256x64xf32>, vector<64x128xf32>, vector<256x128xf32> -> vector<256x128xf32>
    %111 = arith.addf %105, %110 : vector<256x128xf32>
    %112 = vector.extract_strided_slice %98 {offsets = [0, 0, 0], sizes = [16, 16, 64], strides = [1, 1, 1]} : vector<18x16x64xf32> to vector<16x16x64xf32>
    %113 = vector.shape_cast %112 : vector<16x16x64xf32> to vector<256x64xf32>
    %114 = vector.extract_strided_slice %94 {offsets = [0, 2, 0, 0], sizes = [1, 1, 64, 128], strides = [1, 1, 1, 1]} : vector<3x3x64x128xf32> to vector<1x1x64x128xf32>
    %115 = vector.shape_cast %114 : vector<1x1x64x128xf32> to vector<64x128xf32>
    %cst_46 = arith.constant dense<0.000000e+00> : vector<256x128xf32>
    %116 = tpu.matmul %113, %115, %cst_46 {dimension_numbers = #tpu.dot_dimension_numbers<[1], [0], [0], [1], [0, 0, 1, 1], [], []>} : vector<256x64xf32>, vector<64x128xf32>, vector<256x128xf32> -> vector<256x128xf32>
    %117 = arith.addf %111, %116 : vector<256x128xf32>
    %118 = vector.extract_strided_slice %96 {offsets = [1, 0, 0], sizes = [16, 16, 64], strides = [1, 1, 1]} : vector<18x16x64xf32> to vector<16x16x64xf32>
    %119 = vector.shape_cast %118 : vector<16x16x64xf32> to vector<256x64xf32>
    %120 = vector.extract_strided_slice %94 {offsets = [1, 0, 0, 0], sizes = [1, 1, 64, 128], strides = [1, 1, 1, 1]} : vector<3x3x64x128xf32> to vector<1x1x64x128xf32>
    %121 = vector.shape_cast %120 : vector<1x1x64x128xf32> to vector<64x128xf32>
    %cst_47 = arith.constant dense<0.000000e+00> : vector<256x128xf32>
    %122 = tpu.matmul %119, %121, %cst_47 {dimension_numbers = #tpu.dot_dimension_numbers<[1], [0], [0], [1], [0, 0, 1, 1], [], []>} : vector<256x64xf32>, vector<64x128xf32>, vector<256x128xf32> -> vector<256x128xf32>
    %123 = arith.addf %117, %122 : vector<256x128xf32>
    %124 = vector.extract_strided_slice %97 {offsets = [1, 0, 0], sizes = [16, 16, 64], strides = [1, 1, 1]} : vector<18x16x64xf32> to vector<16x16x64xf32>
    %125 = vector.shape_cast %124 : vector<16x16x64xf32> to vector<256x64xf32>
    %126 = vector.extract_strided_slice %94 {offsets = [1, 1, 0, 0], sizes = [1, 1, 64, 128], strides = [1, 1, 1, 1]} : vector<3x3x64x128xf32> to vector<1x1x64x128xf32>
    %127 = vector.shape_cast %126 : vector<1x1x64x128xf32> to vector<64x128xf32>
    %cst_48 = arith.constant dense<0.000000e+00> : vector<256x128xf32>
    %128 = tpu.matmul %125, %127, %cst_48 {dimension_numbers = #tpu.dot_dimension_numbers<[1], [0], [0], [1], [0, 0, 1, 1], [], []>} : vector<256x64xf32>, vector<64x128xf32>, vector<256x128xf32> -> vector<256x128xf32>
    %129 = arith.addf %123, %128 : vector<256x128xf32>
    %130 = vector.extract_strided_slice %98 {offsets = [1, 0, 0], sizes = [16, 16, 64], strides = [1, 1, 1]} : vector<18x16x64xf32> to vector<16x16x64xf32>
    %131 = vector.shape_cast %130 : vector<16x16x64xf32> to vector<256x64xf32>
    %132 = vector.extract_strided_slice %94 {offsets = [1, 2, 0, 0], sizes = [1, 1, 64, 128], strides = [1, 1, 1, 1]} : vector<3x3x64x128xf32> to vector<1x1x64x128xf32>
    %133 = vector.shape_cast %132 : vector<1x1x64x128xf32> to vector<64x128xf32>
    %cst_49 = arith.constant dense<0.000000e+00> : vector<256x128xf32>
    %134 = tpu.matmul %131, %133, %cst_49 {dimension_numbers = #tpu.dot_dimension_numbers<[1], [0], [0], [1], [0, 0, 1, 1], [], []>} : vector<256x64xf32>, vector<64x128xf32>, vector<256x128xf32> -> vector<256x128xf32>
    %135 = arith.addf %129, %134 : vector<256x128xf32>
    %136 = vector.extract_strided_slice %96 {offsets = [2, 0, 0], sizes = [16, 16, 64], strides = [1, 1, 1]} : vector<18x16x64xf32> to vector<16x16x64xf32>
    %137 = vector.shape_cast %136 : vector<16x16x64xf32> to vector<256x64xf32>
    %138 = vector.extract_strided_slice %94 {offsets = [2, 0, 0, 0], sizes = [1, 1, 64, 128], strides = [1, 1, 1, 1]} : vector<3x3x64x128xf32> to vector<1x1x64x128xf32>
    %139 = vector.shape_cast %138 : vector<1x1x64x128xf32> to vector<64x128xf32>
    %cst_50 = arith.constant dense<0.000000e+00> : vector<256x128xf32>
    %140 = tpu.matmul %137, %139, %cst_50 {dimension_numbers = #tpu.dot_dimension_numbers<[1], [0], [0], [1], [0, 0, 1, 1], [], []>} : vector<256x64xf32>, vector<64x128xf32>, vector<256x128xf32> -> vector<256x128xf32>
    %141 = arith.addf %135, %140 : vector<256x128xf32>
    %142 = vector.extract_strided_slice %97 {offsets = [2, 0, 0], sizes = [16, 16, 64], strides = [1, 1, 1]} : vector<18x16x64xf32> to vector<16x16x64xf32>
    %143 = vector.shape_cast %142 : vector<16x16x64xf32> to vector<256x64xf32>
    %144 = vector.extract_strided_slice %94 {offsets = [2, 1, 0, 0], sizes = [1, 1, 64, 128], strides = [1, 1, 1, 1]} : vector<3x3x64x128xf32> to vector<1x1x64x128xf32>
    %145 = vector.shape_cast %144 : vector<1x1x64x128xf32> to vector<64x128xf32>
    %cst_51 = arith.constant dense<0.000000e+00> : vector<256x128xf32>
    %146 = tpu.matmul %143, %145, %cst_51 {dimension_numbers = #tpu.dot_dimension_numbers<[1], [0], [0], [1], [0, 0, 1, 1], [], []>} : vector<256x64xf32>, vector<64x128xf32>, vector<256x128xf32> -> vector<256x128xf32>
    %147 = arith.addf %141, %146 : vector<256x128xf32>
    %148 = vector.extract_strided_slice %98 {offsets = [2, 0, 0], sizes = [16, 16, 64], strides = [1, 1, 1]} : vector<18x16x64xf32> to vector<16x16x64xf32>
    %149 = vector.shape_cast %148 : vector<16x16x64xf32> to vector<256x64xf32>
    %150 = vector.extract_strided_slice %94 {offsets = [2, 2, 0, 0], sizes = [1, 1, 64, 128], strides = [1, 1, 1, 1]} : vector<3x3x64x128xf32> to vector<1x1x64x128xf32>
    %151 = vector.shape_cast %150 : vector<1x1x64x128xf32> to vector<64x128xf32>
    %cst_52 = arith.constant dense<0.000000e+00> : vector<256x128xf32>
    %152 = tpu.matmul %149, %151, %cst_52 {dimension_numbers = #tpu.dot_dimension_numbers<[1], [0], [0], [1], [0, 0, 1, 1], [], []>} : vector<256x64xf32>, vector<64x128xf32>, vector<256x128xf32> -> vector<256x128xf32>
    %153 = arith.addf %147, %152 : vector<256x128xf32>
    %154 = vector.broadcast %95 : vector<1x128xf32> to vector<256x128xf32>
    %155 = arith.addf %153, %154 : vector<256x128xf32>
    %cst_53 = arith.constant 0.000000e+00 : f32
    %156 = vector.broadcast %cst_53 : f32 to vector<256x128xf32>
    %157 = arith.maximumf %155, %156 : vector<256x128xf32>
    %158 = tpu.iota {dimensions = array<i32: 0>} : vector<64x256xi32>
    %159 = tpu.iota {dimensions = array<i32: 1>} : vector<64x256xi32>
    %c3_i32 = arith.constant 3 : i32
    %160 = vector.broadcast %c3_i32 : i32 to vector<64x256xi32>
    %161 = arith.shrsi %158, %160 : vector<64x256xi32>
    %c7_i32 = arith.constant 7 : i32
    %162 = vector.broadcast %c7_i32 : i32 to vector<64x256xi32>
    %163 = arith.andi %158, %162 : vector<64x256xi32>
    %c32_i32 = arith.constant 32 : i32
    %164 = vector.broadcast %c32_i32 : i32 to vector<64x256xi32>
    %165 = arith.muli %164, %161 : vector<64x256xi32>
    %c2_i32 = arith.constant 2 : i32
    %166 = vector.broadcast %c2_i32 : i32 to vector<64x256xi32>
    %167 = arith.muli %166, %163 : vector<64x256xi32>
    %168 = arith.addi %165, %167 : vector<64x256xi32>
    %c0_i32 = arith.constant 0 : i32
    %169 = vector.broadcast %c0_i32 : i32 to vector<64x256xi32>
    %170 = arith.addi %168, %169 : vector<64x256xi32>
    %c0_i32_54 = arith.constant 0 : i32
    %171 = vector.broadcast %c0_i32_54 : i32 to vector<64x256xi32>
    %172 = arith.addi %170, %171 : vector<64x256xi32>
    %173 = arith.cmpi eq, %159, %172 : vector<64x256xi32>
    %174 = arith.extui %173 : vector<64x256xi1> to vector<64x256xi32>
    %175 = arith.sitofp %174 : vector<64x256xi32> to vector<64x256xf32>
    %cst_55 = arith.constant dense<0.000000e+00> : vector<64x128xf32>
    %176 = tpu.matmul %175, %157, %cst_55 {dimension_numbers = #tpu.dot_dimension_numbers<[1], [0], [0], [1], [0, 0, 1, 1], [], []>} : vector<64x256xf32>, vector<256x128xf32>, vector<64x128xf32> -> vector<64x128xf32>
    %c0_i32_56 = arith.constant 0 : i32
    %177 = vector.broadcast %c0_i32_56 : i32 to vector<64x256xi32>
    %178 = arith.addi %168, %177 : vector<64x256xi32>
    %c1_i32 = arith.constant 1 : i32
    %179 = vector.broadcast %c1_i32 : i32 to vector<64x256xi32>
    %180 = arith.addi %178, %179 : vector<64x256xi32>
    %181 = arith.cmpi eq, %159, %180 : vector<64x256xi32>
    %182 = arith.extui %181 : vector<64x256xi1> to vector<64x256xi32>
    %183 = arith.sitofp %182 : vector<64x256xi32> to vector<64x256xf32>
    %cst_57 = arith.constant dense<0.000000e+00> : vector<64x128xf32>
    %184 = tpu.matmul %183, %157, %cst_57 {dimension_numbers = #tpu.dot_dimension_numbers<[1], [0], [0], [1], [0, 0, 1, 1], [], []>} : vector<64x256xf32>, vector<256x128xf32>, vector<64x128xf32> -> vector<64x128xf32>
    %185 = arith.maximumf %176, %184 : vector<64x128xf32>
    %c16_i32 = arith.constant 16 : i32
    %186 = vector.broadcast %c16_i32 : i32 to vector<64x256xi32>
    %187 = arith.addi %168, %186 : vector<64x256xi32>
    %c0_i32_58 = arith.constant 0 : i32
    %188 = vector.broadcast %c0_i32_58 : i32 to vector<64x256xi32>
    %189 = arith.addi %187, %188 : vector<64x256xi32>
    %190 = arith.cmpi eq, %159, %189 : vector<64x256xi32>
    %191 = arith.extui %190 : vector<64x256xi1> to vector<64x256xi32>
    %192 = arith.sitofp %191 : vector<64x256xi32> to vector<64x256xf32>
    %cst_59 = arith.constant dense<0.000000e+00> : vector<64x128xf32>
    %193 = tpu.matmul %192, %157, %cst_59 {dimension_numbers = #tpu.dot_dimension_numbers<[1], [0], [0], [1], [0, 0, 1, 1], [], []>} : vector<64x256xf32>, vector<256x128xf32>, vector<64x128xf32> -> vector<64x128xf32>
    %c16_i32_60 = arith.constant 16 : i32
    %194 = vector.broadcast %c16_i32_60 : i32 to vector<64x256xi32>
    %195 = arith.addi %168, %194 : vector<64x256xi32>
    %c1_i32_61 = arith.constant 1 : i32
    %196 = vector.broadcast %c1_i32_61 : i32 to vector<64x256xi32>
    %197 = arith.addi %195, %196 : vector<64x256xi32>
    %198 = arith.cmpi eq, %159, %197 : vector<64x256xi32>
    %199 = arith.extui %198 : vector<64x256xi1> to vector<64x256xi32>
    %200 = arith.sitofp %199 : vector<64x256xi32> to vector<64x256xf32>
    %cst_62 = arith.constant dense<0.000000e+00> : vector<64x128xf32>
    %201 = tpu.matmul %200, %157, %cst_62 {dimension_numbers = #tpu.dot_dimension_numbers<[1], [0], [0], [1], [0, 0, 1, 1], [], []>} : vector<64x256xf32>, vector<256x128xf32>, vector<64x128xf32> -> vector<64x128xf32>
    %202 = arith.maximumf %193, %201 : vector<64x128xf32>
    %203 = arith.maximumf %185, %202 : vector<64x128xf32>
    %204 = vector.shape_cast %203 : vector<64x128xf32> to vector<8x8x128xf32>
    %c1_63 = arith.constant 1 : index
    %c1_64 = arith.constant 1 : index
    %c0_65 = arith.constant 0 : index
    %205 = vector.load %arg13[%c1_63, %c1_64, %c0_65] : memref<10x10x128xf32, #tpu.memory_space<vmem>>, vector<8x8x128xf32>
    tpu.vector_store %arg13[%c1_63, %c1_64, %c0_65], %204 {strides = array<i32>} : memref<10x10x128xf32, #tpu.memory_space<vmem>>, vector<8x8x128xf32>,
    %c0_66 = arith.constant 0 : index
    %c0_67 = arith.constant 0 : index
    %c0_68 = arith.constant 0 : index
    %206 = vector.load %arg13[%c0_66, %c0_67, %c0_68] : memref<10x10x128xf32, #tpu.memory_space<vmem>>, vector<10x10x128xf32>
    %c0_69 = arith.constant 0 : index
    %c0_70 = arith.constant 0 : index
    %c0_71 = arith.constant 0 : index
    %c0_72 = arith.constant 0 : index
    %207 = vector.load %arg6[%c0_69, %c0_70, %c0_71, %c0_72] : memref<3x3x128x64xf32, #tpu.memory_space<vmem>>, vector<3x3x128x64xf32>
    %c0_73 = arith.constant 0 : index
    %c0_74 = arith.constant 0 : index
    %208 = vector.load %arg7[%c0_73, %c0_74] : memref<1x64xf32, #tpu.memory_space<vmem>>, vector<1x64xf32>
    %209 = vector.extract_strided_slice %206 {offsets = [0, 0, 0], sizes = [10, 8, 128], strides = [1, 1, 1]} : vector<10x10x128xf32> to vector<10x8x128xf32>
    %210 = vector.extract_strided_slice %206 {offsets = [0, 1, 0], sizes = [10, 8, 128], strides = [1, 1, 1]} : vector<10x10x128xf32> to vector<10x8x128xf32>
    %211 = vector.extract_strided_slice %206 {offsets = [0, 2, 0], sizes = [10, 8, 128], strides = [1, 1, 1]} : vector<10x10x128xf32> to vector<10x8x128xf32>
    %cst_75 = arith.constant 0.000000e+00 : f32
    %212 = vector.broadcast %cst_75 : f32 to vector<64x64xf32>
    %213 = vector.extract_strided_slice %209 {offsets = [0, 0, 0], sizes = [8, 8, 128], strides = [1, 1, 1]} : vector<10x8x128xf32> to vector<8x8x128xf32>
    %214 = vector.shape_cast %213 : vector<8x8x128xf32> to vector<64x128xf32>
    %215 = vector.extract_strided_slice %207 {offsets = [0, 0, 0, 0], sizes = [1, 1, 128, 64], strides = [1, 1, 1, 1]} : vector<3x3x128x64xf32> to vector<1x1x128x64xf32>
    %216 = vector.shape_cast %215 : vector<1x1x128x64xf32> to vector<128x64xf32>
    %cst_76 = arith.constant dense<0.000000e+00> : vector<64x64xf32>
    %217 = tpu.matmul %214, %216, %cst_76 {dimension_numbers = #tpu.dot_dimension_numbers<[1], [0], [0], [1], [0, 0, 1, 1], [], []>} : vector<64x128xf32>, vector<128x64xf32>, vector<64x64xf32> -> vector<64x64xf32>
    %218 = arith.addf %212, %217 : vector<64x64xf32>
    %219 = vector.extract_strided_slice %210 {offsets = [0, 0, 0], sizes = [8, 8, 128], strides = [1, 1, 1]} : vector<10x8x128xf32> to vector<8x8x128xf32>
    %220 = vector.shape_cast %219 : vector<8x8x128xf32> to vector<64x128xf32>
    %221 = vector.extract_strided_slice %207 {offsets = [0, 1, 0, 0], sizes = [1, 1, 128, 64], strides = [1, 1, 1, 1]} : vector<3x3x128x64xf32> to vector<1x1x128x64xf32>
    %222 = vector.shape_cast %221 : vector<1x1x128x64xf32> to vector<128x64xf32>
    %cst_77 = arith.constant dense<0.000000e+00> : vector<64x64xf32>
    %223 = tpu.matmul %220, %222, %cst_77 {dimension_numbers = #tpu.dot_dimension_numbers<[1], [0], [0], [1], [0, 0, 1, 1], [], []>} : vector<64x128xf32>, vector<128x64xf32>, vector<64x64xf32> -> vector<64x64xf32>
    %224 = arith.addf %218, %223 : vector<64x64xf32>
    %225 = vector.extract_strided_slice %211 {offsets = [0, 0, 0], sizes = [8, 8, 128], strides = [1, 1, 1]} : vector<10x8x128xf32> to vector<8x8x128xf32>
    %226 = vector.shape_cast %225 : vector<8x8x128xf32> to vector<64x128xf32>
    %227 = vector.extract_strided_slice %207 {offsets = [0, 2, 0, 0], sizes = [1, 1, 128, 64], strides = [1, 1, 1, 1]} : vector<3x3x128x64xf32> to vector<1x1x128x64xf32>
    %228 = vector.shape_cast %227 : vector<1x1x128x64xf32> to vector<128x64xf32>
    %cst_78 = arith.constant dense<0.000000e+00> : vector<64x64xf32>
    %229 = tpu.matmul %226, %228, %cst_78 {dimension_numbers = #tpu.dot_dimension_numbers<[1], [0], [0], [1], [0, 0, 1, 1], [], []>} : vector<64x128xf32>, vector<128x64xf32>, vector<64x64xf32> -> vector<64x64xf32>
    %230 = arith.addf %224, %229 : vector<64x64xf32>
    %231 = vector.extract_strided_slice %209 {offsets = [1, 0, 0], sizes = [8, 8, 128], strides = [1, 1, 1]} : vector<10x8x128xf32> to vector<8x8x128xf32>
    %232 = vector.shape_cast %231 : vector<8x8x128xf32> to vector<64x128xf32>
    %233 = vector.extract_strided_slice %207 {offsets = [1, 0, 0, 0], sizes = [1, 1, 128, 64], strides = [1, 1, 1, 1]} : vector<3x3x128x64xf32> to vector<1x1x128x64xf32>
    %234 = vector.shape_cast %233 : vector<1x1x128x64xf32> to vector<128x64xf32>
    %cst_79 = arith.constant dense<0.000000e+00> : vector<64x64xf32>
    %235 = tpu.matmul %232, %234, %cst_79 {dimension_numbers = #tpu.dot_dimension_numbers<[1], [0], [0], [1], [0, 0, 1, 1], [], []>} : vector<64x128xf32>, vector<128x64xf32>, vector<64x64xf32> -> vector<64x64xf32>
    %236 = arith.addf %230, %235 : vector<64x64xf32>
    %237 = vector.extract_strided_slice %210 {offsets = [1, 0, 0], sizes = [8, 8, 128], strides = [1, 1, 1]} : vector<10x8x128xf32> to vector<8x8x128xf32>
    %238 = vector.shape_cast %237 : vector<8x8x128xf32> to vector<64x128xf32>
    %239 = vector.extract_strided_slice %207 {offsets = [1, 1, 0, 0], sizes = [1, 1, 128, 64], strides = [1, 1, 1, 1]} : vector<3x3x128x64xf32> to vector<1x1x128x64xf32>
    %240 = vector.shape_cast %239 : vector<1x1x128x64xf32> to vector<128x64xf32>
    %cst_80 = arith.constant dense<0.000000e+00> : vector<64x64xf32>
    %241 = tpu.matmul %238, %240, %cst_80 {dimension_numbers = #tpu.dot_dimension_numbers<[1], [0], [0], [1], [0, 0, 1, 1], [], []>} : vector<64x128xf32>, vector<128x64xf32>, vector<64x64xf32> -> vector<64x64xf32>
    %242 = arith.addf %236, %241 : vector<64x64xf32>
    %243 = vector.extract_strided_slice %211 {offsets = [1, 0, 0], sizes = [8, 8, 128], strides = [1, 1, 1]} : vector<10x8x128xf32> to vector<8x8x128xf32>
    %244 = vector.shape_cast %243 : vector<8x8x128xf32> to vector<64x128xf32>
    %245 = vector.extract_strided_slice %207 {offsets = [1, 2, 0, 0], sizes = [1, 1, 128, 64], strides = [1, 1, 1, 1]} : vector<3x3x128x64xf32> to vector<1x1x128x64xf32>
    %246 = vector.shape_cast %245 : vector<1x1x128x64xf32> to vector<128x64xf32>
    %cst_81 = arith.constant dense<0.000000e+00> : vector<64x64xf32>
    %247 = tpu.matmul %244, %246, %cst_81 {dimension_numbers = #tpu.dot_dimension_numbers<[1], [0], [0], [1], [0, 0, 1, 1], [], []>} : vector<64x128xf32>, vector<128x64xf32>, vector<64x64xf32> -> vector<64x64xf32>
    %248 = arith.addf %242, %247 : vector<64x64xf32>
    %249 = vector.extract_strided_slice %209 {offsets = [2, 0, 0], sizes = [8, 8, 128], strides = [1, 1, 1]} : vector<10x8x128xf32> to vector<8x8x128xf32>
    %250 = vector.shape_cast %249 : vector<8x8x128xf32> to vector<64x128xf32>
    %251 = vector.extract_strided_slice %207 {offsets = [2, 0, 0, 0], sizes = [1, 1, 128, 64], strides = [1, 1, 1, 1]} : vector<3x3x128x64xf32> to vector<1x1x128x64xf32>
    %252 = vector.shape_cast %251 : vector<1x1x128x64xf32> to vector<128x64xf32>
    %cst_82 = arith.constant dense<0.000000e+00> : vector<64x64xf32>
    %253 = tpu.matmul %250, %252, %cst_82 {dimension_numbers = #tpu.dot_dimension_numbers<[1], [0], [0], [1], [0, 0, 1, 1], [], []>} : vector<64x128xf32>, vector<128x64xf32>, vector<64x64xf32> -> vector<64x64xf32>
    %254 = arith.addf %248, %253 : vector<64x64xf32>
    %255 = vector.extract_strided_slice %210 {offsets = [2, 0, 0], sizes = [8, 8, 128], strides = [1, 1, 1]} : vector<10x8x128xf32> to vector<8x8x128xf32>
    %256 = vector.shape_cast %255 : vector<8x8x128xf32> to vector<64x128xf32>
    %257 = vector.extract_strided_slice %207 {offsets = [2, 1, 0, 0], sizes = [1, 1, 128, 64], strides = [1, 1, 1, 1]} : vector<3x3x128x64xf32> to vector<1x1x128x64xf32>
    %258 = vector.shape_cast %257 : vector<1x1x128x64xf32> to vector<128x64xf32>
    %cst_83 = arith.constant dense<0.000000e+00> : vector<64x64xf32>
    %259 = tpu.matmul %256, %258, %cst_83 {dimension_numbers = #tpu.dot_dimension_numbers<[1], [0], [0], [1], [0, 0, 1, 1], [], []>} : vector<64x128xf32>, vector<128x64xf32>, vector<64x64xf32> -> vector<64x64xf32>
    %260 = arith.addf %254, %259 : vector<64x64xf32>
    %261 = vector.extract_strided_slice %211 {offsets = [2, 0, 0], sizes = [8, 8, 128], strides = [1, 1, 1]} : vector<10x8x128xf32> to vector<8x8x128xf32>
    %262 = vector.shape_cast %261 : vector<8x8x128xf32> to vector<64x128xf32>
    %263 = vector.extract_strided_slice %207 {offsets = [2, 2, 0, 0], sizes = [1, 1, 128, 64], strides = [1, 1, 1, 1]} : vector<3x3x128x64xf32> to vector<1x1x128x64xf32>
    %264 = vector.shape_cast %263 : vector<1x1x128x64xf32> to vector<128x64xf32>
    %cst_84 = arith.constant dense<0.000000e+00> : vector<64x64xf32>
    %265 = tpu.matmul %262, %264, %cst_84 {dimension_numbers = #tpu.dot_dimension_numbers<[1], [0], [0], [1], [0, 0, 1, 1], [], []>} : vector<64x128xf32>, vector<128x64xf32>, vector<64x64xf32> -> vector<64x64xf32>
    %266 = arith.addf %260, %265 : vector<64x64xf32>
    %267 = vector.broadcast %208 : vector<1x64xf32> to vector<64x64xf32>
    %268 = arith.addf %266, %267 : vector<64x64xf32>
    %cst_85 = arith.constant 0.000000e+00 : f32
    %269 = vector.broadcast %cst_85 : f32 to vector<64x64xf32>
    %270 = arith.maximumf %268, %269 : vector<64x64xf32>
    %271 = tpu.iota {dimensions = array<i32: 0>} : vector<256x64xi32>
    %272 = tpu.iota {dimensions = array<i32: 1>} : vector<256x64xi32>
    %c5_i32 = arith.constant 5 : i32
    %273 = vector.broadcast %c5_i32 : i32 to vector<256x64xi32>
    %274 = arith.shrsi %271, %273 : vector<256x64xi32>
    %c15_i32 = arith.constant 15 : i32
    %275 = vector.broadcast %c15_i32 : i32 to vector<256x64xi32>
    %276 = arith.andi %271, %275 : vector<256x64xi32>
    %c1_i32_86 = arith.constant 1 : i32
    %277 = vector.broadcast %c1_i32_86 : i32 to vector<256x64xi32>
    %278 = arith.shrsi %276, %277 : vector<256x64xi32>
    %c8_i32 = arith.constant 8 : i32
    %279 = vector.broadcast %c8_i32 : i32 to vector<256x64xi32>
    %280 = arith.muli %279, %274 : vector<256x64xi32>
    %281 = arith.addi %280, %278 : vector<256x64xi32>
    %282 = arith.cmpi eq, %272, %281 : vector<256x64xi32>
    %283 = arith.extui %282 : vector<256x64xi1> to vector<256x64xi32>
    %284 = arith.sitofp %283 : vector<256x64xi32> to vector<256x64xf32>
    %cst_87 = arith.constant dense<0.000000e+00> : vector<256x64xf32>
    %285 = tpu.matmul %284, %270, %cst_87 {dimension_numbers = #tpu.dot_dimension_numbers<[1], [0], [0], [1], [0, 0, 1, 1], [], []>} : vector<256x64xf32>, vector<64x64xf32>, vector<256x64xf32> -> vector<256x64xf32>
    %286 = vector.shape_cast %285 : vector<256x64xf32> to vector<16x16x64xf32>
    %c1_88 = arith.constant 1 : index
    %c1_89 = arith.constant 1 : index
    %c0_90 = arith.constant 0 : index
    %287 = vector.load %arg14[%c1_88, %c1_89, %c0_90] : memref<18x18x64xf32, #tpu.memory_space<vmem>>, vector<16x16x64xf32>
    tpu.vector_store %arg14[%c1_88, %c1_89, %c0_90], %286 {strides = array<i32>} : memref<18x18x64xf32, #tpu.memory_space<vmem>>, vector<16x16x64xf32>,
    %c0_91 = arith.constant 0 : index
    %c0_92 = arith.constant 0 : index
    %c0_93 = arith.constant 0 : index
    %288 = vector.load %arg14[%c0_91, %c0_92, %c0_93] : memref<18x18x64xf32, #tpu.memory_space<vmem>>, vector<18x18x64xf32>
    %c0_94 = arith.constant 0 : index
    %c0_95 = arith.constant 0 : index
    %c0_96 = arith.constant 0 : index
    %c0_97 = arith.constant 0 : index
    %289 = vector.load %arg8[%c0_94, %c0_95, %c0_96, %c0_97] : memref<3x3x64x3xf32, #tpu.memory_space<vmem>>, vector<3x3x64x3xf32>
    %c0_98 = arith.constant 0 : index
    %c0_99 = arith.constant 0 : index
    %290 = vector.load %arg9[%c0_98, %c0_99] : memref<1x3xf32, #tpu.memory_space<vmem>>, vector<1x3xf32>
    %291 = vector.extract_strided_slice %288 {offsets = [0, 0, 0], sizes = [18, 16, 64], strides = [1, 1, 1]} : vector<18x18x64xf32> to vector<18x16x64xf32>
    %292 = vector.extract_strided_slice %288 {offsets = [0, 1, 0], sizes = [18, 16, 64], strides = [1, 1, 1]} : vector<18x18x64xf32> to vector<18x16x64xf32>
    %293 = vector.extract_strided_slice %288 {offsets = [0, 2, 0], sizes = [18, 16, 64], strides = [1, 1, 1]} : vector<18x18x64xf32> to vector<18x16x64xf32>
    %cst_100 = arith.constant 0.000000e+00 : f32
    %294 = vector.broadcast %cst_100 : f32 to vector<256x3xf32>
    %295 = vector.extract_strided_slice %291 {offsets = [0, 0, 0], sizes = [16, 16, 64], strides = [1, 1, 1]} : vector<18x16x64xf32> to vector<16x16x64xf32>
    %296 = vector.shape_cast %295 : vector<16x16x64xf32> to vector<256x64xf32>
    %297 = vector.extract_strided_slice %289 {offsets = [0, 0, 0, 0], sizes = [1, 1, 64, 3], strides = [1, 1, 1, 1]} : vector<3x3x64x3xf32> to vector<1x1x64x3xf32>
    %298 = vector.shape_cast %297 : vector<1x1x64x3xf32> to vector<64x3xf32>
    %cst_101 = arith.constant dense<0.000000e+00> : vector<256x3xf32>
    %299 = tpu.matmul %296, %298, %cst_101 {dimension_numbers = #tpu.dot_dimension_numbers<[1], [0], [0], [1], [0, 0, 1, 1], [], []>} : vector<256x64xf32>, vector<64x3xf32>, vector<256x3xf32> -> vector<256x3xf32>
    %300 = arith.addf %294, %299 : vector<256x3xf32>
    %301 = vector.extract_strided_slice %292 {offsets = [0, 0, 0], sizes = [16, 16, 64], strides = [1, 1, 1]} : vector<18x16x64xf32> to vector<16x16x64xf32>
    %302 = vector.shape_cast %301 : vector<16x16x64xf32> to vector<256x64xf32>
    %303 = vector.extract_strided_slice %289 {offsets = [0, 1, 0, 0], sizes = [1, 1, 64, 3], strides = [1, 1, 1, 1]} : vector<3x3x64x3xf32> to vector<1x1x64x3xf32>
    %304 = vector.shape_cast %303 : vector<1x1x64x3xf32> to vector<64x3xf32>
    %cst_102 = arith.constant dense<0.000000e+00> : vector<256x3xf32>
    %305 = tpu.matmul %302, %304, %cst_102 {dimension_numbers = #tpu.dot_dimension_numbers<[1], [0], [0], [1], [0, 0, 1, 1], [], []>} : vector<256x64xf32>, vector<64x3xf32>, vector<256x3xf32> -> vector<256x3xf32>
    %306 = arith.addf %300, %305 : vector<256x3xf32>
    %307 = vector.extract_strided_slice %293 {offsets = [0, 0, 0], sizes = [16, 16, 64], strides = [1, 1, 1]} : vector<18x16x64xf32> to vector<16x16x64xf32>
    %308 = vector.shape_cast %307 : vector<16x16x64xf32> to vector<256x64xf32>
    %309 = vector.extract_strided_slice %289 {offsets = [0, 2, 0, 0], sizes = [1, 1, 64, 3], strides = [1, 1, 1, 1]} : vector<3x3x64x3xf32> to vector<1x1x64x3xf32>
    %310 = vector.shape_cast %309 : vector<1x1x64x3xf32> to vector<64x3xf32>
    %cst_103 = arith.constant dense<0.000000e+00> : vector<256x3xf32>
    %311 = tpu.matmul %308, %310, %cst_103 {dimension_numbers = #tpu.dot_dimension_numbers<[1], [0], [0], [1], [0, 0, 1, 1], [], []>} : vector<256x64xf32>, vector<64x3xf32>, vector<256x3xf32> -> vector<256x3xf32>
    %312 = arith.addf %306, %311 : vector<256x3xf32>
    %313 = vector.extract_strided_slice %291 {offsets = [1, 0, 0], sizes = [16, 16, 64], strides = [1, 1, 1]} : vector<18x16x64xf32> to vector<16x16x64xf32>
    %314 = vector.shape_cast %313 : vector<16x16x64xf32> to vector<256x64xf32>
    %315 = vector.extract_strided_slice %289 {offsets = [1, 0, 0, 0], sizes = [1, 1, 64, 3], strides = [1, 1, 1, 1]} : vector<3x3x64x3xf32> to vector<1x1x64x3xf32>
    %316 = vector.shape_cast %315 : vector<1x1x64x3xf32> to vector<64x3xf32>
    %cst_104 = arith.constant dense<0.000000e+00> : vector<256x3xf32>
    %317 = tpu.matmul %314, %316, %cst_104 {dimension_numbers = #tpu.dot_dimension_numbers<[1], [0], [0], [1], [0, 0, 1, 1], [], []>} : vector<256x64xf32>, vector<64x3xf32>, vector<256x3xf32> -> vector<256x3xf32>
    %318 = arith.addf %312, %317 : vector<256x3xf32>
    %319 = vector.extract_strided_slice %292 {offsets = [1, 0, 0], sizes = [16, 16, 64], strides = [1, 1, 1]} : vector<18x16x64xf32> to vector<16x16x64xf32>
    %320 = vector.shape_cast %319 : vector<16x16x64xf32> to vector<256x64xf32>
    %321 = vector.extract_strided_slice %289 {offsets = [1, 1, 0, 0], sizes = [1, 1, 64, 3], strides = [1, 1, 1, 1]} : vector<3x3x64x3xf32> to vector<1x1x64x3xf32>
    %322 = vector.shape_cast %321 : vector<1x1x64x3xf32> to vector<64x3xf32>
    %cst_105 = arith.constant dense<0.000000e+00> : vector<256x3xf32>
    %323 = tpu.matmul %320, %322, %cst_105 {dimension_numbers = #tpu.dot_dimension_numbers<[1], [0], [0], [1], [0, 0, 1, 1], [], []>} : vector<256x64xf32>, vector<64x3xf32>, vector<256x3xf32> -> vector<256x3xf32>
    %324 = arith.addf %318, %323 : vector<256x3xf32>
    %325 = vector.extract_strided_slice %293 {offsets = [1, 0, 0], sizes = [16, 16, 64], strides = [1, 1, 1]} : vector<18x16x64xf32> to vector<16x16x64xf32>
    %326 = vector.shape_cast %325 : vector<16x16x64xf32> to vector<256x64xf32>
    %327 = vector.extract_strided_slice %289 {offsets = [1, 2, 0, 0], sizes = [1, 1, 64, 3], strides = [1, 1, 1, 1]} : vector<3x3x64x3xf32> to vector<1x1x64x3xf32>
    %328 = vector.shape_cast %327 : vector<1x1x64x3xf32> to vector<64x3xf32>
    %cst_106 = arith.constant dense<0.000000e+00> : vector<256x3xf32>
    %329 = tpu.matmul %326, %328, %cst_106 {dimension_numbers = #tpu.dot_dimension_numbers<[1], [0], [0], [1], [0, 0, 1, 1], [], []>} : vector<256x64xf32>, vector<64x3xf32>, vector<256x3xf32> -> vector<256x3xf32>
    %330 = arith.addf %324, %329 : vector<256x3xf32>
    %331 = vector.extract_strided_slice %291 {offsets = [2, 0, 0], sizes = [16, 16, 64], strides = [1, 1, 1]} : vector<18x16x64xf32> to vector<16x16x64xf32>
    %332 = vector.shape_cast %331 : vector<16x16x64xf32> to vector<256x64xf32>
    %333 = vector.extract_strided_slice %289 {offsets = [2, 0, 0, 0], sizes = [1, 1, 64, 3], strides = [1, 1, 1, 1]} : vector<3x3x64x3xf32> to vector<1x1x64x3xf32>
    %334 = vector.shape_cast %333 : vector<1x1x64x3xf32> to vector<64x3xf32>
    %cst_107 = arith.constant dense<0.000000e+00> : vector<256x3xf32>
    %335 = tpu.matmul %332, %334, %cst_107 {dimension_numbers = #tpu.dot_dimension_numbers<[1], [0], [0], [1], [0, 0, 1, 1], [], []>} : vector<256x64xf32>, vector<64x3xf32>, vector<256x3xf32> -> vector<256x3xf32>
    %336 = arith.addf %330, %335 : vector<256x3xf32>
    %337 = vector.extract_strided_slice %292 {offsets = [2, 0, 0], sizes = [16, 16, 64], strides = [1, 1, 1]} : vector<18x16x64xf32> to vector<16x16x64xf32>
    %338 = vector.shape_cast %337 : vector<16x16x64xf32> to vector<256x64xf32>
    %339 = vector.extract_strided_slice %289 {offsets = [2, 1, 0, 0], sizes = [1, 1, 64, 3], strides = [1, 1, 1, 1]} : vector<3x3x64x3xf32> to vector<1x1x64x3xf32>
    %340 = vector.shape_cast %339 : vector<1x1x64x3xf32> to vector<64x3xf32>
    %cst_108 = arith.constant dense<0.000000e+00> : vector<256x3xf32>
    %341 = tpu.matmul %338, %340, %cst_108 {dimension_numbers = #tpu.dot_dimension_numbers<[1], [0], [0], [1], [0, 0, 1, 1], [], []>} : vector<256x64xf32>, vector<64x3xf32>, vector<256x3xf32> -> vector<256x3xf32>
    %342 = arith.addf %336, %341 : vector<256x3xf32>
    %343 = vector.extract_strided_slice %293 {offsets = [2, 0, 0], sizes = [16, 16, 64], strides = [1, 1, 1]} : vector<18x16x64xf32> to vector<16x16x64xf32>
    %344 = vector.shape_cast %343 : vector<16x16x64xf32> to vector<256x64xf32>
    %345 = vector.extract_strided_slice %289 {offsets = [2, 2, 0, 0], sizes = [1, 1, 64, 3], strides = [1, 1, 1, 1]} : vector<3x3x64x3xf32> to vector<1x1x64x3xf32>
    %346 = vector.shape_cast %345 : vector<1x1x64x3xf32> to vector<64x3xf32>
    %cst_109 = arith.constant dense<0.000000e+00> : vector<256x3xf32>
    %347 = tpu.matmul %344, %346, %cst_109 {dimension_numbers = #tpu.dot_dimension_numbers<[1], [0], [0], [1], [0, 0, 1, 1], [], []>} : vector<256x64xf32>, vector<64x3xf32>, vector<256x3xf32> -> vector<256x3xf32>
    %348 = arith.addf %342, %347 : vector<256x3xf32>
    %349 = vector.broadcast %290 : vector<1x3xf32> to vector<256x3xf32>
    %350 = arith.addf %348, %349 : vector<256x3xf32>
    %351 = arith.negf %350 : vector<256x3xf32>
    %352 = math.exp %351 : vector<256x3xf32>
    %cst_110 = arith.constant 1.000000e+00 : f32
    %353 = vector.broadcast %cst_110 : f32 to vector<256x3xf32>
    %354 = arith.addf %353, %352 : vector<256x3xf32>
    %355 = arith.divf %353, %354 : vector<256x3xf32>
    %356 = vector.shape_cast %355 : vector<256x3xf32> to vector<16x16x3xf32>
    %c0_111 = arith.constant 0 : index
    %c0_112 = arith.constant 0 : index
    %c0_113 = arith.constant 0 : index
    %c0_114 = arith.constant 0 : index
    %357 = vector.load %arg10[%c0_111, %c0_112, %c0_113, %c0_114] : memref<1x16x16x3xf32, #tpu.memory_space<vmem>>, vector<1x16x16x3xf32>
    %358 = vector.shape_cast %357 : vector<1x16x16x3xf32> to vector<16x16x3xf32>
    %359 = vector.shape_cast %356 : vector<16x16x3xf32> to vector<1x16x16x3xf32>
    tpu.vector_store %arg10[%c0_111, %c0_112, %c0_113, %c0_114], %359 {strides = array<i32>} : memref<1x16x16x3xf32, #tpu.memory_space<vmem>>, vector<1x16x16x3xf32>,
    return
  }
  func.func @transform_0(%arg0: i32) -> (i32, i32, i32, i32) {
    %c0_i32 = arith.constant 0 : i32
    %c0_i32_0 = arith.constant 0 : i32
    %c0_i32_1 = arith.constant 0 : i32
    %c0_i32_2 = arith.constant 0 : i32
    return %arg0, %c0_i32, %c0_i32_0, %c0_i32_1 : i32, i32, i32, i32
  }
  func.func @transform_1(%arg0: i32) -> (i32, i32, i32, i32) {
    %c0_i32 = arith.constant 0 : i32
    %c0_i32_0 = arith.constant 0 : i32
    %c0_i32_1 = arith.constant 0 : i32
    %c0_i32_2 = arith.constant 0 : i32
    %c0_i32_3 = arith.constant 0 : i32
    return %c0_i32, %c0_i32_0, %c0_i32_1, %c0_i32_2 : i32, i32, i32, i32
  }
  func.func @transform_2(%arg0: i32) -> (i32, i32) {
    %c0_i32 = arith.constant 0 : i32
    %c0_i32_0 = arith.constant 0 : i32
    %c0_i32_1 = arith.constant 0 : i32
    return %c0_i32, %c0_i32_0 : i32, i32
  }
  func.func @transform_3(%arg0: i32) -> (i32, i32, i32, i32) {
    %c0_i32 = arith.constant 0 : i32
    %c0_i32_0 = arith.constant 0 : i32
    %c0_i32_1 = arith.constant 0 : i32
    %c0_i32_2 = arith.constant 0 : i32
    %c0_i32_3 = arith.constant 0 : i32
    return %c0_i32, %c0_i32_0, %c0_i32_1, %c0_i32_2 : i32, i32, i32, i32
  }
  func.func @transform_4(%arg0: i32) -> (i32, i32) {
    %c0_i32 = arith.constant 0 : i32
    %c0_i32_0 = arith.constant 0 : i32
    %c0_i32_1 = arith.constant 0 : i32
    return %c0_i32, %c0_i32_0 : i32, i32
  }
  func.func @transform_5(%arg0: i32) -> (i32, i32, i32, i32) {
    %c0_i32 = arith.constant 0 : i32
    %c0_i32_0 = arith.constant 0 : i32
    %c0_i32_1 = arith.constant 0 : i32
    %c0_i32_2 = arith.constant 0 : i32
    %c0_i32_3 = arith.constant 0 : i32
    return %c0_i32, %c0_i32_0, %c0_i32_1, %c0_i32_2 : i32, i32, i32, i32
  }
  func.func @transform_6(%arg0: i32) -> (i32, i32) {
    %c0_i32 = arith.constant 0 : i32
    %c0_i32_0 = arith.constant 0 : i32
    %c0_i32_1 = arith.constant 0 : i32
    return %c0_i32, %c0_i32_0 : i32, i32
  }
  func.func @transform_7(%arg0: i32) -> (i32, i32, i32, i32) {
    %c0_i32 = arith.constant 0 : i32
    %c0_i32_0 = arith.constant 0 : i32
    %c0_i32_1 = arith.constant 0 : i32
    %c0_i32_2 = arith.constant 0 : i32
    %c0_i32_3 = arith.constant 0 : i32
    return %c0_i32, %c0_i32_0, %c0_i32_1, %c0_i32_2 : i32, i32, i32, i32
  }
  func.func @transform_8(%arg0: i32) -> (i32, i32) {
    %c0_i32 = arith.constant 0 : i32
    %c0_i32_0 = arith.constant 0 : i32
    %c0_i32_1 = arith.constant 0 : i32
    return %c0_i32, %c0_i32_0 : i32, i32
  }
  func.func @transform_9(%arg0: i32) -> (i32, i32, i32, i32) {
    %c0_i32 = arith.constant 0 : i32
    %c0_i32_0 = arith.constant 0 : i32
    %c0_i32_1 = arith.constant 0 : i32
    %c0_i32_2 = arith.constant 0 : i32
    return %arg0, %c0_i32, %c0_i32_0, %c0_i32_1 : i32, i32, i32, i32
  }
}

</mosaic_0001>

<bundles_post_ra>
// kernel: colorization_cnn.1
= control target key start
LH: loop header
LB: loop body
LE: loop exit
PB: predicated region body
PF: predicated region fallthrough
CT: control target
= control target key end

     0   :  { %s16596_s30 = smov 0   ;;  %s21856_s0 = inlined_call_operand.vmem [shape: f32[2,16,16,1], index: 0, kind: input, shape index: {}]   ;;  %s21857_s1 = inlined_call_operand.vmem [shape: f32[3,3,1,64], index: 1, kind: input, shape index: {}]   ;;  %s21858_s2 = inlined_call_operand.vmem [shape: f32[1,64], index: 2, kind: input, shape index: {}]   ;;  %s21859_s3 = inlined_call_operand.vmem [shape: f32[3,3,64,128], index: 3, kind: input, shape index: {}]   ;;  %s21860_s4 = inlined_call_operand.vmem [shape: f32[1,128], index: 4, kind: input, shape index: {}]   ;;  %s21861_s5 = inlined_call_operand.vmem [shape: f32[3,3,128,64], index: 5, kind: input, shape index: {}]   ;;  %s21862_s6 = inlined_call_operand.vmem [shape: f32[1,64], index: 6, kind: input, shape index: {}]   ;;  %s21863_s7 = inlined_call_operand.vmem [shape: f32[3,3,64,3], index: 7, kind: input, shape index: {}]   ;;  %s21864_s8 = inlined_call_operand.vmem [shape: f32[1,3], index: 8, kind: input, shape index: {}]   ;;  %s21865_s9 = inlined_call_operand.vmem [shape: f32[2,16,16,3], index: 9, kind: output, shape index: {}]  }
   0x1 LB: > { %s11392_s10 = sadd.s32 4294967295, %s16541_s30   ;;  %p11396_p0 = scmp.ge.s32.totalorder %s16541_s30, 1  ;;  %s16541_s30 = sphi %s16596_s30, %s19_s30  }
   0x2   : > { %p287_p1 = scmp.lt.s32.totalorder %s16541_s30, 3 }
   0x4   : > { %p288_p2 = pnand %p11396_p0, %p287_p1 }
   0x6   : > { %291 = sbr.rel (%p288_p2) target bundleno = 2971 (0xb9b), region = 56 }
   0xd   : > { %vm333_vm0 = vcmask 7168   ;;  %vm336_vm1 = vcmask 1024   ;;  %p16606_p3 = scmp.lt.s32.totalorder %s11392_s10, 1  ;;  %v16543_v0 = vmov 0   ;;  %v16544_v1 = vmov 0.0   ;;  %v2771_v56 = vld [vmem:[%s21859_s3 + $0x40] sm:$0xff] }
   0xe   : > { %16345 = vset.pattern.permute.xlu0 %v16543_v0  ;;  %334 = vst.msk [vmem:[#allocation2] sm:$0xff] %vm333_vm0, %v16544_v1  ;;  %335 = vst.msk [vmem:[#allocation2 + $0x8] sm:$0xff] %vm333_vm0, %v16544_v1  ;;  %16346 = vset.pattern.permute.xlu1 %v16543_v0  ;;  %vm389_vm2 = vcmask 523264   ;;  %vm392_vm3 = vcmask 517120   ;;  %v2772_v57 = vld [vmem:[%s21859_s3 + $0x48] sm:$0xff]  ;;  %vm1060_vm4 = vcmask 1046528  }
   0xf   : > { %338 = vst.msk [vmem:[#allocation2 + $0x18] sm:$0xff] %vm333_vm0, %v16544_v1  ;;  %339 = vst.msk [vmem:[#allocation2 + $0x20] sm:$0xff] %vm333_vm0, %v16544_v1  ;;  %s22228_s10 = smov (!%p16606_p3, %s11392_s10), 1  ;;  %v15030_v59 = vpack.c.bf16 %v2772_v57, %v2771_v56  ;;  %vm1307_vm5 = vcmask 1045504   ;;  %v17089_v56 = vld [vmem:[%s21857_s1 + $0x4] ss:$0 sm:$0xff] }
  0x10   : > { %341 = vst.msk [vmem:[#allocation2 + $0x30] sm:$0xff] %vm333_vm0, %v16544_v1  ;;  %342 = vst.msk [vmem:[#allocation2 + $0x38] sm:$0xff] %vm333_vm0, %v16544_v1  ;;  %s12216_s12 = sshll.u32 %s22228_s10, 8  ;;  %v17094_v57 = vld [vmem:[%s21857_s1 + $0x5] ss:$0 sm:$0xff] }
  0x11   : > { %344 = vst.msk [vmem:[#allocation2 + $0x48] sm:$0xff] %vm333_vm0, %v16544_v1  ;;  %345 = vst.msk [vmem:[#allocation2 + $0x50] sm:$0xff] %vm333_vm0, %v16544_v1  ;;  %s16749_s15 = scalar_lea.vmem %s21856_s0, %s12216_s12  ;;  %15031 = vmatprep.subr.bf16.mxu0 %v15030_v59  ;;  %s21750_s11 = scalar_lea.vmem %s21865_s9, %s12216_s12 }
  0x12   : > { %347 = vst.msk [vmem:[#allocation2 + $0x60] sm:$0xff] %vm333_vm0, %v16544_v1  ;;  %348 = vst.msk [vmem:[#allocation2 + $0x68] sm:$0xff] %vm333_vm0, %v16544_v1  ;;  %v519_v2 = vld [vmem:[%s16749_s15] sm:$0xff]  ;;  %v520_v3 = vld [vmem:[%s16749_s15 + $0x8] sm:$0xff]  ;;  %15033 = vmatpush3.bf16.msra.mxu0 %v15030_v59 }
  0x13   : > { %350 = vst.msk [vmem:[#allocation2 + $0x78] sm:$0xff] %vm333_vm0, %v16544_v1  ;;  %351 = vst.msk [vmem:[#allocation2 + $0x80] sm:$0xff] %vm333_vm0, %v16544_v1  ;;  %v521_v4 = vld [vmem:[%s16749_s15 + $0x10] sm:$0xff]  ;;  %v522_v5 = vld [vmem:[%s16749_s15 + $0x18] sm:$0xff] }
  0x14   : > { %353 = vst.msk [vmem:[#allocation2 + $0x90] sm:$0xff] %vm333_vm0, %v16544_v1  ;;  %354 = vst.msk [vmem:[#allocation2 + $0x98] sm:$0xff] %vm333_vm0, %v16544_v1  ;;  %v523_v6 = vld [vmem:[%s16749_s15 + $0x20] sm:$0xff]  ;;  %v524_v7 = vld [vmem:[%s16749_s15 + $0x28] sm:$0xff] }
  0x15   : > { %356 = vst.msk [vmem:[#allocation2 + $0xa8] sm:$0xff] %vm333_vm0, %v16544_v1  ;;  %357 = vst.msk [vmem:[#allocation2 + $0xb0] sm:$0xff] %vm333_vm0, %v16544_v1  ;;  %v584_v8 = vld [vmem:[#allocation2] sm:$0xff]  ;;  %v585_v10 = vld [vmem:[#allocation2 + $0x8] sm:$0xff] }
  0x16   : > { %359 = vst.msk [vmem:[#allocation2 + $0xc0] sm:$0xff] %vm333_vm0, %v16544_v1  ;;  %360 = vst.msk [vmem:[#allocation2 + $0xc8] sm:$0xff] %vm333_vm0, %v16544_v1  ;;  %650 = vperm.xlu0 %16345, %v584_v8   ;;  %v525_v11 = vld [vmem:[%s16749_s15 + $0x30] sm:$0xff]  ;;  %v526_v12 = vld [vmem:[%s16749_s15 + $0x38] sm:$0xff] }
  0x17   : > { %362 = vst.msk [vmem:[#allocation2 + $0xd8] sm:$0xff] %vm333_vm0, %v16544_v1  ;;  %363 = vst.msk [vmem:[#allocation2 + $0xe0] sm:$0xff] %vm333_vm0, %v16544_v1  ;;  %v527_v13 = vld [vmem:[%s16749_s15 + $0x40] sm:$0xff]  ;;  %v528_v14 = vld [vmem:[%s16749_s15 + $0x48] sm:$0xff] }
  0x18   : > { %365 = vst.msk [vmem:[#allocation2 + $0xf0] sm:$0xff] %vm333_vm0, %v16544_v1  ;;  %366 = vst.msk [vmem:[#allocation2 + $0xf8] sm:$0xff] %vm333_vm0, %v16544_v1  ;;  %v529_v15 = vld [vmem:[%s16749_s15 + $0x50] sm:$0xff]  ;;  %v530_v16 = vld [vmem:[%s16749_s15 + $0x58] sm:$0xff] }
  0x19   : > { %368 = vst.msk [vmem:[#allocation2 + $0x108] sm:$0xff] %vm333_vm0, %v16544_v1  ;;  %369 = vst.msk [vmem:[#allocation2 + $0x110] sm:$0xff] %vm333_vm0, %v16544_v1  ;;  %v531_v17 = vld [vmem:[%s16749_s15 + $0x60] sm:$0xff]  ;;  %v532_v18 = vld [vmem:[%s16749_s15 + $0x68] sm:$0xff] }
  0x1a   : > { %371 = vst.msk [vmem:[#allocation2 + $0x120] sm:$0xff] %vm333_vm0, %v16544_v1  ;;  %372 = vst.msk [vmem:[#allocation2 + $0x128] sm:$0xff] %vm333_vm0, %v16544_v1  ;;  %v533_v19 = vld [vmem:[%s16749_s15 + $0x70] sm:$0xff]  ;;  %v534_v20 = vld [vmem:[%s16749_s15 + $0x78] sm:$0xff]  ;;  %655 = vperm.xlu0 %16345, %v585_v10  }
  0x1b   : > { %374 = vst.msk [vmem:[#allocation2 + $0x138] sm:$0xff] %vm333_vm0, %v16544_v1  ;;  %375 = vst.msk [vmem:[#allocation2 + $0x140] sm:$0xff] %vm333_vm0, %v16544_v1  ;;  %v535_v21 = vld [vmem:[%s16749_s15 + $0x80] sm:$0xff]  ;;  %v536_v22 = vld [vmem:[%s16749_s15 + $0x88] sm:$0xff] }
  0x1c   : > { %377 = vst.msk [vmem:[#allocation2 + $0x150] sm:$0xff] %vm333_vm0, %v16544_v1  ;;  %378 = vst.msk [vmem:[#allocation2 + $0x158] sm:$0xff] %vm333_vm0, %v16544_v1  ;;  %v537_v23 = vld [vmem:[%s16749_s15 + $0x90] sm:$0xff]  ;;  %v538_v24 = vld [vmem:[%s16749_s15 + $0x98] sm:$0xff] }
  0x1d   : > { %380 = vst.msk [vmem:[#allocation2 + $0x168] sm:$0xff] %vm333_vm0, %v16544_v1  ;;  %381 = vst.msk [vmem:[#allocation2 + $0x170] sm:$0xff] %vm333_vm0, %v16544_v1  ;;  %v539_v25 = vld [vmem:[%s16749_s15 + $0xa0] sm:$0xff]  ;;  %v540_v34 = vld [vmem:[%s16749_s15 + $0xa8] sm:$0xff] }
  0x1e   : > { %383 = vst.msk [vmem:[#allocation2 + $0x180] sm:$0xff] %vm333_vm0, %v16544_v1  ;;  %384 = vst.msk [vmem:[#allocation2 + $0x188] sm:$0xff] %vm333_vm0, %v16544_v1  ;;  %v541_v35 = vld [vmem:[%s16749_s15 + $0xb0] sm:$0xff]  ;;  %v542_v36 = vld [vmem:[%s16749_s15 + $0xb8] sm:$0xff] }
  0x1f   : > { %386 = vst.msk [vmem:[#allocation2 + $0x198] sm:$0xff] %vm333_vm0, %v16544_v1  ;;  %387 = vst.msk [vmem:[#allocation2 + $0x1a0] sm:$0xff] %vm333_vm0, %v16544_v1  ;;  %v543_v37 = vld [vmem:[%s16749_s15 + $0xc0] sm:$0xff]  ;;  %v544_v38 = vld [vmem:[%s16749_s15 + $0xc8] sm:$0xff] }
  0x20   : > { %445 = vst [vmem:[#allocation4] sm:$0xff] %v16544_v1  ;;  %446 = vst [vmem:[#allocation4 + $0x8] sm:$0x3] %v16544_v1  ;;  %v545_v39 = vld [vmem:[%s16749_s15 + $0xd0] sm:$0xff]  ;;  %v546_v40 = vld [vmem:[%s16749_s15 + $0xd8] sm:$0xff] }
  0x21   : > { %447 = vst [vmem:[#allocation4 + $0x10] sm:$0xff] %v16544_v1  ;;  %448 = vst [vmem:[#allocation4 + $0x18] sm:$0x3] %v16544_v1  ;;  %v547_v41 = vld [vmem:[%s16749_s15 + $0xe0] sm:$0xff]  ;;  %v548_v42 = vld [vmem:[%s16749_s15 + $0xe8] sm:$0xff] }
  0x22   : > { %449 = vst [vmem:[#allocation4 + $0x20] sm:$0xff] %v16544_v1  ;;  %450 = vst [vmem:[#allocation4 + $0x28] sm:$0x3] %v16544_v1  ;;  %v549_v43 = vld [vmem:[%s16749_s15 + $0xf0] sm:$0xff]  ;;  %v550_v44 = vld [vmem:[%s16749_s15 + $0xf8] sm:$0xff] }
  0x23   : > { %451 = vst [vmem:[#allocation4 + $0x30] sm:$0xff] %v16544_v1  ;;  %452 = vst [vmem:[#allocation4 + $0x38] sm:$0x3] %v16544_v1 }
  0x24   : > { %453 = vst [vmem:[#allocation4 + $0x40] sm:$0xff] %v16544_v1  ;;  %454 = vst [vmem:[#allocation4 + $0x48] sm:$0x3] %v16544_v1 }
  0x25   : > { %455 = vst [vmem:[#allocation4 + $0x50] sm:$0xff] %v16544_v1  ;;  %456 = vst [vmem:[#allocation4 + $0x58] sm:$0x3] %v16544_v1 }
  0x26   : > { %457 = vst [vmem:[#allocation4 + $0x60] sm:$0xff] %v16544_v1  ;;  %458 = vst [vmem:[#allocation4 + $0x68] sm:$0x3] %v16544_v1 }
  0x27   : > { %459 = vst [vmem:[#allocation4 + $0x70] sm:$0xff] %v16544_v1  ;;  %460 = vst [vmem:[#allocation4 + $0x78] sm:$0x3] %v16544_v1 }
  0x28   : > { %461 = vst [vmem:[#allocation4 + $0x80] sm:$0xff] %v16544_v1  ;;  %462 = vst [vmem:[#allocation4 + $0x88] sm:$0x3] %v16544_v1 }
  0x29   : > { %464 = vst [vmem:[#allocation4 + $0x98] sm:$0x3] %v16544_v1  ;;  %337 = vst.msk [vmem:[#allocation2 + $0x10] sm:$0x3] %vm336_vm1, %v16544_v1 }
  0x2a   : > { %340 = vst.msk [vmem:[#allocation2 + $0x28] sm:$0x3] %vm336_vm1, %v16544_v1  ;;  %343 = vst.msk [vmem:[#allocation2 + $0x40] sm:$0x3] %vm336_vm1, %v16544_v1 }
  0x2b   : > { %346 = vst.msk [vmem:[#allocation2 + $0x58] sm:$0x3] %vm336_vm1, %v16544_v1  ;;  %349 = vst.msk [vmem:[#allocation2 + $0x70] sm:$0x3] %vm336_vm1, %v16544_v1 }
  0x2c   : > { %352 = vst.msk [vmem:[#allocation2 + $0x88] sm:$0x3] %vm336_vm1, %v16544_v1  ;;  %355 = vst.msk [vmem:[#allocation2 + $0xa0] sm:$0x3] %vm336_vm1, %v16544_v1 }
  0x2d   : > { %358 = vst.msk [vmem:[#allocation2 + $0xb8] sm:$0x3] %vm336_vm1, %v16544_v1  ;;  %361 = vst.msk [vmem:[#allocation2 + $0xd0] sm:$0x3] %vm336_vm1, %v16544_v1 }
  0x2e   : > { %364 = vst.msk [vmem:[#allocation2 + $0xe8] sm:$0x3] %vm336_vm1, %v16544_v1  ;;  %367 = vst.msk [vmem:[#allocation2 + $0x100] sm:$0x3] %vm336_vm1, %v16544_v1 }
  0x2f   : > { %370 = vst.msk [vmem:[#allocation2 + $0x118] sm:$0x3] %vm336_vm1, %v16544_v1  ;;  %373 = vst.msk [vmem:[#allocation2 + $0x130] sm:$0x3] %vm336_vm1, %v16544_v1 }
  0x30   : > { %376 = vst.msk [vmem:[#allocation2 + $0x148] sm:$0x3] %vm336_vm1, %v16544_v1  ;;  %379 = vst.msk [vmem:[#allocation2 + $0x160] sm:$0x3] %vm336_vm1, %v16544_v1  ;;  %v586_v9 = vld [vmem:[#allocation2 + $0x10] sm:$0x3] }
  0x31   : > { %382 = vst.msk [vmem:[#allocation2 + $0x178] sm:$0x3] %vm336_vm1, %v16544_v1  ;;  %385 = vst.msk [vmem:[#allocation2 + $0x190] sm:$0x3] %vm336_vm1, %v16544_v1  ;;  %880 = vperm.xlu1 %16346, %v586_v9  }
  0x32   : > { %388 = vst.msk [vmem:[#allocation2 + $0x1a8] sm:$0x3] %vm336_vm1, %v16544_v1 }
  0x33   : > { %552 = vst.msk [vmem:[#allocation2 + $0x19] sm:$0xff] %vm333_vm0, %v519_v2  ;;  %553 = vst.msk [vmem:[#allocation2 + $0x21] sm:$0xff] %vm333_vm0, %v520_v3 }
  0x34   : > { %554 = vst.msk [vmem:[#allocation2 + $0x31] sm:$0xff] %vm333_vm0, %v521_v4  ;;  %555 = vst.msk [vmem:[#allocation2 + $0x39] sm:$0xff] %vm333_vm0, %v522_v5  ;;  %v2773_v4 = vld [vmem:[%s21859_s3 + $0x50] sm:$0xff]  ;;  %v2774_v5 = vld [vmem:[%s21859_s3 + $0x58] sm:$0xff] }
  0x35   : > { %556 = vst.msk [vmem:[#allocation2 + $0x49] sm:$0xff] %vm333_vm0, %v523_v6  ;;  %557 = vst.msk [vmem:[#allocation2 + $0x51] sm:$0xff] %vm333_vm0, %v524_v7  ;;  %v15034_v6 = vpack.c.bf16 %v2774_v5, %v2773_v4 }
  0x36   : > { %558 = vst.msk [vmem:[#allocation2 + $0x61] sm:$0xff] %vm333_vm0, %v525_v11  ;;  %559 = vst.msk [vmem:[#allocation2 + $0x69] sm:$0xff] %vm333_vm0, %v526_v12 }
  0x37   : > { %560 = vst.msk [vmem:[#allocation2 + $0x79] sm:$0xff] %vm333_vm0, %v527_v13  ;;  %561 = vst.msk [vmem:[#allocation2 + $0x81] sm:$0xff] %vm333_vm0, %v528_v14  ;;  %15035 = vmatprep.subr.bf16.mxu0 %v15034_v6  ;;  %v2775_v13 = vld [vmem:[%s21859_s3 + $0x60] sm:$0xff]  ;;  %v2776_v14 = vld [vmem:[%s21859_s3 + $0x68] sm:$0xff] }
  0x38   : > { %562 = vst.msk [vmem:[#allocation2 + $0x91] sm:$0xff] %vm333_vm0, %v529_v15  ;;  %563 = vst.msk [vmem:[#allocation2 + $0x99] sm:$0xff] %vm333_vm0, %v530_v16  ;;  %15037 = vmatpush3.bf16.msra.mxu0 %v15034_v6  ;;  %v15038_v16 = vpack.c.bf16 %v2776_v14, %v2775_v13 }
  0x39   : > { %564 = vst.msk [vmem:[#allocation2 + $0xa9] sm:$0xff] %vm333_vm0, %v531_v17  ;;  %565 = vst.msk [vmem:[#allocation2 + $0xb1] sm:$0xff] %vm333_vm0, %v532_v18 }
  0x3a   : > { %566 = vst.msk [vmem:[#allocation2 + $0xc1] sm:$0xff] %vm333_vm0, %v533_v19  ;;  %567 = vst.msk [vmem:[#allocation2 + $0xc9] sm:$0xff] %vm333_vm0, %v534_v20  ;;  %v587_v26 = vld [vmem:[#allocation2 + $0x18] sm:$0xff]  ;;  %v588_v27 = vld [vmem:[#allocation2 + $0x20] sm:$0xff]  ;;  %15039 = vmatprep.subr.bf16.mxu0 %v15038_v16 }
  0x3b   : > { %568 = vst.msk [vmem:[#allocation2 + $0xd9] sm:$0xff] %vm333_vm0, %v535_v21  ;;  %569 = vst.msk [vmem:[#allocation2 + $0xe1] sm:$0xff] %vm333_vm0, %v536_v22  ;;  %660 = vperm.xlu1 %16346, %v587_v26   ;;  %v589_v28 = vld [vmem:[#allocation2 + $0x28] sm:$0x3]  ;;  %665 = vperm.xlu0 %16345, %v588_v27   ;;  %v590_v29 = vld [vmem:[#allocation2 + $0x30] sm:$0xff] }
  0x3c   : > { %570 = vst.msk [vmem:[#allocation2 + $0xf1] sm:$0xff] %vm333_vm0, %v537_v23  ;;  %571 = vst.msk [vmem:[#allocation2 + $0xf9] sm:$0xff] %vm333_vm0, %v538_v24  ;;  %v591_v30 = vld [vmem:[#allocation2 + $0x38] sm:$0xff]  ;;  %v592_v31 = vld [vmem:[#allocation2 + $0x40] sm:$0x3]  ;;  %15041 = vmatpush3.bf16.msra.mxu0 %v15038_v16 }
  0x3d   : > { %572 = vst.msk [vmem:[#allocation2 + $0x109] sm:$0xff] %vm333_vm0, %v539_v25  ;;  %v593_v32 = vld [vmem:[#allocation2 + $0x48] sm:$0xff]  ;;  %v594_v33 = vld [vmem:[#allocation2 + $0x50] sm:$0xff]  ;;  %573 = vst.msk [vmem:[#allocation2 + $0x111] sm:$0xff] %vm333_vm0, %v540_v34 }
  0x3e   : > { %574 = vst.msk [vmem:[#allocation2 + $0x121] sm:$0xff] %vm333_vm0, %v541_v35  ;;  %575 = vst.msk [vmem:[#allocation2 + $0x129] sm:$0xff] %vm333_vm0, %v542_v36  ;;  %v595_v45 = vld [vmem:[#allocation2 + $0x58] sm:$0x3]  ;;  %v596_v46 = vld [vmem:[#allocation2 + $0x60] sm:$0xff] }
  0x3f   : > { %885 = vperm.xlu1 %16346, %v589_v28   ;;  %670 = vperm.xlu0 %16345, %v590_v29   ;;  %576 = vst.msk [vmem:[#allocation2 + $0x139] sm:$0xff] %vm333_vm0, %v543_v37  ;;  %577 = vst.msk [vmem:[#allocation2 + $0x141] sm:$0xff] %vm333_vm0, %v544_v38  ;;  %v16815_v47 = vld [vmem:[#allocation2 + $0x68] sm:$0xff]  ;;  %v16817_v48 = vld [vmem:[#allocation2 + $0x70] sm:$0x3] }
  0x40   : > { %578 = vst.msk [vmem:[#allocation2 + $0x151] sm:$0xff] %vm333_vm0, %v545_v39  ;;  %579 = vst.msk [vmem:[#allocation2 + $0x159] sm:$0xff] %vm333_vm0, %v546_v40  ;;  %v599_v49 = vld [vmem:[#allocation2 + $0x78] sm:$0xff]  ;;  %v600_v50 = vld [vmem:[#allocation2 + $0x80] sm:$0xff] }
  0x41   : > { %580 = vst.msk [vmem:[#allocation2 + $0x169] sm:$0xff] %vm333_vm0, %v547_v41  ;;  %581 = vst.msk [vmem:[#allocation2 + $0x171] sm:$0xff] %vm333_vm0, %v548_v42  ;;  %v601_v51 = vld [vmem:[#allocation2 + $0x88] sm:$0x3]  ;;  %v602_v52 = vld [vmem:[#allocation2 + $0x90] sm:$0xff] }
  0x42   : > { %582 = vst.msk [vmem:[#allocation2 + $0x181] sm:$0xff] %vm333_vm0, %v549_v43  ;;  %583 = vst.msk [vmem:[#allocation2 + $0x189] sm:$0xff] %vm333_vm0, %v550_v44  ;;  %v603_v53 = vld [vmem:[#allocation2 + $0x98] sm:$0xff]  ;;  %v604_v54 = vld [vmem:[#allocation2 + $0xa0] sm:$0x3] }
  0x43   : > { %675 = vperm.xlu1 %16346, %v591_v30   ;;  %890 = vperm.xlu0 %16345, %v592_v31   ;;  %394 = vst.msk [vmem:[#allocation3 + $0x18] sm:$0xff] %vm389_vm2, %v16544_v1  ;;  %395 = vst.msk [vmem:[#allocation3 + $0x20] sm:$0xff] %vm389_vm2, %v16544_v1  ;;  %v605_v55 = vld [vmem:[#allocation2 + $0xa8] sm:$0xff]  ;;  %v606_v58 = vld [vmem:[#allocation2 + $0xb0] sm:$0xff] }
  0x44   : > { %396 = vst.msk [vmem:[#allocation3 + $0x28] sm:$0x3] %vm392_vm3, %v16544_v1  ;;  %393 = vst.msk [vmem:[#allocation3 + $0x10] sm:$0x3] %vm392_vm3, %v16544_v1  ;;  %v607_v60 = vld [vmem:[#allocation2 + $0xb8] sm:$0x3] }
  0x45   : > { %390 = vst.msk [vmem:[#allocation3] sm:$0xff] %vm389_vm2, %v16544_v1  ;;  %391 = vst.msk [vmem:[#allocation3 + $0x8] sm:$0xff] %vm389_vm2, %v16544_v1  ;;  %v608_v61 = vld [vmem:[#allocation2 + $0xc0] sm:$0xff]  ;;  %v609_v62 = vld [vmem:[#allocation2 + $0xc8] sm:$0xff] }
  0x46   : > { %397 = vst.msk [vmem:[#allocation3 + $0x30] sm:$0xff] %vm389_vm2, %v16544_v1  ;;  %398 = vst.msk [vmem:[#allocation3 + $0x38] sm:$0xff] %vm389_vm2, %v16544_v1  ;;  %v610_v63 = vld [vmem:[#allocation2 + $0xd0] sm:$0x3]  ;;  %v611_v0 = vld [vmem:[#allocation2 + $0xd8] sm:$0xff] }
  0x47   : > { %680 = vperm.xlu1 %16346, %v593_v32   ;;  %685 = vperm.xlu0 %16345, %v594_v33   ;;  %399 = vst.msk [vmem:[#allocation3 + $0x40] sm:$0x3] %vm392_vm3, %v16544_v1  ;;  %402 = vst.msk [vmem:[#allocation3 + $0x58] sm:$0x3] %vm392_vm3, %v16544_v1  ;;  %v613_v2 = vld [vmem:[#allocation2 + $0xe8] sm:$0x3] }
  0x48   : > { %400 = vst.msk [vmem:[#allocation3 + $0x48] sm:$0xff] %vm389_vm2, %v16544_v1  ;;  %401 = vst.msk [vmem:[#allocation3 + $0x50] sm:$0xff] %vm389_vm2, %v16544_v1  ;;  %v614_v3 = vld [vmem:[#allocation2 + $0xf0] sm:$0xff]  ;;  %v615_v7 = vld [vmem:[#allocation2 + $0xf8] sm:$0xff] }
  0x49   : > { %403 = vst.msk [vmem:[#allocation3 + $0x60] sm:$0xff] %vm389_vm2, %v16544_v1  ;;  %404 = vst.msk [vmem:[#allocation3 + $0x68] sm:$0xff] %vm389_vm2, %v16544_v1  ;;  %v616_v8 = vld [vmem:[#allocation2 + $0x100] sm:$0x3]  ;;  %v617_v9 = vld [vmem:[#allocation2 + $0x108] sm:$0xff] }
  0x4a   : > { %405 = vst.msk [vmem:[#allocation3 + $0x70] sm:$0x3] %vm392_vm3, %v16544_v1  ;;  %408 = vst.msk [vmem:[#allocation3 + $0x88] sm:$0x3] %vm392_vm3, %v16544_v1  ;;  %v618_v10 = vld [vmem:[#allocation2 + $0x110] sm:$0xff]  ;;  %v620_v12 = vld [vmem:[#allocation2 + $0x120] sm:$0xff] }
  0x4b   : > { %895 = vperm.xlu1 %16346, %v595_v45   ;;  %690 = vperm.xlu0 %16345, %v596_v46   ;;  %406 = vst.msk [vmem:[#allocation3 + $0x78] sm:$0xff] %vm389_vm2, %v16544_v1  ;;  %407 = vst.msk [vmem:[#allocation3 + $0x80] sm:$0xff] %vm389_vm2, %v16544_v1  ;;  %v619_v11 = vld [vmem:[#allocation2 + $0x118] sm:$0x3]  ;;  %v621_v15 = vld [vmem:[#allocation2 + $0x128] sm:$0xff] }
  0x4c   : > { %409 = vst.msk [vmem:[#allocation3 + $0x90] sm:$0xff] %vm389_vm2, %v16544_v1  ;;  %410 = vst.msk [vmem:[#allocation3 + $0x98] sm:$0xff] %vm389_vm2, %v16544_v1  ;;  %v622_v17 = vld [vmem:[#allocation2 + $0x130] sm:$0x3]  ;;  %v623_v18 = vld [vmem:[#allocation2 + $0x138] sm:$0xff] }
  0x4d   : > { %411 = vst.msk [vmem:[#allocation3 + $0xa0] sm:$0x3] %vm392_vm3, %v16544_v1  ;;  %414 = vst.msk [vmem:[#allocation3 + $0xb8] sm:$0x3] %vm392_vm3, %v16544_v1  ;;  %v624_v19 = vld [vmem:[#allocation2 + $0x140] sm:$0xff]  ;;  %v2777_v20 = vld [vmem:[%s21859_s3 + $0x70] sm:$0xff] }
  0x4e   : > { %412 = vst.msk [vmem:[#allocation3 + $0xa8] sm:$0xff] %vm389_vm2, %v16544_v1  ;;  %413 = vst.msk [vmem:[#allocation3 + $0xb0] sm:$0xff] %vm389_vm2, %v16544_v1  ;;  %v2778_v21 = vld [vmem:[%s21859_s3 + $0x78] sm:$0xff]  ;;  %v625_v23 = vld [vmem:[#allocation2 + $0x148] sm:$0x3] }
  0x4f   : > { %415 = vst.msk [vmem:[#allocation3 + $0xc0] sm:$0xff] %vm389_vm2, %v16544_v1  ;;  %416 = vst.msk [vmem:[#allocation3 + $0xc8] sm:$0xff] %vm389_vm2, %v16544_v1  ;;  %695 = vperm.xlu1 %16346, %v16815_v47   ;;  %900 = vperm.xlu0 %16345, %v16817_v48   ;;  %v15042_v22 = vpack.c.bf16 %v2778_v21, %v2777_v20  ;;  %v626_v24 = vld [vmem:[#allocation2 + $0x150] sm:$0xff]  ;;  %v627_v25 = vld [vmem:[#allocation2 + $0x158] sm:$0xff] }
  0x50   : > { %417 = vst.msk [vmem:[#allocation3 + $0xd0] sm:$0x3] %vm392_vm3, %v16544_v1  ;;  %420 = vst.msk [vmem:[#allocation3 + $0xe8] sm:$0x3] %vm392_vm3, %v16544_v1  ;;  %v628_v26 = vld [vmem:[#allocation2 + $0x160] sm:$0x3] }
  0x51   : > { %418 = vst.msk [vmem:[#allocation3 + $0xd8] sm:$0xff] %vm389_vm2, %v16544_v1  ;;  %419 = vst.msk [vmem:[#allocation3 + $0xe0] sm:$0xff] %vm389_vm2, %v16544_v1  ;;  %15043 = vmatprep.subr.bf16.mxu0 %v15042_v22  ;;  %v629_v27 = vld [vmem:[#allocation2 + $0x168] sm:$0xff]  ;;  %v630_v28 = vld [vmem:[#allocation2 + $0x170] sm:$0xff] }
  0x52   : > { %421 = vst.msk [vmem:[#allocation3 + $0xf0] sm:$0xff] %vm389_vm2, %v16544_v1  ;;  %422 = vst.msk [vmem:[#allocation3 + $0xf8] sm:$0xff] %vm389_vm2, %v16544_v1  ;;  %15045 = vmatpush3.bf16.msra.mxu0 %v15042_v22  ;;  %v631_v29 = vld [vmem:[#allocation2 + $0x178] sm:$0x3]  ;;  %v2709_v30 = vld [vmem:[#allocation3] sm:$0xff] }
  0x53   : > { %423 = vst.msk [vmem:[#allocation3 + $0x100] sm:$0x3] %vm392_vm3, %v16544_v1  ;;  %426 = vst.msk [vmem:[#allocation3 + $0x118] sm:$0x3] %vm392_vm3, %v16544_v1  ;;  %700 = vperm.xlu1 %16346, %v599_v49   ;;  %705 = vperm.xlu0 %16345, %v600_v50   ;;  %v2710_v31 = vld [vmem:[#allocation3 + $0x8] sm:$0xff]  ;;  %v632_v32 = vld [vmem:[#allocation2 + $0x180] sm:$0xff] }
  0x54   : > { %424 = vst.msk [vmem:[#allocation3 + $0x108] sm:$0xff] %vm389_vm2, %v16544_v1  ;;  %425 = vst.msk [vmem:[#allocation3 + $0x110] sm:$0xff] %vm389_vm2, %v16544_v1  ;;  %v2884_v33 = vrot.slane %v2709_v30, 1  ;;  %v2885_v34 = vrot.slane %v2710_v31, 1  ;;  %v2711_v35 = vld [vmem:[#allocation3 + $0x10] sm:$0x3] }
  0x55   : > { %427 = vst.msk [vmem:[#allocation3 + $0x120] sm:$0xff] %vm389_vm2, %v16544_v1  ;;  %428 = vst.msk [vmem:[#allocation3 + $0x128] sm:$0xff] %vm389_vm2, %v16544_v1  ;;  %v2887_v36 = vrot.slane %v2711_v35, 1  ;;  %v633_v37 = vld [vmem:[#allocation2 + $0x188] sm:$0xff]  ;;  %v634_v40 = vld [vmem:[#allocation2 + $0x190] sm:$0x3] }
  0x56   : > { %429 = vst.msk [vmem:[#allocation3 + $0x130] sm:$0x3] %vm392_vm3, %v16544_v1  ;;  %432 = vst.msk [vmem:[#allocation3 + $0x148] sm:$0x3] %vm392_vm3, %v16544_v1  ;;  %v2886_v38 = vsel %vm1060_vm4, %v2884_v33, %v2885_v34  ;;  %v635_v41 = vld [vmem:[#allocation2 + $0x198] sm:$0xff]  ;;  %v636_v42 = vld [vmem:[#allocation2 + $0x1a0] sm:$0xff] }
  0x57   : > { %430 = vst.msk [vmem:[#allocation3 + $0x138] sm:$0xff] %vm389_vm2, %v16544_v1  ;;  %431 = vst.msk [vmem:[#allocation3 + $0x140] sm:$0xff] %vm389_vm2, %v16544_v1  ;;  %905 = vperm.xlu1 %16346, %v601_v51   ;;  %710 = vperm.xlu0 %16345, %v602_v52   ;;  %v2888_v39 = vsel %vm1060_vm4, %v2885_v34, %v2887_v36  ;;  %v637_v43 = vld [vmem:[#allocation2 + $0x1a8] sm:$0x3]  ;;  %v17068_v44 = vld [vmem:[%s21857_s1 + $0x1] ss:$0 sm:$0xff] }
  0x58   : > { %433 = vst.msk [vmem:[#allocation3 + $0x150] sm:$0xff] %vm389_vm2, %v16544_v1  ;;  %434 = vst.msk [vmem:[#allocation3 + $0x158] sm:$0xff] %vm389_vm2, %v16544_v1  ;;  %13434 = vmatprep.mubr.msk.f32.mxu0 %vm389_vm2, %v2886_v38  ;;  %v17073_v45 = vld [vmem:[%s21857_s1 + $0x2] ss:$0 sm:$0xff]  ;;  %v17081_v51 = vld [vmem:[%s21857_s1] ss:$0 sm:$0xff] }
  0x59   : > { %435 = vst.msk [vmem:[#allocation3 + $0x160] sm:$0x3] %vm392_vm3, %v16544_v1  ;;  %438 = vst.msk [vmem:[#allocation3 + $0x178] sm:$0x3] %vm392_vm3, %v16544_v1  ;;  %13435 = vmatmul.mubr.msk.f32.vlgmr.msra.gmra.mrb[0].mxu0 %vm389_vm2, %v2888_v39 }
  0x5a   : > { %436 = vst.msk [vmem:[#allocation3 + $0x168] sm:$0xff] %vm389_vm2, %v16544_v1  ;;  %437 = vst.msk [vmem:[#allocation3 + $0x170] sm:$0xff] %vm389_vm2, %v16544_v1 }
  0x5b   : > { %439 = vst.msk [vmem:[#allocation3 + $0x180] sm:$0xff] %vm389_vm2, %v16544_v1  ;;  %440 = vst.msk [vmem:[#allocation3 + $0x188] sm:$0xff] %vm389_vm2, %v16544_v1  ;;  %715 = vperm.xlu1 %16346, %v603_v53   ;;  %910 = vperm.xlu0 %16345, %v604_v54  }
  0x5c   : > { %441 = vst.msk [vmem:[#allocation3 + $0x190] sm:$0x3] %vm392_vm3, %v16544_v1  ;;  %444 = vst.msk [vmem:[#allocation3 + $0x1a8] sm:$0x3] %vm392_vm3, %v16544_v1 }
  0x5d   : > { %442 = vst.msk [vmem:[#allocation3 + $0x198] sm:$0xff] %vm389_vm2, %v16544_v1  ;;  %443 = vst.msk [vmem:[#allocation3 + $0x1a0] sm:$0xff] %vm389_vm2, %v16544_v1 }
  0x5e   : > { %465 = vst.msk [vmem:[#allocation5] sm:$0xff] %vm389_vm2, %v16544_v1  ;;  %466 = vst.msk [vmem:[#allocation5 + $0x8] sm:$0xff] %vm389_vm2, %v16544_v1 }
  0x5f   : > { %467 = vst.msk [vmem:[#allocation5 + $0x10] sm:$0x3] %vm392_vm3, %v16544_v1  ;;  %470 = vst.msk [vmem:[#allocation5 + $0x28] sm:$0x3] %vm392_vm3, %v16544_v1  ;;  %720 = vperm.xlu1 %16346, %v605_v55   ;;  %725 = vperm.xlu0 %16345, %v606_v58  }
  0x60   : > { %468 = vst.msk [vmem:[#allocation5 + $0x18] sm:$0xff] %vm389_vm2, %v16544_v1  ;;  %469 = vst.msk [vmem:[#allocation5 + $0x20] sm:$0xff] %vm389_vm2, %v16544_v1 }
  0x61   : > { %471 = vst.msk [vmem:[#allocation5 + $0x30] sm:$0xff] %vm389_vm2, %v16544_v1  ;;  %472 = vst.msk [vmem:[#allocation5 + $0x38] sm:$0xff] %vm389_vm2, %v16544_v1 }
  0x62   : > { %473 = vst.msk [vmem:[#allocation5 + $0x40] sm:$0x3] %vm392_vm3, %v16544_v1  ;;  %476 = vst.msk [vmem:[#allocation5 + $0x58] sm:$0x3] %vm392_vm3, %v16544_v1 }
  0x63   : > { %474 = vst.msk [vmem:[#allocation5 + $0x48] sm:$0xff] %vm389_vm2, %v16544_v1  ;;  %475 = vst.msk [vmem:[#allocation5 + $0x50] sm:$0xff] %vm389_vm2, %v16544_v1  ;;  %915 = vperm.xlu1 %16346, %v607_v60   ;;  %730 = vperm.xlu0 %16345, %v608_v61  }
  0x64   : > { %477 = vst.msk [vmem:[#allocation5 + $0x60] sm:$0xff] %vm389_vm2, %v16544_v1  ;;  %478 = vst.msk [vmem:[#allocation5 + $0x68] sm:$0xff] %vm389_vm2, %v16544_v1 }
  0x65   : > { %479 = vst.msk [vmem:[#allocation5 + $0x70] sm:$0x3] %vm392_vm3, %v16544_v1  ;;  %482 = vst.msk [vmem:[#allocation5 + $0x88] sm:$0x3] %vm392_vm3, %v16544_v1 }
  0x66   : > { %480 = vst.msk [vmem:[#allocation5 + $0x78] sm:$0xff] %vm389_vm2, %v16544_v1  ;;  %481 = vst.msk [vmem:[#allocation5 + $0x80] sm:$0xff] %vm389_vm2, %v16544_v1 }
  0x67   : > { %483 = vst.msk [vmem:[#allocation5 + $0x90] sm:$0xff] %vm389_vm2, %v16544_v1  ;;  %484 = vst.msk [vmem:[#allocation5 + $0x98] sm:$0xff] %vm389_vm2, %v16544_v1  ;;  %735 = vperm.xlu1 %16346, %v609_v62   ;;  %920 = vperm.xlu0 %16345, %v610_v63   ;;  %v17100_v62 = vld [vmem:[%s21857_s1 + $0x3] ss:$0 sm:$0xff] }
  0x68   : > { %485 = vst.msk [vmem:[#allocation5 + $0xa0] sm:$0x3] %vm392_vm3, %v16544_v1  ;;  %488 = vst.msk [vmem:[#allocation5 + $0xb8] sm:$0x3] %vm392_vm3, %v16544_v1 }
  0x69   : > { %486 = vst.msk [vmem:[#allocation5 + $0xa8] sm:$0xff] %vm389_vm2, %v16544_v1  ;;  %487 = vst.msk [vmem:[#allocation5 + $0xb0] sm:$0xff] %vm389_vm2, %v16544_v1 }
  0x6a   : > { %489 = vst.msk [vmem:[#allocation5 + $0xc0] sm:$0xff] %vm389_vm2, %v16544_v1  ;;  %490 = vst.msk [vmem:[#allocation5 + $0xc8] sm:$0xff] %vm389_vm2, %v16544_v1 }
  0x6b   : > { %491 = vst.msk [vmem:[#allocation5 + $0xd0] sm:$0x3] %vm392_vm3, %v16544_v1  ;;  %494 = vst.msk [vmem:[#allocation5 + $0xe8] sm:$0x3] %vm392_vm3, %v16544_v1  ;;  %740 = vperm.xlu1 %16346, %v611_v0  }
  0x6c   : > { %492 = vst.msk [vmem:[#allocation5 + $0xd8] sm:$0xff] %vm389_vm2, %v16544_v1  ;;  %493 = vst.msk [vmem:[#allocation5 + $0xe0] sm:$0xff] %vm389_vm2, %v16544_v1 }
  0x6d   : > { %495 = vst.msk [vmem:[#allocation5 + $0xf0] sm:$0xff] %vm389_vm2, %v16544_v1  ;;  %496 = vst.msk [vmem:[#allocation5 + $0xf8] sm:$0xff] %vm389_vm2, %v16544_v1 }
  0x6e   : > { %497 = vst.msk [vmem:[#allocation5 + $0x100] sm:$0x3] %vm392_vm3, %v16544_v1  ;;  %500 = vst.msk [vmem:[#allocation5 + $0x118] sm:$0x3] %vm392_vm3, %v16544_v1 }
  0x6f   : > { %498 = vst.msk [vmem:[#allocation5 + $0x108] sm:$0xff] %vm389_vm2, %v16544_v1  ;;  %499 = vst.msk [vmem:[#allocation5 + $0x110] sm:$0xff] %vm389_vm2, %v16544_v1  ;;  %925 = vperm.xlu1 %16346, %v613_v2  }
  0x70   : > { %501 = vst.msk [vmem:[#allocation5 + $0x120] sm:$0xff] %vm389_vm2, %v16544_v1  ;;  %502 = vst.msk [vmem:[#allocation5 + $0x128] sm:$0xff] %vm389_vm2, %v16544_v1 }
  0x71   : > { %503 = vst.msk [vmem:[#allocation5 + $0x130] sm:$0x3] %vm392_vm3, %v16544_v1  ;;  %506 = vst.msk [vmem:[#allocation5 + $0x148] sm:$0x3] %vm392_vm3, %v16544_v1 }
  0x72   : > { %504 = vst.msk [vmem:[#allocation5 + $0x138] sm:$0xff] %vm389_vm2, %v16544_v1  ;;  %505 = vst.msk [vmem:[#allocation5 + $0x140] sm:$0xff] %vm389_vm2, %v16544_v1 }
  0x73   : > { %507 = vst.msk [vmem:[#allocation5 + $0x150] sm:$0xff] %vm389_vm2, %v16544_v1  ;;  %508 = vst.msk [vmem:[#allocation5 + $0x158] sm:$0xff] %vm389_vm2, %v16544_v1  ;;  %755 = vperm.xlu1 %16346, %v615_v7  }
  0x74   : > { %509 = vst.msk [vmem:[#allocation5 + $0x160] sm:$0x3] %vm392_vm3, %v16544_v1  ;;  %512 = vst.msk [vmem:[#allocation5 + $0x178] sm:$0x3] %vm392_vm3, %v16544_v1 }
  0x75   : > { %510 = vst.msk [vmem:[#allocation5 + $0x168] sm:$0xff] %vm389_vm2, %v16544_v1  ;;  %511 = vst.msk [vmem:[#allocation5 + $0x170] sm:$0xff] %vm389_vm2, %v16544_v1 }
  0x76   : > { %513 = vst.msk [vmem:[#allocation5 + $0x180] sm:$0xff] %vm389_vm2, %v16544_v1  ;;  %514 = vst.msk [vmem:[#allocation5 + $0x188] sm:$0xff] %vm389_vm2, %v16544_v1 }
  0x77   : > { %515 = vst.msk [vmem:[#allocation5 + $0x190] sm:$0x3] %vm392_vm3, %v16544_v1  ;;  %518 = vst.msk [vmem:[#allocation5 + $0x1a8] sm:$0x3] %vm392_vm3, %v16544_v1  ;;  %760 = vperm.xlu1 %16346, %v617_v9  }
  0x78   : > { %516 = vst.msk [vmem:[#allocation5 + $0x198] sm:$0xff] %vm389_vm2, %v16544_v1  ;;  %517 = vst.msk [vmem:[#allocation5 + $0x1a0] sm:$0xff] %vm389_vm2, %v16544_v1  ;;  %v612_v1 = vld [vmem:[#allocation2 + $0xe0] sm:$0xff] }
  0x79   : > { %745 = vperm.xlu0 %16345, %v612_v1  }
  0x7b   : > { %935 = vperm.xlu1 %16346, %v619_v11  }
  0x7d   : > { %750 = vperm.xlu0 %16345, %v614_v3  }
  0x7f   : > { %775 = vperm.xlu1 %16346, %v621_v15  }
  0x81   : > { %930 = vperm.xlu0 %16345, %v616_v8  }
  0x83   : > { %780 = vperm.xlu1 %16346, %v623_v18  }
  0x85   : > { %765 = vperm.xlu0 %16345, %v618_v10  }
  0x87   : > { %945 = vperm.xlu1 %16346, %v625_v23  }
  0x89   : > { %770 = vperm.xlu0 %16345, %v620_v12  }
  0x8b   : > { %795 = vperm.xlu1 %16346, %v627_v25  }
  0x8d   : > { %940 = vperm.xlu0 %16345, %v622_v17  }
  0x8f   : > { %800 = vperm.xlu1 %16346, %v629_v27  }
  0x91   : > { %785 = vperm.xlu0 %16345, %v624_v19  }
  0x93   : > { %955 = vperm.xlu1 %16346, %v631_v29  }
  0x95   : > { %790 = vperm.xlu0 %16345, %v626_v24   ;;  %v651_v46 = vpop.permute.xlu0 %650 }
  0x96   : > { %v964_v48 = vmul.f32 %v17068_v44, %v651_v46  ;;  %v1211_v49 = vmul.f32 %v17073_v45, %v651_v46  ;;  %v814_v58 = vmul.f32 %v17081_v51, %v651_v46 }
  0x97   : > { %1459 = vperm.xlu1 %16346, %v633_v37  }
  0x98   : > { %v1061_v59 = vrot.slane %v964_v48, 1  ;;  %v1308_v60 = vrot.slane %v1211_v49, 2 }
  0x99   : > { %950 = vperm.xlu0 %16345, %v628_v26   ;;  %v656_v53 = vpop.permute.xlu0 %655 }
  0x9a   : > { %v965_v54 = vmul.f32 %v17068_v44, %v656_v53  ;;  %v1212_v55 = vmul.f32 %v17073_v45, %v656_v53  ;;  %v815_v4 = vmul.f32 %v17081_v51, %v656_v53 }
  0x9b   : > { %2031 = vperm.xlu1 %16346, %v635_v41  }
  0x9c   : > { %v1062_v1 = vrot.slane %v965_v54, 1  ;;  %v1309_v2 = vrot.slane %v1212_v55, 2 }
  0x9d   : > { %805 = vperm.xlu0 %16345, %v630_v28  }
  0x9e   : > { %v1063_v9 = vsel %vm1060_vm4, %v1061_v59, %v1062_v1  ;;  %v1310_v15 = vsel %vm1307_vm5, %v1308_v60, %v1309_v2 }
  0x9f   : > { %2111 = vperm.xlu1 %16346, %v637_v43   ;;  %v1173_v13 = vadd.f32 %v1063_v9, %v814_v58 }
  0xa1   : > { %1454 = vperm.xlu0 %16345, %v632_v32   ;;  %v1420_v22 = vadd.f32 %v1310_v15, %v1173_v13 }
  0xa5   : > { %1534 = vperm.xlu0 %16345, %v634_v40  }
  0xa9   : > { %2036 = vperm.xlu0 %16345, %v636_v42  }
  0xb0   : > { %v881_v47 = vpop.permute.xlu1 %880 }
  0xb1   : > { %v966_v50 = vmul.f32 %v17068_v44, %v881_v47  ;;  %v1213_v52 = vmul.f32 %v17073_v45, %v881_v47 }
  0xb3   : > { %v1064_v61 = vrot.slane %v966_v50, 1  ;;  %v1311_v0 = vrot.slane %v1213_v52, 2 }
  0xb5   : > { %v1065_v10 = vsel %vm1060_vm4, %v1062_v1, %v1064_v61  ;;  %v1312_v16 = vsel %vm1307_vm5, %v1309_v2, %v1311_v0 }
  0xb6   : > { %v1174_v14 = vadd.f32 %v1065_v10, %v815_v4  ;;  %v17141_v4 = vld [vmem:[%s21857_s1 + $0x7] ss:$0 sm:$0xff] }
  0xb8   : > { %v1421_v23 = vadd.f32 %v1312_v16, %v1174_v14 }
  0xba   : > { %v661_v63 = vpop.permute.xlu1 %660  ;;  %v666_v8 = vpop.permute.xlu0 %665 }
  0xbb   : > { %v967_v3 = vmul.f32 %v17068_v44, %v661_v63  ;;  %v1214_v5 = vmul.f32 %v17073_v45, %v661_v63  ;;  %v1543_v6 = vmul.f32 %v17089_v56, %v661_v63  ;;  %v1789_v7 = vmul.f32 %v17094_v57, %v661_v63 }
  0xbc   : > { %v816_v11 = vmul.f32 %v17081_v51, %v661_v63  ;;  %v1468_v12 = vmul.f32 %v17100_v62, %v661_v63  ;;  %v968_v21 = vmul.f32 %v17068_v44, %v666_v8  ;;  %v1215_v25 = vmul.f32 %v17073_v45, %v666_v8  ;;  %v17133_v63 = vld [vmem:[%s21857_s1 + $0x6] ss:$0 sm:$0xff] }
  0xbd   : > { %v1066_v18 = vrot.slane %v967_v3, 1  ;;  %v1313_v19 = vrot.slane %v1214_v5, 2  ;;  %v1639_v20 = vrot.slane %v1543_v6, 1  ;;  %v1885_v24 = vrot.slane %v1789_v7, 2  ;;  %v17146_v5 = vld [vmem:[%s21857_s1 + $0x8] ss:$0 sm:$0xff] }
  0xbe   : > { %v886_v17 = vpop.permute.xlu1 %885  ;;  %v1067_v26 = vrot.slane %v968_v21, 1  ;;  %v1544_v27 = vmul.f32 %v17089_v56, %v666_v8  ;;  %v1790_v28 = vmul.f32 %v17094_v57, %v666_v8  ;;  %v1500_v30 = vadd.f32 %v1468_v12, %v1420_v22  ;;  %v671_v42 = vpop.permute.xlu0 %670 }
  0xbf   : > { %v969_v29 = vmul.f32 %v17068_v44, %v886_v17  ;;  %v1314_v31 = vrot.slane %v1215_v25, 2  ;;  %v1469_v32 = vmul.f32 %v17100_v62, %v666_v8  ;;  %v1216_v33 = vmul.f32 %v17073_v45, %v886_v17 }
  0xc0   : > { %v1068_v34 = vsel %vm1060_vm4, %v1066_v18, %v1067_v26  ;;  %v1640_v35 = vrot.slane %v1544_v27, 1  ;;  %v1886_v36 = vrot.slane %v1790_v28, 2  ;;  %v817_v38 = vmul.f32 %v17081_v51, %v666_v8 }
  0xc1   : > { %v1069_v37 = vrot.slane %v969_v29, 1  ;;  %v1175_v39 = vadd.f32 %v1068_v34, %v816_v11  ;;  %v1316_v40 = vrot.slane %v1216_v33, 2  ;;  %v1545_v41 = vmul.f32 %v17089_v56, %v886_v17 }
  0xc2   : > { %v1641_v43 = vsel %vm1060_vm4, %v1639_v20, %v1640_v35  ;;  %v1501_v46 = vadd.f32 %v1469_v32, %v1421_v23  ;;  %v1791_v48 = vmul.f32 %v17094_v57, %v886_v17  ;;  %v1315_v49 = vsel %vm1307_vm5, %v1313_v19, %v1314_v31  ;;  %v676_v8 = vpop.permute.xlu1 %675  ;;  %v891_v13 = vpop.permute.xlu0 %890 }
  0xc3   : > { %v1070_v47 = vsel %vm1060_vm4, %v1067_v26, %v1069_v37  ;;  %v1751_v50 = vadd.f32 %v1641_v43, %v1500_v30  ;;  %v1887_v52 = vsel %vm1307_vm5, %v1885_v24, %v1886_v36  ;;  %v1422_v54 = vadd.f32 %v1315_v49, %v1175_v39 }
  0xc4   : > { %v1176_v53 = vadd.f32 %v1070_v47, %v817_v38  ;;  %v1642_v55 = vrot.slane %v1545_v41, 1  ;;  %v1888_v58 = vrot.slane %v1791_v48, 2  ;;  %v970_v59 = vmul.f32 %v17068_v44, %v671_v42 }
  0xc5   : > { %v1997_v60 = vadd.f32 %v1887_v52, %v1751_v50  ;;  %v1317_v61 = vsel %vm1307_vm5, %v1314_v31, %v1316_v40  ;;  %v818_v0 = vmul.f32 %v17081_v51, %v671_v42  ;;  %v1217_v1 = vmul.f32 %v17073_v45, %v671_v42 }
  0xc6   : > { %v1423_v2 = vadd.f32 %v1317_v61, %v1176_v53  ;;  %v1643_v3 = vsel %vm1060_vm4, %v1640_v35, %v1642_v55  ;;  %v1470_v6 = vmul.f32 %v17100_v62, %v671_v42  ;;  %v1546_v7 = vmul.f32 %v17089_v56, %v671_v42 }
  0xc7   : > { %v1752_v9 = vadd.f32 %v1643_v3, %v1501_v46  ;;  %v1889_v10 = vsel %vm1307_vm5, %v1886_v36, %v1888_v58  ;;  %v1071_v11 = vrot.slane %v970_v59, 1  ;;  %v1792_v12 = vmul.f32 %v17094_v57, %v671_v42 }
  0xc8   : > { %v1318_v14 = vrot.slane %v1217_v1, 2  ;;  %v1502_v15 = vadd.f32 %v1470_v6, %v1422_v54  ;;  %v1644_v16 = vrot.slane %v1546_v7, 1  ;;  %v2045_v17 = vmul.f32 %v17133_v63, %v671_v42  ;;  %v681_v1 = vpop.permute.xlu1 %680 }
  0xc9   : > { %v1998_v18 = vadd.f32 %v1889_v10, %v1752_v9  ;;  %v2120_v19 = vmul.f32 %v17141_v4, %v671_v42  ;;  %v2366_v20 = vmul.f32 %v17146_v5, %v671_v42  ;;  %v971_v21 = vmul.f32 %v17068_v44, %v676_v8 }
  0xca   : > { %v1890_v22 = vrot.slane %v1792_v12, 2  ;;  %v2077_v23 = vadd.f32 %v2045_v17, %v1997_v60  ;;  %v819_v24 = vmul.f32 %v17081_v51, %v676_v8  ;;  %v972_v25 = vmul.f32 %v17068_v44, %v891_v13 }
  0xcb   : > { %v1072_v26 = vrot.slane %v971_v21, 1  ;;  %v1218_v27 = vmul.f32 %v17073_v45, %v676_v8  ;;  %v1219_v28 = vmul.f32 %v17073_v45, %v891_v13  ;;  %v1471_v29 = vmul.f32 %v17100_v62, %v676_v8 }
  0xcc   : > { %v1074_v30 = vrot.slane %v972_v25, 1  ;;  %v1547_v31 = vmul.f32 %v17089_v56, %v676_v8  ;;  %v1548_v32 = vmul.f32 %v17089_v56, %v891_v13  ;;  %v1793_v33 = vmul.f32 %v17094_v57, %v676_v8  ;;  %v17187_v25 = vld [vmem:[%s21858_s2] ss:$0 sm:$0xff] }
  0xcd   : > { %v1073_v34 = vsel %vm1060_vm4, %v1071_v11, %v1072_v26  ;;  %v1319_v35 = vrot.slane %v1218_v27, 2  ;;  %v1321_v36 = vrot.slane %v1219_v28, 2  ;;  %v1503_v37 = vadd.f32 %v1471_v29, %v1423_v2 }
  0xce   : > { %v1075_v38 = vsel %vm1060_vm4, %v1072_v26, %v1074_v30  ;;  %v1177_v39 = vadd.f32 %v1073_v34, %v818_v0  ;;  %v1645_v40 = vrot.slane %v1547_v31, 1  ;;  %v1647_v41 = vrot.slane %v1548_v32, 1  ;;  %v686_v30 = vpop.permute.xlu0 %685 }
  0xcf   : > { %v2216_v42 = vrot.slane %v2120_v19, 1  ;;  %v2462_v43 = vrot.slane %v2366_v20, 2  ;;  %v1178_v46 = vadd.f32 %v1075_v38, %v819_v24  ;;  %v1794_v47 = vmul.f32 %v17094_v57, %v891_v13 }
  0xd0   : > { %v1320_v48 = vsel %vm1307_vm5, %v1318_v14, %v1319_v35  ;;  %v1646_v49 = vsel %vm1060_vm4, %v1644_v16, %v1645_v40  ;;  %v1648_v50 = vsel %vm1060_vm4, %v1645_v40, %v1647_v41  ;;  %v1891_v52 = vrot.slane %v1793_v33, 2 }
  0xd1   : > { %v1322_v53 = vsel %vm1307_vm5, %v1319_v35, %v1321_v36  ;;  %v1424_v54 = vadd.f32 %v1320_v48, %v1177_v39  ;;  %v1753_v55 = vadd.f32 %v1646_v49, %v1502_v15  ;;  %v1893_v58 = vrot.slane %v1794_v47, 2 }
  0xd2   : > { %v1754_v59 = vadd.f32 %v1648_v50, %v1503_v37  ;;  %v2046_v60 = vmul.f32 %v17133_v63, %v676_v8  ;;  %v2121_v61 = vmul.f32 %v17141_v4, %v676_v8  ;;  %v2122_v0 = vmul.f32 %v17141_v4, %v891_v13 }
  0xd3   : > { %v1425_v2 = vadd.f32 %v1322_v53, %v1178_v46  ;;  %v1892_v3 = vsel %vm1307_vm5, %v1890_v22, %v1891_v52  ;;  %v2367_v6 = vmul.f32 %v17146_v5, %v676_v8  ;;  %v2368_v7 = vmul.f32 %v17146_v5, %v891_v13 }
  0xd4   : > { %v1894_v9 = vsel %vm1307_vm5, %v1891_v52, %v1893_v58  ;;  %v2078_v10 = vadd.f32 %v2046_v60, %v1998_v18  ;;  %v2217_v11 = vrot.slane %v2121_v61, 1  ;;  %v2219_v12 = vrot.slane %v2122_v0, 1 }
  0xd5   : > { %v1999_v14 = vadd.f32 %v1892_v3, %v1753_v55  ;;  %v2463_v15 = vrot.slane %v2367_v6, 2  ;;  %v2465_v16 = vrot.slane %v2368_v7, 2  ;;  %v973_v17 = vmul.f32 %v17068_v44, %v681_v1 }
  0xd6   : > { %v2000_v19 = vadd.f32 %v1894_v9, %v1754_v59  ;;  %v2218_v20 = vsel %vm1060_vm4, %v2216_v42, %v2217_v11  ;;  %v2220_v21 = vsel %vm1060_vm4, %v2217_v11, %v2219_v12  ;;  %v1220_v22 = vmul.f32 %v17073_v45, %v681_v1 }
  0xd7   : > { %v2328_v8 = vadd.f32 %v2218_v20, %v2077_v23  ;;  %v2329_v24 = vadd.f32 %v2220_v21, %v2078_v10  ;;  %v820_v13 = vmul.f32 %v17081_v51, %v681_v1  ;;  %v1472_v18 = vmul.f32 %v17100_v62, %v681_v1 }
  0xd8   : > { %v2464_v26 = vsel %vm1307_vm5, %v2462_v43, %v2463_v15  ;;  %v2466_v27 = vsel %vm1307_vm5, %v2463_v15, %v2465_v16  ;;  %v1076_v28 = vrot.slane %v973_v17, 1  ;;  %v1549_v29 = vmul.f32 %v17089_v56, %v681_v1 }
  0xd9   : > { %v2574_v31 = vadd.f32 %v2464_v26, %v2328_v8  ;;  %v2575_v23 = vadd.f32 %v2466_v27, %v2329_v24  ;;  %v1323_v32 = vrot.slane %v1220_v22, 2  ;;  %v1795_v33 = vmul.f32 %v17094_v57, %v681_v1 }
  0xda   : > { %v1504_v34 = vadd.f32 %v1472_v18, %v1424_v54  ;;  %v1649_v35 = vrot.slane %v1549_v29, 1  ;;  %v2047_v36 = vmul.f32 %v17133_v63, %v681_v1  ;;  %v2123_v37 = vmul.f32 %v17141_v4, %v681_v1 }
  0xdb   : > { %v2612_v38 = vadd.f32 %v17187_v25, %v2574_v31  ;;  %v2613_v39 = vadd.f32 %v17187_v25, %v2575_v23  ;;  %v2369_v40 = vmul.f32 %v17146_v5, %v681_v1  ;;  %v821_v41 = vmul.f32 %v17081_v51, %v686_v30  ;;  %v896_v1 = vpop.permute.xlu1 %895  ;;  %v691_v31 = vpop.permute.xlu0 %690 }
  0xdc   : > { %v1895_v42 = vrot.slane %v1795_v33, 2  ;;  %v2079_v43 = vadd.f32 %v2047_v36, %v1999_v14  ;;  %v974_v46 = vmul.f32 %v17068_v44, %v686_v30  ;;  %v1221_v47 = vmul.f32 %v17073_v45, %v686_v30 }
  0xdd   : > { %v2644_v48 = vmax.f32 %v2612_v38, 0.0  ;;  %v2645_v49 = vmax.f32 %v2613_v39, 0.0  ;;  %v2221_v50 = vrot.slane %v2123_v37, 1  ;;  %v1550_v52 = vmul.f32 %v17089_v56, %v686_v30 }
  0xde   : > { %v1077_v53 = vrot.slane %v974_v46, 1  ;;  %v1324_v54 = vrot.slane %v1221_v47, 2  ;;  %v1473_v55 = vmul.f32 %v17100_v62, %v686_v30  ;;  %v1796_v58 = vmul.f32 %v17094_v57, %v686_v30 }
  0xdf   : > { %2677 = vst.msk [vmem:[#allocation3 + $0x19] sm:$0xff] %vm389_vm2, %v2644_v48  ;;  %2678 = vst.msk [vmem:[#allocation3 + $0x21] sm:$0xff] %vm389_vm2, %v2645_v49  ;;  %v2467_v59 = vrot.slane %v2369_v40, 2  ;;  %v1650_v60 = vrot.slane %v1550_v52, 1  ;;  %v2124_v61 = vmul.f32 %v17141_v4, %v686_v30  ;;  %v2370_v0 = vmul.f32 %v17146_v5, %v686_v30 }
  0xe0   : > { %v1078_v3 = vsel %vm1060_vm4, %v1076_v28, %v1077_v53  ;;  %v1505_v6 = vadd.f32 %v1473_v55, %v1425_v2  ;;  %v1896_v7 = vrot.slane %v1796_v58, 2  ;;  %v2048_v9 = vmul.f32 %v17133_v63, %v686_v30 }
  0xe1   : > { %v1325_v10 = vsel %vm1307_vm5, %v1323_v32, %v1324_v54  ;;  %v1651_v11 = vsel %vm1060_vm4, %v1649_v35, %v1650_v60  ;;  %v2222_v12 = vrot.slane %v2124_v61, 1  ;;  %v2468_v14 = vrot.slane %v2370_v0, 2 }
  0xe2   : > { %v1179_v15 = vadd.f32 %v1078_v3, %v820_v13  ;;  %v1755_v16 = vadd.f32 %v1651_v11, %v1504_v34  ;;  %v975_v17 = vmul.f32 %v17068_v44, %v896_v1  ;;  %v1222_v20 = vmul.f32 %v17073_v45, %v896_v1  ;;  %v901_v3 = vpop.permute.xlu0 %900 }
  0xe3   : > { %v1897_v21 = vsel %vm1307_vm5, %v1895_v42, %v1896_v7  ;;  %v2080_v22 = vadd.f32 %v2048_v9, %v2000_v19  ;;  %v2223_v2 = vsel %vm1060_vm4, %v2221_v50, %v2222_v12  ;;  %v1551_v8 = vmul.f32 %v17089_v56, %v896_v1 }
  0xe4   : > { %v2330_v24 = vadd.f32 %v2223_v2, %v2079_v43  ;;  %v2469_v18 = vsel %vm1307_vm5, %v2467_v59, %v2468_v14  ;;  %v1079_v26 = vrot.slane %v975_v17, 1  ;;  %v1326_v27 = vrot.slane %v1222_v20, 2 }
  0xe5   : > { %v1652_v28 = vrot.slane %v1551_v8, 1  ;;  %v1797_v13 = vmul.f32 %v17094_v57, %v896_v1  ;;  %v2125_v29 = vmul.f32 %v17141_v4, %v896_v1  ;;  %v2371_v30 = vmul.f32 %v17146_v5, %v896_v1 }
  0xe6   : > { %v1426_v23 = vadd.f32 %v1325_v10, %v1179_v15  ;;  %v2001_v32 = vadd.f32 %v1897_v21, %v1755_v16  ;;  %v2576_v19 = vadd.f32 %v2469_v18, %v2330_v24  ;;  %v1080_v33 = vsel %vm1060_vm4, %v1077_v53, %v1079_v26 }
  0xe7   : > { %v1180_v34 = vadd.f32 %v1080_v33, %v821_v41  ;;  %v1653_v35 = vsel %vm1060_vm4, %v1650_v60, %v1652_v28  ;;  %v1898_v36 = vrot.slane %v1797_v13, 2  ;;  %v2224_v37 = vrot.slane %v2125_v29, 1  ;;  %v696_v60 = vpop.permute.xlu1 %695 }
  0xe8   : > { %v2614_v38 = vadd.f32 %v17187_v25, %v2576_v19  ;;  %v1756_v39 = vadd.f32 %v1653_v35, %v1505_v6  ;;  %v2470_v40 = vrot.slane %v2371_v30, 2  ;;  %v976_v42 = vmul.f32 %v17068_v44, %v691_v31 }
  0xe9   : > { %v1327_v43 = vsel %vm1307_vm5, %v1324_v54, %v1326_v27  ;;  %v2225_v46 = vsel %vm1060_vm4, %v2222_v12, %v2224_v37  ;;  %v822_v47 = vmul.f32 %v17081_v51, %v691_v31  ;;  %v1223_v48 = vmul.f32 %v17073_v45, %v691_v31 }
  0xea   : > { %v2646_v49 = vmax.f32 %v2614_v38, 0.0  ;;  %v1427_v41 = vadd.f32 %v1327_v43, %v1180_v34  ;;  %v1899_v50 = vsel %vm1307_vm5, %v1896_v7, %v1898_v36  ;;  %v2331_v52 = vadd.f32 %v2225_v46, %v2080_v22 }
  0xeb   : > { %v2002_v53 = vadd.f32 %v1899_v50, %v1756_v39  ;;  %v2471_v55 = vsel %vm1307_vm5, %v2468_v14, %v2470_v40  ;;  %v1474_v58 = vmul.f32 %v17100_v62, %v691_v31  ;;  %v1552_v59 = vmul.f32 %v17089_v56, %v691_v31 }
  0xec   : > { %2679 = vst.msk [vmem:[#allocation3 + $0x31] sm:$0xff] %vm389_vm2, %v2646_v49  ;;  %v2577_v54 = vadd.f32 %v2471_v55, %v2331_v52  ;;  %v1081_v61 = vrot.slane %v976_v42, 1  ;;  %v1328_v0 = vrot.slane %v1223_v48, 2  ;;  %v1798_v1 = vmul.f32 %v17094_v57, %v691_v31  ;;  %v701_v55 = vpop.permute.xlu1 %700 }
  0xed   : > { %v1506_v6 = vadd.f32 %v1474_v58, %v1426_v23  ;;  %v1654_v9 = vrot.slane %v1552_v59, 1  ;;  %v2049_v7 = vmul.f32 %v17133_v63, %v691_v31  ;;  %v2126_v10 = vmul.f32 %v17141_v4, %v691_v31 }
  0xee   : > { %v2615_v11 = vadd.f32 %v17187_v25, %v2577_v54  ;;  %v1900_v12 = vrot.slane %v1798_v1, 2  ;;  %v2372_v14 = vmul.f32 %v17146_v5, %v691_v31  ;;  %v823_v15 = vmul.f32 %v17081_v51, %v696_v60 }
  0xef   : > { %v2081_v16 = vadd.f32 %v2049_v7, %v2001_v32  ;;  %v977_v17 = vmul.f32 %v17068_v44, %v696_v60  ;;  %v978_v20 = vmul.f32 %v17068_v44, %v901_v3  ;;  %v1224_v21 = vmul.f32 %v17073_v45, %v696_v60 }
  0xf0   : > { %v2647_v22 = vmax.f32 %v2615_v11, 0.0  ;;  %v1225_v2 = vmul.f32 %v17073_v45, %v901_v3  ;;  %v1475_v8 = vmul.f32 %v17100_v62, %v696_v60  ;;  %v1553_v24 = vmul.f32 %v17089_v56, %v696_v60 }
  0xf1   : > { %v1082_v18 = vrot.slane %v977_v17, 1  ;;  %v1084_v26 = vrot.slane %v978_v20, 1  ;;  %v1329_v27 = vrot.slane %v1224_v21, 2  ;;  %v1554_v28 = vmul.f32 %v17089_v56, %v901_v3 }
  0xf2   : > { %2680 = vst.msk [vmem:[#allocation3 + $0x39] sm:$0xff] %vm389_vm2, %v2647_v22  ;;  %v2226_v13 = vrot.slane %v2126_v10, 1  ;;  %v1331_v29 = vrot.slane %v1225_v2, 2  ;;  %v1655_v30 = vrot.slane %v1553_v24, 1  ;;  %v1799_v31 = vmul.f32 %v17094_v57, %v696_v60 }
  0xf3   : > { %v1083_v23 = vsel %vm1060_vm4, %v1081_v61, %v1082_v18  ;;  %v1085_v32 = vsel %vm1060_vm4, %v1082_v18, %v1084_v26  ;;  %v1507_v19 = vadd.f32 %v1475_v8, %v1427_v41  ;;  %v1657_v33 = vrot.slane %v1554_v28, 1  ;;  %v706_v18 = vpop.permute.xlu0 %705 }
  0xf4   : > { %v1181_v34 = vadd.f32 %v1083_v23, %v822_v47  ;;  %v1182_v35 = vadd.f32 %v1085_v32, %v823_v15  ;;  %v1330_v36 = vsel %vm1307_vm5, %v1328_v0, %v1329_v27  ;;  %v1656_v37 = vsel %vm1060_vm4, %v1654_v9, %v1655_v30 }
  0xf5   : > { %v1658_v38 = vsel %vm1060_vm4, %v1655_v30, %v1657_v33  ;;  %v1757_v39 = vadd.f32 %v1656_v37, %v1506_v6  ;;  %v1800_v40 = vmul.f32 %v17094_v57, %v901_v3  ;;  %v1901_v42 = vrot.slane %v1799_v31, 2 }
  0xf6   : > { %v2472_v43 = vrot.slane %v2372_v14, 2  ;;  %v1332_v46 = vsel %vm1307_vm5, %v1329_v27, %v1331_v29  ;;  %v1428_v48 = vadd.f32 %v1330_v36, %v1181_v34  ;;  %v2050_v49 = vmul.f32 %v17133_v63, %v696_v60 }
  0xf7   : > { %v1758_v41 = vadd.f32 %v1658_v38, %v1507_v19  ;;  %v1903_v50 = vrot.slane %v1800_v40, 2  ;;  %v2127_v47 = vmul.f32 %v17141_v4, %v696_v60  ;;  %v2128_v52 = vmul.f32 %v17141_v4, %v901_v3 }
  0xf8   : > { %v1902_v58 = vsel %vm1307_vm5, %v1900_v12, %v1901_v42  ;;  %v2082_v59 = vadd.f32 %v2050_v49, %v2002_v53  ;;  %v2373_v54 = vmul.f32 %v17146_v5, %v696_v60  ;;  %v2374_v61 = vmul.f32 %v17146_v5, %v901_v3 }
  0xf9   : > { %v1429_v0 = vadd.f32 %v1332_v46, %v1182_v35  ;;  %v2003_v1 = vadd.f32 %v1902_v58, %v1757_v39  ;;  %v2227_v6 = vrot.slane %v2127_v47, 1  ;;  %v2229_v9 = vrot.slane %v2128_v52, 1 }
  0xfa   : > { %v1904_v7 = vsel %vm1307_vm5, %v1901_v42, %v1903_v50  ;;  %v2473_v10 = vrot.slane %v2373_v54, 2  ;;  %v2475_v11 = vrot.slane %v2374_v61, 2  ;;  %v979_v14 = vmul.f32 %v17068_v44, %v701_v55 }
  0xfb   : > { %v2228_v15 = vsel %vm1060_vm4, %v2226_v13, %v2227_v6  ;;  %v2230_v17 = vsel %vm1060_vm4, %v2227_v6, %v2229_v9  ;;  %v824_v53 = vmul.f32 %v17081_v51, %v701_v55  ;;  %v1226_v60 = vmul.f32 %v17073_v45, %v701_v55 }
  0xfc   : > { %v2004_v12 = vadd.f32 %v1904_v7, %v1758_v41  ;;  %v2332_v3 = vadd.f32 %v2228_v15, %v2081_v16  ;;  %v2333_v20 = vadd.f32 %v2230_v17, %v2082_v59  ;;  %v1476_v21 = vmul.f32 %v17100_v62, %v701_v55 }
  0xfd   : > { %v2474_v22 = vsel %vm1307_vm5, %v2472_v43, %v2473_v10  ;;  %v2476_v2 = vsel %vm1307_vm5, %v2473_v10, %v2475_v11  ;;  %v1086_v8 = vrot.slane %v979_v14, 1  ;;  %v1555_v24 = vmul.f32 %v17089_v56, %v701_v55 }
  0xfe   : > { %v2578_v26 = vadd.f32 %v2474_v22, %v2332_v3  ;;  %v2579_v27 = vadd.f32 %v2476_v2, %v2333_v20  ;;  %v1333_v28 = vrot.slane %v1226_v60, 2  ;;  %v1801_v13 = vmul.f32 %v17094_v57, %v701_v55 }
  0xff   : > { %v1508_v29 = vadd.f32 %v1476_v21, %v1428_v48  ;;  %v1659_v30 = vrot.slane %v1555_v24, 1  ;;  %v2051_v16 = vmul.f32 %v17133_v63, %v701_v55  ;;  %v2129_v31 = vmul.f32 %v17141_v4, %v701_v55 }
 0x100   : > { %v2616_v23 = vadd.f32 %v17187_v25, %v2578_v26  ;;  %v2617_v32 = vadd.f32 %v17187_v25, %v2579_v27  ;;  %v2375_v19 = vmul.f32 %v17146_v5, %v701_v55  ;;  %v825_v33 = vmul.f32 %v17081_v51, %v706_v18  ;;  %v906_v55 = vpop.permute.xlu1 %905  ;;  %v711_v26 = vpop.permute.xlu0 %710 }
 0x101   : > { %v1905_v34 = vrot.slane %v1801_v13, 2  ;;  %v2083_v35 = vadd.f32 %v2051_v16, %v2003_v1  ;;  %v980_v36 = vmul.f32 %v17068_v44, %v706_v18  ;;  %v1227_v37 = vmul.f32 %v17073_v45, %v706_v18 }
 0x102   : > { %v2648_v38 = vmax.f32 %v2616_v23, 0.0  ;;  %v2649_v39 = vmax.f32 %v2617_v32, 0.0  ;;  %v2231_v40 = vrot.slane %v2129_v31, 1  ;;  %v1556_v42 = vmul.f32 %v17089_v56, %v706_v18 }
 0x103   : > { %v1087_v43 = vrot.slane %v980_v36, 1  ;;  %v1334_v46 = vrot.slane %v1227_v37, 2  ;;  %v1477_v48 = vmul.f32 %v17100_v62, %v706_v18  ;;  %v1802_v49 = vmul.f32 %v17094_v57, %v706_v18 }
 0x104   : > { %2681 = vst.msk [vmem:[#allocation3 + $0x49] sm:$0xff] %vm389_vm2, %v2648_v38  ;;  %2682 = vst.msk [vmem:[#allocation3 + $0x51] sm:$0xff] %vm389_vm2, %v2649_v39  ;;  %v2477_v41 = vrot.slane %v2375_v19, 2  ;;  %v1660_v50 = vrot.slane %v1556_v42, 1  ;;  %v2130_v47 = vmul.f32 %v17141_v4, %v706_v18  ;;  %v2376_v52 = vmul.f32 %v17146_v5, %v706_v18 }
 0x105   : > { %v1088_v58 = vsel %vm1060_vm4, %v1086_v8, %v1087_v43  ;;  %v1509_v59 = vadd.f32 %v1477_v48, %v1429_v0  ;;  %v1906_v54 = vrot.slane %v1802_v49, 2  ;;  %v2052_v61 = vmul.f32 %v17133_v63, %v706_v18 }
 0x106   : > { %v1335_v1 = vsel %vm1307_vm5, %v1333_v28, %v1334_v46  ;;  %v1661_v6 = vsel %vm1060_vm4, %v1659_v30, %v1660_v50  ;;  %v2232_v9 = vrot.slane %v2130_v47, 1  ;;  %v2478_v7 = vrot.slane %v2376_v52, 2 }
 0x107   : > { %v1183_v10 = vadd.f32 %v1088_v58, %v824_v53  ;;  %v1759_v11 = vadd.f32 %v1661_v6, %v1508_v29  ;;  %v981_v14 = vmul.f32 %v17068_v44, %v906_v55  ;;  %v1228_v15 = vmul.f32 %v17073_v45, %v906_v55  ;;  %v911_v58 = vpop.permute.xlu0 %910 }
 0x108   : > { %v1907_v17 = vsel %vm1307_vm5, %v1905_v34, %v1906_v54  ;;  %v2084_v60 = vadd.f32 %v2052_v61, %v2004_v12  ;;  %v2233_v0 = vsel %vm1060_vm4, %v2231_v40, %v2232_v9  ;;  %v1557_v3 = vmul.f32 %v17089_v56, %v906_v55 }
 0x109   : > { %v2334_v20 = vadd.f32 %v2233_v0, %v2083_v35  ;;  %v2479_v21 = vsel %vm1307_vm5, %v2477_v41, %v2478_v7  ;;  %v1089_v22 = vrot.slane %v981_v14, 1  ;;  %v1336_v2 = vrot.slane %v1228_v15, 2 }
 0x10a   : > { %v1662_v8 = vrot.slane %v1557_v3, 1  ;;  %v1803_v53 = vmul.f32 %v17094_v57, %v906_v55  ;;  %v2131_v24 = vmul.f32 %v17141_v4, %v906_v55  ;;  %v2377_v18 = vmul.f32 %v17146_v5, %v906_v55 }
 0x10b   : > { %v1430_v27 = vadd.f32 %v1335_v1, %v1183_v10  ;;  %v2005_v28 = vadd.f32 %v1907_v17, %v1759_v11  ;;  %v2580_v12 = vadd.f32 %v2479_v21, %v2334_v20  ;;  %v1090_v13 = vsel %vm1060_vm4, %v1087_v43, %v1089_v22 }
 0x10c   : > { %v1184_v29 = vadd.f32 %v1090_v13, %v825_v33  ;;  %v1663_v30 = vsel %vm1060_vm4, %v1660_v50, %v1662_v8  ;;  %v1908_v16 = vrot.slane %v1803_v53, 2  ;;  %v2234_v31 = vrot.slane %v2131_v24, 1  ;;  %v716_v50 = vpop.permute.xlu1 %715 }
 0x10d   : > { %v2618_v23 = vadd.f32 %v17187_v25, %v2580_v12  ;;  %v1760_v32 = vadd.f32 %v1663_v30, %v1509_v59  ;;  %v2480_v19 = vrot.slane %v2377_v18, 2  ;;  %v982_v34 = vmul.f32 %v17068_v44, %v711_v26 }
 0x10e   : > { %v1337_v35 = vsel %vm1307_vm5, %v1334_v46, %v1336_v2  ;;  %v2235_v36 = vsel %vm1060_vm4, %v2232_v9, %v2234_v31  ;;  %v826_v37 = vmul.f32 %v17081_v51, %v711_v26  ;;  %v1229_v38 = vmul.f32 %v17073_v45, %v711_v26 }
 0x10f   : > { %v2650_v39 = vmax.f32 %v2618_v23, 0.0  ;;  %v1431_v33 = vadd.f32 %v1337_v35, %v1184_v29  ;;  %v1909_v40 = vsel %vm1307_vm5, %v1906_v54, %v1908_v16  ;;  %v2335_v42 = vadd.f32 %v2235_v36, %v2084_v60 }
 0x110   : > { %v2006_v43 = vadd.f32 %v1909_v40, %v1760_v32  ;;  %v2481_v48 = vsel %vm1307_vm5, %v2478_v7, %v2480_v19  ;;  %v1478_v49 = vmul.f32 %v17100_v62, %v711_v26  ;;  %v1558_v41 = vmul.f32 %v17089_v56, %v711_v26  ;;  %v2712_v40 = vld [vmem:[#allocation3 + $0x18] sm:$0xff] }
 0x111   : > { %2683 = vst.msk [vmem:[#allocation3 + $0x61] sm:$0xff] %vm389_vm2, %v2650_v39  ;;  %v2581_v46 = vadd.f32 %v2481_v48, %v2335_v42  ;;  %v1091_v47 = vrot.slane %v982_v34, 1  ;;  %v1804_v52 = vmul.f32 %v17094_v57, %v711_v26  ;;  %v17316_v55 = vmul.f32 %v17141_v4, %v711_v26 }
 0x112   : > { %v1338_v59 = vrot.slane %v1229_v38, 2  ;;  %v1510_v54 = vadd.f32 %v1478_v49, %v1430_v27  ;;  %v1664_v61 = vrot.slane %v1558_v41, 1  ;;  %v2053_v1 = vmul.f32 %v17133_v63, %v711_v26  ;;  %v2713_v49 = vld [vmem:[#allocation3 + $0x20] sm:$0xff] }
 0x113   : > { %v2619_v6 = vadd.f32 %v17187_v25, %v2581_v46  ;;  %v1910_v9 = vrot.slane %v1804_v52, 2  ;;  %v17321_v7 = vmul.f32 %v17146_v5, %v711_v26  ;;  %v827_v10 = vmul.f32 %v17081_v51, %v716_v50 }
 0x114   : > { %v2085_v11 = vadd.f32 %v2053_v1, %v2005_v28  ;;  %v983_v14 = vmul.f32 %v17068_v44, %v716_v50  ;;  %v984_v15 = vmul.f32 %v17068_v44, %v911_v58  ;;  %v1230_v17 = vmul.f32 %v17073_v45, %v716_v50 }
 0x115   : > { %v2651_v60 = vmax.f32 %v2619_v6, 0.0  ;;  %v2236_v0 = vrot.slane %v17316_v55, 1  ;;  %v1231_v3 = vmul.f32 %v17073_v45, %v911_v58  ;;  %v1559_v20 = vmul.f32 %v17089_v56, %v716_v50  ;;  %v2714_v55 = vld [vmem:[#allocation3 + $0x28] sm:$0x3] }
 0x116   : > { %v1092_v21 = vrot.slane %v983_v14, 1  ;;  %v1094_v22 = vrot.slane %v984_v15, 1  ;;  %v1339_v2 = vrot.slane %v1230_v17, 2  ;;  %v1560_v8 = vmul.f32 %v17089_v56, %v911_v58  ;;  %v721_v15 = vpop.permute.xlu1 %720 }
 0x117   : > { %2684 = vst.msk [vmem:[#allocation3 + $0x69] sm:$0xff] %vm389_vm2, %v2651_v60  ;;  %v1341_v53 = vrot.slane %v1231_v3, 2  ;;  %v1479_v24 = vmul.f32 %v17100_v62, %v716_v50  ;;  %v1665_v18 = vrot.slane %v1559_v20, 1  ;;  %v1805_v26 = vmul.f32 %v17094_v57, %v716_v50 }
 0x118   : > { %v2482_v27 = vrot.slane %v17321_v7, 2  ;;  %v1093_v28 = vsel %vm1060_vm4, %v1091_v47, %v1092_v21  ;;  %v1095_v12 = vsel %vm1060_vm4, %v1092_v21, %v1094_v22  ;;  %v1667_v13 = vrot.slane %v1560_v8, 1 }
 0x119   : > { %v1185_v29 = vadd.f32 %v1093_v28, %v826_v37  ;;  %v1186_v30 = vadd.f32 %v1095_v12, %v827_v10  ;;  %v1511_v16 = vadd.f32 %v1479_v24, %v1431_v33  ;;  %v1666_v31 = vsel %vm1060_vm4, %v1664_v61, %v1665_v18  ;;  %v726_v12 = vpop.permute.xlu0 %725 }
 0x11a   : > { %v1340_v23 = vsel %vm1307_vm5, %v1338_v59, %v1339_v2  ;;  %v1668_v32 = vsel %vm1060_vm4, %v1665_v18, %v1667_v13  ;;  %v1806_v19 = vmul.f32 %v17094_v57, %v911_v58  ;;  %v1911_v34 = vrot.slane %v1805_v26, 2 }
 0x11b   : > { %v1342_v35 = vsel %vm1307_vm5, %v1339_v2, %v1341_v53  ;;  %v1432_v36 = vadd.f32 %v1340_v23, %v1185_v29  ;;  %v1761_v38 = vadd.f32 %v1666_v31, %v1510_v54  ;;  %v2054_v39 = vmul.f32 %v17133_v63, %v716_v50 }
 0x11c   : > { %v17343_v42 = vadd.f32 %v1342_v35, %v1186_v30  ;;  %v1913_v37 = vrot.slane %v1806_v19, 2  ;;  %v2133_v33 = vmul.f32 %v17141_v4, %v716_v50  ;;  %v2134_v48 = vmul.f32 %v17141_v4, %v911_v58 }
 0x11d   : > { %v1762_v41 = vadd.f32 %v1668_v32, %v1511_v16  ;;  %v2086_v46 = vadd.f32 %v2054_v39, %v2006_v43  ;;  %v2379_v47 = vmul.f32 %v17146_v5, %v716_v50  ;;  %v2380_v52 = vmul.f32 %v17146_v5, %v911_v58 }
 0x11e   : > { %v1912_v59 = vsel %vm1307_vm5, %v1910_v9, %v1911_v34  ;;  %v2237_v54 = vrot.slane %v2133_v33, 1  ;;  %v2239_v61 = vrot.slane %v2134_v48, 1  ;;  %v2889_v1 = vrot.slane %v2712_v40, 1 }
 0x11f   : > { %v2007_v6 = vadd.f32 %v1912_v59, %v1761_v38  ;;  %v2483_v7 = vrot.slane %v2379_v47, 2  ;;  %v2485_v10 = vrot.slane %v2380_v52, 2  ;;  %v2890_v14 = vrot.slane %v2713_v49, 1 }
 0x120   : > { %v1914_v17 = vsel %vm1307_vm5, %v1911_v34, %v1913_v37  ;;  %v2238_v60 = vsel %vm1060_vm4, %v2236_v0, %v2237_v54  ;;  %v2240_v43 = vsel %vm1060_vm4, %v2237_v54, %v2239_v61  ;;  %v2892_v50 = vrot.slane %v2714_v55, 1  ;;  %v916_v55 = vpop.permute.xlu1 %915 }
 0x121   : > { %v2336_v3 = vadd.f32 %v2238_v60, %v2085_v11  ;;  %v2337_v58 = vadd.f32 %v2240_v43, %v2086_v46  ;;  %v2484_v20 = vsel %vm1307_vm5, %v2482_v27, %v2483_v7  ;;  %v2486_v9 = vsel %vm1307_vm5, %v2483_v7, %v2485_v10  ;;  %v17393_v10 = vld [vmem:[%s21857_s1 + $0x1] ss:$0 sm:$0xff] }
 0x122   : > { %v17356_v21 = vsel %vm1060_vm4, %v2889_v1, %v2890_v14  ;;  %v17359_v22 = vsel %vm1060_vm4, %v2890_v14, %v2892_v50  ;;  %v985_v2 = vmul.f32 %v17068_v44, %v721_v15  ;;  %v1232_v8 = vmul.f32 %v17073_v45, %v721_v15 }
 0x123   : > { %v2008_v0 = vadd.f32 %v1914_v17, %v1762_v41  ;;  %v2582_v53 = vadd.f32 %v2484_v20, %v2336_v3  ;;  %v2583_v24 = vadd.f32 %v2486_v9, %v2337_v58  ;;  %13437 = vmatprep.mubr.msk.f32.mxu0 %vm389_vm2, %v17356_v21  ;;  %v1561_v11 = vmul.f32 %v17089_v56, %v721_v15  ;;  %v17409_v9 = vld [vmem:[%s21857_s1 + $0x4] ss:$0 sm:$0xff] }
 0x124   : > { %13438 = vmatmul.mubr.msk.f32.gmra.mrb[2].mxu0 %vm389_vm2, %v17359_v22  ;;  %v828_v18 = vmul.f32 %v17081_v51, %v721_v15  ;;  %v1096_v26 = vrot.slane %v985_v2, 1  ;;  %v1480_v27 = vmul.f32 %v17100_v62, %v721_v15  ;;  %v1807_v28 = vmul.f32 %v17094_v57, %v721_v15 }
 0x125   : > { %v2620_v13 = vadd.f32 %v17187_v25, %v2582_v53  ;;  %v2621_v29 = vadd.f32 %v17187_v25, %v2583_v24  ;;  %v1343_v30 = vrot.slane %v1232_v8, 2  ;;  %v2055_v16 = vmul.f32 %v17133_v63, %v721_v15 }
 0x126   : > { %v1512_v31 = vadd.f32 %v1480_v27, %v1432_v36  ;;  %v1669_v23 = vrot.slane %v1561_v11, 1  ;;  %v1915_v32 = vrot.slane %v1807_v28, 2  ;;  %v2135_v19 = vmul.f32 %v17141_v4, %v721_v15 }
 0x127   : > { %v2652_v34 = vmax.f32 %v2620_v13, 0.0  ;;  %v2653_v35 = vmax.f32 %v2621_v29, 0.0  ;;  %v2381_v38 = vmul.f32 %v17146_v5, %v721_v15  ;;  %v986_v39 = vmul.f32 %v17068_v44, %v726_v12  ;;  %v17399_v15 = vld [vmem:[%s21857_s1 + $0x2] ss:$0 sm:$0xff] }
 0x128   : > { %v2087_v40 = vadd.f32 %v2055_v16, %v2007_v6  ;;  %v2241_v37 = vrot.slane %v2135_v19, 1  ;;  %v829_v33 = vmul.f32 %v17081_v51, %v726_v12  ;;  %v1233_v48 = vmul.f32 %v17073_v45, %v726_v12 }
 0x129   : > { %2685 = vst.msk [vmem:[#allocation3 + $0x79] sm:$0xff] %vm389_vm2, %v2652_v34  ;;  %2686 = vst.msk [vmem:[#allocation3 + $0x81] sm:$0xff] %vm389_vm2, %v2653_v35  ;;  %v1097_v36 = vrot.slane %v986_v39, 1  ;;  %v1481_v49 = vmul.f32 %v17100_v62, %v726_v12  ;;  %v1562_v41 = vmul.f32 %v17089_v56, %v726_v12  ;;  %v1808_v46 = vmul.f32 %v17094_v57, %v726_v12 }
 0x12a   : > { %v1344_v47 = vrot.slane %v1233_v48, 2  ;;  %v2056_v44 = vmul.f32 %v17133_v63, %v726_v12  ;;  %v2136_v52 = vmul.f32 %v17141_v4, %v726_v12  ;;  %v2382_v51 = vmul.f32 %v17146_v5, %v726_v12 }
 0x12b   : > { %v2487_v45 = vrot.slane %v2381_v38, 2  ;;  %v1098_v59 = vsel %vm1060_vm4, %v1096_v26, %v1097_v36  ;;  %v1670_v54 = vrot.slane %v1562_v41, 1  ;;  %v1916_v61 = vrot.slane %v1808_v46, 2  ;;  %v2716_v26 = vld [vmem:[#allocation3 + $0x38] sm:$0xff] }
 0x12c   : > { %v1513_v1 = vadd.f32 %v1481_v49, %v17343_v42  ;;  %v2088_v62 = vadd.f32 %v2056_v44, %v2008_v0  ;;  %v2242_v6 = vrot.slane %v2136_v52, 1  ;;  %v2488_v56 = vrot.slane %v2382_v51, 2  ;;  %v17415_v0 = vld [vmem:[%s21857_s1 + $0x5] ss:$0 sm:$0xff]  ;;  %v17438_v51 = vld [vmem:[%s21857_s1 + $0x3] ss:$0 sm:$0xff] }
 0x12d   : > { %v1187_v7 = vadd.f32 %v1098_v59, %v828_v18  ;;  %v1671_v57 = vsel %vm1060_vm4, %v1669_v23, %v1670_v54  ;;  %v987_v14 = vmul.f32 %v17393_v10, %v916_v55  ;;  %v1234_v42 = vmul.f32 %v17399_v15, %v916_v55  ;;  %v2715_v18 = vld [vmem:[#allocation3 + $0x30] sm:$0xff]  ;;  %v731_v23 = vpop.permute.xlu0 %730 }
 0x12e   : > { %v1345_v17 = vsel %vm1307_vm5, %v1343_v30, %v1344_v47  ;;  %v1763_v60 = vadd.f32 %v1671_v57, %v1512_v31  ;;  %v1917_v43 = vsel %vm1307_vm5, %v1915_v32, %v1916_v61  ;;  %v2243_v50 = vsel %vm1060_vm4, %v2241_v37, %v2242_v6 }
 0x12f   : > { %v2338_v3 = vadd.f32 %v2243_v50, %v2087_v40  ;;  %v2489_v58 = vsel %vm1307_vm5, %v2487_v45, %v2488_v56  ;;  %v1099_v20 = vrot.slane %v987_v14, 1  ;;  %v1563_v2 = vmul.f32 %v17409_v9, %v916_v55 }
 0x130   : > { %v1346_v8 = vrot.slane %v1234_v42, 2  ;;  %v1809_v53 = vmul.f32 %v17415_v0, %v916_v55  ;;  %v2137_v24 = vmul.f32 %v17141_v4, %v916_v55  ;;  %v2383_v11 = vmul.f32 %v17146_v5, %v916_v55 }
 0x131   : > { %v1434_v27 = vadd.f32 %v1345_v17, %v1187_v7  ;;  %v2584_v28 = vadd.f32 %v2489_v58, %v2338_v3  ;;  %v1100_v12 = vsel %vm1060_vm4, %v1097_v36, %v1099_v20  ;;  %v1672_v13 = vrot.slane %v1563_v2, 1  ;;  %v736_v7 = vpop.permute.xlu1 %735  ;;  %v921_v57 = vpop.permute.xlu0 %920 }
 0x132   : > { %v1188_v29 = vadd.f32 %v1100_v12, %v829_v33  ;;  %v1918_v30 = vrot.slane %v1809_v53, 2  ;;  %v2244_v16 = vrot.slane %v2137_v24, 1  ;;  %v2490_v31 = vrot.slane %v2383_v11, 2 }
 0x133   : > { %v2622_v32 = vadd.f32 %v17187_v25, %v2584_v28  ;;  %v1673_v19 = vsel %vm1060_vm4, %v1670_v54, %v1672_v13  ;;  %v2894_v34 = vrot.slane %v2715_v18, 1  ;;  %v2895_v35 = vrot.slane %v2716_v26, 1  ;;  %v2717_v54 = vld [vmem:[#allocation3 + $0x40] sm:$0x3] }
 0x134   : > { %v2009_v38 = vadd.f32 %v1917_v43, %v1763_v60  ;;  %v1347_v39 = vsel %vm1307_vm5, %v1344_v47, %v1346_v8  ;;  %v1764_v40 = vadd.f32 %v1673_v19, %v1513_v1  ;;  %v2245_v37 = vsel %vm1060_vm4, %v2242_v6, %v2244_v16  ;;  %v17446_v1 = vld [vmem:[%s21857_s1] ss:$0 sm:$0xff] }
 0x135   : > { %v2654_v48 = vmax.f32 %v2622_v32, 0.0  ;;  %v1435_v36 = vadd.f32 %v1347_v39, %v1188_v29  ;;  %v2339_v49 = vadd.f32 %v2245_v37, %v2088_v62  ;;  %v17426_v33 = vsel %vm1060_vm4, %v2894_v34, %v2895_v35 }
 0x136   : > { %v1919_v41 = vsel %vm1307_vm5, %v1916_v61, %v1918_v30  ;;  %v2491_v46 = vsel %vm1307_vm5, %v2488_v56, %v2490_v31  ;;  %13440 = vmatprep.mubr.msk.f32.mxu0 %vm389_vm2, %v17426_v33  ;;  %v988_v44 = vmul.f32 %v17393_v10, %v731_v23  ;;  %v1235_v47 = vmul.f32 %v17399_v15, %v731_v23 }
 0x137   : > { %2687 = vst.msk [vmem:[#allocation3 + $0x91] sm:$0xff] %vm389_vm2, %v2654_v48  ;;  %v2585_v52 = vadd.f32 %v2491_v46, %v2339_v49  ;;  %v1482_v55 = vmul.f32 %v17438_v51, %v731_v23  ;;  %v1564_v45 = vmul.f32 %v17409_v9, %v731_v23  ;;  %v1810_v59 = vmul.f32 %v17415_v0, %v731_v23 }
 0x138   : > { %v2010_v61 = vadd.f32 %v1919_v41, %v1764_v40  ;;  %v830_v62 = vmul.f32 %v17446_v1, %v731_v23  ;;  %v1101_v6 = vrot.slane %v988_v44, 1  ;;  %v2057_v56 = vmul.f32 %v17133_v63, %v731_v23 }
 0x139   : > { %v2623_v14 = vadd.f32 %v17187_v25, %v2585_v52  ;;  %v1348_v42 = vrot.slane %v1235_v47, 2  ;;  %v1514_v17 = vadd.f32 %v1482_v55, %v1434_v27  ;;  %v17452_v60 = vmul.f32 %v17141_v4, %v731_v23  ;;  %v17494_v55 = vld [vmem:[%s21857_s1 + $0x7] ss:$0 sm:$0xff] }
 0x13a   : > { %v1674_v43 = vrot.slane %v1564_v45, 1  ;;  %v1920_v50 = vrot.slane %v1810_v59, 2  ;;  %v17454_v3 = vadd.f32 %v2057_v56, %v2009_v38  ;;  %v2897_v58 = vrot.slane %v2717_v54, 1  ;;  %v2718_v59 = vld [vmem:[#allocation3 + $0x48] sm:$0xff]  ;;  %v2719_v54 = vld [vmem:[#allocation3 + $0x50] sm:$0xff] }
 0x13b   : > { %v2655_v20 = vmax.f32 %v2623_v14, 0.0  ;;  %v17457_v2 = vmul.f32 %v17146_v5, %v731_v23  ;;  %v989_v63 = vmul.f32 %v17393_v10, %v736_v7  ;;  %v990_v8 = vmul.f32 %v17393_v10, %v921_v57 }
 0x13c   : > { %v17462_v53 = vsel %vm1060_vm4, %v2895_v35, %v2897_v58  ;;  %v831_v24 = vmul.f32 %v17446_v1, %v736_v7  ;;  %v1236_v4 = vmul.f32 %v17399_v15, %v736_v7  ;;  %v1237_v11 = vmul.f32 %v17399_v15, %v921_v57 }
 0x13d   : > { %2688 = vst.msk [vmem:[#allocation3 + $0x99] sm:$0xff] %vm389_vm2, %v2655_v20  ;;  %13441 = vmatmul.mubr.msk.f32.gmra.mrb[4].mxu0 %vm389_vm2, %v17462_v53  ;;  %v1102_v5 = vrot.slane %v989_v63, 1  ;;  %v1104_v18 = vrot.slane %v990_v8, 1  ;;  %v1483_v26 = vmul.f32 %v17438_v51, %v736_v7  ;;  %v1565_v27 = vmul.f32 %v17409_v9, %v736_v7 }
 0x13e   : > { %v1349_v28 = vrot.slane %v1236_v4, 2  ;;  %v1351_v12 = vrot.slane %v1237_v11, 2  ;;  %v1566_v13 = vmul.f32 %v17409_v9, %v921_v57  ;;  %v1811_v29 = vmul.f32 %v17415_v0, %v736_v7 }
 0x13f   : > { %v2246_v30 = vrot.slane %v17452_v60, 1  ;;  %v1103_v16 = vsel %vm1060_vm4, %v1101_v6, %v1102_v5  ;;  %v1105_v31 = vsel %vm1060_vm4, %v1102_v5, %v1104_v18  ;;  %v1675_v23 = vrot.slane %v1565_v27, 1 }
 0x140   : > { %v1189_v32 = vadd.f32 %v1103_v16, %v830_v62  ;;  %v1190_v19 = vadd.f32 %v1105_v31, %v831_v24  ;;  %v1350_v34 = vsel %vm1307_vm5, %v1348_v42, %v1349_v28  ;;  %v1515_v35 = vadd.f32 %v1483_v26, %v1435_v36  ;;  %v17488_v36 = vld [vmem:[%s21857_s1 + $0x6] ss:$0 sm:$0xff]  ;;  %v2720_v42 = vld [vmem:[#allocation3 + $0x58] sm:$0x3] }
 0x141   : > { %v1676_v38 = vsel %vm1060_vm4, %v1674_v43, %v1675_v23  ;;  %v1677_v39 = vrot.slane %v1566_v13, 1  ;;  %v1812_v40 = vmul.f32 %v17415_v0, %v921_v57  ;;  %v1921_v37 = vrot.slane %v1811_v29, 2  ;;  %v17502_v43 = vld [vmem:[%s21857_s1 + $0x8] ss:$0 sm:$0xff] }
 0x142   : > { %v2492_v48 = vrot.slane %v17457_v2, 2  ;;  %v1352_v49 = vsel %vm1307_vm5, %v1349_v28, %v1351_v12  ;;  %v1436_v41 = vadd.f32 %v1350_v34, %v1189_v32  ;;  %v1765_v46 = vadd.f32 %v1676_v38, %v1514_v17 }
 0x143   : > { %v17482_v44 = vadd.f32 %v1352_v49, %v1190_v19  ;;  %v1678_v47 = vsel %vm1060_vm4, %v1675_v23, %v1677_v39  ;;  %v2058_v52 = vmul.f32 %v17488_v36, %v736_v7  ;;  %v2139_v45 = vmul.f32 %v17494_v55, %v736_v7 }
 0x144   : > { %v1766_v62 = vadd.f32 %v1678_v47, %v1515_v35  ;;  %v1922_v6 = vsel %vm1307_vm5, %v1920_v50, %v1921_v37  ;;  %v1923_v56 = vrot.slane %v1812_v40, 2  ;;  %v2140_v14 = vmul.f32 %v17494_v55, %v921_v57  ;;  %v746_v40 = vpop.permute.xlu0 %745 }
 0x145   : > { %v2090_v17 = vadd.f32 %v2058_v52, %v2010_v61  ;;  %v2247_v60 = vrot.slane %v2139_v45, 1  ;;  %v2385_v58 = vmul.f32 %v17502_v43, %v736_v7  ;;  %v2386_v20 = vmul.f32 %v17502_v43, %v921_v57  ;;  %v741_v61 = vpop.permute.xlu1 %740 }
 0x146   : > { %v2011_v2 = vadd.f32 %v1922_v6, %v1765_v46  ;;  %v2249_v63 = vrot.slane %v2140_v14, 1  ;;  %v2899_v8 = vrot.slane %v2718_v59, 1  ;;  %v2900_v24 = vrot.slane %v2719_v54, 1 }
 0x147   : > { %v2248_v50 = vsel %vm1060_vm4, %v2246_v30, %v2247_v60  ;;  %v2493_v4 = vrot.slane %v2385_v58, 2  ;;  %v2495_v11 = vrot.slane %v2386_v20, 2  ;;  %v2902_v5 = vrot.slane %v2720_v42, 1 }
 0x148   : > { %v1924_v18 = vsel %vm1307_vm5, %v1921_v37, %v1923_v56  ;;  %v2250_v26 = vsel %vm1060_vm4, %v2247_v60, %v2249_v63  ;;  %v2340_v27 = vadd.f32 %v2248_v50, %v17454_v3  ;;  %v17511_v7 = vsel %vm1060_vm4, %v2899_v8, %v2900_v24  ;;  %v17533_v37 = vld [vmem:[%s21858_s2] ss:$0 sm:$0xff] }
 0x149   : > { %v2012_v57 = vadd.f32 %v1924_v18, %v1766_v62  ;;  %v2341_v28 = vadd.f32 %v2250_v26, %v2090_v17  ;;  %v2494_v12 = vsel %vm1307_vm5, %v2492_v48, %v2493_v4  ;;  %13443 = vmatprep.mubr.msk.f32.mxu0 %vm389_vm2, %v17511_v7  ;;  %v17517_v13 = vsel %vm1060_vm4, %v2900_v24, %v2902_v5  ;;  %v926_v60 = vpop.permute.xlu1 %925 }
 0x14a   : > { %v2496_v29 = vsel %vm1307_vm5, %v2493_v4, %v2495_v11  ;;  %v2586_v30 = vadd.f32 %v2494_v12, %v2340_v27  ;;  %13444 = vmatmul.mubr.msk.f32.gmra.mrb[6].mxu0 %vm389_vm2, %v17517_v13  ;;  %v991_v3 = vmul.f32 %v17393_v10, %v741_v61  ;;  %v1238_v16 = vmul.f32 %v17399_v15, %v741_v61 }
 0x14b   : > { %v2587_v31 = vadd.f32 %v2496_v29, %v2341_v28  ;;  %v1484_v23 = vmul.f32 %v17438_v51, %v741_v61  ;;  %v1567_v32 = vmul.f32 %v17409_v9, %v741_v61  ;;  %v1813_v19 = vmul.f32 %v17415_v0, %v741_v61 }
 0x14c   : > { %v2624_v34 = vadd.f32 %v17187_v25, %v2586_v30  ;;  %v832_v35 = vmul.f32 %v17446_v1, %v741_v61  ;;  %v1106_v38 = vrot.slane %v991_v3, 1  ;;  %v2059_v39 = vmul.f32 %v17488_v36, %v741_v61 }
 0x14d   : > { %v2625_v48 = vadd.f32 %v17533_v37, %v2587_v31  ;;  %v1353_v49 = vrot.slane %v1238_v16, 2  ;;  %v1516_v46 = vadd.f32 %v1484_v23, %v1436_v41  ;;  %v1679_v47 = vrot.slane %v1567_v32, 1 }
 0x14e   : > { %v2656_v52 = vmax.f32 %v2624_v34, 0.0  ;;  %v1925_v45 = vrot.slane %v1813_v19, 2  ;;  %v2141_v25 = vmul.f32 %v17494_v55, %v741_v61  ;;  %v2387_v59 = vmul.f32 %v17502_v43, %v741_v61 }
 0x14f   : > { %v2657_v54 = vmax.f32 %v2625_v48, 0.0  ;;  %v2091_v62 = vadd.f32 %v2059_v39, %v2011_v2  ;;  %v992_v6 = vmul.f32 %v17393_v10, %v746_v40  ;;  %v1239_v56 = vmul.f32 %v17399_v15, %v746_v40  ;;  %v2721_v39 = vld [vmem:[#allocation3 + $0x60] sm:$0xff] }
 0x150   : > { %2689 = vst.msk [vmem:[#allocation3 + $0xa9] sm:$0xff] %vm389_vm2, %v2656_v52  ;;  %v833_v14 = vmul.f32 %v17446_v1, %v746_v40  ;;  %v1485_v42 = vmul.f32 %v17438_v51, %v746_v40  ;;  %v1568_v41 = vmul.f32 %v17409_v9, %v746_v40  ;;  %v1814_v17 = vmul.f32 %v17415_v0, %v746_v40 }
 0x151   : > { %2690 = vst.msk [vmem:[#allocation3 + $0xb1] sm:$0xff] %vm389_vm2, %v2657_v54  ;;  %v2251_v58 = vrot.slane %v2141_v25, 1  ;;  %v2497_v20 = vrot.slane %v2387_v59, 2  ;;  %v1107_v2 = vrot.slane %v992_v6, 1  ;;  %v1354_v63 = vrot.slane %v1239_v56, 2  ;;  %v751_v54 = vpop.permute.xlu0 %750 }
 0x152   : > { %v1517_v8 = vadd.f32 %v1485_v42, %v17482_v44  ;;  %v1680_v24 = vrot.slane %v1568_v41, 1  ;;  %v2142_v50 = vmul.f32 %v17494_v55, %v746_v40  ;;  %v2388_v4 = vmul.f32 %v17502_v43, %v746_v40 }
 0x153   : > { %v1108_v11 = vsel %vm1060_vm4, %v1106_v38, %v1107_v2  ;;  %v1926_v5 = vrot.slane %v1814_v17, 2  ;;  %v2060_v61 = vmul.f32 %v17488_v36, %v746_v40  ;;  %v993_v18 = vmul.f32 %v17393_v10, %v926_v60  ;;  %v2722_v40 = vld [vmem:[#allocation3 + $0x68] sm:$0xff] }
 0x154   : > { %v1191_v26 = vadd.f32 %v1108_v11, %v832_v35  ;;  %v1355_v27 = vsel %vm1307_vm5, %v1353_v49, %v1354_v63  ;;  %v1681_v28 = vsel %vm1060_vm4, %v1679_v47, %v1680_v24  ;;  %v2252_v12 = vrot.slane %v2142_v50, 1 }
 0x155   : > { %v2092_v29 = vadd.f32 %v2060_v61, %v2012_v57  ;;  %v2498_v44 = vrot.slane %v2388_v4, 2  ;;  %v1109_v30 = vrot.slane %v993_v18, 1  ;;  %v1240_v3 = vmul.f32 %v17399_v15, %v926_v60  ;;  %v2723_v18 = vld [vmem:[#allocation3 + $0x70] sm:$0x3] }
 0x156   : > { %v1767_v16 = vadd.f32 %v1681_v28, %v1516_v46  ;;  %v2253_v31 = vsel %vm1060_vm4, %v2251_v58, %v2252_v12  ;;  %v1569_v23 = vmul.f32 %v17409_v9, %v926_v60  ;;  %v1815_v32 = vmul.f32 %v17415_v0, %v926_v60 }
 0x157   : > { %v1438_v19 = vadd.f32 %v1355_v27, %v1191_v26  ;;  %v1927_v34 = vsel %vm1307_vm5, %v1925_v45, %v1926_v5  ;;  %v2342_v35 = vadd.f32 %v2253_v31, %v2091_v62  ;;  %v1110_v38 = vsel %vm1060_vm4, %v1107_v2, %v1109_v30  ;;  %v931_v31 = vpop.permute.xlu0 %930 }
 0x158   : > { %v2499_v57 = vsel %vm1307_vm5, %v2497_v20, %v2498_v44  ;;  %v1356_v48 = vrot.slane %v1240_v3, 2  ;;  %v1682_v49 = vrot.slane %v1569_v23, 1  ;;  %v1928_v47 = vrot.slane %v1815_v32, 2 }
 0x159   : > { %v2588_v46 = vadd.f32 %v2499_v57, %v2342_v35  ;;  %v1192_v52 = vadd.f32 %v1110_v38, %v833_v14  ;;  %v2143_v25 = vmul.f32 %v17494_v55, %v926_v60  ;;  %v2389_v59 = vmul.f32 %v17502_v43, %v926_v60 }
 0x15a   : > { %v2013_v6 = vadd.f32 %v1927_v34, %v1767_v16  ;;  %v1683_v45 = vsel %vm1060_vm4, %v1680_v24, %v1682_v49  ;;  %v2904_v62 = vrot.slane %v2721_v39, 1  ;;  %v2905_v56 = vrot.slane %v2722_v40, 1 }
 0x15b   : > { %v2626_v42 = vadd.f32 %v17533_v37, %v2588_v46  ;;  %v1357_v41 = vsel %vm1307_vm5, %v1354_v63, %v1356_v48  ;;  %v1768_v17 = vadd.f32 %v1683_v45, %v1517_v8  ;;  %v2254_v58 = vrot.slane %v2143_v25, 1 }
 0x15c   : > { %v1929_v20 = vsel %vm1307_vm5, %v1926_v5, %v1928_v47  ;;  %v2500_v2 = vrot.slane %v2389_v59, 2  ;;  %v17568_v14 = vsel %vm1060_vm4, %v2904_v62, %v2905_v56  ;;  %v994_v60 = vmul.f32 %v17393_v10, %v751_v54 }
 0x15d   : > { %v2658_v50 = vmax.f32 %v2626_v42, 0.0  ;;  %v1439_v4 = vadd.f32 %v1357_v41, %v1192_v52  ;;  %v2255_v24 = vsel %vm1060_vm4, %v2252_v12, %v2254_v58  ;;  %13446 = vmatprep.mubr.msk.f32.mxu0 %vm389_vm2, %v17568_v14  ;;  %v1241_v11 = vmul.f32 %v17399_v15, %v751_v54 }
 0x15e   : > { %v17575_v63 = vadd.f32 %v1929_v20, %v1768_v17  ;;  %v2343_v8 = vadd.f32 %v2255_v24, %v2092_v29  ;;  %v2501_v5 = vsel %vm1307_vm5, %v2498_v44, %v2500_v2  ;;  %v834_v61 = vmul.f32 %v17446_v1, %v751_v54  ;;  %v756_v44 = vpop.permute.xlu1 %755 }
 0x15f   : > { %2691 = vst.msk [vmem:[#allocation3 + $0xc1] sm:$0xff] %vm389_vm2, %v2658_v50  ;;  %v1111_v26 = vrot.slane %v994_v60, 1  ;;  %v1486_v27 = vmul.f32 %v17438_v51, %v751_v54  ;;  %v1570_v28 = vmul.f32 %v17409_v9, %v751_v54  ;;  %v1816_v12 = vmul.f32 %v17415_v0, %v751_v54 }
 0x160   : > { %v2589_v30 = vadd.f32 %v2501_v5, %v2343_v8  ;;  %v1358_v3 = vrot.slane %v1241_v11, 2  ;;  %v2061_v16 = vmul.f32 %v17488_v36, %v751_v54  ;;  %v17585_v29 = vmul.f32 %v17494_v55, %v751_v54 }
 0x161   : > { %v1518_v23 = vadd.f32 %v1486_v27, %v1438_v19  ;;  %v1684_v32 = vrot.slane %v1570_v28, 1  ;;  %v17588_v34 = vmul.f32 %v17502_v43, %v751_v54  ;;  %v2907_v35 = vrot.slane %v2723_v18, 1 }
 0x162   : > { %v2627_v38 = vadd.f32 %v17533_v37, %v2589_v30  ;;  %v1930_v39 = vrot.slane %v1816_v12, 2  ;;  %v2093_v40 = vadd.f32 %v2061_v16, %v2013_v6  ;;  %v2256_v57 = vrot.slane %v17585_v29, 1 }
 0x163   : > { %v17593_v48 = vsel %vm1060_vm4, %v2905_v56, %v2907_v35  ;;  %v995_v49 = vmul.f32 %v17393_v10, %v756_v44  ;;  %v996_v47 = vmul.f32 %v17393_v10, %v931_v31  ;;  %v1242_v19 = vmul.f32 %v17399_v15, %v756_v44 }
 0x164   : > { %22007 = vst [vmem:[#allocation6_spill] sm:$0xff] %v17593_v48  ;;  %v2659_v46 = vmax.f32 %v2627_v38, 0.0  ;;  %13447 = vmatmul.mubr.msk.f32.gmra.mrb[8].mxu0 %vm389_vm2, %v17593_v48  ;;  %v835_v52 = vmul.f32 %v17446_v1, %v756_v44  ;;  %v1243_v25 = vmul.f32 %v17399_v15, %v931_v31  ;;  %v1571_v59 = vmul.f32 %v17409_v9, %v756_v44 }
 0x165   : > { %v1112_v54 = vrot.slane %v995_v49, 1  ;;  %v1114_v6 = vrot.slane %v996_v47, 1  ;;  %v1359_v45 = vrot.slane %v1242_v19, 2  ;;  %v1572_v62 = vmul.f32 %v17409_v9, %v931_v31  ;;  %v2724_v49 = vld [vmem:[#allocation3 + $0x78] sm:$0xff]  ;;  %v2726_v47 = vld [vmem:[#allocation3 + $0x88] sm:$0x3] }
 0x166   : > { %2692 = vst.msk [vmem:[#allocation3 + $0xc9] sm:$0xff] %vm389_vm2, %v2659_v46  ;;  %v1361_v56 = vrot.slane %v1243_v25, 2  ;;  %v1487_v42 = vmul.f32 %v17438_v51, %v756_v44  ;;  %v1685_v41 = vrot.slane %v1571_v59, 1  ;;  %v1817_v17 = vmul.f32 %v17415_v0, %v756_v44 }
 0x167   : > { %v2502_v58 = vrot.slane %v17588_v34, 2  ;;  %v1113_v20 = vsel %vm1060_vm4, %v1111_v26, %v1112_v54  ;;  %v1115_v2 = vsel %vm1060_vm4, %v1112_v54, %v1114_v6  ;;  %v1687_v60 = vrot.slane %v1572_v62, 1  ;;  %v2725_v34 = vld [vmem:[#allocation3 + $0x80] sm:$0xff]  ;;  %v761_v62 = vpop.permute.xlu1 %760 }
 0x168   : > { %v1193_v50 = vadd.f32 %v1113_v20, %v834_v61  ;;  %v1194_v24 = vadd.f32 %v1115_v2, %v835_v52  ;;  %v1519_v11 = vadd.f32 %v1487_v42, %v1439_v4  ;;  %v1686_v8 = vsel %vm1060_vm4, %v1684_v32, %v1685_v41 }
 0x169   : > { %v1360_v5 = vsel %vm1307_vm5, %v1358_v3, %v1359_v45  ;;  %v1769_v18 = vadd.f32 %v1686_v8, %v1518_v23  ;;  %v1818_v27 = vmul.f32 %v17415_v0, %v931_v31  ;;  %v1931_v28 = vrot.slane %v1817_v17, 2 }
 0x16a   : > { %v1362_v12 = vsel %vm1307_vm5, %v1359_v45, %v1361_v56  ;;  %v1440_v30 = vadd.f32 %v1360_v5, %v1193_v50  ;;  %v1688_v16 = vsel %vm1060_vm4, %v1685_v41, %v1687_v60  ;;  %v2062_v26 = vmul.f32 %v17488_v36, %v756_v44 }
 0x16b   : > { %v17616_v29 = vadd.f32 %v1362_v12, %v1194_v24  ;;  %v1933_v61 = vrot.slane %v1818_v27, 2  ;;  %v2145_v4 = vmul.f32 %v17494_v55, %v756_v44  ;;  %v2146_v32 = vmul.f32 %v17494_v55, %v931_v31  ;;  %v766_v27 = vpop.permute.xlu0 %765 }
 0x16c   : > { %v1932_v3 = vsel %vm1307_vm5, %v1930_v39, %v1931_v28  ;;  %v2094_v23 = vadd.f32 %v2062_v26, %v17575_v63  ;;  %v2391_v35 = vmul.f32 %v17502_v43, %v756_v44  ;;  %v2392_v38 = vmul.f32 %v17502_v43, %v931_v31 }
 0x16d   : > { %v1770_v19 = vadd.f32 %v1688_v16, %v1519_v11  ;;  %v2015_v46 = vadd.f32 %v1932_v3, %v1769_v18  ;;  %v2257_v52 = vrot.slane %v2145_v4, 1  ;;  %v2259_v25 = vrot.slane %v2146_v32, 1 }
 0x16e   : > { %v1934_v59 = vsel %vm1307_vm5, %v1931_v28, %v1933_v61  ;;  %v2503_v54 = vrot.slane %v2391_v35, 2  ;;  %v2505_v6 = vrot.slane %v2392_v38, 2  ;;  %v2910_v45 = vrot.slane %v2725_v34, 1 }
 0x16f   : > { %v2258_v39 = vsel %vm1060_vm4, %v2256_v57, %v2257_v52  ;;  %v2260_v63 = vsel %vm1060_vm4, %v2257_v52, %v2259_v25  ;;  %v2909_v56 = vrot.slane %v2724_v49, 1  ;;  %v2912_v44 = vrot.slane %v2726_v47, 1 }
 0x170   : > { %v2344_v42 = vadd.f32 %v2258_v39, %v2093_v40  ;;  %v2345_v31 = vadd.f32 %v2260_v63, %v2094_v23  ;;  %v2504_v41 = vsel %vm1307_vm5, %v2502_v58, %v2503_v54  ;;  %v2506_v17 = vsel %vm1307_vm5, %v2503_v54, %v2505_v6  ;;  %v936_v39 = vpop.permute.xlu1 %935 }
 0x171   : > { %v17630_v20 = vsel %vm1060_vm4, %v2909_v56, %v2910_v45  ;;  %v17633_v2 = vsel %vm1060_vm4, %v2910_v45, %v2912_v44  ;;  %v997_v60 = vmul.f32 %v17393_v10, %v761_v62  ;;  %v1244_v57 = vmul.f32 %v17399_v15, %v761_v62 }
 0x172   : > { %22008 = vst [vmem:[#allocation7_spill] sm:$0xff] %v17630_v20  ;;  %22009 = vst [vmem:[#allocation8_spill] sm:$0xff] %v17633_v2  ;;  %v2016_v50 = vadd.f32 %v1934_v59, %v1770_v19  ;;  %v2590_v24 = vadd.f32 %v2504_v41, %v2344_v42  ;;  %v2591_v11 = vadd.f32 %v2506_v17, %v2345_v31  ;;  %13449 = vmatprep.mubr.msk.f32.mxu0 %vm389_vm2, %v17630_v20 }
 0x173   : > { %v1573_v40 = vmul.f32 %v17409_v9, %v761_v62  ;;  %13450 = vmatmul.mubr.msk.f32.gmra.mrb[10].mxu0 %vm389_vm2, %v17633_v2  ;;  %v836_v58 = vmul.f32 %v17446_v1, %v761_v62  ;;  %v1116_v8 = vrot.slane %v997_v60, 1  ;;  %v1488_v5 = vmul.f32 %v17438_v51, %v761_v62 }
 0x174   : > { %v1819_v18 = vmul.f32 %v17415_v0, %v761_v62  ;;  %v2628_v28 = vadd.f32 %v17533_v37, %v2590_v24  ;;  %v2629_v12 = vadd.f32 %v17533_v37, %v2591_v11  ;;  %v1363_v16 = vrot.slane %v1244_v57, 2 }
 0x175   : > { %v2063_v26 = vmul.f32 %v17488_v36, %v761_v62  ;;  %v1520_v61 = vadd.f32 %v1488_v5, %v1440_v30  ;;  %v1689_v4 = vrot.slane %v1573_v40, 1  ;;  %v2147_v34 = vmul.f32 %v17494_v55, %v761_v62 }
 0x176   : > { %v1935_v32 = vrot.slane %v1819_v18, 2  ;;  %v2660_v3 = vmax.f32 %v2628_v28, 0.0  ;;  %v2661_v23 = vmax.f32 %v2629_v12, 0.0  ;;  %v2393_v35 = vmul.f32 %v17502_v43, %v761_v62 }
 0x177   : > { %v998_v38 = vmul.f32 %v17393_v10, %v766_v27  ;;  %v2095_v49 = vadd.f32 %v2063_v26, %v2015_v46  ;;  %v2261_v47 = vrot.slane %v2147_v34, 1  ;;  %v837_v19 = vmul.f32 %v17446_v1, %v766_v27 }
 0x178   : > { %v1245_v52 = vmul.f32 %v17399_v15, %v766_v27  ;;  %2693 = vst.msk [vmem:[#allocation3 + $0xd9] sm:$0xff] %vm389_vm2, %v2660_v3  ;;  %2694 = vst.msk [vmem:[#allocation3 + $0xe1] sm:$0xff] %vm389_vm2, %v2661_v23  ;;  %v1489_v25 = vmul.f32 %v17438_v51, %v766_v27  ;;  %v1574_v59 = vmul.f32 %v17409_v9, %v766_v27  ;;  %v2507_v63 = vrot.slane %v2393_v35, 2  ;;  %v2727_v3 = vld [vmem:[#allocation3 + $0x90] sm:$0xff] }
 0x179   : > { %v1117_v30 = vrot.slane %v998_v38, 1  ;;  %v1820_v54 = vmul.f32 %v17415_v0, %v766_v27  ;;  %v2064_v45 = vmul.f32 %v17488_v36, %v766_v27  ;;  %v2148_v46 = vmul.f32 %v17494_v55, %v766_v27 }
 0x17a   : > { %v1364_v6 = vrot.slane %v1245_v52, 2  ;;  %v2394_v62 = vmul.f32 %v17502_v43, %v766_v27  ;;  %v1690_v44 = vrot.slane %v1574_v59, 1  ;;  %v1521_v31 = vadd.f32 %v1489_v25, %v17616_v29  ;;  %v771_v25 = vpop.permute.xlu0 %770 }
 0x17b   : > { %v1118_v56 = vsel %vm1060_vm4, %v1116_v8, %v1117_v30  ;;  %v1936_v42 = vrot.slane %v1820_v54, 2  ;;  %v2096_v41 = vadd.f32 %v2064_v45, %v2016_v50  ;;  %v2262_v17 = vrot.slane %v2148_v46, 1 }
 0x17c   : > { %v2508_v60 = vrot.slane %v2394_v62, 2  ;;  %v1195_v57 = vadd.f32 %v1118_v56, %v836_v58  ;;  %v1691_v24 = vsel %vm1060_vm4, %v1689_v4, %v1690_v44  ;;  %v999_v11 = vmul.f32 %v17393_v10, %v936_v39 }
 0x17d   : > { %v1246_v40 = vmul.f32 %v17399_v15, %v936_v39  ;;  %v1365_v5 = vsel %vm1307_vm5, %v1363_v16, %v1364_v6  ;;  %v1771_v18 = vadd.f32 %v1691_v24, %v1520_v61  ;;  %v1937_v27 = vsel %vm1307_vm5, %v1935_v32, %v1936_v42  ;;  %v2728_v16 = vld [vmem:[#allocation3 + $0x98] sm:$0xff] }
 0x17e   : > { %v2263_v8 = vsel %vm1060_vm4, %v2261_v47, %v2262_v17  ;;  %v2509_v29 = vsel %vm1307_vm5, %v2507_v63, %v2508_v60  ;;  %v1119_v50 = vrot.slane %v999_v11, 1  ;;  %v1575_v12 = vmul.f32 %v17409_v9, %v936_v39 }
 0x17f   : > { %v2346_v28 = vadd.f32 %v2263_v8, %v2095_v49  ;;  %v1366_v58 = vrot.slane %v1246_v40, 2  ;;  %v1821_v26 = vmul.f32 %v17415_v0, %v936_v39  ;;  %v2149_v4 = vmul.f32 %v17494_v55, %v936_v39 }
 0x180   : > { %v2395_v34 = vmul.f32 %v17502_v43, %v936_v39  ;;  %v1442_v61 = vadd.f32 %v1365_v5, %v1195_v57  ;;  %v1120_v32 = vsel %vm1060_vm4, %v1117_v30, %v1119_v50  ;;  %v1692_v35 = vrot.slane %v1575_v12, 1 }
 0x181   : > { %v2592_v23 = vadd.f32 %v2509_v29, %v2346_v28  ;;  %v1196_v38 = vadd.f32 %v1120_v32, %v837_v19  ;;  %v1938_v49 = vrot.slane %v1821_v26, 2  ;;  %v2264_v47 = vrot.slane %v2149_v4, 1  ;;  %v776_v28 = vpop.permute.xlu1 %775  ;;  %v941_v29 = vpop.permute.xlu0 %940 }
 0x182   : > { %v2510_v52 = vrot.slane %v2395_v34, 2  ;;  %v1693_v54 = vsel %vm1060_vm4, %v1690_v44, %v1692_v35  ;;  %v2914_v45 = vrot.slane %v2727_v3, 1  ;;  %v2915_v46 = vrot.slane %v2728_v16, 1 }
 0x183   : > { %v2630_v59 = vadd.f32 %v17533_v37, %v2592_v23  ;;  %v2017_v62 = vadd.f32 %v1937_v27, %v1771_v18  ;;  %v1367_v39 = vsel %vm1307_vm5, %v1364_v6, %v1366_v58  ;;  %v1772_v63 = vadd.f32 %v1693_v54, %v1521_v31  ;;  %v2729_v18 = vld [vmem:[#allocation3 + $0xa0] sm:$0x3] }
 0x184   : > { %v2265_v56 = vsel %vm1060_vm4, %v2262_v17, %v2264_v47  ;;  %v1443_v30 = vadd.f32 %v1367_v39, %v1196_v38  ;;  %v17680_v19 = vsel %vm1060_vm4, %v2914_v45, %v2915_v46  ;;  %v1939_v11 = vsel %vm1307_vm5, %v1936_v42, %v1938_v49 }
 0x185   : > { %v2662_v57 = vmax.f32 %v2630_v59, 0.0  ;;  %v2347_v24 = vadd.f32 %v2265_v56, %v2096_v41  ;;  %22010 = vst [vmem:[#allocation9_spill] sm:$0xff] %v17680_v19  ;;  %v2511_v40 = vsel %vm1307_vm5, %v2508_v60, %v2510_v52  ;;  %13452 = vmatprep.mubr.msk.f32.mxu0 %vm389_vm2, %v17680_v19  ;;  %v1000_v44 = vmul.f32 %v17393_v10, %v771_v25 }
 0x186   : > { %v1247_v6 = vmul.f32 %v17399_v15, %v771_v25  ;;  %v1490_v17 = vmul.f32 %v17438_v51, %v771_v25  ;;  %v1576_v41 = vmul.f32 %v17409_v9, %v771_v25  ;;  %v1822_v5 = vmul.f32 %v17415_v0, %v771_v25 }
 0x187   : > { %2695 = vst.msk [vmem:[#allocation3 + $0xf1] sm:$0xff] %vm389_vm2, %v2662_v57  ;;  %v2593_v31 = vadd.f32 %v2511_v40, %v2347_v24  ;;  %v2018_v42 = vadd.f32 %v1939_v11, %v1772_v63  ;;  %v838_v60 = vmul.f32 %v17446_v1, %v771_v25  ;;  %v1121_v27 = vrot.slane %v1000_v44, 1 }
 0x188   : > { %v2065_v8 = vmul.f32 %v17488_v36, %v771_v25  ;;  %v1368_v12 = vrot.slane %v1247_v6, 2  ;;  %v1522_v58 = vadd.f32 %v1490_v17, %v1442_v61  ;;  %v2150_v26 = vmul.f32 %v17494_v55, %v771_v25 }
 0x189   : > { %v2631_v50 = vadd.f32 %v17533_v37, %v2593_v31  ;;  %v1694_v4 = vrot.slane %v1576_v41, 1  ;;  %v1940_v34 = vrot.slane %v1822_v5, 2  ;;  %v2917_v16 = vrot.slane %v2729_v18, 1 }
 0x18a   : > { %v17696_v3 = vadd.f32 %v2065_v8, %v2017_v62  ;;  %v17699_v32 = vmul.f32 %v17502_v43, %v771_v25  ;;  %v1001_v35 = vmul.f32 %v17393_v10, %v776_v28  ;;  %v1002_v38 = vmul.f32 %v17393_v10, %v941_v29 }
 0x18b   : > { %v2663_v23 = vmax.f32 %v2631_v50, 0.0  ;;  %v17704_v49 = vsel %vm1060_vm4, %v2915_v46, %v2917_v16  ;;  %v839_v61 = vmul.f32 %v17446_v1, %v776_v28  ;;  %v1248_v47 = vmul.f32 %v17399_v15, %v776_v28 }
 0x18c   : > { %22011 = vst [vmem:[#allocation10_spill] sm:$0xff] %v17704_v49  ;;  %v1249_v52 = vmul.f32 %v17399_v15, %v941_v29  ;;  %13453 = vmatmul.mubr.msk.f32.gmra.mrb[12].mxu0 %vm389_vm2, %v17704_v49  ;;  %v1122_v25 = vrot.slane %v1001_v35, 1  ;;  %v1124_v59 = vrot.slane %v1002_v38, 1  ;;  %v1491_v54 = vmul.f32 %v17438_v51, %v776_v28 }
 0x18d   : > { %2696 = vst.msk [vmem:[#allocation3 + $0xf9] sm:$0xff] %vm389_vm2, %v2663_v23  ;;  %v1577_v45 = vmul.f32 %v17409_v9, %v776_v28  ;;  %v1369_v62 = vrot.slane %v1248_v47, 2  ;;  %v1578_v39 = vmul.f32 %v17409_v9, %v941_v29  ;;  %v1823_v63 = vmul.f32 %v17415_v0, %v776_v28  ;;  %v2732_v47 = vld [vmem:[#allocation3 + $0xb8] sm:$0x3] }
 0x18e   : > { %v1371_v46 = vrot.slane %v1249_v52, 2  ;;  %v2266_v56 = vrot.slane %v2150_v26, 1  ;;  %v1123_v57 = vsel %vm1060_vm4, %v1121_v27, %v1122_v25  ;;  %v1125_v24 = vsel %vm1060_vm4, %v1122_v25, %v1124_v59 }
 0x18f   : > { %v1695_v11 = vrot.slane %v1577_v45, 1  ;;  %v1197_v40 = vadd.f32 %v1123_v57, %v838_v60  ;;  %v1198_v44 = vadd.f32 %v1125_v24, %v839_v61  ;;  %v1370_v6 = vsel %vm1307_vm5, %v1368_v12, %v1369_v62  ;;  %v17728_v12 = vld [vmem:[#allocation3 + $0xa8] sm:$0xff]  ;;  %v781_v24 = vpop.permute.xlu1 %780 }
 0x190   : > { %v1523_v31 = vadd.f32 %v1491_v54, %v1443_v30  ;;  %v1697_v41 = vrot.slane %v1578_v39, 1  ;;  %v1824_v5 = vmul.f32 %v17415_v0, %v941_v29  ;;  %v1941_v18 = vrot.slane %v1823_v63, 2 }
 0x191   : > { %v1696_v17 = vsel %vm1060_vm4, %v1694_v4, %v1695_v11  ;;  %v2512_v8 = vrot.slane %v17699_v32, 2  ;;  %v1372_v50 = vsel %vm1307_vm5, %v1369_v62, %v1371_v46  ;;  %v1444_v26 = vadd.f32 %v1370_v6, %v1197_v40  ;;  %v17730_v4 = vld [vmem:[#allocation3 + $0xb0] sm:$0xff] }
 0x192   : > { %v1773_v27 = vadd.f32 %v1696_v17, %v1522_v58  ;;  %v17723_v16 = vadd.f32 %v1372_v50, %v1198_v44  ;;  %v1698_v60 = vsel %vm1060_vm4, %v1695_v11, %v1697_v41  ;;  %v2066_v23 = vmul.f32 %v17488_v36, %v776_v28 }
 0x193   : > { %v2151_v30 = vmul.f32 %v17494_v55, %v776_v28  ;;  %v1774_v35 = vadd.f32 %v1698_v60, %v1523_v31  ;;  %v1942_v38 = vsel %vm1307_vm5, %v1940_v34, %v1941_v18  ;;  %v1943_v32 = vrot.slane %v1824_v5, 2 }
 0x194   : > { %v2152_v61 = vmul.f32 %v17494_v55, %v941_v29  ;;  %v2098_v58 = vadd.f32 %v2066_v23, %v2018_v42  ;;  %v2397_v25 = vmul.f32 %v17502_v43, %v776_v28  ;;  %v2398_v59 = vmul.f32 %v17502_v43, %v941_v29 }
 0x195   : > { %v2267_v52 = vrot.slane %v2151_v30, 1  ;;  %v2019_v54 = vadd.f32 %v1942_v38, %v1773_v27  ;;  %v2919_v62 = vrot.slane %v17728_v12, 1  ;;  %v2920_v46 = vrot.slane %v17730_v4, 1 }
 0x196   : > { %v2269_v45 = vrot.slane %v2152_v61, 1  ;;  %v2513_v63 = vrot.slane %v2397_v25, 2  ;;  %v2515_v34 = vrot.slane %v2398_v59, 2  ;;  %v2922_v57 = vrot.slane %v2732_v47, 1 }
 0x197   : > { %v2268_v39 = vsel %vm1060_vm4, %v2266_v56, %v2267_v52  ;;  %v1944_v11 = vsel %vm1307_vm5, %v1941_v18, %v1943_v32  ;;  %v17743_v29 = vsel %vm1060_vm4, %v2919_v62, %v2920_v46  ;;  %v1250_v41 = vmul.f32 %v17399_v15, %v781_v24 }
 0x198   : > { %v2270_v42 = vsel %vm1060_vm4, %v2267_v52, %v2269_v45  ;;  %v2348_v28 = vadd.f32 %v2268_v39, %v17696_v3  ;;  %22012 = vst [vmem:[#allocation11_spill] sm:$0xff] %v17743_v29  ;;  %v2020_v40 = vadd.f32 %v1944_v11, %v1774_v35  ;;  %v2514_v6 = vsel %vm1307_vm5, %v2512_v8, %v2513_v63  ;;  %v786_v35 = vpop.permute.xlu0 %785  ;;  %v946_v11 = vpop.permute.xlu1 %945 }
 0x199   : > { %v2349_v44 = vadd.f32 %v2270_v42, %v2098_v58  ;;  %13455 = vmatprep.mubr.msk.f32.mxu0 %vm389_vm2, %v17743_v29  ;;  %v17749_v56 = vsel %vm1060_vm4, %v2920_v46, %v2922_v57  ;;  %v2516_v31 = vsel %vm1307_vm5, %v2513_v63, %v2515_v34  ;;  %v1003_v3 = vmul.f32 %v17393_v10, %v781_v24 }
 0x19a   : > { %22013 = vst [vmem:[#allocation12_spill] sm:$0xff] %v17749_v56  ;;  %v2594_v17 = vadd.f32 %v2514_v6, %v2348_v28  ;;  %13456 = vmatmul.mubr.msk.f32.gmra.mrb[14].mxu0 %vm389_vm2, %v17749_v56  ;;  %v1492_v18 = vmul.f32 %v17438_v51, %v781_v24  ;;  %v1579_v8 = vmul.f32 %v17409_v9, %v781_v24  ;;  %v1373_v32 = vrot.slane %v1250_v41, 2 }
 0x19b   : > { %v2595_v5 = vadd.f32 %v2516_v31, %v2349_v44  ;;  %v1825_v50 = vmul.f32 %v17415_v0, %v781_v24  ;;  %v840_v60 = vmul.f32 %v17446_v1, %v781_v24  ;;  %v1126_v23 = vrot.slane %v1003_v3, 1 }
 0x19c   : > { %v2632_v27 = vadd.f32 %v17533_v37, %v2594_v17  ;;  %v2067_v30 = vmul.f32 %v17488_v36, %v781_v24  ;;  %v1524_v61 = vadd.f32 %v1492_v18, %v1444_v26  ;;  %v1699_v47 = vrot.slane %v1579_v8, 1 }
 0x19d   : > { %v2633_v38 = vadd.f32 %v17533_v37, %v2595_v5  ;;  %v1945_v52 = vrot.slane %v1825_v50, 2  ;;  %v2153_v25 = vmul.f32 %v17494_v55, %v781_v24  ;;  %v2399_v59 = vmul.f32 %v17502_v43, %v781_v24  ;;  %v17789_v50 = vld [vmem:[%s21857_s1 + $0x2] ss:$0 sm:$0xff] }
 0x19e   : > { %v2664_v58 = vmax.f32 %v2632_v27, 0.0  ;;  %v2099_v62 = vadd.f32 %v2067_v30, %v2019_v54  ;;  %v1004_v46 = vmul.f32 %v17393_v10, %v786_v35  ;;  %v1251_v39 = vmul.f32 %v17399_v15, %v786_v35 }
 0x19f   : > { %v2665_v45 = vmax.f32 %v2633_v38, 0.0  ;;  %v841_v63 = vmul.f32 %v17446_v1, %v786_v35  ;;  %v1493_v34 = vmul.f32 %v17438_v51, %v786_v35  ;;  %v1580_v26 = vmul.f32 %v17409_v9, %v786_v35 }
 0x1a0   : > { %2697 = vst.msk [vmem:[#allocation3 + $0x109] sm:$0xff] %vm389_vm2, %v2664_v58  ;;  %v1826_v57 = vmul.f32 %v17415_v0, %v786_v35  ;;  %v2271_v24 = vrot.slane %v2153_v25, 1  ;;  %v2517_v42 = vrot.slane %v2399_v59, 2  ;;  %v1127_v54 = vrot.slane %v1004_v46, 1  ;;  %v17781_v0 = vld [vmem:[%s21857_s1 + $0x1] ss:$0 sm:$0xff] }
 0x1a1   : > { %2698 = vst.msk [vmem:[#allocation3 + $0x111] sm:$0xff] %vm389_vm2, %v2665_v45  ;;  %v1374_v28 = vrot.slane %v1251_v39, 2  ;;  %v1525_v10 = vadd.f32 %v1493_v34, %v17723_v16  ;;  %v1700_v15 = vrot.slane %v1580_v26, 1  ;;  %v2154_v44 = vmul.f32 %v17494_v55, %v786_v35  ;;  %v17807_v25 = vld [vmem:[#allocation3 + $0xc0] sm:$0xff]  ;;  %v17809_v59 = vld [vmem:[#allocation3 + $0xc8] sm:$0xff] }
 0x1a2   : > { %v2400_v1 = vmul.f32 %v17502_v43, %v786_v35  ;;  %v1128_v51 = vsel %vm1060_vm4, %v1126_v23, %v1127_v54  ;;  %v1946_v6 = vrot.slane %v1826_v57, 2  ;;  %v2068_v9 = vmul.f32 %v17488_v36, %v786_v35 }
 0x1a3   : > { %v1005_v31 = vmul.f32 %v17781_v0, %v946_v11  ;;  %v1199_v17 = vadd.f32 %v1128_v51, %v840_v60  ;;  %v1375_v16 = vsel %vm1307_vm5, %v1373_v32, %v1374_v28  ;;  %v1701_v3 = vsel %vm1060_vm4, %v1699_v47, %v1700_v15  ;;  %v17796_v60 = vld [vmem:[%s21857_s1 + $0x4] ss:$0 sm:$0xff] }
 0x1a4   : > { %v2272_v41 = vrot.slane %v2154_v44, 1  ;;  %v2100_v5 = vadd.f32 %v2068_v9, %v2020_v40  ;;  %v2518_v18 = vrot.slane %v2400_v1, 2  ;;  %v1252_v27 = vmul.f32 %v17789_v50, %v946_v11  ;;  %v17802_v40 = vld [vmem:[%s21857_s1 + $0x5] ss:$0 sm:$0xff]  ;;  %v791_v1 = vpop.permute.xlu0 %790 }
 0x1a5   : > { %v1129_v8 = vrot.slane %v1005_v31, 1  ;;  %v1775_v23 = vadd.f32 %v1701_v3, %v1524_v61  ;;  %v1581_v35 = vmul.f32 %v17796_v60, %v946_v11  ;;  %v1827_v38 = vmul.f32 %v17802_v40, %v946_v11 }
 0x1a6   : > { %v2273_v30 = vsel %vm1060_vm4, %v2271_v24, %v2272_v41  ;;  %v1446_v32 = vadd.f32 %v1375_v16, %v1199_v17  ;;  %v1947_v47 = vsel %vm1307_vm5, %v1945_v52, %v1946_v6  ;;  %v2519_v45 = vsel %vm1307_vm5, %v2517_v42, %v2518_v18 }
 0x1a7   : > { %v2350_v61 = vadd.f32 %v2273_v30, %v2099_v62  ;;  %v1130_v58 = vsel %vm1060_vm4, %v1127_v54, %v1129_v8  ;;  %v1376_v46 = vrot.slane %v1252_v27, 2  ;;  %v1702_v39 = vrot.slane %v1581_v35, 1  ;;  %v17836_v30 = vld [vmem:[%s21857_s1] ss:$0 sm:$0xff] }
 0x1a8   : > { %v1948_v34 = vrot.slane %v1827_v38, 2  ;;  %v1200_v57 = vadd.f32 %v1130_v58, %v841_v63  ;;  %v2155_v24 = vmul.f32 %v17494_v55, %v946_v11  ;;  %v2401_v44 = vmul.f32 %v17502_v43, %v946_v11  ;;  %v17841_v38 = vld [vmem:[#allocation3 + $0xd0] sm:$0x3]  ;;  %v18091_v20 = vld [vmem:[#allocation3 + $0x118] sm:$0x3] }
 0x1a9   : > { %v2596_v26 = vadd.f32 %v2519_v45, %v2350_v61  ;;  %v2021_v52 = vadd.f32 %v1947_v47, %v1775_v23  ;;  %v1703_v62 = vsel %vm1060_vm4, %v1700_v15, %v1702_v39  ;;  %v2924_v54 = vrot.slane %v17807_v25, 1  ;;  %v17911_v45 = vld [vmem:[#allocation3 + $0xe8] sm:$0x3] }
 0x1aa   : > { %v2925_v51 = vrot.slane %v17809_v59, 1  ;;  %v1377_v42 = vsel %vm1307_vm5, %v1374_v28, %v1376_v46  ;;  %v1776_v31 = vadd.f32 %v1703_v62, %v1525_v10  ;;  %v2274_v17 = vrot.slane %v2155_v24, 1 }
 0x1ab   : > { %v2634_v9 = vadd.f32 %v17533_v37, %v2596_v26  ;;  %v1949_v63 = vsel %vm1307_vm5, %v1946_v6, %v1948_v34  ;;  %v2520_v16 = vrot.slane %v2401_v44, 2  ;;  %v17824_v11 = vmul.f32 %v17781_v0, %v791_v1  ;;  %v796_v34 = vpop.permute.xlu1 %795  ;;  %v951_v26 = vpop.permute.xlu0 %950 }
 0x1ac   : > { %v17821_v3 = vsel %vm1060_vm4, %v2924_v54, %v2925_v51  ;;  %v1447_v8 = vadd.f32 %v1377_v42, %v1200_v57  ;;  %v2275_v27 = vsel %vm1060_vm4, %v2272_v41, %v2274_v17  ;;  %v17830_v28 = vmul.f32 %v17789_v50, %v791_v1 }
 0x1ad   : > { %22014 = vst [vmem:[#allocation13_spill] sm:$0xff] %v17821_v3  ;;  %v2666_v15 = vmax.f32 %v2634_v9, 0.0  ;;  %13458 = vmatprep.mubr.msk.f32.mxu0 %vm389_vm2, %v17821_v3  ;;  %v2022_v10 = vadd.f32 %v1949_v63, %v1776_v31  ;;  %v2351_v23 = vadd.f32 %v2275_v27, %v2100_v5  ;;  %v2521_v6 = vsel %vm1307_vm5, %v2518_v18, %v2520_v16  ;;  %v17848_v5 = vld [vmem:[%s21857_s1 + $0x3] ss:$0 sm:$0xff] }
 0x1ae   : > { %v17839_v35 = vmul.f32 %v17836_v30, %v791_v1  ;;  %v1494_v18 = vmul.f32 %v17848_v5, %v791_v1  ;;  %v1582_v47 = vmul.f32 %v17796_v60, %v791_v1  ;;  %v1828_v61 = vmul.f32 %v17802_v40, %v791_v1 }
 0x1af   : > { %2699 = vst.msk [vmem:[#allocation3 + $0x121] sm:$0xff] %vm389_vm2, %v2666_v15  ;;  %v2597_v58 = vadd.f32 %v2521_v6, %v2351_v23  ;;  %v2069_v46 = vmul.f32 %v17488_v36, %v791_v1  ;;  %v17856_v39 = vmul.f32 %v17494_v55, %v791_v1  ;;  %v17859_v44 = vmul.f32 %v17502_v43, %v791_v1  ;;  %v17931_v56 = vpop.permute.xlu0 %805 }
 0x1b0   : > { %v1526_v57 = vadd.f32 %v1494_v18, %v1446_v32  ;;  %v1704_v24 = vrot.slane %v1582_v47, 1  ;;  %v2927_v62 = vrot.slane %v17841_v38, 1  ;;  %v1950_v9 = vrot.slane %v1828_v61, 2 }
 0x1b1   : > { %v2635_v54 = vadd.f32 %v17533_v37, %v2597_v58  ;;  %v2101_v42 = vadd.f32 %v2069_v46, %v2021_v52  ;;  %v2276_v31 = vrot.slane %v17856_v39, 1  ;;  %v17868_v55 = vmul.f32 %v17781_v0, %v796_v34 }
 0x1b2   : > { %v17865_v36 = vsel %vm1060_vm4, %v2925_v51, %v2927_v62  ;;  %v1008_v32 = vmul.f32 %v17781_v0, %v951_v26  ;;  %v17872_v17 = vmul.f32 %v17789_v50, %v796_v34  ;;  %v1255_v37 = vmul.f32 %v17789_v50, %v951_v26 }
 0x1b3   : > { %22015 = vst [vmem:[#allocation14_spill] sm:$0xff] %v17865_v36  ;;  %v2667_v43 = vmax.f32 %v2635_v54, 0.0  ;;  %13459 = vmatmul.mubr.msk.f32.gmra.mrb[16].mxu0 %vm389_vm2, %v17865_v36  ;;  %v1495_v1 = vmul.f32 %v17848_v5, %v796_v34  ;;  %v1583_v52 = vmul.f32 %v17796_v60, %v796_v34  ;;  %v843_v51 = vmul.f32 %v17836_v30, %v796_v34 }
 0x1b4   : > { %v21867_v63 = vrot.slane %v17868_v55, 1  ;;  %v1134_v16 = vrot.slane %v1008_v32, 1  ;;  %v1584_v15 = vmul.f32 %v17796_v60, %v951_v26  ;;  %v1381_v27 = vrot.slane %v1255_v37, 2 }
 0x1b5   : > { %2700 = vst.msk [vmem:[#allocation3 + $0x129] sm:$0xff] %vm389_vm2, %v2667_v43  ;;  %v1527_v23 = vadd.f32 %v1495_v1, %v1447_v8  ;;  %v1705_v6 = vrot.slane %v1583_v52, 1  ;;  %v1829_v18 = vmul.f32 %v17802_v40, %v796_v34  ;;  %v21866_v61 = vrot.slane %v17872_v17, 2  ;;  %v17893_v8 = vld [vmem:[%s21857_s1 + $0x6] ss:$0 sm:$0xff] }
 0x1b6   : > { %v1135_v47 = vsel %vm1060_vm4, %v21867_v63, %v1134_v16  ;;  %v1707_v58 = vrot.slane %v1584_v15, 1  ;;  %v1830_v46 = vmul.f32 %v17802_v40, %v951_v26  ;;  %v2070_v32 = vmul.f32 %v17893_v8, %v796_v34 }
 0x1b7   : > { %v1202_v39 = vadd.f32 %v1135_v47, %v843_v51  ;;  %v1706_v62 = vsel %vm1060_vm4, %v1704_v24, %v1705_v6  ;;  %v1951_v54 = vrot.slane %v1829_v18, 2  ;;  %v2522_v43 = vrot.slane %v17859_v44, 2  ;;  %v17901_v51 = vld [vmem:[#allocation3 + $0xd8] sm:$0xff]  ;;  %v17906_v18 = vld [vmem:[%s21857_s1 + $0x7] ss:$0 sm:$0xff]  ;;  %v17909_v44 = vld [vmem:[#allocation3 + $0xe0] sm:$0xff] }
 0x1b8   : > { %v1382_v37 = vsel %vm1307_vm5, %v21866_v61, %v1381_v27  ;;  %v1708_v1 = vsel %vm1060_vm4, %v1705_v6, %v1707_v58  ;;  %v1953_v52 = vrot.slane %v1830_v46, 2  ;;  %v1777_v24 = vadd.f32 %v1706_v62, %v1526_v57  ;;  %v17913_v27 = vpop.permute.xlu1 %800 }
 0x1b9   : > { %v1778_v16 = vadd.f32 %v1708_v1, %v1527_v23  ;;  %v2102_v15 = vadd.f32 %v2070_v32, %v2022_v10  ;;  %v2157_v47 = vmul.f32 %v17906_v18, %v796_v34  ;;  %v17915_v6 = vadd.f32 %v1382_v37, %v1202_v39  ;;  %v17922_v10 = vld [vmem:[%s21857_s1 + $0x8] ss:$0 sm:$0xff] }
 0x1ba   : > { %v1952_v58 = vsel %vm1307_vm5, %v1950_v9, %v1951_v54  ;;  %v2158_v57 = vmul.f32 %v17906_v18, %v951_v26  ;;  %v2403_v23 = vmul.f32 %v17922_v10, %v796_v34  ;;  %v1954_v46 = vsel %vm1307_vm5, %v1951_v54, %v1953_v52 }
 0x1bb   : > { %v2277_v62 = vrot.slane %v2157_v47, 1  ;;  %v2404_v32 = vmul.f32 %v17922_v10, %v951_v26  ;;  %v2929_v1 = vrot.slane %v17901_v51, 1  ;;  %v2930_v9 = vrot.slane %v17909_v44, 1 }
 0x1bc   : > { %v2279_v39 = vrot.slane %v2158_v57, 1  ;;  %v2523_v37 = vrot.slane %v2403_v23, 2  ;;  %v2932_v61 = vrot.slane %v17911_v45, 1  ;;  %v2023_v41 = vadd.f32 %v1952_v58, %v1777_v24 }
 0x1bd   : > { %v2024_v63 = vadd.f32 %v1954_v46, %v1778_v16  ;;  %v2278_v36 = vsel %vm1060_vm4, %v2276_v31, %v2277_v62  ;;  %v2525_v3 = vrot.slane %v2404_v32, 2  ;;  %v17935_v26 = vsel %vm1060_vm4, %v2929_v1, %v2930_v9  ;;  %v956_v16 = vpop.permute.xlu1 %955 }
 0x1be   : > { %v2280_v34 = vsel %vm1060_vm4, %v2277_v62, %v2279_v39  ;;  %v2352_v54 = vadd.f32 %v2278_v36, %v2101_v42  ;;  %22016 = vst [vmem:[#allocation15_spill] sm:$0xff] %v17935_v26  ;;  %v2159_v52 = vmul.f32 %v17906_v18, %v17913_v27  ;;  %v2524_v57 = vsel %vm1307_vm5, %v2522_v43, %v2523_v37 }
 0x1bf   : > { %v2353_v47 = vadd.f32 %v2280_v34, %v2102_v15  ;;  %13461 = vmatprep.mubr.msk.f32.mxu0 %vm389_vm2, %v17935_v26  ;;  %v17943_v31 = vsel %vm1060_vm4, %v2930_v9, %v2932_v61  ;;  %v2071_v24 = vmul.f32 %v17893_v8, %v17913_v27  ;;  %v2526_v42 = vsel %vm1307_vm5, %v2523_v37, %v2525_v3  ;;  %v17963_v3 = vld [vmem:[%s21858_s2] ss:$0 sm:$0xff] }
 0x1c0   : > { %22017 = vst [vmem:[#allocation16_spill] sm:$0xff] %v17943_v31  ;;  %v2598_v36 = vadd.f32 %v2524_v57, %v2352_v54  ;;  %13462 = vmatmul.mubr.msk.f32.gmra.mrb[18].mxu0 %vm389_vm2, %v17943_v31  ;;  %v2405_v15 = vmul.f32 %v17922_v10, %v17913_v27  ;;  %v17954_v43 = vmul.f32 %v17796_v60, %v17931_v56  ;;  %v2281_v32 = vrot.slane %v2159_v52, 1  ;;  %v17977_v52 = vld [vmem:[#allocation3 + $0xf0] sm:$0xff] }
 0x1c1   : > { %v2599_v58 = vadd.f32 %v2526_v42, %v2353_v47  ;;  %v2103_v61 = vadd.f32 %v2071_v24, %v2023_v41  ;;  %v2160_v23 = vmul.f32 %v17906_v18, %v17931_v56  ;;  %v2406_v46 = vmul.f32 %v17922_v10, %v17931_v56  ;;  %v17979_v42 = vld [vmem:[#allocation3 + $0xf8] sm:$0xff] }
 0x1c2   : > { %v2636_v62 = vadd.f32 %v17963_v3, %v2598_v36  ;;  %v2072_v1 = vmul.f32 %v17893_v8, %v17931_v56  ;;  %v17969_v39 = vmul.f32 %v17781_v0, %v956_v16  ;;  %v2527_v37 = vrot.slane %v2405_v15, 2 }
 0x1c3   : > { %v2637_v41 = vadd.f32 %v17963_v3, %v2599_v58  ;;  %v2282_v9 = vrot.slane %v2160_v23, 1  ;;  %v2528_v34 = vrot.slane %v2406_v46, 2  ;;  %v1710_v47 = vrot.slane %v17954_v43, 1 }
 0x1c4   : > { %v2668_v54 = vmax.f32 %v2636_v62, 0.0  ;;  %v17974_v57 = vmul.f32 %v17789_v50, %v956_v16  ;;  %v1587_v24 = vmul.f32 %v17796_v60, %v956_v16  ;;  %v2104_v31 = vadd.f32 %v2072_v1, %v2024_v63 }
 0x1c5   : > { %v2669_v36 = vmax.f32 %v2637_v41, 0.0  ;;  %v2283_v26 = vsel %vm1060_vm4, %v2281_v32, %v2282_v9  ;;  %v17983_v15 = vmul.f32 %v17802_v40, %v956_v16  ;;  %v2161_v46 = vmul.f32 %v17906_v18, %v956_v16 }
 0x1c6   : > { %2701 = vst.msk [vmem:[#allocation3 + $0x139] sm:$0xff] %vm389_vm2, %v2668_v54  ;;  %v2354_v58 = vadd.f32 %v2283_v26, %v2103_v61  ;;  %v1712_v23 = vrot.slane %v1587_v24, 1  ;;  %v2529_v62 = vsel %vm1307_vm5, %v2527_v37, %v2528_v34  ;;  %v2407_v41 = vmul.f32 %v17922_v10, %v956_v16  ;;  %v1455_v37 = vpop.permute.xlu0 %1454 }
 0x1c7   : > { %2702 = vst.msk [vmem:[#allocation3 + $0x141] sm:$0xff] %vm389_vm2, %v2669_v36  ;;  %v2934_v63 = vrot.slane %v17977_v52, 1  ;;  %v2935_v32 = vrot.slane %v17979_v42, 1  ;;  %v2284_v61 = vrot.slane %v2161_v46, 1  ;;  %v18000_v36 = vmul.f32 %v17802_v40, %v17931_v56 }
 0x1c8   : > { %v2600_v1 = vadd.f32 %v2529_v62, %v2354_v58  ;;  %v2530_v54 = vrot.slane %v2407_v41, 2  ;;  %v22019_v16 = vrot.slane %v17868_v55, 1  ;;  %v22020_v43 = vrot.slane %v17824_v11, 1 }
 0x1c9   : > { %v17996_v24 = vsel %vm1060_vm4, %v2934_v63, %v2935_v32  ;;  %v18009_v29 = vsel %vm1060_vm4, %v1710_v47, %v1712_v23  ;;  %v2285_v46 = vsel %vm1060_vm4, %v2282_v9, %v2284_v61  ;;  %v22021_v55 = vrot.slane %v17872_v17, 2 }
 0x1ca   : > { %22018 = vst [vmem:[#allocation17_spill] sm:$0xff] %v17996_v24  ;;  %v1133_v58 = vsel %vm1060_vm4, %v22020_v43, %v22019_v16  ;;  %v2638_v62 = vadd.f32 %v17963_v3, %v2600_v1  ;;  %13464 = vmatprep.mubr.msk.f32.mxu0 %vm389_vm2, %v17996_v24  ;;  %v2355_v63 = vadd.f32 %v2285_v46, %v2104_v31  ;;  %v22022_v11 = vrot.slane %v17830_v28, 2  ;;  %v1535_v49 = vpop.permute.xlu0 %1534 }
 0x1cb   : > { %v1201_v41 = vadd.f32 %v1133_v58, %v17839_v35  ;;  %v2531_v26 = vsel %vm1307_vm5, %v2528_v34, %v2530_v54  ;;  %v1496_v23 = vmul.f32 %v17848_v5, %v17913_v27  ;;  %v1585_v9 = vmul.f32 %v17796_v60, %v17913_v27  ;;  %v18034_v34 = vld [vmem:[#allocation3 + $0x100] sm:$0x3]  ;;  %v18036_v54 = vpop.permute.xlu1 %1459 }
 0x1cc   : > { %v1380_v43 = vsel %vm1307_vm5, %v22022_v11, %v22021_v55  ;;  %v2670_v1 = vmax.f32 %v2638_v62, 0.0  ;;  %v18026_v61 = vmul.f32 %v17796_v60, %v1455_v37  ;;  %v2601_v35 = vadd.f32 %v2531_v26, %v2355_v63 }
 0x1cd   : > { %v1448_v16 = vadd.f32 %v1380_v43, %v1201_v41  ;;  %v1956_v31 = vrot.slane %v18000_v36, 2  ;;  %v1831_v17 = vmul.f32 %v17802_v40, %v17913_v27  ;;  %v18032_v28 = vmul.f32 %v17802_v40, %v1455_v37 }
 0x1ce   : > { %2703 = vst.msk [vmem:[#allocation3 + $0x151] sm:$0xff] %vm389_vm2, %v2670_v1  ;;  %v18040_v58 = vmul.f32 %v17848_v5, %v1455_v37  ;;  %v1709_v46 = vrot.slane %v1585_v9, 1  ;;  %v2162_v26 = vmul.f32 %v17906_v18, %v1455_v37  ;;  %v2639_v36 = vadd.f32 %v17963_v3, %v2601_v35  ;;  %v18081_v9 = vld [vmem:[#allocation3 + $0x110] sm:$0xff] }
 0x1cf   : > { %v1528_v62 = vadd.f32 %v1496_v23, %v1448_v16  ;;  %v2073_v63 = vmul.f32 %v17893_v8, %v1455_v37  ;;  %v2408_v55 = vmul.f32 %v17922_v10, %v1455_v37  ;;  %v1955_v43 = vrot.slane %v1831_v17, 2 }
 0x1d0   : > { %v1711_v11 = vsel %vm1060_vm4, %v1709_v46, %v1710_v47  ;;  %v2937_v1 = vrot.slane %v18034_v34, 1  ;;  %v18051_v24 = vmul.f32 %v17796_v60, %v18036_v54  ;;  %v2671_v23 = vmax.f32 %v2639_v36, 0.0 }
 0x1d1   : > { %v1779_v16 = vadd.f32 %v1711_v11, %v1528_v62  ;;  %v2286_v35 = vrot.slane %v2162_v26, 1  ;;  %v1957_v41 = vsel %vm1307_vm5, %v1955_v43, %v1956_v31  ;;  %v2532_v19 = vrot.slane %v2408_v55, 2  ;;  %v18078_v11 = vld [vmem:[#allocation3 + $0x108] sm:$0xff] }
 0x1d2   : > { %v18056_v37 = vsel %vm1060_vm4, %v2935_v32, %v2937_v1  ;;  %v18060_v47 = vmul.f32 %v17802_v40, %v18036_v54  ;;  %2704 = vst.msk [vmem:[#allocation3 + $0x159] sm:$0xff] %vm389_vm2, %v2671_v23  ;;  %v2163_v62 = vmul.f32 %v17906_v18, %v18036_v54  ;;  %v2409_v46 = vmul.f32 %v17922_v10, %v18036_v54 }
 0x1d3   : > { %22023 = vst [vmem:[#allocation18_spill] sm:$0xff] %v18056_v37  ;;  %v2025_v17 = vadd.f32 %v1957_v41, %v1779_v16  ;;  %13465 = vmatmul.mubr.msk.f32.gmra.mrb[20].mxu0 %vm389_vm2, %v18056_v37  ;;  %v1497_v32 = vmul.f32 %v17848_v5, %v17931_v56  ;;  %v2074_v55 = vmul.f32 %v17893_v8, %v18036_v54  ;;  %v22024_v36 = vrot.slane %v17983_v15, 2 }
 0x1d4   : > { %v18076_v41 = vmul.f32 %v17796_v60, %v1535_v49  ;;  %v2287_v1 = vrot.slane %v2163_v62, 1  ;;  %v2533_v23 = vrot.slane %v2409_v46, 2  ;;  %v18084_v37 = vmul.f32 %v17802_v40, %v1535_v49 }
 0x1d5   : > { %v2105_v43 = vadd.f32 %v2073_v63, %v2025_v17  ;;  %v1529_v16 = vadd.f32 %v1497_v32, %v17915_v6  ;;  %v1959_v26 = vsel %vm1307_vm5, %v1956_v31, %v22024_v36  ;;  %v2164_v2 = vmul.f32 %v17906_v18, %v1535_v49 }
 0x1d6   : > { %v2410_v60 = vmul.f32 %v17922_v10, %v1535_v49  ;;  %v2288_v63 = vsel %vm1060_vm4, %v2286_v35, %v2287_v1  ;;  %v1717_v17 = vrot.slane %v18076_v41, 1  ;;  %v2939_v62 = vrot.slane %v18078_v11, 1 }
 0x1d7   : > { %v1780_v6 = vadd.f32 %v18009_v29, %v1529_v16  ;;  %v2356_v40 = vadd.f32 %v2288_v63, %v2105_v43  ;;  %v2289_v46 = vrot.slane %v2164_v2, 1  ;;  %v2940_v15 = vrot.slane %v18081_v9, 1 }
 0x1d8   : > { %v2535_v32 = vrot.slane %v2410_v60, 2  ;;  %v2534_v31 = vsel %vm1307_vm5, %v2532_v19, %v2533_v23  ;;  %v2942_v49 = vrot.slane %v18091_v20, 1  ;;  %v1009_v48 = vmul.f32 %v17781_v0, %v17913_v27  ;;  %v2032_v60 = vpop.permute.xlu1 %2031 }
 0x1d9   : > { %v2026_v36 = vadd.f32 %v1959_v26, %v1780_v6  ;;  %v2602_v35 = vadd.f32 %v2534_v31, %v2356_v40  ;;  %v1963_v41 = vrot.slane %v18084_v37, 2  ;;  %v2290_v29 = vsel %vm1060_vm4, %v2287_v1, %v2289_v46 }
 0x1da   : > { %v18105_v16 = vsel %vm1060_vm4, %v2939_v62, %v2940_v15  ;;  %v18110_v19 = vsel %vm1060_vm4, %v2940_v15, %v2942_v49  ;;  %v844_v26 = vmul.f32 %v17836_v30, %v17913_v27  ;;  %v1010_v43 = vmul.f32 %v17781_v0, %v17931_v56 }
 0x1db   : > { %22025 = vst [vmem:[#allocation19_spill] sm:$0xff] %v18105_v16  ;;  %v2106_v2 = vadd.f32 %v2074_v55, %v2026_v36  ;;  %13467 = vmatprep.mubr.msk.f32.mxu0 %vm389_vm2, %v18105_v16  ;;  %22026 = vst [vmem:[#allocation20_spill] sm:$0xff] %v18110_v19  ;;  %v2640_v37 = vadd.f32 %v17963_v3, %v2602_v35  ;;  %v2536_v1 = vsel %vm1307_vm5, %v2533_v23, %v2535_v32 }
 0x1dc   : > { %13468 = vmatmul.mubr.msk.f32.gmra.mrb[22].mxu0 %vm389_vm2, %v18110_v19  ;;  %v1256_v55 = vmul.f32 %v17789_v50, %v17913_v27  ;;  %v1257_v63 = vmul.f32 %v17789_v50, %v17931_v56  ;;  %v1136_v62 = vrot.slane %v1009_v48, 1  ;;  %v1137_v40 = vrot.slane %v1010_v43, 1 }
 0x1dd   : > { %v2357_v6 = vadd.f32 %v2290_v29, %v2106_v2  ;;  %v22027_v46 = vrot.slane %v18051_v24, 1  ;;  %v22028_v0 = vrot.slane %v18026_v61, 1  ;;  %v2672_v31 = vmax.f32 %v2640_v37, 0.0  ;;  %v2037_v37 = vpop.permute.xlu0 %2036 }
 0x1de   : > { %v1383_v23 = vrot.slane %v1256_v55, 2  ;;  %v1384_v32 = vrot.slane %v1257_v63, 2  ;;  %v2165_v36 = vmul.f32 %v17906_v18, %v2032_v60  ;;  %v1138_v27 = vsel %vm1060_vm4, %v1136_v62, %v1137_v40 }
 0x1df   : > { %v1716_v15 = vsel %vm1060_vm4, %v22028_v0, %v22027_v46  ;;  %v2603_v49 = vadd.f32 %v2536_v1, %v2357_v6  ;;  %v18132_v35 = vmul.f32 %v17922_v10, %v2032_v60  ;;  %v845_v48 = vmul.f32 %v17836_v30, %v17931_v56  ;;  %2705 = vst.msk [vmem:[#allocation3 + $0x169] sm:$0xff] %vm389_vm2, %v2672_v31 }
 0x1e0   : > { %v1203_v50 = vadd.f32 %v1138_v27, %v844_v26  ;;  %v22029_v61 = vrot.slane %v18060_v47, 2  ;;  %v22030_v29 = vrot.slane %v18032_v28, 2  ;;  %v2075_v43 = vmul.f32 %v17893_v8, %v2032_v60  ;;  %v2112_v26 = vpop.permute.xlu1 %2111 }
 0x1e1   : > { %v22031_v1 = vrot.slane %v17969_v39, 1  ;;  %v2641_v63 = vadd.f32 %v17963_v3, %v2603_v49  ;;  %v1385_v56 = vsel %vm1307_vm5, %v1383_v23, %v1384_v32  ;;  %v2291_v30 = vrot.slane %v2165_v36, 1  ;;  %v18154_v39 = vld [vmem:[#allocation3 + $0x120] sm:$0xff] }
 0x1e2   : > { %v1962_v2 = vsel %vm1307_vm5, %v22030_v29, %v22029_v61  ;;  %v1450_v62 = vadd.f32 %v1385_v56, %v1203_v50  ;;  %v2537_v46 = vrot.slane %v18132_v35, 2  ;;  %v22032_v28 = vrot.slane %v17974_v57, 2  ;;  %v18182_v56 = vld [vmem:[#allocation3 + $0x140] sm:$0xff] }
 0x1e3   : > { %v1140_v55 = vsel %vm1060_vm4, %v1137_v40, %v22031_v1  ;;  %v1499_v60 = vmul.f32 %v17848_v5, %v18036_v54  ;;  %v18156_v40 = vld [vmem:[#allocation3 + $0x128] sm:$0xff]  ;;  %v2673_v31 = vmax.f32 %v2641_v63, 0.0  ;;  %v22033_v23 = vrot.slane %v18051_v24, 1  ;;  %v18168_v54 = vld [vmem:[#allocation3 + $0x130] sm:$0x3]  ;;  %v18180_v63 = vld [vmem:[#allocation3 + $0x138] sm:$0xff] }
 0x1e4   : > { %v1204_v6 = vadd.f32 %v1140_v55, %v845_v48  ;;  %v1387_v0 = vsel %vm1307_vm5, %v1384_v32, %v22032_v28  ;;  %v2166_v27 = vmul.f32 %v17906_v18, %v2037_v37  ;;  %v1530_v48 = vadd.f32 %v18040_v58, %v1450_v62  ;;  %v2763_v58 = vld [vmem:[%s21859_s3] sm:$0xff] }
 0x1e5   : > { %v1718_v36 = vsel %vm1060_vm4, %v22033_v23, %v1717_v17  ;;  %v18164_v57 = vmul.f32 %v17922_v10, %v2037_v37  ;;  %v2167_v32 = vmul.f32 %v17906_v18, %v2112_v26  ;;  %v2413_v5 = vmul.f32 %v17922_v10, %v2112_v26  ;;  %2706 = vst.msk [vmem:[#allocation3 + $0x171] sm:$0xff] %vm389_vm2, %v2673_v31  ;;  %v18206_v23 = vld [vmem:[#allocation3 + $0x158] sm:$0xff] }
 0x1e6   : > { %v1451_v49 = vadd.f32 %v1387_v0, %v1204_v6  ;;  %v2292_v61 = vrot.slane %v2166_v27, 1  ;;  %v2944_v24 = vrot.slane %v18154_v39, 1  ;;  %v2945_v17 = vrot.slane %v18156_v40, 1  ;;  %v2764_v6 = vld [vmem:[%s21859_s3 + $0x8] sm:$0xff] }
 0x1e7   : > { %v1781_v29 = vadd.f32 %v1716_v15, %v1530_v48  ;;  %v22034_v1 = vrot.slane %v18060_v47, 2  ;;  %v2076_v10 = vmul.f32 %v17893_v8, %v2037_v37  ;;  %v2294_v55 = vrot.slane %v2167_v32, 1  ;;  %v2765_v8 = vld [vmem:[%s21859_s3 + $0x10] sm:$0xff]  ;;  %v2766_v37 = vld [vmem:[%s21859_s3 + $0x18] sm:$0xff] }
 0x1e8   : > { %v1531_v50 = vadd.f32 %v1499_v60, %v1451_v49  ;;  %v2538_v62 = vrot.slane %v18164_v57, 2  ;;  %v18189_v15 = vsel %vm1060_vm4, %v2944_v24, %v2945_v17  ;;  %v2947_v47 = vrot.slane %v18168_v54, 1  ;;  %v18204_v49 = vld [vmem:[#allocation3 + $0x150] sm:$0xff]  ;;  %v18213_v57 = vld [vmem:[#allocation3 + $0x160] sm:$0x3] }
 0x1e9   : > { %v1964_v18 = vsel %vm1307_vm5, %v22034_v1, %v1963_v41  ;;  %22035 = vst [vmem:[#allocation21_spill] sm:$0xff] %v18189_v15  ;;  %v18192_v41 = vld [vmem:[#allocation3 + $0x148] sm:$0x3]  ;;  %v2027_v28 = vadd.f32 %v1962_v2, %v1781_v29  ;;  %v2293_v0 = vsel %vm1060_vm4, %v2291_v30, %v2292_v61  ;;  %v2295_v60 = vsel %vm1060_vm4, %v2292_v61, %v2294_v55  ;;  %v2767_v1 = vld [vmem:[%s21859_s3 + $0x20] sm:$0xff] }
 0x1ea   : > { %v1782_v26 = vadd.f32 %v1718_v36, %v1531_v50  ;;  %v2540_v31 = vrot.slane %v2413_v5, 2  ;;  %13470 = vmatprep.mubr.msk.f32.mxu0 %vm389_vm2, %v18189_v15  ;;  %v18209_v27 = vsel %vm1060_vm4, %v2945_v17, %v2947_v47  ;;  %v2949_v48 = vrot.slane %v18180_v63, 1 }
 0x1eb   : > { %22036 = vst [vmem:[#allocation22_spill] sm:$0xff] %v18209_v27  ;;  %v2950_v2 = vrot.slane %v18182_v56, 1  ;;  %v2107_v30 = vadd.f32 %v2075_v43, %v2027_v28  ;;  %13471 = vmatmul.mubr.msk.f32.gmra.mrb[24].mxu0 %vm389_vm2, %v18209_v27  ;;  %v2952_v32 = vrot.slane %v18192_v41, 1  ;;  %v15046_v5 = vpack.c.bf16 %v2764_v6, %v2763_v58  ;;  %v2768_v43 = vld [vmem:[%s21859_s3 + $0x28] sm:$0xff] }
 0x1ec   : > { %v2028_v36 = vadd.f32 %v1964_v18, %v1782_v26  ;;  %v15050_v50 = vpack.c.bf16 %v2766_v37, %v2765_v8  ;;  %v2954_v17 = vrot.slane %v18204_v49, 1  ;;  %v2955_v29 = vrot.slane %v18206_v23, 1  ;;  %v18229_v18 = vld [vmem:[#allocation3 + $0x168] sm:$0xff]  ;;  %v18237_v6 = vld [vmem:[#allocation3 + $0x170] sm:$0xff]  ;;  %v18239_v26 = vld [vmem:[#allocation3 + $0x178] sm:$0x3] }
 0x1ed   : > { %v18219_v24 = vsel %vm1060_vm4, %v2949_v48, %v2950_v2  ;;  %v2358_v58 = vadd.f32 %v2293_v0, %v2107_v30  ;;  %15047 = vmatprep.subr.bf16.mxu0 %v15046_v5  ;;  %v2957_v55 = vrot.slane %v18213_v57, 1  ;;  %v2539_v47 = vsel %vm1307_vm5, %v2537_v46, %v2538_v62 }
 0x1ee   : > { %v2108_v61 = vadd.f32 %v2076_v10, %v2028_v36  ;;  %22037 = vst [vmem:[#allocation23_spill] sm:$0xff] %v18219_v24  ;;  %13473 = vmatprep.mubr.msk.f32.mxu0 %vm389_vm2, %v18219_v24  ;;  %v18234_v10 = vsel %vm1060_vm4, %v2950_v2, %v2952_v32  ;;  %15049 = vmatpush3.bf16.msra.mxu0 %v15046_v5  ;;  %v2960_v28 = vrot.slane %v18237_v6, 1  ;;  %v2959_v2 = vrot.slane %v18229_v18, 1 }
 0x1ef   : > { %22038 = vst [vmem:[#allocation24_spill] sm:$0xff] %v18234_v10  ;;  %v18245_v37 = vsel %vm1060_vm4, %v2954_v17, %v2955_v29  ;;  %v2604_v0 = vadd.f32 %v2539_v47, %v2358_v58  ;;  %v2541_v36 = vsel %vm1307_vm5, %v2538_v62, %v2540_v31  ;;  %13474 = vmatmul.mubr.msk.f32.gmra.mrb[26].mxu0 %vm389_vm2, %v18234_v10  ;;  %v2769_v62 = vld [vmem:[%s21859_s3 + $0x30] sm:$0xff]  ;;  %v2770_v31 = vld [vmem:[%s21859_s3 + $0x38] sm:$0xff] }
 0x1f0   : > { %v2359_v8 = vadd.f32 %v2295_v60, %v2108_v61  ;;  %22039 = vst [vmem:[#allocation25_spill] sm:$0xff] %v18245_v37  ;;  %15051 = vmatprep.subr.bf16.mxu0 %v15050_v50  ;;  %v15054_v48 = vpack.c.bf16 %v2768_v43, %v2767_v1  ;;  %13476 = vmatprep.mubr.msk.f32.mxu0 %vm389_vm2, %v18245_v37  ;;  %v2962_v60 = vrot.slane %v18239_v26, 1  ;;  %v2779_v43 = vld [vmem:[%s21859_s3 + $0x80] sm:$0xff]  ;;  %v18286_v58 = vld [vmem:[#allocation3] sm:$0xff]  ;;  %v2782_v47 = vld [vmem:[%s21859_s3 + $0x98] sm:$0xff] }
 0x1f1   : > { %v18255_v46 = vsel %vm1060_vm4, %v2955_v29, %v2957_v55  ;;  %v2642_v30 = vadd.f32 %v17963_v3, %v2604_v0  ;;  %v18266_v32 = vsel %vm1060_vm4, %v2959_v2, %v2960_v28  ;;  %v15058_v17 = vpack.c.bf16 %v2770_v31, %v2769_v62  ;;  %v2781_v55 = vld [vmem:[%s21859_s3 + $0x90] sm:$0xff]  ;;  %v2784_v0 = vld [vmem:[%s21859_s3 + $0xa8] sm:$0xff]  ;;  %v18320_v31 = vld [vmem:[#allocation3 + $0x30] sm:$0xff] }
 0x1f2   : > { %v2605_v35 = vadd.f32 %v2541_v36, %v2359_v8  ;;  %22040 = vst [vmem:[#allocation26_spill] sm:$0xff] %v18255_v46  ;;  %22041 = vst [vmem:[#allocation27_spill] sm:$0xff] %v18266_v32  ;;  %15053 = vmatpush3.bf16.msra.mxu0 %v15050_v50  ;;  %v18274_v1 = vsel %vm1060_vm4, %v2960_v28, %v2962_v60  ;;  %v15066_v8 = vpack.c.bf16 %v2782_v47, %v2781_v55  ;;  %v2783_v28 = vld [vmem:[%s21859_s3 + $0xa0] sm:$0xff]  ;;  %v18302_v36 = vld [vmem:[#allocation3 + $0x8] sm:$0xff] }
 0x1f3   : > { %v2674_v61 = vmax.f32 %v2642_v30, 0.0  ;;  %13477 = vmatmul.mubr.msk.f32.gmra.mrb[28].mxu0 %vm389_vm2, %v18255_v46  ;;  %15055 = vmatprep.subr.bf16.mxu0 %v15054_v48  ;;  %22042 = vst [vmem:[#allocation28_spill] sm:$0xff] %v18274_v1  ;;  %v15070_v2 = vpack.c.bf16 %v2784_v0, %v2783_v28  ;;  %v2786_v60 = vld [vmem:[%s21859_s3 + $0xb8] sm:$0xff]  ;;  %v18316_v62 = vld [vmem:[#allocation3 + $0x20] sm:$0xff]  ;;  %v18350_v47 = vld [vmem:[#allocation3 + $0x78] sm:$0xff] }
 0x1f4   : > { %v2643_v5 = vadd.f32 %v17963_v3, %v2605_v35  ;;  %13479 = vmatprep.mubr.msk.f32.mxu0 %vm389_vm2, %v18266_v32  ;;  %v2780_v3 = vld [vmem:[%s21859_s3 + $0x88] sm:$0xff]  ;;  %v2785_v35 = vld [vmem:[%s21859_s3 + $0xb0] sm:$0xff]  ;;  %v18346_v55 = vld [vmem:[#allocation3 + $0x68] sm:$0xff] }
 0x1f5   : > { %2707 = vst.msk [vmem:[#allocation3 + $0x181] sm:$0xff] %vm389_vm2, %v2674_v61  ;;  %v15062_v50 = vpack.c.bf16 %v2780_v3, %v2779_v43  ;;  %v15074_v30 = vpack.c.bf16 %v2786_v60, %v2785_v35  ;;  %v2788_v61 = vld [vmem:[%s21859_s3 + $0xc8] sm:$0xff]  ;;  %v18338_v3 = vld [vmem:[#allocation3 + $0x50] sm:$0xff] }
 0x1f6   : > { %v2675_v29 = vmax.f32 %v2643_v5, 0.0  ;;  %15057 = vmatpush3.bf16.msra.mxu0 %v15054_v48  ;;  %v18306_v48 = vld [vmem:[#allocation3 + $0x18] sm:$0xff]  ;;  %v2787_v5 = vld [vmem:[%s21859_s3 + $0xc0] sm:$0xff] }
 0x1f7   : > { %13480 = vmatmul.mubr.msk.f32.gmra.mrb[30].mxu0 %vm389_vm2, %v18274_v1  ;;  %15059 = vmatprep.subr.bf16.mxu0 %v15058_v17  ;;  %v15078_v43 = vpack.c.bf16 %v2788_v61, %v2787_v5  ;;  %v18358_v28 = vld [vmem:[#allocation3 + $0x90] sm:$0xff]  ;;  %v18362_v0 = vld [vmem:[#allocation3 + $0x98] sm:$0xff]  ;;  %v3548_v5 = vrot.slane %v18316_v62, 2 }
 0x1f8   : > { %2708 = vst.msk [vmem:[#allocation3 + $0x189] sm:$0xff] %vm389_vm2, %v2675_v29  ;;  %13498 = vmatprep.mubr.msk.f32.mxu0 %vm389_vm2, %v18286_v58  ;;  %v18334_v29 = vld [vmem:[#allocation3 + $0x48] sm:$0xff]  ;;  %v2791_v32 = vld [vmem:[%s21859_s3 + $0xe0] sm:$0xff]  ;;  %v2792_v46 = vld [vmem:[%s21859_s3 + $0xe8] sm:$0xff] }
 0x1fa   : > { %15061 = vmatpush3.bf16.msra.mxu0 %v15058_v17  ;;  %v18330_v17 = vld [vmem:[#allocation3 + $0x38] sm:$0xff] }
 0x1fb   : > { %15063 = vmatprep.subr.bf16.mxu0 %v15062_v50 }
 0x1fd   : > { %13499 = vmatmul.mubr.msk.f32.vlgmr.msra.gmra.mrb[0].mxu0 %vm389_vm2, %v18302_v36 }
 0x1fe   : > { %13501 = vmatprep.mubr.msk.f32.mxu0 %vm389_vm2, %v18306_v48  ;;  %15065 = vmatpush3.bf16.msra.mxu0 %v15062_v50  ;;  %v18342_v50 = vld [vmem:[#allocation3 + $0x60] sm:$0xff] }
 0x1ff   : > { %15067 = vmatprep.subr.bf16.mxu0 %v15066_v8 }
 0x201   : > { %13502 = vmatmul.mubr.msk.f32.gmra.mrb[2].mxu0 %vm389_vm2, %v18316_v62 }
 0x202   : > { %13504 = vmatprep.mubr.msk.f32.mxu0 %vm389_vm2, %v18320_v31  ;;  %15069 = vmatpush3.bf16.msra.mxu0 %v15066_v8  ;;  %v18354_v8 = vld [vmem:[#allocation3 + $0x80] sm:$0xff] }
 0x203   : > { %15071 = vmatprep.subr.bf16.mxu0 %v15070_v2 }
 0x205   : > { %13505 = vmatmul.mubr.msk.f32.gmra.mrb[4].mxu0 %vm389_vm2, %v18330_v17 }
 0x206   : > { %13507 = vmatprep.mubr.msk.f32.mxu0 %vm389_vm2, %v18334_v29  ;;  %15073 = vmatpush3.bf16.msra.mxu0 %v15070_v2  ;;  %v16509_v2 = vld [vmem:[#allocation3 + $0x10] sm:$0x3] }
 0x207   : > { %15075 = vmatprep.subr.bf16.mxu0 %v15074_v30  ;;  %v3545_v35 = vrot.slane %v16509_v2, 2  ;;  %v16510_v2 = vld [vmem:[#allocation3 + $0x28] sm:$0x3] }
 0x208   : > { %v3550_v1 = vrot.slane %v16510_v2, 2 }
 0x209   : > { %13508 = vmatmul.mubr.msk.f32.gmra.mrb[6].mxu0 %vm389_vm2, %v18338_v3 }
 0x20a   : > { %13510 = vmatprep.mubr.msk.f32.mxu0 %vm389_vm2, %v18342_v50  ;;  %15077 = vmatpush3.bf16.msra.mxu0 %v15074_v30  ;;  %v2789_v30 = vld [vmem:[%s21859_s3 + $0xd0] sm:$0xff] }
 0x20b   : > { %15079 = vmatprep.subr.bf16.mxu0 %v15078_v43 }
 0x20d   : > { %13511 = vmatmul.mubr.msk.f32.gmra.mrb[8].mxu0 %vm389_vm2, %v18346_v55 }
 0x20e   : > { %13513 = vmatprep.mubr.msk.f32.mxu0 %vm389_vm2, %v18350_v47 }
 0x211   : > { %13514 = vmatmul.mubr.msk.f32.gmra.mrb[10].mxu0 %vm389_vm2, %v18354_v8 }
 0x212   : > { %13516 = vmatprep.mubr.msk.f32.mxu0 %vm389_vm2, %v18358_v28 }
 0x215   : > { %13517 = vmatmul.mubr.msk.f32.gmra.mrb[12].mxu0 %vm389_vm2, %v18362_v0 }
 0x216   : > { %13519 = vmatprep.mubr.msk.f32.mxu0 %vm389_vm2, %v17728_v12  ;;  %v3542_v12 = vrot.slane %v18286_v58, 2  ;;  %v2790_v58 = vld [vmem:[%s21859_s3 + $0xd8] sm:$0xff] }
 0x219   : > { %13520 = vmatmul.mubr.msk.f32.gmra.mrb[14].mxu0 %vm389_vm2, %v17730_v4  ;;  %v3543_v4 = vrot.slane %v18302_v36, 2  ;;  %v3547_v36 = vrot.slane %v18306_v48, 2 }
 0x21a   : > { %13522 = vmatprep.mubr.msk.f32.mxu0 %vm389_vm2, %v17807_v25 }
 0x21b   : > { %v3544_v60 = vsel %vm1307_vm5, %v3542_v12, %v3543_v4  ;;  %v3546_v61 = vsel %vm1307_vm5, %v3543_v4, %v3545_v35  ;;  %v15082_v12 = vpack.c.bf16 %v2790_v58, %v2789_v30  ;;  %v18423_v37 = vsel %vm1307_vm5, %v3547_v36, %v3548_v5  ;;  %v16511_v58 = vld [vmem:[#allocation3 + $0x40] sm:$0x3] }
 0x21c   : > { %22043 = vst [vmem:[#allocation29_spill] sm:$0xff] %v18423_v37  ;;  %v3552_v4 = vrot.slane %v18320_v31, 2  ;;  %v15086_v35 = vpack.c.bf16 %v2792_v46, %v2791_v32  ;;  %v18430_v30 = vsel %vm1307_vm5, %v3548_v5, %v3550_v1  ;;  %v3555_v2 = vrot.slane %v16511_v58, 2  ;;  %v2793_v36 = vld [vmem:[%s21859_s3 + $0xf0] sm:$0xff]  ;;  %v16512_v58 = vld [vmem:[#allocation3 + $0x58] sm:$0x3] }
 0x21d   : > { %13523 = vmatmul.mubr.msk.f32.gmra.mrb[16].mxu0 %vm389_vm2, %v17809_v59  ;;  %22044 = vst [vmem:[#allocation30_spill] sm:$0xff] %v18430_v30  ;;  %v3558_v46 = vrot.slane %v18338_v3, 2  ;;  %v3557_v32 = vrot.slane %v18334_v29, 2 }
 0x21e   : > { %13525 = vmatprep.mubr.msk.f32.mxu0 %vm389_vm2, %v17901_v51 }
 0x221   : > { %13526 = vmatmul.mubr.msk.f32.gmra.mrb[18].mxu0 %vm389_vm2, %v17909_v44 }
 0x222   : > { %13528 = vmatprep.mubr.msk.f32.mxu0 %vm389_vm2, %v17977_v52 }
 0x225   : > { %13529 = vmatmul.mubr.msk.f32.gmra.mrb[20].mxu0 %vm389_vm2, %v17979_v42 }
 0x226   : > { %13531 = vmatprep.mubr.msk.f32.mxu0 %vm389_vm2, %v18078_v11 }
 0x229   : > { %13532 = vmatmul.mubr.msk.f32.gmra.mrb[22].mxu0 %vm389_vm2, %v18081_v9 }
 0x22a   : > { %13534 = vmatprep.mubr.msk.f32.mxu0 %vm389_vm2, %v18154_v39 }
 0x22d   : > { %13535 = vmatmul.mubr.msk.f32.gmra.mrb[24].mxu0 %vm389_vm2, %v18156_v40 }
 0x22e   : > { %13537 = vmatprep.mubr.msk.f32.mxu0 %vm389_vm2, %v18180_v63 }
 0x231   : > { %13538 = vmatmul.mubr.msk.f32.gmra.mrb[26].mxu0 %vm389_vm2, %v18182_v56 }
 0x232   : > { %13540 = vmatprep.mubr.msk.f32.mxu0 %vm389_vm2, %v18204_v49 }
 0x235   : > { %13541 = vmatmul.mubr.msk.f32.gmra.mrb[28].mxu0 %vm389_vm2, %v18206_v23 }
 0x236   : > { %13543 = vmatprep.mubr.msk.f32.mxu0 %vm389_vm2, %v18229_v18 }
 0x239   : > { %13544 = vmatmul.mubr.msk.f32.gmra.mrb[30].mxu0 %vm389_vm2, %v18237_v6 }
 0x23a   : > { %13562 = vmatprep.mubr.msk.f32.mxu0 %vm389_vm2, %v3544_v60  ;;  %v3553_v60 = vrot.slane %v18330_v17, 2 }
 0x23c   : > { %v18448_v5 = vsel %vm1307_vm5, %v3553_v60, %v3555_v2 }
 0x23d   : > { %13563 = vmatmul.mubr.msk.f32.vlgmr.msra.gmra.mrb[0].mxu0 %vm389_vm2, %v3546_v61  ;;  %v2794_v61 = vld [vmem:[%s21859_s3 + $0xf8] sm:$0xff]  ;;  %22046 = vst [vmem:[#allocation32_spill] sm:$0xff] %v18448_v5 }
 0x23e   : > { %13565 = vmatprep.mubr.msk.f32.mxu0 %vm389_vm2, %v18423_v37  ;;  %15081 = vmatpush3.bf16.msra.mxu0 %v15078_v43  ;;  %v18441_v43 = vsel %vm1307_vm5, %v3552_v4, %v3553_v60  ;;  %v15090_v1 = vpack.c.bf16 %v2794_v61, %v2793_v36  ;;  %v3560_v37 = vrot.slane %v16512_v58, 2  ;;  %v2795_v4 = vld [vmem:[%s21859_s3 + $0x100] sm:$0xff]  ;;  %v3563_v36 = vrot.slane %v18346_v55, 2 }
 0x23f   : > { %15083 = vmatprep.subr.bf16.mxu0 %v15082_v12  ;;  %22045 = vst [vmem:[#allocation31_spill] sm:$0xff] %v18441_v43  ;;  %v3562_v60 = vrot.slane %v18342_v50, 2  ;;  %v16513_v58 = vld [vmem:[#allocation3 + $0x70] sm:$0x3] }
 0x240   : > { %v18468_v61 = vsel %vm1307_vm5, %v3558_v46, %v3560_v37 }
 0x241   : > { %13566 = vmatmul.mubr.msk.f32.gmra.mrb[2].mxu0 %vm389_vm2, %v18430_v30  ;;  %v2796_v30 = vld [vmem:[%s21859_s3 + $0x108] sm:$0xff]  ;;  %22048 = vst [vmem:[#allocation34_spill] sm:$0xff] %v18468_v61 }
 0x242   : > { %13568 = vmatprep.mubr.msk.f32.mxu0 %vm389_vm2, %v18441_v43  ;;  %15085 = vmatpush3.bf16.msra.mxu0 %v15082_v12  ;;  %v18459_v12 = vsel %vm1307_vm5, %v3557_v32, %v3558_v46  ;;  %v18465_v2 = vpack.c.bf16 %v2796_v30, %v2795_v4  ;;  %v3565_v43 = vrot.slane %v16513_v58, 2  ;;  %v18473_v32 = vsel %vm1307_vm5, %v3562_v60, %v3563_v36  ;;  %v16514_v30 = vld [vmem:[#allocation3 + $0x88] sm:$0x3] }
 0x243   : > { %15087 = vmatprep.subr.bf16.mxu0 %v15086_v35  ;;  %22047 = vst [vmem:[#allocation33_spill] sm:$0xff] %v18459_v12  ;;  %22049 = vst [vmem:[#allocation35_spill] sm:$0xff] %v18473_v32  ;;  %v3570_v46 = vrot.slane %v16514_v30, 2  ;;  %v3573_v60 = vrot.slane %v18362_v0, 2 }
 0x244   : > { %v18481_v37 = vsel %vm1307_vm5, %v3563_v36, %v3565_v43  ;;  %v16515_v43 = vld [vmem:[#allocation3 + $0xa0] sm:$0x3] }
 0x245   : > { %13569 = vmatmul.mubr.msk.f32.gmra.mrb[4].mxu0 %vm389_vm2, %v18448_v5  ;;  %v3568_v5 = vrot.slane %v18354_v8, 2  ;;  %22050 = vst [vmem:[#allocation36_spill] sm:$0xff] %v18481_v37  ;;  %v3575_v36 = vrot.slane %v16515_v43, 2  ;;  %v16518_v43 = vld [vmem:[#allocation3 + $0xb8] sm:$0x3] }
 0x246   : > { %13571 = vmatprep.mubr.msk.f32.mxu0 %vm389_vm2, %v18459_v12  ;;  %15089 = vmatpush3.bf16.msra.mxu0 %v15086_v35  ;;  %v3567_v35 = vrot.slane %v18350_v47, 2 }
 0x247   : > { %15091 = vmatprep.subr.bf16.mxu0 %v15090_v1  ;;  %v18493_v58 = vsel %vm1307_vm5, %v3568_v5, %v3570_v46  ;;  %v18509_v46 = vsel %vm1307_vm5, %v3573_v60, %v3575_v36 }
 0x248   : > { %v18486_v4 = vsel %vm1307_vm5, %v3567_v35, %v3568_v5  ;;  %22052 = vst [vmem:[#allocation38_spill] sm:$0xff] %v18493_v58  ;;  %v18500_v35 = vld [vmem:[#allocation3 + $0xb0] sm:$0xff] }
 0x249   : > { %13572 = vmatmul.mubr.msk.f32.gmra.mrb[6].mxu0 %vm389_vm2, %v18468_v61  ;;  %22051 = vst [vmem:[#allocation37_spill] sm:$0xff] %v18486_v4 }
 0x24a   : > { %13574 = vmatprep.mubr.msk.f32.mxu0 %vm389_vm2, %v18473_v32  ;;  %15093 = vmatpush3.bf16.msra.mxu0 %v15090_v1  ;;  %v3572_v1 = vrot.slane %v18358_v28, 2  ;;  %v3580_v32 = vrot.slane %v16518_v43, 2  ;;  %v3597_v43 = vrot.slane %v18078_v11, 2 }
 0x24b   : > { %15095 = vmatprep.subr.bf16.mxu0 %v18465_v2 }
 0x24c   : > { %v18498_v30 = vsel %vm1307_vm5, %v3572_v1, %v3573_v60  ;;  %v3585_v60 = vrot.slane %v17841_v38, 2 }
 0x24d   : > { %13575 = vmatmul.mubr.msk.f32.gmra.mrb[8].mxu0 %vm389_vm2, %v18481_v37  ;;  %22053 = vst [vmem:[#allocation39_spill] sm:$0xff] %v18498_v30  ;;  %v3578_v37 = vrot.slane %v18500_v35, 2 }
 0x24e   : > { %13577 = vmatprep.mubr.msk.f32.mxu0 %vm389_vm2, %v18486_v4  ;;  %v18505_v4 = vld [vmem:[#allocation3 + $0xa8] sm:$0xff] }
 0x24f   : > { %v3577_v5 = vrot.slane %v18505_v4, 2  ;;  %v18521_v61 = vsel %vm1307_vm5, %v3578_v37, %v3580_v32  ;;  %v3590_v32 = vrot.slane %v17911_v45, 2 }
 0x251   : > { %13578 = vmatmul.mubr.msk.f32.gmra.mrb[10].mxu0 %vm389_vm2, %v18493_v58  ;;  %v18514_v1 = vsel %vm1307_vm5, %v3577_v5, %v3578_v37  ;;  %v3583_v58 = vrot.slane %v17809_v59, 2  ;;  %v3588_v5 = vrot.slane %v17909_v44, 2  ;;  %v3587_v59 = vrot.slane %v17901_v51, 2 }
 0x252   : > { %13580 = vmatprep.mubr.msk.f32.mxu0 %vm389_vm2, %v18498_v30  ;;  %v3582_v30 = vrot.slane %v17807_v25, 2  ;;  %v3593_v37 = vrot.slane %v17979_v42, 2  ;;  %v3592_v44 = vrot.slane %v17977_v52, 2 }
 0x253   : > { %v18534_v25 = vsel %vm1307_vm5, %v3583_v58, %v3585_v60  ;;  %v18540_v38 = vsel %vm1307_vm5, %v3587_v59, %v3588_v5  ;;  %v18547_v51 = vsel %vm1307_vm5, %v3588_v5, %v3590_v32  ;;  %v3600_v5 = vrot.slane %v18091_v20, 2 }
 0x254   : > { %v18527_v36 = vsel %vm1307_vm5, %v3582_v30, %v3583_v58  ;;  %v3595_v58 = vrot.slane %v18034_v34, 2  ;;  %v18553_v45 = vsel %vm1307_vm5, %v3592_v44, %v3593_v37  ;;  %v3598_v30 = vrot.slane %v18081_v9, 2 }
 0x255   : > { %13581 = vmatmul.mubr.msk.f32.gmra.mrb[12].mxu0 %vm389_vm2, %v18509_v46  ;;  %v3603_v59 = vrot.slane %v18156_v40, 2  ;;  %v3602_v32 = vrot.slane %v18154_v39, 2 }
 0x256   : > { %13583 = vmatprep.mubr.msk.f32.mxu0 %vm389_vm2, %v18514_v1  ;;  %v18560_v60 = vsel %vm1307_vm5, %v3593_v37, %v3595_v58  ;;  %v18566_v34 = vsel %vm1307_vm5, %v3597_v43, %v3598_v30  ;;  %v18573_v44 = vsel %vm1307_vm5, %v3598_v30, %v3600_v5  ;;  %v3605_v37 = vrot.slane %v18168_v54, 2 }
 0x257   : > { %22054 = vst [vmem:[#allocation40_spill] sm:$0xff] %v18566_v34  ;;  %v18579_v20 = vsel %vm1307_vm5, %v3602_v32, %v3603_v59  ;;  %v3608_v58 = vrot.slane %v18182_v56, 2  ;;  %v3607_v43 = vrot.slane %v18180_v63, 2  ;;  %v3610_v30 = vrot.slane %v18192_v41, 2 }
 0x258   : > { %22055 = vst [vmem:[#allocation41_spill] sm:$0xff] %v18579_v20  ;;  %v3613_v5 = vrot.slane %v18206_v23, 2  ;;  %v3612_v32 = vrot.slane %v18204_v49, 2 }
 0x259   : > { %13584 = vmatmul.mubr.msk.f32.gmra.mrb[14].mxu0 %vm389_vm2, %v18521_v61  ;;  %v18592_v54 = vsel %vm1307_vm5, %v3607_v43, %v3608_v58  ;;  %v3617_v43 = vrot.slane %v18229_v18, 2 }
 0x25a   : > { %13586 = vmatprep.mubr.msk.f32.mxu0 %vm389_vm2, %v18527_v36  ;;  %22057 = vst [vmem:[#allocation43_spill] sm:$0xff] %v18592_v54  ;;  %v18605_v41 = vsel %vm1307_vm5, %v3612_v32, %v3613_v5  ;;  %v2797_v32 = vld [vmem:[%s21859_s3 + $0x110] sm:$0xff] }
 0x25b   : > { %22059 = vst [vmem:[#allocation45_spill] sm:$0xff] %v18605_v41 }
 0x25d   : > { %13587 = vmatmul.mubr.msk.f32.gmra.mrb[16].mxu0 %vm389_vm2, %v18534_v25 }
 0x25e   : > { %13589 = vmatprep.mubr.msk.f32.mxu0 %vm389_vm2, %v18540_v38 }
 0x261   : > { %13590 = vmatmul.mubr.msk.f32.gmra.mrb[18].mxu0 %vm389_vm2, %v18547_v51 }
 0x262   : > { %13592 = vmatprep.mubr.msk.f32.mxu0 %vm389_vm2, %v18553_v45 }
 0x265   : > { %13593 = vmatmul.mubr.msk.f32.gmra.mrb[20].mxu0 %vm389_vm2, %v18560_v60 }
 0x266   : > { %13595 = vmatprep.mubr.msk.f32.mxu0 %vm389_vm2, %v18566_v34  ;;  %v18586_v34 = vsel %vm1307_vm5, %v3603_v59, %v3605_v37  ;;  %v3615_v59 = vrot.slane %v18213_v57, 2  ;;  %v3618_v37 = vrot.slane %v18237_v6, 2 }
 0x267   : > { %22056 = vst [vmem:[#allocation42_spill] sm:$0xff] %v18586_v34 }
 0x268   : > { %v18618_v57 = vsel %vm1307_vm5, %v3617_v43, %v3618_v37 }
 0x269   : > { %13596 = vmatmul.mubr.msk.f32.gmra.mrb[22].mxu0 %vm389_vm2, %v18573_v44  ;;  %22060 = vst [vmem:[#allocation46_spill] sm:$0xff] %v18618_v57 }
 0x26a   : > { %13598 = vmatprep.mubr.msk.f32.mxu0 %vm389_vm2, %v18579_v20  ;;  %v18599_v20 = vsel %vm1307_vm5, %v3608_v58, %v3610_v30  ;;  %v3620_v58 = vrot.slane %v18239_v26, 2  ;;  %v2798_v26 = vld [vmem:[%s21859_s3 + $0x118] sm:$0xff] }
 0x26b   : > { %22058 = vst [vmem:[#allocation44_spill] sm:$0xff] %v18599_v20 }
 0x26c   : > { %v18623_v30 = vsel %vm1307_vm5, %v3618_v37, %v3620_v58  ;;  %v2800_v37 = vld [vmem:[%s21859_s3 + $0x128] sm:$0xff]  ;;  %v2802_v58 = vld [vmem:[%s21859_s3 + $0x138] sm:$0xff] }
 0x26d   : > { %13599 = vmatmul.mubr.msk.f32.gmra.mrb[24].mxu0 %vm389_vm2, %v18586_v34 }
 0x26e   : > { %13601 = vmatprep.mubr.msk.f32.mxu0 %vm389_vm2, %v18592_v54  ;;  %v18612_v54 = vsel %vm1307_vm5, %v3613_v5, %v3615_v59  ;;  %v15098_v5 = vpack.c.bf16 %v2798_v26, %v2797_v32  ;;  %v2799_v59 = vld [vmem:[%s21859_s3 + $0x120] sm:$0xff]  ;;  %v2804_v32 = vld [vmem:[%s21859_s3 + $0x148] sm:$0xff] }
 0x26f   : > { %v15102_v43 = vpack.c.bf16 %v2800_v37, %v2799_v59  ;;  %v18684_v59 = vld [vmem:[#allocation3 + $0xc8] sm:$0xff]  ;;  %v18688_v37 = vld [vmem:[#allocation3 + $0xd8] sm:$0xff] }
 0x271   : > { %13602 = vmatmul.mubr.msk.f32.gmra.mrb[26].mxu0 %vm389_vm2, %v18599_v20 }
 0x272   : > { %13604 = vmatprep.mubr.msk.f32.mxu0 %vm389_vm2, %v18605_v41 }
 0x275   : > { %13605 = vmatmul.mubr.msk.f32.gmra.mrb[28].mxu0 %vm389_vm2, %v18612_v54 }
 0x276   : > { %13607 = vmatprep.mubr.msk.f32.mxu0 %vm389_vm2, %v18618_v57 }
 0x279   : > { %13608 = vmatmul.mubr.msk.f32.gmra.mrb[30].mxu0 %vm389_vm2, %v18623_v30 }
 0x27a   : > { %13626 = vmatprep.mubr.msk.f32.mxu0 %vm389_vm2, %v18306_v48  ;;  %v2801_v48 = vld [vmem:[%s21859_s3 + $0x130] sm:$0xff] }
 0x27d   : > { %13627 = vmatmul.mubr.msk.f32.vlgmr.msra.gmra.mrb[0].mxu0 %vm389_vm2, %v18316_v62  ;;  %v15106_v62 = vpack.c.bf16 %v2802_v58, %v2801_v48  ;;  %v2807_v58 = vld [vmem:[%s21859_s3 + $0x160] sm:$0xff] }
 0x27e   : > { %13629 = vmatprep.mubr.msk.f32.mxu0 %vm389_vm2, %v18320_v31  ;;  %15097 = vmatpush3.bf16.msra.mxu0 %v18465_v2  ;;  %v2803_v2 = vld [vmem:[%s21859_s3 + $0x140] sm:$0xff] }
 0x27f   : > { %15099 = vmatprep.subr.bf16.mxu0 %v15098_v5  ;;  %v15110_v26 = vpack.c.bf16 %v2804_v32, %v2803_v2  ;;  %v2810_v32 = vld [vmem:[%s21859_s3 + $0x178] sm:$0xff] }
 0x281   : > { %13630 = vmatmul.mubr.msk.f32.gmra.mrb[2].mxu0 %vm389_vm2, %v18330_v17 }
 0x282   : > { %13632 = vmatprep.mubr.msk.f32.mxu0 %vm389_vm2, %v18334_v29  ;;  %15101 = vmatpush3.bf16.msra.mxu0 %v15098_v5  ;;  %v18680_v5 = vld [vmem:[#allocation3 + $0xc0] sm:$0xff] }
 0x283   : > { %15103 = vmatprep.subr.bf16.mxu0 %v15102_v43 }
 0x285   : > { %13633 = vmatmul.mubr.msk.f32.gmra.mrb[4].mxu0 %vm389_vm2, %v18338_v3 }
 0x286   : > { %13635 = vmatprep.mubr.msk.f32.mxu0 %vm389_vm2, %v18342_v50  ;;  %15105 = vmatpush3.bf16.msra.mxu0 %v15102_v43  ;;  %v18692_v43 = vld [vmem:[#allocation3 + $0xe0] sm:$0xff] }
 0x287   : > { %15107 = vmatprep.subr.bf16.mxu0 %v15106_v62 }
 0x289   : > { %13636 = vmatmul.mubr.msk.f32.gmra.mrb[6].mxu0 %vm389_vm2, %v18346_v55 }
 0x28a   : > { %13638 = vmatprep.mubr.msk.f32.mxu0 %vm389_vm2, %v18350_v47  ;;  %15109 = vmatpush3.bf16.msra.mxu0 %v15106_v62  ;;  %v2808_v62 = vld [vmem:[%s21859_s3 + $0x168] sm:$0xff] }
 0x28b   : > { %15111 = vmatprep.subr.bf16.mxu0 %v15110_v26  ;;  %v15118_v2 = vpack.c.bf16 %v2808_v62, %v2807_v58  ;;  %v22062_v58 = vld [vmem:[#allocation7_spill] sm:$0xff]  ;;  %v22063_v62 = vld [vmem:[#allocation8_spill] sm:$0xff] }
 0x28d   : > { %13639 = vmatmul.mubr.msk.f32.gmra.mrb[8].mxu0 %vm389_vm2, %v18354_v8 }
 0x28e   : > { %13641 = vmatprep.mubr.msk.f32.mxu0 %vm389_vm2, %v18358_v28 }
 0x291   : > { %13642 = vmatmul.mubr.msk.f32.gmra.mrb[10].mxu0 %vm389_vm2, %v18362_v0 }
 0x292   : > { %13644 = vmatprep.mubr.msk.f32.mxu0 %vm389_vm2, %v18505_v4 }
 0x295   : > { %13645 = vmatmul.mubr.msk.f32.gmra.mrb[12].mxu0 %vm389_vm2, %v18500_v35 }
 0x296   : > { %13647 = vmatprep.mubr.msk.f32.mxu0 %vm389_vm2, %v18680_v5 }
 0x299   : > { %13648 = vmatmul.mubr.msk.f32.gmra.mrb[14].mxu0 %vm389_vm2, %v18684_v59 }
 0x29a   : > { %13650 = vmatprep.mubr.msk.f32.mxu0 %vm389_vm2, %v18688_v37 }
 0x29d   : > { %13651 = vmatmul.mubr.msk.f32.gmra.mrb[16].mxu0 %vm389_vm2, %v18692_v43 }
 0x29e   : > { %13653 = vmatprep.mubr.msk.f32.mxu0 %vm389_vm2, %v17977_v52  ;;  %v18720_v52 = vld [vmem:[#allocation3 + $0x180] sm:$0xff] }
 0x2a1   : > { %13654 = vmatmul.mubr.msk.f32.gmra.mrb[18].mxu0 %vm389_vm2, %v17979_v42  ;;  %v18724_v42 = vld [vmem:[#allocation3 + $0x188] sm:$0xff] }
 0x2a2   : > { %13656 = vmatprep.mubr.msk.f32.mxu0 %vm389_vm2, %v18078_v11  ;;  %v2806_v11 = vld [vmem:[%s21859_s3 + $0x158] sm:$0xff] }
 0x2a5   : > { %13657 = vmatmul.mubr.msk.f32.gmra.mrb[20].mxu0 %vm389_vm2, %v18081_v9  ;;  %v2805_v9 = vld [vmem:[%s21859_s3 + $0x150] sm:$0xff] }
 0x2a6   : > { %13659 = vmatprep.mubr.msk.f32.mxu0 %vm389_vm2, %v18154_v39  ;;  %v15114_v48 = vpack.c.bf16 %v2806_v11, %v2805_v9  ;;  %v2812_v9 = vld [vmem:[%s21859_s3 + $0x188] sm:$0xff] }
 0x2a9   : > { %13660 = vmatmul.mubr.msk.f32.gmra.mrb[22].mxu0 %vm389_vm2, %v18156_v40 }
 0x2aa   : > { %13662 = vmatprep.mubr.msk.f32.mxu0 %vm389_vm2, %v18180_v63 }
 0x2ad   : > { %13663 = vmatmul.mubr.msk.f32.gmra.mrb[24].mxu0 %vm389_vm2, %v18182_v56 }
 0x2ae   : > { %13665 = vmatprep.mubr.msk.f32.mxu0 %vm389_vm2, %v18204_v49 }
 0x2b1   : > { %13666 = vmatmul.mubr.msk.f32.gmra.mrb[26].mxu0 %vm389_vm2, %v18206_v23 }
 0x2b2   : > { %13668 = vmatprep.mubr.msk.f32.mxu0 %vm389_vm2, %v18229_v18 }
 0x2b5   : > { %13669 = vmatmul.mubr.msk.f32.gmra.mrb[28].mxu0 %vm389_vm2, %v18237_v6 }
 0x2b6   : > { %13671 = vmatprep.mubr.msk.f32.mxu0 %vm389_vm2, %v18720_v52 }
 0x2b9   : > { %13672 = vmatmul.mubr.msk.f32.gmra.mrb[30].mxu0 %vm389_vm2, %v18724_v42 }
 0x2ba   : > { %13690 = vmatprep.mubr.msk.f32.mxu0 %vm389_vm2, %v17356_v21  ;;  %v2809_v21 = vld [vmem:[%s21859_s3 + $0x170] sm:$0xff] }
 0x2bd   : > { %13691 = vmatmul.mubr.msk.f32.vlgmr.msra.gmra.mrb[0].mxu0 %vm389_vm2, %v17359_v22  ;;  %v15122_v22 = vpack.c.bf16 %v2810_v32, %v2809_v21  ;;  %v22064_v21 = vld [vmem:[#allocation9_spill] sm:$0xff]  ;;  %v22065_v32 = vld [vmem:[#allocation10_spill] sm:$0xff] }
 0x2be   : > { %13693 = vmatprep.mubr.msk.f32.mxu0 %vm389_vm2, %v17426_v33  ;;  %15113 = vmatpush3.bf16.msra.mxu0 %v15110_v26  ;;  %v2811_v26 = vld [vmem:[%s21859_s3 + $0x180] sm:$0xff] }
 0x2bf   : > { %15115 = vmatprep.subr.bf16.mxu0 %v15114_v48  ;;  %v15126_v11 = vpack.c.bf16 %v2812_v9, %v2811_v26  ;;  %v22067_v26 = vld [vmem:[#allocation12_spill] sm:$0xff]  ;;  %v22068_v9 = vld [vmem:[#allocation13_spill] sm:$0xff] }
 0x2c1   : > { %13694 = vmatmul.mubr.msk.f32.gmra.mrb[2].mxu0 %vm389_vm2, %v17462_v53 }
 0x2c2   : > { %13696 = vmatprep.mubr.msk.f32.mxu0 %vm389_vm2, %v17511_v7  ;;  %15117 = vmatpush3.bf16.msra.mxu0 %v15114_v48  ;;  %v22061_v48 = vld [vmem:[#allocation6_spill] sm:$0xff] }
 0x2c3   : > { %15119 = vmatprep.subr.bf16.mxu0 %v15118_v2 }
 0x2c5   : > { %13697 = vmatmul.mubr.msk.f32.gmra.mrb[4].mxu0 %vm389_vm2, %v17517_v13 }
 0x2c6   : > { %13699 = vmatprep.mubr.msk.f32.mxu0 %vm389_vm2, %v17568_v14  ;;  %15121 = vmatpush3.bf16.msra.mxu0 %v15118_v2  ;;  %v22066_v2 = vld [vmem:[#allocation11_spill] sm:$0xff] }
 0x2c7   : > { %15123 = vmatprep.subr.bf16.mxu0 %v15122_v22 }
 0x2c9   : > { %13700 = vmatmul.mubr.msk.f32.gmra.mrb[6].mxu0 %vm389_vm2, %v22061_v48 }
 0x2ca   : > { %13702 = vmatprep.mubr.msk.f32.mxu0 %vm389_vm2, %v22062_v58  ;;  %15125 = vmatpush3.bf16.msra.mxu0 %v15122_v22  ;;  %v22069_v22 = vld [vmem:[#allocation14_spill] sm:$0xff]  ;;  %v22070_v58 = vld [vmem:[#allocation15_spill] sm:$0xff] }
 0x2cb   : > { %15127 = vmatprep.subr.bf16.mxu0 %v15126_v11 }
 0x2cd   : > { %13703 = vmatmul.mubr.msk.f32.gmra.mrb[8].mxu0 %vm389_vm2, %v22063_v62  ;;  %v22071_v62 = vld [vmem:[#allocation16_spill] sm:$0xff] }
 0x2ce   : > { %13705 = vmatprep.mubr.msk.f32.mxu0 %vm389_vm2, %v22064_v21  ;;  %v22072_v21 = vld [vmem:[#allocation17_spill] sm:$0xff] }
 0x2d1   : > { %13706 = vmatmul.mubr.msk.f32.gmra.mrb[10].mxu0 %vm389_vm2, %v22065_v32  ;;  %v22073_v32 = vld [vmem:[#allocation18_spill] sm:$0xff] }
 0x2d2   : > { %13708 = vmatprep.mubr.msk.f32.mxu0 %vm389_vm2, %v22066_v2 }
 0x2d5   : > { %13709 = vmatmul.mubr.msk.f32.gmra.mrb[12].mxu0 %vm389_vm2, %v22067_v26 }
 0x2d6   : > { %13711 = vmatprep.mubr.msk.f32.mxu0 %vm389_vm2, %v22068_v9 }
 0x2d9   : > { %13712 = vmatmul.mubr.msk.f32.gmra.mrb[14].mxu0 %vm389_vm2, %v22069_v22 }
 0x2da   : > { %13714 = vmatprep.mubr.msk.f32.mxu0 %vm389_vm2, %v22070_v58  ;;  %v22082_v58 = vld [vmem:[#allocation31_spill] sm:$0xff] }
 0x2dd   : > { %13715 = vmatmul.mubr.msk.f32.gmra.mrb[16].mxu0 %vm389_vm2, %v22071_v62  ;;  %v22077_v62 = vld [vmem:[#allocation28_spill] sm:$0xff] }
 0x2de   : > { %13717 = vmatprep.mubr.msk.f32.mxu0 %vm389_vm2, %v22072_v21  ;;  %v22074_v21 = vld [vmem:[#allocation25_spill] sm:$0xff] }
 0x2e1   : > { %13718 = vmatmul.mubr.msk.f32.gmra.mrb[18].mxu0 %vm389_vm2, %v22073_v32  ;;  %v22075_v32 = vld [vmem:[#allocation26_spill] sm:$0xff] }
 0x2e2   : > { %13720 = vmatprep.mubr.msk.f32.mxu0 %vm389_vm2, %v18105_v16  ;;  %v4208_v16 = vrot.slane %v18724_v42, 1 }
 0x2e5   : > { %13721 = vmatmul.mubr.msk.f32.gmra.mrb[20].mxu0 %vm389_vm2, %v18110_v19  ;;  %v18809_v19 = vld [vmem:[#allocation3 + $0x190] sm:$0x3] }
 0x2e6   : > { %13723 = vmatprep.mubr.msk.f32.mxu0 %vm389_vm2, %v18189_v15  ;;  %v22076_v15 = vld [vmem:[#allocation27_spill] sm:$0xff] }
 0x2e9   : > { %13724 = vmatmul.mubr.msk.f32.gmra.mrb[22].mxu0 %vm389_vm2, %v18209_v27  ;;  %v4207_v27 = vrot.slane %v18720_v52, 1 }
 0x2ea   : > { %13726 = vmatprep.mubr.msk.f32.mxu0 %vm389_vm2, %v18219_v24  ;;  %v4210_v24 = vrot.slane %v18809_v19, 1 }
 0x2ed   : > { %13727 = vmatmul.mubr.msk.f32.gmra.mrb[24].mxu0 %vm389_vm2, %v18234_v10  ;;  %v18818_v10 = vsel %vm1060_vm4, %v4207_v27, %v4208_v16 }
 0x2ee   : > { %13729 = vmatprep.mubr.msk.f32.mxu0 %vm389_vm2, %v22074_v21  ;;  %22078 = vst [vmem:[#allocation6_spill] sm:$0xff] %v18818_v10  ;;  %v2814_v21 = vld [vmem:[%s21859_s3 + $0x198] sm:$0xff] }
 0x2f1   : > { %13730 = vmatmul.mubr.msk.f32.gmra.mrb[26].mxu0 %vm389_vm2, %v22075_v32  ;;  %v18823_v32 = vsel %vm1060_vm4, %v4208_v16, %v4210_v24  ;;  %v2815_v16 = vld [vmem:[%s21859_s3 + $0x1a0] sm:$0xff]  ;;  %v2816_v24 = vld [vmem:[%s21859_s3 + $0x1a8] sm:$0xff] }
 0x2f2   : > { %13732 = vmatprep.mubr.msk.f32.mxu0 %vm389_vm2, %v22076_v15  ;;  %22079 = vst [vmem:[#allocation11_spill] sm:$0xff] %v18823_v32  ;;  %v2813_v15 = vld [vmem:[%s21859_s3 + $0x190] sm:$0xff] }
 0x2f3   : > { %v15130_v27 = vpack.c.bf16 %v2814_v21, %v2813_v15  ;;  %v2817_v15 = vld [vmem:[%s21859_s3 + $0x1b0] sm:$0xff]  ;;  %v22083_v21 = vld [vmem:[#allocation32_spill] sm:$0xff] }
 0x2f5   : > { %13733 = vmatmul.mubr.msk.f32.gmra.mrb[28].mxu0 %vm389_vm2, %v22077_v62  ;;  %v22080_v62 = vld [vmem:[#allocation29_spill] sm:$0xff] }
 0x2f6   : > { %13735 = vmatprep.mubr.msk.f32.mxu0 %vm389_vm2, %v18818_v10  ;;  %v22081_v10 = vld [vmem:[#allocation30_spill] sm:$0xff] }
 0x2f9   : > { %13736 = vmatmul.mubr.msk.f32.gmra.mrb[30].mxu0 %vm389_vm2, %v18823_v32  ;;  %v15134_v32 = vpack.c.bf16 %v2816_v24, %v2815_v16  ;;  %v2820_v16 = vld [vmem:[%s21859_s3 + $0x1c8] sm:$0xff]  ;;  %v22084_v24 = vld [vmem:[#allocation34_spill] sm:$0xff] }
 0x2fa   : > { %13754 = vmatprep.mubr.msk.f32.mxu0 %vm389_vm2, %v22080_v62  ;;  %v2818_v62 = vld [vmem:[%s21859_s3 + $0x1b8] sm:$0xff] }
 0x2fd   : > { %13755 = vmatmul.mubr.msk.f32.vlgmr.msra.gmra.mrb[0].mxu0 %vm389_vm2, %v22081_v10  ;;  %v15138_v10 = vpack.c.bf16 %v2818_v62, %v2817_v15  ;;  %v22087_v15 = vld [vmem:[#allocation37_spill] sm:$0xff]  ;;  %v22088_v62 = vld [vmem:[#allocation38_spill] sm:$0xff] }
 0x2fe   : > { %13757 = vmatprep.mubr.msk.f32.mxu0 %vm389_vm2, %v22082_v58  ;;  %15129 = vmatpush3.bf16.msra.mxu0 %v15126_v11  ;;  %v2819_v11 = vld [vmem:[%s21859_s3 + $0x1c0] sm:$0xff]  ;;  %v22085_v58 = vld [vmem:[#allocation35_spill] sm:$0xff] }
 0x2ff   : > { %15131 = vmatprep.subr.bf16.mxu0 %v15130_v27 }
 0x301   : > { %13758 = vmatmul.mubr.msk.f32.gmra.mrb[2].mxu0 %vm389_vm2, %v22083_v21  ;;  %v22089_v21 = vld [vmem:[#allocation39_spill] sm:$0xff] }
 0x302   : > { %13760 = vmatprep.mubr.msk.f32.mxu0 %vm389_vm2, %v18459_v12  ;;  %15133 = vmatpush3.bf16.msra.mxu0 %v15130_v27  ;;  %v15142_v12 = vpack.c.bf16 %v2820_v16, %v2819_v11  ;;  %v22086_v27 = vld [vmem:[#allocation36_spill] sm:$0xff]  ;;  %v22092_v11 = vld [vmem:[#allocation43_spill] sm:$0xff]  ;;  %v4474_v16 = vrot.slane %v18724_v42, 2 }
 0x303   : > { %15135 = vmatprep.subr.bf16.mxu0 %v15134_v32 }
 0x305   : > { %13761 = vmatmul.mubr.msk.f32.gmra.mrb[4].mxu0 %vm389_vm2, %v22084_v24 }
 0x306   : > { %13763 = vmatprep.mubr.msk.f32.mxu0 %vm389_vm2, %v22085_v58  ;;  %15137 = vmatpush3.bf16.msra.mxu0 %v15134_v32  ;;  %v22090_v32 = vld [vmem:[#allocation40_spill] sm:$0xff] }
 0x307   : > { %15139 = vmatprep.subr.bf16.mxu0 %v15138_v10 }
 0x309   : > { %13764 = vmatmul.mubr.msk.f32.gmra.mrb[6].mxu0 %vm389_vm2, %v22086_v27 }
 0x30a   : > { %13766 = vmatprep.mubr.msk.f32.mxu0 %vm389_vm2, %v22087_v15  ;;  %15141 = vmatpush3.bf16.msra.mxu0 %v15138_v10  ;;  %v22091_v10 = vld [vmem:[#allocation41_spill] sm:$0xff] }
 0x30b   : > { %15143 = vmatprep.subr.bf16.mxu0 %v15142_v12 }
 0x30d   : > { %13767 = vmatmul.mubr.msk.f32.gmra.mrb[8].mxu0 %vm389_vm2, %v22088_v62 }
 0x30e   : > { %13769 = vmatprep.mubr.msk.f32.mxu0 %vm389_vm2, %v22089_v21 }
 0x311   : > { %13770 = vmatmul.mubr.msk.f32.gmra.mrb[10].mxu0 %vm389_vm2, %v18509_v46 }
 0x312   : > { %13772 = vmatprep.mubr.msk.f32.mxu0 %vm389_vm2, %v18514_v1 }
 0x315   : > { %13773 = vmatmul.mubr.msk.f32.gmra.mrb[12].mxu0 %vm389_vm2, %v18521_v61 }
 0x316   : > { %13775 = vmatprep.mubr.msk.f32.mxu0 %vm389_vm2, %v18527_v36 }
 0x319   : > { %13776 = vmatmul.mubr.msk.f32.gmra.mrb[14].mxu0 %vm389_vm2, %v18534_v25 }
 0x31a   : > { %13778 = vmatprep.mubr.msk.f32.mxu0 %vm389_vm2, %v18540_v38 }
 0x31d   : > { %13779 = vmatmul.mubr.msk.f32.gmra.mrb[16].mxu0 %vm389_vm2, %v18547_v51 }
 0x31e   : > { %13781 = vmatprep.mubr.msk.f32.mxu0 %vm389_vm2, %v18553_v45 }
 0x321   : > { %13782 = vmatmul.mubr.msk.f32.gmra.mrb[18].mxu0 %vm389_vm2, %v18560_v60 }
 0x322   : > { %13784 = vmatprep.mubr.msk.f32.mxu0 %vm389_vm2, %v22090_v32 }
 0x325   : > { %13785 = vmatmul.mubr.msk.f32.gmra.mrb[20].mxu0 %vm389_vm2, %v18573_v44 }
 0x326   : > { %13787 = vmatprep.mubr.msk.f32.mxu0 %vm389_vm2, %v22091_v10  ;;  %v4473_v10 = vrot.slane %v18720_v52, 2 }
 0x329   : > { %13788 = vmatmul.mubr.msk.f32.gmra.mrb[22].mxu0 %vm389_vm2, %v18586_v34  ;;  %v4476_v34 = vrot.slane %v18809_v19, 2  ;;  %v2822_v19 = vld [vmem:[%s21859_s3 + $0x1d8] sm:$0xff] }
 0x32a   : > { %13790 = vmatprep.mubr.msk.f32.mxu0 %vm389_vm2, %v22092_v11 }
 0x32d   : > { %13791 = vmatmul.mubr.msk.f32.gmra.mrb[24].mxu0 %vm389_vm2, %v18599_v20  ;;  %v18915_v20 = vsel %vm1307_vm5, %v4473_v10, %v4474_v16 }
 0x32e   : > { %13793 = vmatprep.mubr.msk.f32.mxu0 %vm389_vm2, %v18605_v41  ;;  %v18920_v41 = vsel %vm1307_vm5, %v4474_v16, %v4476_v34  ;;  %v2823_v34 = vld [vmem:[%s21859_s3 + $0x1e0] sm:$0xff]  ;;  %v2824_v16 = vld [vmem:[%s21859_s3 + $0x1e8] sm:$0xff] }
 0x32f   : > { %22093 = vst [vmem:[#allocation12_spill] sm:$0xff] %v18920_v41 }
 0x331   : > { %13794 = vmatmul.mubr.msk.f32.gmra.mrb[26].mxu0 %vm389_vm2, %v18612_v54 }
 0x332   : > { %13796 = vmatprep.mubr.msk.f32.mxu0 %vm389_vm2, %v18618_v57  ;;  %v2821_v57 = vld [vmem:[%s21859_s3 + $0x1d0] sm:$0xff] }
 0x333   : > { %v15146_v10 = vpack.c.bf16 %v2822_v19, %v2821_v57  ;;  %v2826_v57 = vld [vmem:[%s21859_s3 + $0x1f8] sm:$0xff] }
 0x335   : > { %13797 = vmatmul.mubr.msk.f32.gmra.mrb[28].mxu0 %vm389_vm2, %v18623_v30 }
 0x336   : > { %13799 = vmatprep.mubr.msk.f32.mxu0 %vm389_vm2, %v18915_v20 }
 0x339   : > { %13800 = vmatmul.mubr.msk.f32.gmra.mrb[30].mxu0 %vm389_vm2, %v18920_v41  ;;  %v15150_v41 = vpack.c.bf16 %v2824_v16, %v2823_v34  ;;  %v22111_v34 = vld [vmem:[#allocation28_spill] sm:$0xff]  ;;  %v22112_v16 = vld [vmem:[#allocation6_spill] sm:$0xff] }
 0x33a   : > { %13818 = vmatprep.mubr.msk.f32.mxu0 %vm389_vm2, %v18320_v31  ;;  %v2825_v31 = vld [vmem:[%s21859_s3 + $0x1f0] sm:$0xff] }
 0x33d   : > { %13819 = vmatmul.mubr.msk.f32.vlgmr.msra.gmra.mrb[0].mxu0 %vm389_vm2, %v18330_v17  ;;  %v15154_v17 = vpack.c.bf16 %v2826_v57, %v2825_v31 }
 0x33e   : > { %13821 = vmatprep.mubr.msk.f32.mxu0 %vm389_vm2, %v18334_v29  ;;  %15145 = vmatpush3.bf16.msra.mxu0 %v15142_v12  ;;  %v2827_v29 = vld [vmem:[%s21859_s3 + $0x200] sm:$0xff]  ;;  %v2828_v12 = vld [vmem:[%s21859_s3 + $0x208] sm:$0xff] }
 0x33f   : > { %15147 = vmatprep.subr.bf16.mxu0 %v15146_v10 }
 0x341   : > { %13822 = vmatmul.mubr.msk.f32.gmra.mrb[2].mxu0 %vm389_vm2, %v18338_v3  ;;  %v15158_v3 = vpack.c.bf16 %v2828_v12, %v2827_v29  ;;  %v22114_v12 = vld [vmem:[#allocation31_spill] sm:$0xff] }
 0x342   : > { %13824 = vmatprep.mubr.msk.f32.mxu0 %vm389_vm2, %v18342_v50  ;;  %15149 = vmatpush3.bf16.msra.mxu0 %v15146_v10  ;;  %v16523_v50 = vld [vmem:[#allocation3 + $0xf0] sm:$0xff]  ;;  %v2762_v10 = vld [vmem:[#allocation3 + $0x1a8] sm:$0x3] }
 0x343   : > { %15151 = vmatprep.subr.bf16.mxu0 %v15150_v41  ;;  %v5006_v31 = vrot.slane %v2762_v10, 1 }
 0x345   : > { %13825 = vmatmul.mubr.msk.f32.gmra.mrb[4].mxu0 %vm389_vm2, %v18346_v55  ;;  %v16524_v55 = vld [vmem:[#allocation3 + $0xf8] sm:$0xff] }
 0x346   : > { %13827 = vmatprep.mubr.msk.f32.mxu0 %vm389_vm2, %v18350_v47  ;;  %15153 = vmatpush3.bf16.msra.mxu0 %v15150_v41  ;;  %v16525_v47 = vld [vmem:[#allocation3 + $0x108] sm:$0xff]  ;;  %v22100_v41 = vld [vmem:[#allocation17_spill] sm:$0xff] }
 0x347   : > { %15155 = vmatprep.subr.bf16.mxu0 %v15154_v17 }
 0x349   : > { %13828 = vmatmul.mubr.msk.f32.gmra.mrb[6].mxu0 %vm389_vm2, %v18354_v8  ;;  %v16526_v8 = vld [vmem:[#allocation3 + $0x110] sm:$0xff] }
 0x34a   : > { %13830 = vmatprep.mubr.msk.f32.mxu0 %vm389_vm2, %v18358_v28  ;;  %15157 = vmatpush3.bf16.msra.mxu0 %v15154_v17  ;;  %v2834_v28 = vld [vmem:[%s21859_s3 + $0x238] sm:$0xff] }
 0x34b   : > { %15159 = vmatprep.subr.bf16.mxu0 %v15158_v3  ;;  %v22113_v17 = vld [vmem:[#allocation11_spill] sm:$0xff] }
 0x34d   : > { %13831 = vmatmul.mubr.msk.f32.gmra.mrb[8].mxu0 %vm389_vm2, %v18362_v0  ;;  %v22095_v0 = vld [vmem:[#allocation8_spill] sm:$0xff] }
 0x34e   : > { %13833 = vmatprep.mubr.msk.f32.mxu0 %vm389_vm2, %v18505_v4  ;;  %v22096_v4 = vld [vmem:[#allocation9_spill] sm:$0xff] }
 0x351   : > { %13834 = vmatmul.mubr.msk.f32.gmra.mrb[10].mxu0 %vm389_vm2, %v18500_v35  ;;  %v22099_v35 = vld [vmem:[#allocation16_spill] sm:$0xff] }
 0x352   : > { %13836 = vmatprep.mubr.msk.f32.mxu0 %vm389_vm2, %v18680_v5  ;;  %v22101_v5 = vld [vmem:[#allocation18_spill] sm:$0xff] }
 0x355   : > { %13837 = vmatmul.mubr.msk.f32.gmra.mrb[12].mxu0 %vm389_vm2, %v18684_v59  ;;  %v22102_v59 = vld [vmem:[#allocation19_spill] sm:$0xff] }
 0x356   : > { %13839 = vmatprep.mubr.msk.f32.mxu0 %vm389_vm2, %v18688_v37  ;;  %v22103_v37 = vld [vmem:[#allocation20_spill] sm:$0xff] }
 0x359   : > { %13840 = vmatmul.mubr.msk.f32.gmra.mrb[14].mxu0 %vm389_vm2, %v18692_v43  ;;  %v22104_v43 = vld [vmem:[#allocation21_spill] sm:$0xff] }
 0x35a   : > { %13842 = vmatprep.mubr.msk.f32.mxu0 %vm389_vm2, %v16523_v50  ;;  %v22116_v50 = vld [vmem:[#allocation33_spill] sm:$0xff] }
 0x35d   : > { %13843 = vmatmul.mubr.msk.f32.gmra.mrb[16].mxu0 %vm389_vm2, %v16524_v55  ;;  %v19179_v55 = vld [vmem:[%s21860_s4] ss:$0 sm:$0xff] }
 0x35e   : > { %13845 = vmatprep.mubr.msk.f32.mxu0 %vm389_vm2, %v16525_v47 }
 0x361   : > { %13846 = vmatmul.mubr.msk.f32.gmra.mrb[18].mxu0 %vm389_vm2, %v16526_v8 }
 0x362   : > { %13848 = vmatprep.mubr.msk.f32.mxu0 %vm389_vm2, %v18154_v39  ;;  %v19002_v39 = vld [vmem:[#allocation3 + $0x198] sm:$0xff] }
 0x365   : > { %13849 = vmatmul.mubr.msk.f32.gmra.mrb[20].mxu0 %vm389_vm2, %v18156_v40  ;;  %v19008_v40 = vld [vmem:[#allocation3 + $0x1a0] sm:$0xff] }
 0x366   : > { %13851 = vmatprep.mubr.msk.f32.mxu0 %vm389_vm2, %v18180_v63  ;;  %v2829_v63 = vld [vmem:[%s21859_s3 + $0x210] sm:$0xff]  ;;  %v5004_v19 = vrot.slane %v19008_v40, 1 }
 0x368   : > { %v5007_v29 = vsel %vm1060_vm4, %v5004_v19, %v5006_v31 }
 0x369   : > { %13852 = vmatmul.mubr.msk.f32.gmra.mrb[22].mxu0 %vm389_vm2, %v18182_v56  ;;  %v2830_v56 = vld [vmem:[%s21859_s3 + $0x218] sm:$0xff] }
 0x36a   : > { %13854 = vmatprep.mubr.msk.f32.mxu0 %vm389_vm2, %v18204_v49  ;;  %v15162_v49 = vpack.c.bf16 %v2830_v56, %v2829_v63 }
 0x36d   : > { %13855 = vmatmul.mubr.msk.f32.gmra.mrb[24].mxu0 %vm389_vm2, %v18206_v23  ;;  %v2831_v23 = vld [vmem:[%s21859_s3 + $0x220] sm:$0xff] }
 0x36e   : > { %13857 = vmatprep.mubr.msk.f32.mxu0 %vm389_vm2, %v18229_v18  ;;  %v2832_v18 = vld [vmem:[%s21859_s3 + $0x228] sm:$0xff] }
 0x371   : > { %13858 = vmatmul.mubr.msk.f32.gmra.mrb[26].mxu0 %vm389_vm2, %v18237_v6  ;;  %v15166_v6 = vpack.c.bf16 %v2832_v18, %v2831_v23 }
 0x372   : > { %13860 = vmatprep.mubr.msk.f32.mxu0 %vm389_vm2, %v18720_v52  ;;  %v22105_v52 = vld [vmem:[#allocation22_spill] sm:$0xff] }
 0x375   : > { %13861 = vmatmul.mubr.msk.f32.gmra.mrb[28].mxu0 %vm389_vm2, %v18724_v42  ;;  %v22106_v42 = vld [vmem:[#allocation23_spill] sm:$0xff] }
 0x376   : > { %13863 = vmatprep.mubr.msk.f32.mxu0 %vm389_vm2, %v19002_v39 }
 0x379   : > { %13864 = vmatmul.mubr.msk.f32.gmra.mrb[30].mxu0 %vm389_vm2, %v19008_v40 }
 0x37a   : > { %13882 = vmatprep.mubr.msk.f32.mxu0 %vm389_vm2, %v17426_v33  ;;  %v2833_v33 = vld [vmem:[%s21859_s3 + $0x230] sm:$0xff] }
 0x37d   : > { %13883 = vmatmul.mubr.msk.f32.vlgmr.msra.gmra.mrb[0].mxu0 %vm389_vm2, %v17462_v53  ;;  %v15170_v53 = vpack.c.bf16 %v2834_v28, %v2833_v33 }
 0x37e   : > { %13885 = vmatprep.mubr.msk.f32.mxu0 %vm389_vm2, %v17511_v7  ;;  %15161 = vmatpush3.bf16.msra.mxu0 %v15158_v3  ;;  %v22094_v7 = vld [vmem:[#allocation7_spill] sm:$0xff]  ;;  %v22115_v3 = vld [vmem:[#allocation32_spill] sm:$0xff] }
 0x37f   : > { %15163 = vmatprep.subr.bf16.mxu0 %v15162_v49 }
 0x381   : > { %13886 = vmatmul.mubr.msk.f32.gmra.mrb[2].mxu0 %vm389_vm2, %v17517_v13  ;;  %v22097_v13 = vld [vmem:[#allocation10_spill] sm:$0xff] }
 0x382   : > { %13888 = vmatprep.mubr.msk.f32.mxu0 %vm389_vm2, %v17568_v14  ;;  %15165 = vmatpush3.bf16.msra.mxu0 %v15162_v49  ;;  %v22098_v14 = vld [vmem:[#allocation15_spill] sm:$0xff] }
 0x383   : > { %15167 = vmatprep.subr.bf16.mxu0 %v15166_v6 }
 0x385   : > { %13889 = vmatmul.mubr.msk.f32.gmra.mrb[4].mxu0 %vm389_vm2, %v22061_v48  ;;  %v22107_v48 = vld [vmem:[#allocation24_spill] sm:$0xff] }
 0x386   : > { %13891 = vmatprep.mubr.msk.f32.mxu0 %vm389_vm2, %v22094_v7  ;;  %15169 = vmatpush3.bf16.msra.mxu0 %v15166_v6 }
 0x387   : > { %15171 = vmatprep.subr.bf16.mxu0 %v15170_v53 }
 0x389   : > { %13892 = vmatmul.mubr.msk.f32.gmra.mrb[6].mxu0 %vm389_vm2, %v22095_v0 }
 0x38a   : > { %13894 = vmatprep.mubr.msk.f32.mxu0 %vm389_vm2, %v22096_v4  ;;  %15173 = vmatpush3.bf16.msra.mxu0 %v15170_v53 }
 0x38d   : > { %13895 = vmatmul.mubr.msk.f32.gmra.mrb[8].mxu0 %vm389_vm2, %v22097_v13 }
 0x38e   : > { %13897 = vmatprep.mubr.msk.f32.mxu0 %vm389_vm2, %v22066_v2  ;;  %v22108_v2 = vld [vmem:[#allocation25_spill] sm:$0xff] }
 0x391   : > { %13898 = vmatmul.mubr.msk.f32.gmra.mrb[10].mxu0 %vm389_vm2, %v22067_v26  ;;  %v22109_v26 = vld [vmem:[#allocation26_spill] sm:$0xff] }
 0x392   : > { %13900 = vmatprep.mubr.msk.f32.mxu0 %vm389_vm2, %v22068_v9  ;;  %v22110_v9 = vld [vmem:[#allocation27_spill] sm:$0xff] }
 0x395   : > { %13901 = vmatmul.mubr.msk.f32.gmra.mrb[12].mxu0 %vm389_vm2, %v22069_v22  ;;  %v5003_v22 = vrot.slane %v19002_v39, 1 }
 0x396   : > { %13903 = vmatprep.mubr.msk.f32.mxu0 %vm389_vm2, %v22098_v14 }
 0x397   : > { %v5005_v57 = vsel %vm1060_vm4, %v5003_v22, %v5004_v19 }
 0x399   : > { %13904 = vmatmul.mubr.msk.f32.gmra.mrb[14].mxu0 %vm389_vm2, %v22099_v35 }
 0x39a   : > { %13906 = vmatprep.mubr.msk.f32.mxu0 %vm389_vm2, %v22100_v41 }
 0x39d   : > { %13907 = vmatmul.mubr.msk.f32.gmra.mrb[16].mxu0 %vm389_vm2, %v22101_v5 }
 0x39e   : > { %13909 = vmatprep.mubr.msk.f32.mxu0 %vm389_vm2, %v22102_v59 }
 0x3a1   : > { %13910 = vmatmul.mubr.msk.f32.gmra.mrb[18].mxu0 %vm389_vm2, %v22103_v37 }
 0x3a2   : > { %13912 = vmatprep.mubr.msk.f32.mxu0 %vm389_vm2, %v22104_v43 }
 0x3a5   : > { %13913 = vmatmul.mubr.msk.f32.gmra.mrb[20].mxu0 %vm389_vm2, %v22105_v52 }
 0x3a6   : > { %13915 = vmatprep.mubr.msk.f32.mxu0 %vm389_vm2, %v22106_v42 }
 0x3a9   : > { %13916 = vmatmul.mubr.msk.f32.gmra.mrb[22].mxu0 %vm389_vm2, %v22107_v48 }
 0x3aa   : > { %13918 = vmatprep.mubr.msk.f32.mxu0 %vm389_vm2, %v22108_v2 }
 0x3ad   : > { %13919 = vmatmul.mubr.msk.f32.gmra.mrb[24].mxu0 %vm389_vm2, %v22109_v26 }
 0x3ae   : > { %13921 = vmatprep.mubr.msk.f32.mxu0 %vm389_vm2, %v22110_v9 }
 0x3b1   : > { %13922 = vmatmul.mubr.msk.f32.gmra.mrb[26].mxu0 %vm389_vm2, %v22111_v34 }
 0x3b2   : > { %13924 = vmatprep.mubr.msk.f32.mxu0 %vm389_vm2, %v22112_v16 }
 0x3b5   : > { %13925 = vmatmul.mubr.msk.f32.gmra.mrb[28].mxu0 %vm389_vm2, %v22113_v17 }
 0x3b6   : > { %13927 = vmatprep.mubr.msk.f32.mxu0 %vm389_vm2, %v5005_v57 }
 0x3b9   : > { %13928 = vmatmul.mubr.msk.f32.gmra.mrb[30].mxu0 %vm389_vm2, %v5007_v29 }
 0x3ba   : > { %13946 = vmatprep.mubr.msk.f32.mxu0 %vm389_vm2, %v22114_v12 }
 0x3bd   : > { %13947 = vmatmul.mubr.msk.f32.vlgmr.msra.gmra.mrb[0].mxu0 %vm389_vm2, %v22115_v3 }
 0x3be   : > { %13949 = vmatprep.mubr.msk.f32.mxu0 %vm389_vm2, %v22116_v50 }
 0x3c1   : > { %13950 = vmatmul.mubr.msk.f32.gmra.mrb[2].mxu0 %vm389_vm2, %v22084_v24 }
 0x3c2   : > { %13952 = vmatprep.mubr.msk.f32.mxu0 %vm389_vm2, %v22085_v58  ;;  %v5605_v58 = vlaneseq }
 0x3c4   : > { %v19164_v24 = vand.u32 127, %v5605_v58 }
 0x3c5   : > { %13953 = vmatmul.mubr.msk.f32.gmra.mrb[4].mxu0 %vm389_vm2, %v22086_v27 }
 0x3c6   : > { %13955 = vmatprep.mubr.msk.f32.mxu0 %vm389_vm2, %v22087_v15  ;;  %v19169_v27 = vadd.s32 128, %v19164_v24 }
 0x3c9   : > { %13956 = vmatmul.mubr.msk.f32.gmra.mrb[6].mxu0 %vm389_vm2, %v22088_v62 }
 0x3ca   : > { %13958 = vmatprep.mubr.msk.f32.mxu0 %vm389_vm2, %v22089_v21  ;;  %v19162_v21 = vshrl.u32 %v5605_v58, 7 }
 0x3cd   : > { %13959 = vmatmul.mubr.msk.f32.gmra.mrb[8].mxu0 %vm389_vm2, %v18509_v46  ;;  %v22118_v46 = vld [vmem:[#allocation42_spill] sm:$0xff] }
 0x3ce   : > { %13961 = vmatprep.mubr.msk.f32.mxu0 %vm389_vm2, %v18514_v1  ;;  %v22119_v1 = vld [vmem:[#allocation44_spill] sm:$0xff] }
 0x3d1   : > { %13962 = vmatmul.mubr.msk.f32.gmra.mrb[10].mxu0 %vm389_vm2, %v18521_v61  ;;  %v22117_v61 = vld [vmem:[#allocation41_spill] sm:$0xff] }
 0x3d2   : > { %13964 = vmatprep.mubr.msk.f32.mxu0 %vm389_vm2, %v18527_v36  ;;  %v22120_v36 = vld [vmem:[#allocation45_spill] sm:$0xff] }
 0x3d5   : > { %13965 = vmatmul.mubr.msk.f32.gmra.mrb[12].mxu0 %vm389_vm2, %v18534_v25  ;;  %v22121_v25 = vld [vmem:[#allocation46_spill] sm:$0xff] }
 0x3d6   : > { %13967 = vmatprep.mubr.msk.f32.mxu0 %vm389_vm2, %v18540_v38  ;;  %v5269_v38 = vrot.slane %v19002_v39, 2 }
 0x3d9   : > { %13968 = vmatmul.mubr.msk.f32.gmra.mrb[14].mxu0 %vm389_vm2, %v18547_v51  ;;  %v5270_v51 = vrot.slane %v19008_v40, 2 }
 0x3da   : > { %13970 = vmatprep.mubr.msk.f32.mxu0 %vm389_vm2, %v18553_v45  ;;  %v5272_v45 = vrot.slane %v2762_v10, 2 }
 0x3dd   : > { %13971 = vmatmul.mubr.msk.f32.gmra.mrb[16].mxu0 %vm389_vm2, %v18560_v60  ;;  %v5271_v60 = vsel %vm1307_vm5, %v5269_v38, %v5270_v51 }
 0x3de   : > { %13973 = vmatprep.mubr.msk.f32.mxu0 %vm389_vm2, %v22090_v32 }
 0x3e1   : > { %13974 = vmatmul.mubr.msk.f32.gmra.mrb[18].mxu0 %vm389_vm2, %v18573_v44  ;;  %v22122_v44 = vld [vmem:[#allocation12_spill] sm:$0xff] }
 0x3e2   : > { %13976 = vmatprep.mubr.msk.f32.mxu0 %vm389_vm2, %v22117_v61 }
 0x3e5   : > { %13977 = vmatmul.mubr.msk.f32.gmra.mrb[20].mxu0 %vm389_vm2, %v22118_v46 }
 0x3e6   : > { %13979 = vmatprep.mubr.msk.f32.mxu0 %vm389_vm2, %v22092_v11  ;;  %v16545_v11 = vmov 1.0  }
 0x3e9   : > { %13980 = vmatmul.mubr.msk.f32.gmra.mrb[22].mxu0 %vm389_vm2, %v22119_v1 }
 0x3ea   : > { %13982 = vmatprep.mubr.msk.f32.mxu0 %vm389_vm2, %v22120_v36 }
 0x3ed   : > { %13983 = vmatmul.mubr.msk.f32.gmra.mrb[24].mxu0 %vm389_vm2, %v18612_v54  ;;  %v5273_v54 = vsel %vm1307_vm5, %v5270_v51, %v5272_v45 }
 0x3ee   : > { %13985 = vmatprep.mubr.msk.f32.mxu0 %vm389_vm2, %v22121_v25 }
 0x3f1   : > { %13986 = vmatmul.mubr.msk.f32.gmra.mrb[26].mxu0 %vm389_vm2, %v18623_v30  ;;  %v5617_v30 = vshra.s32 %v19162_v21, 3 }
 0x3f2   : > { %13988 = vmatprep.mubr.msk.f32.mxu0 %vm389_vm2, %v18915_v20  ;;  %v5625_v20 = vand.u32 7, %v19162_v21 }
 0x3f3   : > { %v5633_v15 = vmul.u32 32, %v5617_v30 }
 0x3f4   : > { %v5641_v62 = vmul.u32 2, %v5625_v20 }
 0x3f5   : > { %13989 = vmatmul.mubr.msk.f32.gmra.mrb[28].mxu0 %vm389_vm2, %v22122_v44 }
 0x3f6   : > { %13991 = vmatprep.mubr.msk.f32.mxu0 %vm389_vm2, %v5271_v60  ;;  %v19171_v32 = vadd.s32 %v5641_v62, %v5633_v15 }
 0x3f8   : > { %vm5658_vm6 = vcmp.eq.s32.totalorder %v19169_v27, %v19171_v32  ;;  %vm5657_vm7 = vcmp.eq.s32.totalorder %v19164_v24, %v19171_v32 }
 0x3f9   : > { %13992 = vmatmul.mubr.msk.f32.gmra.mrb[30].mxu0 %vm389_vm2, %v5273_v54  ;;  %11716 = vmatprep.mubr.msk.f32.mxu1 %vm5658_vm6, %v16545_v11 }
 0x490   : > { %v13948_v47 = vpop.f32.mrb[0].mxu0 }
 0x491   : > { %v5542_v8 = vadd.f32 %v13948_v47, %v19179_v55  ;;  %v5344_v39 = vpop.f32.mrb[1].mxu0 }
 0x492   : > { %v5541_v40 = vadd.f32 %v19179_v55, %v5344_v39 }
 0x493   : > { %v5574_v63 = vmax.f32 %v5542_v8, 0.0 }
 0x494   : > { %v5573_v56 = vmax.f32 %v5541_v40, 0.0  ;;  %v13951_v49 = vpop.f32.mrb[2].mxu0 }
 0x495   : > { %v5544_v23 = vadd.f32 %v13951_v49, %v19179_v55  ;;  %v5354_v18 = vpop.f32.mrb[3].mxu0 }
 0x496   : > { %v19184_v6 = vpack.c.bf16 %v5574_v63, %v5573_v56  ;;  %v5543_v33 = vadd.f32 %v19179_v55, %v5354_v18 }
 0x497   : > { %v5576_v28 = vmax.f32 %v5544_v23, 0.0 }
 0x498   : > { %v5575_v53 = vmax.f32 %v5543_v33, 0.0  ;;  %v13954_v7 = vpop.f32.mrb[4].mxu0 }
 0x499   : > { %v5546_v0 = vadd.f32 %v13954_v7, %v19179_v55  ;;  %v5364_v4 = vpop.f32.mrb[5].mxu0 }
 0x49a   : > { %v19188_v13 = vpack.c.bf16 %v5576_v28, %v5575_v53  ;;  %v5545_v14 = vadd.f32 %v19179_v55, %v5364_v4 }
 0x49b   : > { %v5578_v35 = vmax.f32 %v5546_v0, 0.0 }
 0x49c   : > { %v5577_v41 = vmax.f32 %v5545_v14, 0.0  ;;  %v13957_v5 = vpop.f32.mrb[6].mxu0 }
 0x49d   : > { %v5548_v59 = vadd.f32 %v13957_v5, %v19179_v55  ;;  %v5374_v37 = vpop.f32.mrb[7].mxu0 }
 0x49e   : > { %v19192_v43 = vpack.c.bf16 %v5578_v35, %v5577_v41  ;;  %v5547_v52 = vadd.f32 %v19179_v55, %v5374_v37 }
 0x49f   : > { %v5580_v42 = vmax.f32 %v5548_v59, 0.0 }
 0x4a0   : > { %v5579_v48 = vmax.f32 %v5547_v52, 0.0  ;;  %v13960_v2 = vpop.f32.mrb[8].mxu0 }
 0x4a1   : > { %v5550_v26 = vadd.f32 %v13960_v2, %v19179_v55  ;;  %v5384_v9 = vpop.f32.mrb[9].mxu0 }
 0x4a2   : > { %v19196_v22 = vpack.c.bf16 %v5580_v42, %v5579_v48  ;;  %v5549_v19 = vadd.f32 %v19179_v55, %v5384_v9 }
 0x4a3   : > { %v5582_v10 = vmax.f32 %v5550_v26, 0.0 }
 0x4a4   : > { %v5581_v34 = vmax.f32 %v5549_v19, 0.0  ;;  %v13963_v16 = vpop.f32.mrb[10].mxu0 }
 0x4a5   : > { %v5552_v31 = vadd.f32 %v13963_v16, %v19179_v55  ;;  %v5394_v57 = vpop.f32.mrb[11].mxu0 }
 0x4a6   : > { %v19200_v17 = vpack.c.bf16 %v5582_v10, %v5581_v34  ;;  %v5551_v29 = vadd.f32 %v19179_v55, %v5394_v57 }
 0x4a7   : > { %v5584_v12 = vmax.f32 %v5552_v31, 0.0 }
 0x4a8   : > { %v5583_v3 = vmax.f32 %v5551_v29, 0.0  ;;  %v13966_v50 = vpop.f32.mrb[12].mxu0 }
 0x4a9   : > { %v5554_v61 = vadd.f32 %v13966_v50, %v19179_v55  ;;  %v5404_v46 = vpop.f32.mrb[13].mxu0 }
 0x4aa   : > { %v19204_v1 = vpack.c.bf16 %v5584_v12, %v5583_v3  ;;  %v5553_v36 = vadd.f32 %v19179_v55, %v5404_v46  ;;  %v19241_v3 = vadd.s32 8, %v19162_v21 }
 0x4ab   : > { %v5586_v25 = vmax.f32 %v5554_v61, 0.0 }
 0x4ac   : > { %v5585_v38 = vmax.f32 %v5553_v36, 0.0  ;;  %v13969_v51 = vpop.f32.mrb[14].mxu0 }
 0x4ad   : > { %v5556_v45 = vadd.f32 %v13969_v51, %v19179_v55  ;;  %v5414_v60 = vpop.f32.mrb[15].mxu0 }
 0x4ae   : > { %v19208_v44 = vpack.c.bf16 %v5586_v25, %v5585_v38  ;;  %v5555_v54 = vadd.f32 %v19179_v55, %v5414_v60  ;;  %v5626_v60 = vand.u32 7, %v19241_v3 }
 0x4af   : > { %v5588_v58 = vmax.f32 %v5556_v45, 0.0  ;;  %v5618_v45 = vshra.s32 %v19241_v3, 3 }
 0x4b0   : > { %v5587_v30 = vmax.f32 %v5555_v54, 0.0  ;;  %v13972_v20 = vpop.f32.mrb[16].mxu0  ;;  %v19252_v54 = vadd.s32 16, %v19162_v21 }
 0x4b1   : > { %v5558_v15 = vadd.f32 %v13972_v20, %v19179_v55  ;;  %v5424_v62 = vpop.f32.mrb[17].mxu0 }
 0x4b2   : > { %v19212_v47 = vpack.c.bf16 %v5588_v58, %v5587_v30  ;;  %v5557_v8 = vadd.f32 %v19179_v55, %v5424_v62 }
 0x4b3   : > { %v5590_v39 = vmax.f32 %v5558_v15, 0.0 }
 0x4b4   : > { %v5589_v40 = vmax.f32 %v5557_v8, 0.0  ;;  %v13975_v63 = vpop.f32.mrb[18].mxu0 }
 0x4b5   : > { %v5560_v56 = vadd.f32 %v13975_v63, %v19179_v55  ;;  %v5434_v49 = vpop.f32.mrb[19].mxu0  ;;  %v5642_v63 = vmul.u32 2, %v5626_v60 }
 0x4b6   : > { %v19216_v23 = vpack.c.bf16 %v5590_v39, %v5589_v40  ;;  %v5559_v18 = vadd.f32 %v19179_v55, %v5434_v49  ;;  %v5634_v40 = vmul.u32 32, %v5618_v45 }
 0x4b7   : > { %v5592_v33 = vmax.f32 %v5560_v56, 0.0  ;;  %v5619_v56 = vshra.s32 %v19252_v54, 3 }
 0x4b8   : > { %v5591_v28 = vmax.f32 %v5559_v18, 0.0  ;;  %v13978_v53 = vpop.f32.mrb[20].mxu0  ;;  %15175 = vmatprep.subr.bf16.mxu1 %v19216_v23 }
 0x4b9   : > { %v5562_v7 = vadd.f32 %v13978_v53, %v19179_v55  ;;  %v5444_v0 = vpop.f32.mrb[21].mxu0  ;;  %15177 = vmatpush3.bf16.msra.mxu1 %v19184_v6 }
 0x4ba   : > { %v19222_v4 = vpack.c.bf16 %v5592_v33, %v5591_v28  ;;  %v5561_v14 = vadd.f32 %v19179_v55, %v5444_v0  ;;  %v5627_v33 = vand.u32 7, %v19252_v54  ;;  %v19266_v28 = vadd.s32 24, %v19162_v21 }
 0x4bb   : > { %v5594_v35 = vmax.f32 %v5562_v7, 0.0  ;;  %v19270_v0 = vadd.s32 %v5642_v63, %v5634_v40  ;;  %v5810_v40 = vadd.s32 1, %v19171_v32 }
 0x4bc   : > { %v5593_v41 = vmax.f32 %v5561_v14, 0.0  ;;  %v13981_v5 = vpop.f32.mrb[22].mxu0  ;;  %15179 = vmatprep.subr.bf16.mxu1 %v19222_v4  ;;  %v5635_v14 = vmul.u32 32, %v5619_v56 }
 0x4bd   : > { %v5564_v59 = vadd.f32 %v13981_v5, %v19179_v55  ;;  %v5454_v37 = vpop.f32.mrb[23].mxu0  ;;  %15181 = vmatpush3.bf16.msra.mxu1 %v19188_v13  ;;  %v5620_v5 = vshra.s32 %v19266_v28, 3  ;;  %vm5660_vm8 = vcmp.eq.s32.totalorder %v19169_v27, %v19270_v0  ;;  %vm5659_vm9 = vcmp.eq.s32.totalorder %v19164_v24, %v19270_v0 }
 0x4be   : > { %v19228_v52 = vpack.c.bf16 %v5594_v35, %v5593_v41  ;;  %v5563_v42 = vadd.f32 %v19179_v55, %v5454_v37  ;;  %v19273_v35 = vadd.s32 32, %v19162_v21  ;;  %v5811_v63 = vadd.s32 1, %v19270_v0 }
 0x4bf   : > { %v5596_v48 = vmax.f32 %v5564_v59, 0.0  ;;  %v5628_v59 = vand.u32 7, %v19266_v28 }
 0x4c0   : > { %v5595_v2 = vmax.f32 %v5563_v42, 0.0  ;;  %v13984_v26 = vpop.f32.mrb[24].mxu0  ;;  %15183 = vmatprep.subr.bf16.mxu1 %v19228_v52  ;;  %v5621_v37 = vshra.s32 %v19273_v35, 3  ;;  %v5629_v42 = vand.u32 7, %v19273_v35 }
 0x4c1   : > { %v5566_v9 = vadd.f32 %v13984_v26, %v19179_v55  ;;  %v5464_v19 = vpop.f32.mrb[25].mxu0  ;;  %15185 = vmatpush3.bf16.msra.mxu1 %v19192_v43  ;;  %v5636_v26 = vmul.u32 32, %v5620_v5  ;;  %v5980_v5 = vadd.s32 16, %v19270_v0 }
 0x4c2   : > { %v19234_v10 = vpack.c.bf16 %v5596_v48, %v5595_v2  ;;  %v5565_v34 = vadd.f32 %v19179_v55, %v5464_v19  ;;  %v19286_v48 = vadd.s32 40, %v19162_v21  ;;  %v5637_v19 = vmul.u32 32, %v5621_v37  ;;  %v6367_v37 = vld [vmem:[%s21861_s5 + $0xa8] sm:$0xff] }
 0x4c3   : > { %v5598_v16 = vmax.f32 %v5566_v9, 0.0  ;;  %v5644_v9 = vmul.u32 2, %v5628_v59  ;;  %v6366_v59 = vld [vmem:[%s21861_s5 + $0xa0] sm:$0xff] }
 0x4c4   : > { %v5597_v31 = vmax.f32 %v5565_v34, 0.0  ;;  %v13987_v57 = vpop.f32.mrb[26].mxu0  ;;  %15187 = vmatprep.subr.bf16.mxu1 %v19234_v10  ;;  %v5645_v34 = vmul.u32 2, %v5629_v42  ;;  %v15310_v42 = vpack.c.bf16 %v6367_v37, %v6366_v59 }
 0x4c5   : > { %v5568_v29 = vadd.f32 %v13987_v57, %v19179_v55  ;;  %v5474_v12 = vpop.f32.mrb[27].mxu0  ;;  %15189 = vmatpush3.bf16.msra.mxu1 %v19196_v22  ;;  %v19303_v57 = vadd.s32 %v5644_v9, %v5636_v26  ;;  %v6369_v26 = vld [vmem:[%s21861_s5 + $0xb8] sm:$0xff] }
 0x4c6   : > { %v19243_v50 = vpack.c.bf16 %v5598_v16, %v5597_v31  ;;  %v5567_v61 = vadd.f32 %v19179_v55, %v5474_v12  ;;  %v5622_v16 = vshra.s32 %v19286_v48, 3  ;;  %v5630_v31 = vand.u32 7, %v19286_v48 }
 0x4c7   : > { %v5600_v46 = vmax.f32 %v5568_v29, 0.0  ;;  %v19306_v29 = vadd.s32 48, %v19162_v21  ;;  %v19313_v12 = vadd.s32 %v5645_v34, %v5637_v19  ;;  %vm5664_vm12 = vcmp.eq.s32.totalorder %v19169_v27, %v19303_v57  ;;  %v6370_v19 = vld [vmem:[%s21861_s5 + $0xc0] sm:$0xff]  ;;  %v6371_v34 = vld [vmem:[%s21861_s5 + $0xc8] sm:$0xff] }
 0x4c8   : > { %v5599_v36 = vmax.f32 %v5567_v61, 0.0  ;;  %v13990_v25 = vpop.f32.mrb[28].mxu0  ;;  %15191 = vmatprep.subr.bf16.mxu1 %v19243_v50  ;;  %v5638_v61 = vmul.u32 32, %v5622_v16  ;;  %vm5663_vm13 = vcmp.eq.s32.totalorder %v19164_v24, %v19303_v57  ;;  %v5982_v0 = vadd.s32 16, %v19303_v57 }
 0x4c9   : > { %v5570_v38 = vadd.f32 %v13990_v25, %v19179_v55  ;;  %v5484_v51 = vpop.f32.mrb[29].mxu0  ;;  %15193 = vmatpush3.bf16.msra.mxu1 %v19200_v17  ;;  %v5631_v25 = vand.u32 7, %v19306_v29  ;;  %vm5666_vm14 = vcmp.eq.s32.totalorder %v19169_v27, %v19313_v12  ;;  %vm5665_vm15 = vcmp.eq.s32.totalorder %v19164_v24, %v19313_v12 }
 0x4ca   : > { %v19254_v58 = vpack.c.bf16 %v5600_v46, %v5599_v36  ;;  %v5569_v30 = vadd.f32 %v19179_v55, %v5484_v51  ;;  %v5646_v46 = vmul.u32 2, %v5630_v31  ;;  %v5623_v36 = vshra.s32 %v19306_v29, 3  ;;  %v6372_v31 = vld [vmem:[%s21861_s5 + $0xd0] sm:$0xff] }
 0x4cb   : > { %v5602_v20 = vmax.f32 %v5570_v38, 0.0  ;;  %v19321_v38 = vadd.s32 56, %v19162_v21  ;;  %v5647_v60 = vmul.u32 2, %v5631_v25  ;;  %v15318_v16 = vpack.c.bf16 %v6371_v34, %v6370_v19  ;;  %v6376_v25 = vld [vmem:[%s21861_s5 + $0xf0] sm:$0xff] }
 0x4cc   : > { %v5601_v15 = vmax.f32 %v5569_v30, 0.0  ;;  %v13993_v62 = vpop.f32.mrb[30].mxu0  ;;  %15195 = vmatprep.subr.bf16.mxu1 %v19254_v58  ;;  %v19330_v51 = vadd.s32 %v5646_v46, %v5638_v61  ;;  %v5639_v45 = vmul.u32 32, %v5623_v36  ;;  %v6374_v61 = vld [vmem:[%s21861_s5 + $0xe0] sm:$0xff]  ;;  %v6375_v46 = vld [vmem:[%s21861_s5 + $0xe8] sm:$0xff] }
 0x4cd   : > { %v5572_v8 = vadd.f32 %v13993_v62, %v19179_v55  ;;  %v5494_v39 = vpop.f32.mrb[31].mxu0  ;;  %15197 = vmatpush3.bf16.msra.mxu1 %v19204_v1  ;;  %v5624_v30 = vshra.s32 %v19321_v38, 3  ;;  %v15326_v36 = vpack.c.bf16 %v6375_v46, %v6374_v61 }
 0x4ce   : > { %v19261_v49 = vpack.c.bf16 %v5602_v20, %v5601_v15  ;;  %v5571_v18 = vadd.f32 %v19179_v55, %v5494_v39  ;;  %v5643_v55 = vmul.u32 2, %v5627_v33  ;;  %v5632_v20 = vand.u32 7, %v19321_v38 }
 0x4cf   : > { %v5604_v53 = vmax.f32 %v5572_v8, 0.0  ;;  %vm5668_vm0 = vcmp.eq.s32.totalorder %v19169_v27, %v19330_v51  ;;  %v19343_v15 = vadd.s32 %v5647_v60, %v5639_v45  ;;  %v5640_v62 = vmul.u32 32, %v5624_v30  ;;  %v19563_v60 = vld [vmem:[#allocation4 + $0x8] sm:$0x3]  ;;  %v19565_v30 = vld [vmem:[#allocation4] sm:$0xff] }
 0x4d0   : > { %v5603_v7 = vmax.f32 %v5571_v18, 0.0  ;;  %15199 = vmatprep.subr.bf16.mxu1 %v19261_v49  ;;  %v19291_v2 = vadd.s32 %v5643_v55, %v5635_v14  ;;  %v5648_v8 = vmul.u32 2, %v5632_v20  ;;  %vm5667_vm1 = vcmp.eq.s32.totalorder %v19164_v24, %v19330_v51 }
 0x4d1   : > { %15201 = vmatpush3.bf16.msra.mxu1 %v19208_v44  ;;  %vm5670_vm3 = vcmp.eq.s32.totalorder %v19169_v27, %v19343_v15  ;;  %vm5669_vm6 = vcmp.eq.s32.totalorder %v19164_v24, %v19343_v15  ;;  %v5813_v18 = vadd.s32 1, %v19303_v57  ;;  %v5814_v33 = vadd.s32 1, %v19313_v12  ;;  %v6373_v57 = vld [vmem:[%s21861_s5 + $0xd8] sm:$0xff] }
 0x4d2   : > { %v19275_v41 = vpack.c.bf16 %v5604_v53, %v5603_v7  ;;  %vm5662_vm10 = vcmp.eq.s32.totalorder %v19169_v27, %v19291_v2  ;;  %vm5661_vm11 = vcmp.eq.s32.totalorder %v19164_v24, %v19291_v2  ;;  %v19353_v39 = vadd.s32 %v5648_v8, %v5640_v62  ;;  %v6347_v62 = vld [vmem:[%s21861_s5 + $0x8] sm:$0xff] }
 0x4d3   : > { %v5812_v56 = vadd.s32 1, %v19291_v2  ;;  %v5815_v53 = vadd.s32 1, %v19330_v51  ;;  %v5816_v7 = vadd.s32 1, %v19343_v15  ;;  %v5979_v55 = vadd.s32 16, %v19171_v32 }
 0x4d4   : > { %15203 = vmatprep.subr.bf16.mxu1 %v19275_v41  ;;  %v5817_v14 = vadd.s32 1, %v19353_v39  ;;  %v5981_v32 = vadd.s32 16, %v19291_v2  ;;  %v6368_v2 = vld [vmem:[%s21861_s5 + $0xb0] sm:$0xff]  ;;  %v6507_v20 = vrot.slane %v19565_v30, 1  ;;  %v6508_v8 = vrot.slane %v19563_v60, 1 }
 0x4d5   : > { %15205 = vmatpush3.bf16.msra.mxu1 %v19212_v47  ;;  %v15314_v9 = vpack.c.bf16 %v6369_v26, %v6368_v2 }
 0x4d6   : > { %15207 = vmatprep.subr.bf16.mxu1 %v19216_v23 }
 0x4d8   : > { %11717 = vmatmul.mubr.msk.f32.vlgmr.msra.gmra.mrb[0].mxu1 %vm5657_vm7, %v16545_v11  ;;  %vm5672_vm7 = vcmp.eq.s32.totalorder %v19169_v27, %v19353_v39 }
 0x4d9   : > { %15209 = vmatpush3.bf16.msra.mxu1 %v19184_v6  ;;  %11718 = vmatprep.mubr.msk.f32.mxu1 %vm5660_vm8, %v16545_v11  ;;  %vm5671_vm8 = vcmp.eq.s32.totalorder %v19164_v24, %v19353_v39 }
 0x4da   : > { %15211 = vmatprep.subr.bf16.mxu1 %v19222_v4 }
 0x4dc   : > { %11719 = vmatmul.mubr.msk.f32.gmra.mrb[2].mxu1 %vm5659_vm9, %v16545_v11  ;;  %vm5819_vm9 = vcmp.eq.s32.totalorder %v19169_v27, %v5810_v40 }
 0x4dd   : > { %15213 = vmatpush3.bf16.msra.mxu1 %v19188_v13  ;;  %11720 = vmatprep.mubr.msk.f32.mxu1 %vm5662_vm10, %v16545_v11  ;;  %vm5818_vm10 = vcmp.eq.s32.totalorder %v19164_v24, %v5810_v40  ;;  %v6509_v40 = vsel %vm1060_vm4, %v6507_v20, %v6508_v8 }
 0x4de   : > { %15215 = vmatprep.subr.bf16.mxu1 %v19228_v52 }
 0x4e0   : > { %11721 = vmatmul.mubr.msk.f32.gmra.mrb[4].mxu1 %vm5661_vm11, %v16545_v11  ;;  %vm5821_vm11 = vcmp.eq.s32.totalorder %v19169_v27, %v5811_v63 }
 0x4e1   : > { %15217 = vmatpush3.bf16.msra.mxu1 %v19192_v43  ;;  %11722 = vmatprep.mubr.msk.f32.mxu1 %vm5664_vm12, %v16545_v11  ;;  %vm5820_vm12 = vcmp.eq.s32.totalorder %v19164_v24, %v5811_v63 }
 0x4e2   : > { %15219 = vmatprep.subr.bf16.mxu1 %v19234_v10 }
 0x4e4   : > { %11723 = vmatmul.mubr.msk.f32.gmra.mrb[6].mxu1 %vm5663_vm13, %v16545_v11  ;;  %vm5823_vm13 = vcmp.eq.s32.totalorder %v19169_v27, %v5812_v56 }
 0x4e5   : > { %15221 = vmatpush3.bf16.msra.mxu1 %v19196_v22  ;;  %11724 = vmatprep.mubr.msk.f32.mxu1 %vm5666_vm14, %v16545_v11  ;;  %vm5822_vm14 = vcmp.eq.s32.totalorder %v19164_v24, %v5812_v56 }
 0x4e6   : > { %15223 = vmatprep.subr.bf16.mxu1 %v19243_v50 }
 0x4e8   : > { %11725 = vmatmul.mubr.msk.f32.gmra.mrb[8].mxu1 %vm5665_vm15, %v16545_v11  ;;  %vm5825_vm15 = vcmp.eq.s32.totalorder %v19169_v27, %v5813_v18 }
 0x4e9   : > { %15225 = vmatpush3.bf16.msra.mxu1 %v19200_v17  ;;  %11726 = vmatprep.mubr.msk.f32.mxu1 %vm5668_vm0, %v16545_v11  ;;  %vm5824_vm0 = vcmp.eq.s32.totalorder %v19164_v24, %v5813_v18 }
 0x4ea   : > { %15227 = vmatprep.subr.bf16.mxu1 %v19254_v58 }
 0x4ec   : > { %11727 = vmatmul.mubr.msk.f32.gmra.mrb[10].mxu1 %vm5667_vm1, %v16545_v11  ;;  %vm5827_vm1 = vcmp.eq.s32.totalorder %v19169_v27, %v5814_v33 }
 0x4ed   : > { %15229 = vmatpush3.bf16.msra.mxu1 %v19204_v1  ;;  %11728 = vmatprep.mubr.msk.f32.mxu1 %vm5670_vm3, %v16545_v11  ;;  %vm5826_vm3 = vcmp.eq.s32.totalorder %v19164_v24, %v5814_v33 }
 0x4ee   : > { %15231 = vmatprep.subr.bf16.mxu1 %v19261_v49 }
 0x4f0   : > { %11729 = vmatmul.mubr.msk.f32.gmra.mrb[12].mxu1 %vm5669_vm6, %v16545_v11  ;;  %vm5829_vm6 = vcmp.eq.s32.totalorder %v19169_v27, %v5815_v53 }
 0x4f1   : > { %15233 = vmatpush3.bf16.msra.mxu1 %v19208_v44  ;;  %11730 = vmatprep.mubr.msk.f32.mxu1 %vm5672_vm7, %v16545_v11  ;;  %vm5828_vm7 = vcmp.eq.s32.totalorder %v19164_v24, %v5815_v53 }
 0x4f2   : > { %15235 = vmatprep.subr.bf16.mxu1 %v19275_v41 }
 0x4f4   : > { %11731 = vmatmul.mubr.msk.f32.gmra.mrb[14].mxu1 %vm5671_vm8, %v16545_v11  ;;  %vm5831_vm8 = vcmp.eq.s32.totalorder %v19169_v27, %v5816_v7 }
 0x4f5   : > { %15237 = vmatpush3.bf16.msra.mxu1 %v19212_v47  ;;  %11748 = vmatprep.mubr.msk.f32.mxu1 %vm5819_vm9, %v16545_v11  ;;  %vm5830_vm9 = vcmp.eq.s32.totalorder %v19164_v24, %v5816_v7 }
 0x4f6   : > { %15239 = vmatprep.subr.bf16.mxu1 %v19216_v23 }
 0x4f8   : > { %11749 = vmatmul.mubr.msk.f32.vlgmr.msra.gmra.mrb[16].mxu1 %vm5818_vm10, %v16545_v11  ;;  %vm5833_vm10 = vcmp.eq.s32.totalorder %v19169_v27, %v5817_v14 }
 0x4f9   : > { %15241 = vmatpush3.bf16.msra.mxu1 %v19184_v6  ;;  %11750 = vmatprep.mubr.msk.f32.mxu1 %vm5821_vm11, %v16545_v11  ;;  %vm5832_vm11 = vcmp.eq.s32.totalorder %v19164_v24, %v5817_v14 }
 0x4fa   : > { %15243 = vmatprep.subr.bf16.mxu1 %v19222_v4 }
 0x4fc   : > { %11751 = vmatmul.mubr.msk.f32.gmra.mrb[18].mxu1 %vm5820_vm12, %v16545_v11  ;;  %vm5988_vm12 = vcmp.eq.s32.totalorder %v19169_v27, %v5979_v55 }
 0x4fd   : > { %15245 = vmatpush3.bf16.msra.mxu1 %v19188_v13  ;;  %11752 = vmatprep.mubr.msk.f32.mxu1 %vm5823_vm13, %v16545_v11  ;;  %vm5987_vm13 = vcmp.eq.s32.totalorder %v19164_v24, %v5979_v55 }
 0x4fe   : > { %15247 = vmatprep.subr.bf16.mxu1 %v19228_v52 }
 0x500   : > { %11753 = vmatmul.mubr.msk.f32.gmra.mrb[20].mxu1 %vm5822_vm14, %v16545_v11  ;;  %vm5990_vm14 = vcmp.eq.s32.totalorder %v19169_v27, %v5980_v5 }
 0x501   : > { %15249 = vmatpush3.bf16.msra.mxu1 %v19192_v43  ;;  %11754 = vmatprep.mubr.msk.f32.mxu1 %vm5825_vm15, %v16545_v11  ;;  %vm5989_vm15 = vcmp.eq.s32.totalorder %v19164_v24, %v5980_v5 }
 0x502   : > { %15251 = vmatprep.subr.bf16.mxu1 %v19234_v10 }
 0x504   : > { %11755 = vmatmul.mubr.msk.f32.gmra.mrb[22].mxu1 %vm5824_vm0, %v16545_v11  ;;  %vm5992_vm0 = vcmp.eq.s32.totalorder %v19169_v27, %v5981_v32 }
 0x505   : > { %15253 = vmatpush3.bf16.msra.mxu1 %v19196_v22  ;;  %11756 = vmatprep.mubr.msk.f32.mxu1 %vm5827_vm1, %v16545_v11  ;;  %vm5991_vm1 = vcmp.eq.s32.totalorder %v19164_v24, %v5981_v32 }
 0x506   : > { %15255 = vmatprep.subr.bf16.mxu1 %v19243_v50 }
 0x508   : > { %11757 = vmatmul.mubr.msk.f32.gmra.mrb[24].mxu1 %vm5826_vm3, %v16545_v11  ;;  %vm5994_vm3 = vcmp.eq.s32.totalorder %v19169_v27, %v5982_v0 }
 0x509   : > { %15257 = vmatpush3.bf16.msra.mxu1 %v19200_v17  ;;  %11758 = vmatprep.mubr.msk.f32.mxu1 %vm5829_vm6, %v16545_v11  ;;  %vm5993_vm6 = vcmp.eq.s32.totalorder %v19164_v24, %v5982_v0 }
 0x50a   : > { %15259 = vmatprep.subr.bf16.mxu1 %v19254_v58 }
 0x50c   : > { %11759 = vmatmul.mubr.msk.f32.gmra.mrb[26].mxu1 %vm5828_vm7, %v16545_v11 }
 0x50d   : > { %15261 = vmatpush3.bf16.msra.mxu1 %v19204_v1  ;;  %11760 = vmatprep.mubr.msk.f32.mxu1 %vm5831_vm8, %v16545_v11 }
 0x50e   : > { %15263 = vmatprep.subr.bf16.mxu1 %v19261_v49 }
 0x510   : > { %11761 = vmatmul.mubr.msk.f32.gmra.mrb[28].mxu1 %vm5830_vm9, %v16545_v11 }
 0x511   : > { %15265 = vmatpush3.bf16.msra.mxu1 %v19208_v44  ;;  %11762 = vmatprep.mubr.msk.f32.mxu1 %vm5833_vm10, %v16545_v11 }
 0x512   : > { %15267 = vmatprep.subr.bf16.mxu1 %v19275_v41 }
 0x514   : > { %11763 = vmatmul.mubr.msk.f32.gmra.mrb[30].mxu1 %vm5832_vm11, %v16545_v11 }
 0x515   : > { %15269 = vmatpush3.bf16.msra.mxu1 %v19212_v47  ;;  %11780 = vmatprep.mubr.msk.f32.mxu1 %vm5988_vm12, %v16545_v11 }
 0x516   : > { %15271 = vmatprep.subr.bf16.mxu1 %v19216_v23  ;;  %v6143_v23 = vadd.s32 1, %v5982_v0 }
 0x518   : > { %11781 = vmatmul.mubr.msk.f32.vlgmr.msra.gmra.mrb[32].mxu1 %vm5987_vm13, %v16545_v11 }
 0x519   : > { %15273 = vmatpush3.bf16.msra.mxu1 %v19184_v6  ;;  %11782 = vmatprep.mubr.msk.f32.mxu1 %vm5990_vm14, %v16545_v11  ;;  %v5983_v6 = vadd.s32 16, %v19313_v12  ;;  %v15322_v12 = vpack.c.bf16 %v6373_v57, %v6372_v31 }
 0x51a   : > { %15275 = vmatprep.subr.bf16.mxu1 %v19222_v4 }
 0x51b   : > { %vm5996_vm7 = vcmp.eq.s32.totalorder %v19169_v27, %v5983_v6  ;;  %vm5995_vm8 = vcmp.eq.s32.totalorder %v19164_v24, %v5983_v6 }
 0x51c   : > { %11783 = vmatmul.mubr.msk.f32.gmra.mrb[34].mxu1 %vm5989_vm15, %v16545_v11 }
 0x51d   : > { %15277 = vmatpush3.bf16.msra.mxu1 %v19188_v13  ;;  %11784 = vmatprep.mubr.msk.f32.mxu1 %vm5992_vm0, %v16545_v11  ;;  %v5984_v13 = vadd.s32 16, %v19330_v51  ;;  %v6377_v51 = vld [vmem:[%s21861_s5 + $0xf8] sm:$0xff] }
 0x51e   : > { %15279 = vmatprep.subr.bf16.mxu1 %v19228_v52  ;;  %v15330_v45 = vpack.c.bf16 %v6377_v51, %v6376_v25 }
 0x51f   : > { %vm5998_vm9 = vcmp.eq.s32.totalorder %v19169_v27, %v5984_v13  ;;  %vm5997_vm10 = vcmp.eq.s32.totalorder %v19164_v24, %v5984_v13  ;;  %v6145_v4 = vadd.s32 1, %v5984_v13 }
 0x520   : > { %11785 = vmatmul.mubr.msk.f32.gmra.mrb[36].mxu1 %vm5991_vm1, %v16545_v11 }
 0x521   : > { %15281 = vmatpush3.bf16.msra.mxu1 %v19192_v43  ;;  %11786 = vmatprep.mubr.msk.f32.mxu1 %vm5994_vm3, %v16545_v11  ;;  %v5985_v43 = vadd.s32 16, %v19343_v15  ;;  %v6346_v15 = vld [vmem:[%s21861_s5] sm:$0xff] }
 0x522   : > { %15283 = vmatprep.subr.bf16.mxu1 %v19234_v10 }
 0x523   : > { %vm6000_vm11 = vcmp.eq.s32.totalorder %v19169_v27, %v5985_v43  ;;  %vm5999_vm12 = vcmp.eq.s32.totalorder %v19164_v24, %v5985_v43  ;;  %v6146_v52 = vadd.s32 1, %v5985_v43 }
 0x524   : > { %11787 = vmatmul.mubr.msk.f32.gmra.mrb[38].mxu1 %vm5993_vm6, %v16545_v11 }
 0x525   : > { %15285 = vmatpush3.bf16.msra.mxu1 %v19196_v22  ;;  %11788 = vmatprep.mubr.msk.f32.mxu1 %vm5996_vm7, %v16545_v11  ;;  %v5986_v22 = vadd.s32 16, %v19353_v39  ;;  %v19575_v39 = vpack.c.bf16 %v6347_v62, %v6346_v15 }
 0x526   : > { %15287 = vmatprep.subr.bf16.mxu1 %v19243_v50  ;;  %v6362_v50 = vld [vmem:[%s21861_s5 + $0x80] sm:$0xff] }
 0x527   : > { %vm6002_vm13 = vcmp.eq.s32.totalorder %v19169_v27, %v5986_v22  ;;  %vm6001_vm14 = vcmp.eq.s32.totalorder %v19164_v24, %v5986_v22  ;;  %v6147_v10 = vadd.s32 1, %v5986_v22 }
 0x528   : > { %11789 = vmatmul.mubr.msk.f32.gmra.mrb[40].mxu1 %vm5995_vm8, %v16545_v11  ;;  %vm6155_vm8 = vcmp.eq.s32.totalorder %v19169_v27, %v6143_v23 }
 0x529   : > { %15289 = vmatpush3.bf16.msra.mxu1 %v19200_v17  ;;  %11790 = vmatprep.mubr.msk.f32.mxu1 %vm5998_vm9, %v16545_v11  ;;  %v6140_v17 = vadd.s32 1, %v5979_v55  ;;  %vm6154_vm9 = vcmp.eq.s32.totalorder %v19164_v24, %v6143_v23 }
 0x52a   : > { %15291 = vmatprep.subr.bf16.mxu1 %v19254_v58  ;;  %v6363_v58 = vld [vmem:[%s21861_s5 + $0x88] sm:$0xff] }
 0x52b   : > { %vm6149_vm15 = vcmp.eq.s32.totalorder %v19169_v27, %v6140_v17  ;;  %vm6148_vm0 = vcmp.eq.s32.totalorder %v19164_v24, %v6140_v17 }
 0x52c   : > { %11791 = vmatmul.mubr.msk.f32.gmra.mrb[42].mxu1 %vm5997_vm10, %v16545_v11 }
 0x52d   : > { %15293 = vmatpush3.bf16.msra.mxu1 %v19204_v1  ;;  %11792 = vmatprep.mubr.msk.f32.mxu1 %vm6000_vm11, %v16545_v11  ;;  %v6141_v1 = vadd.s32 1, %v5980_v5 }
 0x52e   : > { %15295 = vmatprep.subr.bf16.mxu1 %v19261_v49  ;;  %v15302_v49 = vpack.c.bf16 %v6363_v58, %v6362_v50 }
 0x52f   : > { %vm6151_vm1 = vcmp.eq.s32.totalorder %v19169_v27, %v6141_v1  ;;  %vm6150_vm3 = vcmp.eq.s32.totalorder %v19164_v24, %v6141_v1 }
 0x530   : > { %11793 = vmatmul.mubr.msk.f32.gmra.mrb[44].mxu1 %vm5999_vm12, %v16545_v11  ;;  %vm6159_vm12 = vcmp.eq.s32.totalorder %v19169_v27, %v6145_v4 }
 0x531   : > { %15297 = vmatpush3.bf16.msra.mxu1 %v19208_v44  ;;  %11794 = vmatprep.mubr.msk.f32.mxu1 %vm6002_vm13, %v16545_v11  ;;  %v6142_v44 = vadd.s32 1, %v5981_v32  ;;  %vm6158_vm13 = vcmp.eq.s32.totalorder %v19164_v24, %v6145_v4 }
 0x532   : > { %15299 = vmatprep.subr.bf16.mxu1 %v19275_v41  ;;  %v6365_v41 = vld [vmem:[%s21861_s5 + $0x98] sm:$0xff] }
 0x533   : > { %vm6153_vm6 = vcmp.eq.s32.totalorder %v19169_v27, %v6142_v44  ;;  %vm6152_vm7 = vcmp.eq.s32.totalorder %v19164_v24, %v6142_v44 }
 0x534   : > { %11795 = vmatmul.mubr.msk.f32.gmra.mrb[46].mxu1 %vm6001_vm14, %v16545_v11  ;;  %vm6161_vm14 = vcmp.eq.s32.totalorder %v19169_v27, %v6146_v52 }
 0x535   : > { %15301 = vmatpush3.bf16.msra.mxu1 %v19212_v47  ;;  %11812 = vmatprep.mubr.msk.f32.mxu1 %vm6149_vm15, %v16545_v11  ;;  %v6144_v47 = vadd.s32 1, %v5983_v6  ;;  %vm6160_vm15 = vcmp.eq.s32.totalorder %v19164_v24, %v6146_v52 }
 0x536   : > { %15303 = vmatprep.subr.bf16.mxu1 %v15302_v49 }
 0x537   : > { %vm6157_vm10 = vcmp.eq.s32.totalorder %v19169_v27, %v6144_v47  ;;  %vm6156_vm11 = vcmp.eq.s32.totalorder %v19164_v24, %v6144_v47 }
 0x538   : > { %11813 = vmatmul.mubr.msk.f32.vlgmr.msra.gmra.mrb[48].mxu1 %vm6148_vm0, %v16545_v11  ;;  %vm6163_vm0 = vcmp.eq.s32.totalorder %v19169_v27, %v6147_v10  ;;  %v6364_v27 = vld [vmem:[%s21861_s5 + $0x90] sm:$0xff] }
 0x539   : > { %11814 = vmatprep.mubr.msk.f32.mxu1 %vm6151_vm1, %v16545_v11  ;;  %vm6162_vm1 = vcmp.eq.s32.totalorder %v19164_v24, %v6147_v10  ;;  %15305 = vmatpush3.bf16.msra.mxu1 %v15302_v49 }
 0x53c   : > { %11815 = vmatmul.mubr.msk.f32.gmra.mrb[50].mxu1 %vm6150_vm3, %v16545_v11 }
 0x53d   : > { %11816 = vmatprep.mubr.msk.f32.mxu1 %vm6153_vm6, %v16545_v11 }
 0x540   : > { %11817 = vmatmul.mubr.msk.f32.gmra.mrb[52].mxu1 %vm6152_vm7, %v16545_v11 }
 0x541   : > { %11818 = vmatprep.mubr.msk.f32.mxu1 %vm6155_vm8, %v16545_v11 }
 0x544   : > { %11819 = vmatmul.mubr.msk.f32.gmra.mrb[54].mxu1 %vm6154_vm9, %v16545_v11 }
 0x545   : > { %11820 = vmatprep.mubr.msk.f32.mxu1 %vm6157_vm10, %v16545_v11 }
 0x548   : > { %11821 = vmatmul.mubr.msk.f32.gmra.mrb[56].mxu1 %vm6156_vm11, %v16545_v11 }
 0x549   : > { %11822 = vmatprep.mubr.msk.f32.mxu1 %vm6159_vm12, %v16545_v11 }
 0x54c   : > { %11823 = vmatmul.mubr.msk.f32.gmra.mrb[58].mxu1 %vm6158_vm13, %v16545_v11 }
 0x54d   : > { %11824 = vmatprep.mubr.msk.f32.mxu1 %vm6161_vm14, %v16545_v11 }
 0x550   : > { %11825 = vmatmul.mubr.msk.f32.gmra.mrb[60].mxu1 %vm6160_vm15, %v16545_v11 }
 0x551   : > { %11826 = vmatprep.mubr.msk.f32.mxu1 %vm6163_vm0, %v16545_v11 }
 0x554   : > { %11827 = vmatmul.mubr.msk.f32.gmra.mrb[62].mxu1 %vm6162_vm1, %v16545_v11  ;;  %v15306_v11 = vpack.c.bf16 %v6365_v41, %v6364_v27 }
 0x555   : > { %14026 = vmatprep.mubr.f32.mxu1 %v6509_v40 }
 0x556   : > { %15307 = vmatprep.subr.bf16.mxu1 %v15306_v11 }
 0x557   : > { %15309 = vmatpush3.bf16.msra.mxu1 %v15306_v11 }
 0x558   : > { %15311 = vmatprep.subr.bf16.mxu1 %v15310_v42 }
 0x55b   : > { %15313 = vmatpush3.bf16.msra.mxu1 %v15310_v42 }
 0x55c   : > { %15315 = vmatprep.subr.bf16.mxu1 %v15314_v9 }
 0x55f   : > { %15317 = vmatpush3.bf16.msra.mxu1 %v15314_v9 }
 0x560   : > { %15319 = vmatprep.subr.bf16.mxu1 %v15318_v16 }
 0x563   : > { %15321 = vmatpush3.bf16.msra.mxu1 %v15318_v16 }
 0x564   : > { %15323 = vmatprep.subr.bf16.mxu1 %v15322_v12 }
 0x567   : > { %15325 = vmatpush3.bf16.msra.mxu1 %v15322_v12 }
 0x568   : > { %15327 = vmatprep.subr.bf16.mxu1 %v15326_v36 }
 0x56b   : > { %15329 = vmatpush3.bf16.msra.mxu1 %v15326_v36 }
 0x56c   : > { %15331 = vmatprep.subr.bf16.mxu1 %v15330_v45 }
 0x56f   : > { %15333 = vmatpush3.bf16.msra.mxu1 %v15330_v45 }
 0x570   : > { %15335 = vmatprep.subr.bf16.mxu1 %v19575_v39 }
 0x5ab   : > { %v12610_v63 = vpop.f32.mrb[0].mxu1 }
 0x5ac   : > { %v12611_v56 = vpop.f32.mrb[1].mxu1 }
 0x5ad   : > { %v19581_v18 = vadd.f32 %v12611_v56, %v12610_v63 }
 0x5af   : > { %v12613_v33 = vpop.f32.mrb[2].mxu1 }
 0x5b0   : > { %v12614_v53 = vpop.f32.mrb[3].mxu1 }
 0x5b1   : > { %v19583_v7 = vadd.f32 %v12614_v53, %v12613_v33 }
 0x5b3   : > { %v12616_v14 = vpop.f32.mrb[4].mxu1 }
 0x5b4   : > { %v12617_v55 = vpop.f32.mrb[5].mxu1 }
 0x5b5   : > { %v19585_v5 = vadd.f32 %v12617_v55, %v12616_v14 }
 0x5b7   : > { %v12619_v32 = vpop.f32.mrb[6].mxu1 }
 0x5b8   : > { %v12620_v0 = vpop.f32.mrb[7].mxu1 }
 0x5b9   : > { %v19587_v6 = vadd.f32 %v12620_v0, %v12619_v32 }
 0x5bb   : > { %v12622_v13 = vpop.f32.mrb[8].mxu1 }
 0x5bc   : > { %v12623_v43 = vpop.f32.mrb[9].mxu1 }
 0x5bd   : > { %v19589_v22 = vadd.f32 %v12623_v43, %v12622_v13 }
 0x5bf   : > { %v12625_v17 = vpop.f32.mrb[10].mxu1 }
 0x5c0   : > { %v12626_v1 = vpop.f32.mrb[11].mxu1 }
 0x5c1   : > { %v19591_v44 = vadd.f32 %v12626_v1, %v12625_v17 }
 0x5c3   : > { %v12628_v23 = vpop.f32.mrb[12].mxu1 }
 0x5c4   : > { %v12629_v47 = vpop.f32.mrb[13].mxu1 }
 0x5c5   : > { %v19593_v4 = vadd.f32 %v12629_v47, %v12628_v23 }
 0x5c7   : > { %v12631_v52 = vpop.f32.mrb[14].mxu1 }
 0x5c8   : > { %v12632_v10 = vpop.f32.mrb[15].mxu1 }
 0x5c9   : > { %v19595_v50 = vadd.f32 %v12632_v10, %v12631_v52 }
 0x5cb   : > { %v12666_v58 = vpop.f32.mrb[16].mxu1 }
 0x5cc   : > { %v12667_v49 = vpop.f32.mrb[17].mxu1 }
 0x5cd   : > { %v12668_v27 = vadd.f32 %v12667_v49, %v12666_v58 }
 0x5cf   : > { %v5971_v41 = vmax.f32 %v19581_v18, %v12668_v27  ;;  %v12669_v11 = vpop.f32.mrb[18].mxu1 }
 0x5d0   : > { %v12670_v59 = vpop.f32.mrb[19].mxu1 }
 0x5d1   : > { %v19598_v37 = vadd.f32 %v12670_v59, %v12669_v11 }
 0x5d3   : > { %v5972_v42 = vmax.f32 %v19583_v7, %v19598_v37  ;;  %v12672_v2 = vpop.f32.mrb[20].mxu1 }
 0x5d4   : > { %v12673_v26 = vpop.f32.mrb[21].mxu1 }
 0x5d5   : > { %v19602_v9 = vadd.f32 %v12673_v26, %v12672_v2 }
 0x5d7   : > { %v5973_v19 = vmax.f32 %v19585_v5, %v19602_v9  ;;  %v12675_v34 = vpop.f32.mrb[22].mxu1 }
 0x5d8   : > { %v12676_v16 = vpop.f32.mrb[23].mxu1 }
 0x5d9   : > { %v19606_v31 = vadd.f32 %v12676_v16, %v12675_v34 }
 0x5db   : > { %v5974_v57 = vmax.f32 %v19587_v6, %v19606_v31  ;;  %v12678_v12 = vpop.f32.mrb[24].mxu1 }
 0x5dc   : > { %v12679_v61 = vpop.f32.mrb[25].mxu1 }
 0x5dd   : > { %v19610_v46 = vadd.f32 %v12679_v61, %v12678_v12 }
 0x5df   : > { %v5975_v36 = vmax.f32 %v19589_v22, %v19610_v46  ;;  %v12681_v25 = vpop.f32.mrb[26].mxu1 }
 0x5e0   : > { %v12682_v51 = vpop.f32.mrb[27].mxu1 }
 0x5e1   : > { %v19614_v45 = vadd.f32 %v12682_v51, %v12681_v25 }
 0x5e3   : > { %v5976_v15 = vmax.f32 %v19591_v44, %v19614_v45  ;;  %v12684_v62 = vpop.f32.mrb[28].mxu1 }
 0x5e4   : > { %v12685_v8 = vpop.f32.mrb[29].mxu1 }
 0x5e5   : > { %v19618_v40 = vadd.f32 %v12685_v8, %v12684_v62 }
 0x5e7   : > { %v5977_v63 = vmax.f32 %v19593_v4, %v19618_v40  ;;  %v12687_v56 = vpop.f32.mrb[30].mxu1 }
 0x5e8   : > { %v12688_v18 = vpop.f32.mrb[31].mxu1 }
 0x5e9   : > { %v19622_v33 = vadd.f32 %v12688_v18, %v12687_v56 }
 0x5eb   : > { %v5978_v53 = vmax.f32 %v19595_v50, %v19622_v33  ;;  %v12722_v7 = vpop.f32.mrb[32].mxu1 }
 0x5ec   : > { %v12723_v14 = vpop.f32.mrb[33].mxu1 }
 0x5ed   : > { %v12724_v55 = vadd.f32 %v12723_v14, %v12722_v7 }
 0x5ef   : > { %v12725_v32 = vpop.f32.mrb[34].mxu1 }
 0x5f0   : > { %v12726_v0 = vpop.f32.mrb[35].mxu1 }
 0x5f1   : > { %v12727_v13 = vadd.f32 %v12726_v0, %v12725_v32 }
 0x5f3   : > { %v12728_v43 = vpop.f32.mrb[36].mxu1 }
 0x5f4   : > { %v12729_v17 = vpop.f32.mrb[37].mxu1 }
 0x5f5   : > { %v12730_v1 = vadd.f32 %v12729_v17, %v12728_v43 }
 0x5f7   : > { %v12731_v23 = vpop.f32.mrb[38].mxu1 }
 0x5f8   : > { %v12732_v47 = vpop.f32.mrb[39].mxu1 }
 0x5f9   : > { %v12733_v52 = vadd.f32 %v12732_v47, %v12731_v23 }
 0x5fb   : > { %v12734_v10 = vpop.f32.mrb[40].mxu1 }
 0x5fc   : > { %v12735_v58 = vpop.f32.mrb[41].mxu1 }
 0x5fd   : > { %v12736_v49 = vadd.f32 %v12735_v58, %v12734_v10 }
 0x5ff   : > { %v12737_v27 = vpop.f32.mrb[42].mxu1 }
 0x600   : > { %v12738_v11 = vpop.f32.mrb[43].mxu1 }
 0x601   : > { %v19626_v59 = vadd.f32 %v12738_v11, %v12737_v27 }
 0x603   : > { %v12740_v37 = vpop.f32.mrb[44].mxu1 }
 0x604   : > { %v12741_v2 = vpop.f32.mrb[45].mxu1 }
 0x605   : > { %v19628_v26 = vadd.f32 %v12741_v2, %v12740_v37 }
 0x607   : > { %v12743_v34 = vpop.f32.mrb[46].mxu1 }
 0x608   : > { %v12744_v16 = vpop.f32.mrb[47].mxu1 }
 0x609   : > { %v19630_v12 = vadd.f32 %v12744_v16, %v12743_v34 }
 0x60b   : > { %v12778_v61 = vpop.f32.mrb[48].mxu1 }
 0x60c   : > { %v12779_v25 = vpop.f32.mrb[49].mxu1 }
 0x60d   : > { %v12780_v51 = vadd.f32 %v12779_v25, %v12778_v61  ;;  %v6350_v61 = vld [vmem:[%s21861_s5 + $0x20] sm:$0xff] }
 0x60f   : > { %v6301_v62 = vmax.f32 %v12724_v55, %v12780_v51  ;;  %v12781_v8 = vpop.f32.mrb[50].mxu1  ;;  %v6349_v55 = vld [vmem:[%s21861_s5 + $0x18] sm:$0xff] }
 0x610   : > { %v12782_v56 = vpop.f32.mrb[51].mxu1 }
 0x611   : > { %v6309_v18 = vmax.f32 %v5971_v41, %v6301_v62  ;;  %v12783_v7 = vadd.f32 %v12782_v56, %v12781_v8  ;;  %v6348_v41 = vld [vmem:[%s21861_s5 + $0x10] sm:$0xff] }
 0x613   : > { %6318 = vst [vmem:[#allocation4 + $0x11] sm:$0xff] %v6309_v18  ;;  %v6302_v14 = vmax.f32 %v12727_v13, %v12783_v7  ;;  %v12784_v32 = vpop.f32.mrb[52].mxu1 }
 0x614   : > { %v12785_v0 = vpop.f32.mrb[53].mxu1 }
 0x615   : > { %v6310_v43 = vmax.f32 %v5972_v42, %v6302_v14  ;;  %v12786_v17 = vadd.f32 %v12785_v0, %v12784_v32 }
 0x617   : > { %6319 = vst [vmem:[#allocation4 + $0x21] sm:$0xff] %v6310_v43  ;;  %v6303_v23 = vmax.f32 %v12730_v1, %v12786_v17  ;;  %v12787_v47 = vpop.f32.mrb[54].mxu1 }
 0x618   : > { %v12788_v10 = vpop.f32.mrb[55].mxu1 }
 0x619   : > { %v6311_v58 = vmax.f32 %v5973_v19, %v6303_v23  ;;  %v12789_v27 = vadd.f32 %v12788_v10, %v12787_v47  ;;  %v15338_v19 = vpack.c.bf16 %v6349_v55, %v6348_v41 }
 0x61a   : > { %v19641_v13 = vld [vmem:[#allocation4 + $0x10] sm:$0xff]  ;;  %v19643_v42 = vld [vmem:[#allocation4 + $0x18] sm:$0x3] }
 0x61b   : > { %6320 = vst [vmem:[#allocation4 + $0x31] sm:$0xff] %v6311_v58  ;;  %v6304_v1 = vmax.f32 %v12733_v52, %v12789_v27  ;;  %v12790_v11 = vpop.f32.mrb[56].mxu1  ;;  %v6510_v37 = vrot.slane %v19641_v13, 1  ;;  %v6511_v5 = vrot.slane %v19643_v42, 1  ;;  %v6351_v52 = vld [vmem:[%s21861_s5 + $0x28] sm:$0xff] }
 0x61c   : > { %v12791_v9 = vpop.f32.mrb[57].mxu1  ;;  %v15342_v56 = vpack.c.bf16 %v6351_v52, %v6350_v61  ;;  %v6355_v27 = vld [vmem:[%s21861_s5 + $0x48] sm:$0xff] }
 0x61d   : > { %v6312_v2 = vmax.f32 %v5974_v57, %v6304_v1  ;;  %v12792_v34 = vadd.f32 %v12791_v9, %v12790_v11  ;;  %v19651_v16 = vsel %vm1060_vm4, %v6510_v37, %v6511_v5 }
 0x61e   : > { %14027 = vmatmul.mubr.f32.vlgmr.msra.gmra.mrb[64].mxu1 %v19651_v16  ;;  %v19660_v25 = vld [vmem:[#allocation4 + $0x20] sm:$0xff]  ;;  %v19662_v51 = vld [vmem:[#allocation4 + $0x28] sm:$0x3] }
 0x61f   : > { %6321 = vst [vmem:[#allocation4 + $0x41] sm:$0xff] %v6312_v2  ;;  %v6305_v6 = vmax.f32 %v12736_v49, %v12792_v34  ;;  %15337 = vmatpush3.bf16.msra.mxu1 %v19575_v39  ;;  %v12793_v31 = vpop.f32.mrb[58].mxu1  ;;  %v6513_v57 = vrot.slane %v19660_v25, 1  ;;  %v6514_v62 = vrot.slane %v19662_v51, 1  ;;  %v6352_v39 = vld [vmem:[%s21861_s5 + $0x30] sm:$0xff]  ;;  %v6353_v49 = vld [vmem:[%s21861_s5 + $0x38] sm:$0xff] }
 0x620   : > { %v12794_v8 = vpop.f32.mrb[59].mxu1  ;;  %15339 = vmatprep.subr.bf16.mxu1 %v15338_v19  ;;  %v15346_v23 = vpack.c.bf16 %v6353_v49, %v6352_v39  ;;  %v6357_v2 = vld [vmem:[%s21861_s5 + $0x58] sm:$0xff] }
 0x621   : > { %v6313_v18 = vmax.f32 %v5975_v36, %v6305_v6  ;;  %v12795_v7 = vadd.f32 %v12794_v8, %v12793_v31  ;;  %v19671_v14 = vsel %vm1060_vm4, %v6513_v57, %v6514_v62  ;;  %v6358_v57 = vld [vmem:[%s21861_s5 + $0x60] sm:$0xff] }
 0x622   : > { %14029 = vmatprep.mubr.f32.mxu1 %v19671_v14  ;;  %v19680_v32 = vld [vmem:[#allocation4 + $0x30] sm:$0xff]  ;;  %v19682_v0 = vld [vmem:[#allocation4 + $0x38] sm:$0x3] }
 0x623   : > { %6322 = vst [vmem:[#allocation4 + $0x51] sm:$0xff] %v6313_v18  ;;  %v6306_v22 = vmax.f32 %v19626_v59, %v12795_v7  ;;  %15341 = vmatpush3.bf16.msra.mxu1 %v15338_v19  ;;  %v12796_v46 = vpop.f32.mrb[60].mxu1  ;;  %v6516_v36 = vrot.slane %v19680_v32, 1  ;;  %v6517_v43 = vrot.slane %v19682_v0, 1  ;;  %v6354_v59 = vld [vmem:[%s21861_s5 + $0x40] sm:$0xff]  ;;  %v6360_v18 = vld [vmem:[%s21861_s5 + $0x70] sm:$0xff] }
 0x624   : > { %v12797_v17 = vpop.f32.mrb[61].mxu1  ;;  %15343 = vmatprep.subr.bf16.mxu1 %v15342_v56  ;;  %v15350_v37 = vpack.c.bf16 %v6355_v27, %v6354_v59  ;;  %v6361_v7 = vld [vmem:[%s21861_s5 + $0x78] sm:$0xff] }
 0x625   : > { %v6314_v47 = vmax.f32 %v5976_v15, %v6306_v22  ;;  %v12798_v10 = vadd.f32 %v12797_v17, %v12796_v46  ;;  %v19691_v58 = vsel %vm1060_vm4, %v6516_v36, %v6517_v43  ;;  %v15362_v36 = vpack.c.bf16 %v6361_v7, %v6360_v18  ;;  %v6378_v17 = vld [vmem:[%s21861_s5 + $0x100] sm:$0xff]  ;;  %v6381_v59 = vld [vmem:[%s21861_s5 + $0x118] sm:$0xff]  ;;  %v6395_v7 = vld [vmem:[%s21861_s5 + $0x188] sm:$0xff] }
 0x626   : > { %14030 = vmatmul.mubr.f32.gmra.mrb[66].mxu1 %v19691_v58  ;;  %v19700_v41 = vld [vmem:[#allocation4 + $0x40] sm:$0xff]  ;;  %v19702_v55 = vld [vmem:[#allocation4 + $0x48] sm:$0x3] }
 0x627   : > { %6323 = vst [vmem:[#allocation4 + $0x61] sm:$0xff] %v6314_v47  ;;  %v6307_v44 = vmax.f32 %v19628_v26, %v12798_v10  ;;  %15345 = vmatpush3.bf16.msra.mxu1 %v15342_v56  ;;  %v12799_v45 = vpop.f32.mrb[62].mxu1  ;;  %v6519_v15 = vrot.slane %v19700_v41, 1  ;;  %v6520_v1 = vrot.slane %v19702_v55, 1  ;;  %v6356_v26 = vld [vmem:[%s21861_s5 + $0x50] sm:$0xff]  ;;  %v6394_v18 = vld [vmem:[%s21861_s5 + $0x180] sm:$0xff] }
 0x628   : > { %v12800_v11 = vpop.f32.mrb[63].mxu1  ;;  %15347 = vmatprep.subr.bf16.mxu1 %v15346_v23  ;;  %v15354_v52 = vpack.c.bf16 %v6357_v2, %v6356_v26  ;;  %v6380_v10 = vld [vmem:[%s21861_s5 + $0x110] sm:$0xff]  ;;  %v6386_v26 = vld [vmem:[%s21861_s5 + $0x140] sm:$0xff]  ;;  %v6387_v2 = vld [vmem:[%s21861_s5 + $0x148] sm:$0xff] }
 0x629   : > { %v6315_v5 = vmax.f32 %v5977_v63, %v6307_v44  ;;  %v12801_v9 = vadd.f32 %v12800_v11, %v12799_v45  ;;  %v19711_v19 = vsel %vm1060_vm4, %v6519_v15, %v6520_v1  ;;  %v15370_v27 = vpack.c.bf16 %v6381_v59, %v6380_v10  ;;  %v6382_v44 = vld [vmem:[%s21861_s5 + $0x120] sm:$0xff]  ;;  %v6383_v45 = vld [vmem:[%s21861_s5 + $0x128] sm:$0xff]  ;;  %v6384_v1 = vld [vmem:[%s21861_s5 + $0x130] sm:$0xff] }
 0x62a   : > { %14032 = vmatprep.mubr.f32.mxu1 %v19711_v19  ;;  %v19720_v34 = vld [vmem:[#allocation4 + $0x50] sm:$0xff]  ;;  %v19722_v61 = vld [vmem:[#allocation4 + $0x58] sm:$0x3]  ;;  %v15374_v15 = vpack.c.bf16 %v6383_v45, %v6382_v44  ;;  %v6756_v10 = vrot.slane %v19662_v51, 2  ;;  %v6759_v44 = vrot.slane %v19682_v0, 2  ;;  %v6398_v45 = vld [vmem:[%s21861_s5 + $0x1a0] sm:$0xff] }
 0x62b   : > { %6324 = vst [vmem:[#allocation4 + $0x71] sm:$0xff] %v6315_v5  ;;  %v6308_v4 = vmax.f32 %v19630_v12, %v12801_v9  ;;  %15349 = vmatpush3.bf16.msra.mxu1 %v15346_v23  ;;  %v6522_v40 = vrot.slane %v19720_v34, 1  ;;  %v6523_v63 = vrot.slane %v19722_v61, 1  ;;  %v6359_v12 = vld [vmem:[%s21861_s5 + $0x68] sm:$0xff]  ;;  %v6385_v11 = vld [vmem:[%s21861_s5 + $0x138] sm:$0xff]  ;;  %v6749_v5 = vrot.slane %v19565_v30, 2 }
 0x62c   : > { %15351 = vmatprep.subr.bf16.mxu1 %v15350_v37  ;;  %v6379_v23 = vld [vmem:[%s21861_s5 + $0x108] sm:$0xff]  ;;  %v6750_v9 = vrot.slane %v19563_v60, 2  ;;  %v6388_v60 = vld [vmem:[%s21861_s5 + $0x150] sm:$0xff] }
 0x62d   : > { %v6316_v6 = vmax.f32 %v5978_v53, %v6308_v4  ;;  %v19731_v31 = vsel %vm1060_vm4, %v6522_v40, %v6523_v63  ;;  %v15358_v53 = vpack.c.bf16 %v6359_v12, %v6358_v57  ;;  %v15366_v47 = vpack.c.bf16 %v6379_v23, %v6378_v17  ;;  %v6389_v63 = vld [vmem:[%s21861_s5 + $0x158] sm:$0xff]  ;;  %v6391_v57 = vld [vmem:[%s21861_s5 + $0x168] sm:$0xff]  ;;  %v6396_v17 = vld [vmem:[%s21861_s5 + $0x190] sm:$0xff] }
 0x62e   : > { %14033 = vmatmul.mubr.f32.gmra.mrb[68].mxu1 %v19731_v31  ;;  %v19740_v62 = vld [vmem:[#allocation4 + $0x60] sm:$0xff]  ;;  %v19742_v8 = vld [vmem:[#allocation4 + $0x68] sm:$0x3]  ;;  %v15382_v4 = vpack.c.bf16 %v6387_v2, %v6386_v26  ;;  %v6751_v40 = vsel %vm1307_vm5, %v6749_v5, %v6750_v9  ;;  %v6397_v23 = vld [vmem:[%s21861_s5 + $0x198] sm:$0xff]  ;;  %v6764_v9 = vrot.slane %v19720_v34, 2  ;;  %v6765_v26 = vrot.slane %v19722_v61, 2 }
 0x62f   : > { %6325 = vst [vmem:[#allocation4 + $0x81] sm:$0xff] %v6316_v6  ;;  %15353 = vmatpush3.bf16.msra.mxu1 %v15350_v37  ;;  %v6525_v50 = vrot.slane %v19740_v62, 1  ;;  %v6526_v33 = vrot.slane %v19742_v8, 1  ;;  %v15378_v37 = vpack.c.bf16 %v6385_v11, %v6384_v1  ;;  %v6390_v6 = vld [vmem:[%s21861_s5 + $0x160] sm:$0xff]  ;;  %v15402_v59 = vpack.c.bf16 %v6397_v23, %v6396_v17  ;;  %v6400_v2 = vld [vmem:[%s21861_s5 + $0x1b0] sm:$0xff] }
 0x630   : > { %15355 = vmatprep.subr.bf16.mxu1 %v15354_v52  ;;  %v15390_v12 = vpack.c.bf16 %v6391_v57, %v6390_v6  ;;  %v6761_v1 = vrot.slane %v19700_v41, 2  ;;  %v6762_v11 = vrot.slane %v19702_v55, 2  ;;  %v6401_v55 = vld [vmem:[%s21861_s5 + $0x1b8] sm:$0xff]  ;;  %v6402_v57 = vld [vmem:[%s21861_s5 + $0x1c0] sm:$0xff] }
 0x631   : > { %v19747_v56 = vsel %vm1060_vm4, %v6525_v50, %v6526_v33  ;;  %v6392_v50 = vld [vmem:[%s21861_s5 + $0x170] sm:$0xff]  ;;  %v6393_v33 = vld [vmem:[%s21861_s5 + $0x178] sm:$0xff]  ;;  %v15410_v61 = vpack.c.bf16 %v6401_v55, %v6400_v2  ;;  %v6410_v23 = vld [vmem:[%s21861_s5 + $0x200] sm:$0xff] }
 0x632   : > { %14035 = vmatprep.mubr.f32.mxu1 %v19747_v56  ;;  %v19756_v39 = vld [vmem:[#allocation4 + $0x70] sm:$0xff]  ;;  %v19758_v49 = vld [vmem:[#allocation4 + $0x78] sm:$0x3]  ;;  %v6419_v2 = vld [vmem:[%s21861_s5 + $0x248] sm:$0xff] }
 0x633   : > { %15357 = vmatpush3.bf16.msra.mxu1 %v15354_v52  ;;  %v6528_v22 = vrot.slane %v19756_v39, 1  ;;  %v6529_v46 = vrot.slane %v19758_v49, 1  ;;  %v15386_v52 = vpack.c.bf16 %v6389_v63, %v6388_v60  ;;  %v6768_v60 = vrot.slane %v19742_v8, 2  ;;  %v6403_v8 = vld [vmem:[%s21861_s5 + $0x1c8] sm:$0xff] }
 0x634   : > { %15359 = vmatprep.subr.bf16.mxu1 %v15358_v53  ;;  %v19880_v63 = vsel %vm1307_vm5, %v6764_v9, %v6765_v26  ;;  %v6771_v6 = vrot.slane %v19758_v49, 2  ;;  %v6418_v26 = vld [vmem:[%s21861_s5 + $0x240] sm:$0xff] }
 0x635   : > { %v19763_v43 = vsel %vm1060_vm4, %v6528_v22, %v6529_v46  ;;  %v15398_v22 = vpack.c.bf16 %v6395_v7, %v6394_v18  ;;  %v6752_v46 = vrot.slane %v19641_v13, 2  ;;  %v6406_v7 = vld [vmem:[%s21861_s5 + $0x1e0] sm:$0xff]  ;;  %v15446_v55 = vpack.c.bf16 %v6419_v2, %v6418_v26  ;;  %v6437_v26 = vld [vmem:[%s21861_s5 + $0x2d8] sm:$0xff] }
 0x636   : > { %14036 = vmatmul.mubr.f32.gmra.mrb[70].mxu1 %v19763_v43 }
 0x637   : > { %15361 = vmatpush3.bf16.msra.mxu1 %v15358_v53  ;;  %14070 = vmatprep.mubr.f32.mxu1 %v19565_v30  ;;  %v15394_v53 = vpack.c.bf16 %v6393_v33, %v6392_v50  ;;  %v15414_v50 = vpack.c.bf16 %v6403_v8, %v6402_v57  ;;  %v6404_v33 = vld [vmem:[%s21861_s5 + $0x1d0] sm:$0xff]  ;;  %v6423_v57 = vld [vmem:[%s21861_s5 + $0x268] sm:$0xff]  ;;  %v7671_v30 = vand.u32 15, %v19241_v3 }
 0x638   : > { %15363 = vmatprep.subr.bf16.mxu1 %v15362_v36 }
 0x63b   : > { %15365 = vmatpush3.bf16.msra.mxu1 %v15362_v36  ;;  %v6753_v36 = vrot.slane %v19643_v42, 2  ;;  %v6758_v42 = vrot.slane %v19680_v32, 2 }
 0x63c   : > { %15367 = vmatprep.subr.bf16.mxu1 %v15366_v47 }
 0x63e   : > { %14071 = vmatmul.mubr.f32.vlgmr.msra.gmra.mrb[64].mxu1 %v19641_v13 }
 0x63f   : > { %14073 = vmatprep.mubr.f32.mxu1 %v19660_v25  ;;  %15369 = vmatpush3.bf16.msra.mxu1 %v15366_v47  ;;  %v6755_v47 = vrot.slane %v19660_v25, 2 }
 0x640   : > { %15371 = vmatprep.subr.bf16.mxu1 %v15370_v27 }
 0x641   : > { %v19856_v51 = vsel %vm1307_vm5, %v6755_v47, %v6756_v10  ;;  %v6411_v47 = vld [vmem:[%s21861_s5 + $0x208] sm:$0xff] }
 0x642   : > { %14074 = vmatmul.mubr.f32.gmra.mrb[66].mxu1 %v19680_v32  ;;  %v15430_v10 = vpack.c.bf16 %v6411_v47, %v6410_v23  ;;  %v6432_v47 = vld [vmem:[%s21861_s5 + $0x2b0] sm:$0xff] }
 0x643   : > { %14076 = vmatprep.mubr.f32.mxu1 %v19700_v41  ;;  %15373 = vmatpush3.bf16.msra.mxu1 %v15370_v27  ;;  %v19844_v27 = vsel %vm1307_vm5, %v6752_v46, %v6753_v36  ;;  %v6408_v36 = vld [vmem:[%s21861_s5 + $0x1f0] sm:$0xff] }
 0x644   : > { %15375 = vmatprep.subr.bf16.mxu1 %v15374_v15 }
 0x646   : > { %14077 = vmatmul.mubr.f32.gmra.mrb[68].mxu1 %v19720_v34 }
 0x647   : > { %14079 = vmatprep.mubr.f32.mxu1 %v19740_v62  ;;  %15377 = vmatpush3.bf16.msra.mxu1 %v15374_v15  ;;  %v6399_v15 = vld [vmem:[%s21861_s5 + $0x1a8] sm:$0xff] }
 0x648   : > { %15379 = vmatprep.subr.bf16.mxu1 %v15378_v37  ;;  %v15406_v0 = vpack.c.bf16 %v6399_v15, %v6398_v45  ;;  %v6414_v45 = vld [vmem:[%s21861_s5 + $0x220] sm:$0xff]  ;;  %v6415_v15 = vld [vmem:[%s21861_s5 + $0x228] sm:$0xff] }
 0x64a   : > { %14080 = vmatmul.mubr.f32.gmra.mrb[70].mxu1 %v19756_v39 }
 0x64b   : > { %15381 = vmatpush3.bf16.msra.mxu1 %v15378_v37  ;;  %14114 = vmatprep.mubr.f32.mxu1 %v6751_v40  ;;  %v19862_v37 = vsel %vm1307_vm5, %v6758_v42, %v6759_v44  ;;  %v6767_v40 = vrot.slane %v19740_v62, 2  ;;  %v6413_v42 = vld [vmem:[%s21861_s5 + $0x218] sm:$0xff] }
 0x64c   : > { %15383 = vmatprep.subr.bf16.mxu1 %v15382_v4 }
 0x64f   : > { %15385 = vmatpush3.bf16.msra.mxu1 %v15382_v4  ;;  %v19874_v4 = vsel %vm1307_vm5, %v6761_v1, %v6762_v11  ;;  %v15438_v1 = vpack.c.bf16 %v6415_v15, %v6414_v45  ;;  %v6416_v11 = vld [vmem:[%s21861_s5 + $0x230] sm:$0xff]  ;;  %v6434_v15 = vld [vmem:[%s21861_s5 + $0x2c0] sm:$0xff] }
 0x650   : > { %15387 = vmatprep.subr.bf16.mxu1 %v15386_v52 }
 0x653   : > { %15389 = vmatpush3.bf16.msra.mxu1 %v15386_v52  ;;  %v6770_v52 = vrot.slane %v19756_v39, 2 }
 0x654   : > { %15391 = vmatprep.subr.bf16.mxu1 %v15390_v12 }
 0x655   : > { %v19896_v49 = vsel %vm1307_vm5, %v6770_v52, %v6771_v6  ;;  %v6422_v6 = vld [vmem:[%s21861_s5 + $0x260] sm:$0xff] }
 0x656   : > { %v15454_v8 = vpack.c.bf16 %v6423_v57, %v6422_v6  ;;  %v6442_v57 = vld [vmem:[%s21861_s5 + $0x300] sm:$0xff] }
 0x657   : > { %15393 = vmatpush3.bf16.msra.mxu1 %v15390_v12  ;;  %v19892_v12 = vsel %vm1307_vm5, %v6767_v40, %v6768_v60  ;;  %v19954_v40 = vld [vmem:[#allocation4 + $0x80] sm:$0xff]  ;;  %v6420_v60 = vld [vmem:[%s21861_s5 + $0x250] sm:$0xff] }
 0x658   : > { %15395 = vmatprep.subr.bf16.mxu1 %v15394_v53 }
 0x65b   : > { %15397 = vmatpush3.bf16.msra.mxu1 %v15394_v53  ;;  %v6405_v53 = vld [vmem:[%s21861_s5 + $0x1d8] sm:$0xff] }
 0x65c   : > { %15399 = vmatprep.subr.bf16.mxu1 %v15398_v22  ;;  %v15418_v18 = vpack.c.bf16 %v6405_v53, %v6404_v33  ;;  %v6426_v53 = vld [vmem:[%s21861_s5 + $0x280] sm:$0xff] }
 0x65e   : > { %14115 = vmatmul.mubr.f32.vlgmr.msra.gmra.mrb[64].mxu1 %v19844_v27 }
 0x65f   : > { %14117 = vmatprep.mubr.f32.mxu1 %v19856_v51  ;;  %15401 = vmatpush3.bf16.msra.mxu1 %v15398_v22  ;;  %v6407_v22 = vld [vmem:[%s21861_s5 + $0x1e8] sm:$0xff] }
 0x660   : > { %15403 = vmatprep.subr.bf16.mxu1 %v15402_v59  ;;  %v15422_v46 = vpack.c.bf16 %v6407_v22, %v6406_v7  ;;  %v6428_v22 = vld [vmem:[%s21861_s5 + $0x290] sm:$0xff] }
 0x662   : > { %14118 = vmatmul.mubr.f32.gmra.mrb[66].mxu1 %v19862_v37 }
 0x663   : > { %14120 = vmatprep.mubr.f32.mxu1 %v19874_v4  ;;  %15405 = vmatpush3.bf16.msra.mxu1 %v15402_v59  ;;  %v6412_v59 = vld [vmem:[%s21861_s5 + $0x210] sm:$0xff] }
 0x664   : > { %15407 = vmatprep.subr.bf16.mxu1 %v15406_v0  ;;  %v15434_v44 = vpack.c.bf16 %v6413_v42, %v6412_v59  ;;  %v20003_v59 = vld [vmem:[#allocation4 + $0x88] sm:$0x3] }
 0x665   : > { %v7010_v45 = vrot.slane %v20003_v59, 1 }
 0x666   : > { %14121 = vmatmul.mubr.f32.gmra.mrb[68].mxu1 %v19880_v63 }
 0x667   : > { %14123 = vmatprep.mubr.f32.mxu1 %v19892_v12  ;;  %15409 = vmatpush3.bf16.msra.mxu1 %v15406_v0  ;;  %v6417_v0 = vld [vmem:[%s21861_s5 + $0x238] sm:$0xff] }
 0x668   : > { %15411 = vmatprep.subr.bf16.mxu1 %v15410_v61  ;;  %v15442_v9 = vpack.c.bf16 %v6417_v0, %v6416_v11 }
 0x66a   : > { %14124 = vmatmul.mubr.f32.gmra.mrb[70].mxu1 %v19896_v49 }
 0x66b   : > { %15413 = vmatpush3.bf16.msra.mxu1 %v15410_v61  ;;  %14158 = vmatprep.mubr.f32.mxu1 %v19641_v13  ;;  %v6409_v13 = vld [vmem:[%s21861_s5 + $0x1f8] sm:$0xff] }
 0x66c   : > { %15415 = vmatprep.subr.bf16.mxu1 %v15414_v50  ;;  %v15426_v17 = vpack.c.bf16 %v6409_v13, %v6408_v36  ;;  %v6421_v61 = vld [vmem:[%s21861_s5 + $0x258] sm:$0xff]  ;;  %v6430_v13 = vld [vmem:[%s21861_s5 + $0x2a0] sm:$0xff] }
 0x66d   : > { %v15450_v52 = vpack.c.bf16 %v6421_v61, %v6420_v60  ;;  %v6439_v60 = vld [vmem:[%s21861_s5 + $0x2e8] sm:$0xff] }
 0x66f   : > { %15417 = vmatpush3.bf16.msra.mxu1 %v15414_v50  ;;  %v6424_v50 = vld [vmem:[%s21861_s5 + $0x270] sm:$0xff] }
 0x670   : > { %15419 = vmatprep.subr.bf16.mxu1 %v15418_v18 }
 0x673   : > { %15421 = vmatpush3.bf16.msra.mxu1 %v15418_v18  ;;  %v6427_v18 = vld [vmem:[%s21861_s5 + $0x288] sm:$0xff] }
 0x674   : > { %15423 = vmatprep.subr.bf16.mxu1 %v15422_v46  ;;  %v15462_v7 = vpack.c.bf16 %v6427_v18, %v6426_v53  ;;  %v6446_v18 = vld [vmem:[%s21861_s5 + $0x320] sm:$0xff] }
 0x677   : > { %15425 = vmatpush3.bf16.msra.mxu1 %v15422_v46  ;;  %v6429_v46 = vld [vmem:[%s21861_s5 + $0x298] sm:$0xff] }
 0x678   : > { %15427 = vmatprep.subr.bf16.mxu1 %v15426_v17  ;;  %v15466_v36 = vpack.c.bf16 %v6429_v46, %v6428_v22  ;;  %v6448_v46 = vld [vmem:[%s21861_s5 + $0x330] sm:$0xff] }
 0x67b   : > { %15429 = vmatpush3.bf16.msra.mxu1 %v15426_v17  ;;  %v6431_v17 = vld [vmem:[%s21861_s5 + $0x2a8] sm:$0xff] }
 0x67c   : > { %15431 = vmatprep.subr.bf16.mxu1 %v15430_v10  ;;  %v15470_v23 = vpack.c.bf16 %v6431_v17, %v6430_v13  ;;  %v7126_v17 = vrot.slane %v19954_v40, 2 }
 0x67e   : > { %14159 = vmatmul.mubr.f32.vlgmr.msra.gmra.mrb[64].mxu1 %v19660_v25 }
 0x67f   : > { %14161 = vmatprep.mubr.f32.mxu1 %v19680_v32  ;;  %15433 = vmatpush3.bf16.msra.mxu1 %v15430_v10  ;;  %v6433_v10 = vld [vmem:[%s21861_s5 + $0x2b8] sm:$0xff] }
 0x680   : > { %15435 = vmatprep.subr.bf16.mxu1 %v15434_v44  ;;  %v15474_v42 = vpack.c.bf16 %v6433_v10, %v6432_v47  ;;  %v6450_v47 = vld [vmem:[%s21861_s5 + $0x340] sm:$0xff]  ;;  %v6451_v10 = vld [vmem:[%s21861_s5 + $0x348] sm:$0xff] }
 0x682   : > { %14162 = vmatmul.mubr.f32.gmra.mrb[66].mxu1 %v19700_v41 }
 0x683   : > { %14164 = vmatprep.mubr.f32.mxu1 %v19720_v34  ;;  %15437 = vmatpush3.bf16.msra.mxu1 %v15434_v44  ;;  %v7009_v44 = vrot.slane %v19954_v40, 1 }
 0x684   : > { %15439 = vmatprep.subr.bf16.mxu1 %v15438_v1 }
 0x685   : > { %v20017_v0 = vsel %vm1060_vm4, %v7009_v44, %v7010_v45  ;;  %v6453_v45 = vld [vmem:[%s21861_s5 + $0x358] sm:$0xff] }
 0x686   : > { %14165 = vmatmul.mubr.f32.gmra.mrb[68].mxu1 %v19740_v62 }
 0x687   : > { %14167 = vmatprep.mubr.f32.mxu1 %v19756_v39  ;;  %15441 = vmatpush3.bf16.msra.mxu1 %v15438_v1  ;;  %v6435_v1 = vld [vmem:[%s21861_s5 + $0x2c8] sm:$0xff] }
 0x688   : > { %15443 = vmatprep.subr.bf16.mxu1 %v15442_v9  ;;  %v15478_v11 = vpack.c.bf16 %v6435_v1, %v6434_v15  ;;  %v6454_v1 = vld [vmem:[%s21861_s5 + $0x360] sm:$0xff] }
 0x68a   : > { %14168 = vmatmul.mubr.f32.gmra.mrb[70].mxu1 %v19954_v40 }
 0x68b   : > { %15445 = vmatpush3.bf16.msra.mxu1 %v15442_v9  ;;  %14202 = vmatprep.mubr.f32.mxu1 %v19651_v16  ;;  %v6425_v16 = vld [vmem:[%s21861_s5 + $0x278] sm:$0xff]  ;;  %v6436_v9 = vld [vmem:[%s21861_s5 + $0x2d0] sm:$0xff] }
 0x68c   : > { %15447 = vmatprep.subr.bf16.mxu1 %v15446_v55  ;;  %v15458_v33 = vpack.c.bf16 %v6425_v16, %v6424_v50  ;;  %v15482_v2 = vpack.c.bf16 %v6437_v26, %v6436_v9  ;;  %v6444_v16 = vld [vmem:[%s21861_s5 + $0x310] sm:$0xff] }
 0x68d   : > { %v6456_v26 = vld [vmem:[%s21861_s5 + $0x370] sm:$0xff] }
 0x68f   : > { %15449 = vmatpush3.bf16.msra.mxu1 %v15446_v55  ;;  %v6438_v55 = vld [vmem:[%s21861_s5 + $0x2e0] sm:$0xff] }
 0x690   : > { %15451 = vmatprep.subr.bf16.mxu1 %v15450_v52  ;;  %v15486_v61 = vpack.c.bf16 %v6439_v60, %v6438_v55  ;;  %v6458_v55 = vld [vmem:[%s21861_s5 + $0x380] sm:$0xff]  ;;  %v6459_v60 = vld [vmem:[%s21861_s5 + $0x388] sm:$0xff] }
 0x693   : > { %15453 = vmatpush3.bf16.msra.mxu1 %v15450_v52  ;;  %v6440_v52 = vld [vmem:[%s21861_s5 + $0x2f0] sm:$0xff] }
 0x694   : > { %15455 = vmatprep.subr.bf16.mxu1 %v15454_v8 }
 0x697   : > { %15457 = vmatpush3.bf16.msra.mxu1 %v15454_v8  ;;  %v6443_v8 = vld [vmem:[%s21861_s5 + $0x308] sm:$0xff] }
 0x698   : > { %15459 = vmatprep.subr.bf16.mxu1 %v15458_v33  ;;  %v15494_v50 = vpack.c.bf16 %v6443_v8, %v6442_v57  ;;  %v6462_v57 = vld [vmem:[%s21861_s5 + $0x3a0] sm:$0xff]  ;;  %v6463_v8 = vld [vmem:[%s21861_s5 + $0x3a8] sm:$0xff] }
 0x69b   : > { %15461 = vmatpush3.bf16.msra.mxu1 %v15458_v33  ;;  %v6445_v33 = vld [vmem:[%s21861_s5 + $0x318] sm:$0xff] }
 0x69c   : > { %15463 = vmatprep.subr.bf16.mxu1 %v15462_v7  ;;  %v15498_v53 = vpack.c.bf16 %v6445_v33, %v6444_v16  ;;  %v6464_v16 = vld [vmem:[%s21861_s5 + $0x3b0] sm:$0xff]  ;;  %v6465_v33 = vld [vmem:[%s21861_s5 + $0x3b8] sm:$0xff] }
 0x69e   : > { %14203 = vmatmul.mubr.f32.vlgmr.msra.gmra.mrb[64].mxu1 %v19671_v14 }
 0x69f   : > { %14205 = vmatprep.mubr.f32.mxu1 %v19691_v58  ;;  %15465 = vmatpush3.bf16.msra.mxu1 %v15462_v7  ;;  %v6447_v7 = vld [vmem:[%s21861_s5 + $0x328] sm:$0xff] }
 0x6a0   : > { %15467 = vmatprep.subr.bf16.mxu1 %v15466_v36  ;;  %v15502_v22 = vpack.c.bf16 %v6447_v7, %v6446_v18  ;;  %v6469_v18 = vld [vmem:[%s21861_s5 + $0x3d8] sm:$0xff]  ;;  %v20142_v7 = vld [vmem:[#allocation4] sm:$0xff] }
 0x6a2   : > { %14206 = vmatmul.mubr.f32.gmra.mrb[66].mxu1 %v19711_v19 }
 0x6a3   : > { %14208 = vmatprep.mubr.f32.mxu1 %v19731_v31  ;;  %15469 = vmatpush3.bf16.msra.mxu1 %v15466_v36  ;;  %v6449_v36 = vld [vmem:[%s21861_s5 + $0x338] sm:$0xff] }
 0x6a4   : > { %15471 = vmatprep.subr.bf16.mxu1 %v15470_v23  ;;  %v15506_v13 = vpack.c.bf16 %v6449_v36, %v6448_v46  ;;  %v6472_v36 = vld [vmem:[%s21861_s5 + $0x3f0] sm:$0xff] }
 0x6a6   : > { %14209 = vmatmul.mubr.f32.gmra.mrb[68].mxu1 %v19747_v56 }
 0x6a7   : > { %14211 = vmatprep.mubr.f32.mxu1 %v19763_v43  ;;  %15473 = vmatpush3.bf16.msra.mxu1 %v15470_v23  ;;  %v7127_v23 = vrot.slane %v20003_v59, 2  ;;  %v6452_v59 = vld [vmem:[%s21861_s5 + $0x350] sm:$0xff] }
 0x6a8   : > { %15475 = vmatprep.subr.bf16.mxu1 %v15474_v42  ;;  %v15514_v15 = vpack.c.bf16 %v6453_v45, %v6452_v59  ;;  %v6478_v45 = vld [vmem:[%s21861_s5 + $0x420] sm:$0xff] }
 0x6a9   : > { %v20078_v44 = vsel %vm1307_vm5, %v7126_v17, %v7127_v23  ;;  %v6474_v17 = vld [vmem:[%s21861_s5 + $0x400] sm:$0xff]  ;;  %v6475_v23 = vld [vmem:[%s21861_s5 + $0x408] sm:$0xff] }
 0x6aa   : > { %14212 = vmatmul.mubr.f32.gmra.mrb[70].mxu1 %v20017_v0 }
 0x6ab   : > { %15477 = vmatpush3.bf16.msra.mxu1 %v15474_v42  ;;  %14246 = vmatprep.mubr.f32.mxu1 %v19844_v27  ;;  %v6441_v27 = vld [vmem:[%s21861_s5 + $0x2f8] sm:$0xff]  ;;  %v15510_v42 = vpack.c.bf16 %v6451_v10, %v6450_v47  ;;  %v15558_v47 = vpack.c.bf16 %v6475_v23, %v6474_v17  ;;  %v6476_v10 = vld [vmem:[%s21861_s5 + $0x410] sm:$0xff] }
 0x6ac   : > { %15479 = vmatprep.subr.bf16.mxu1 %v15478_v11  ;;  %v15490_v6 = vpack.c.bf16 %v6441_v27, %v6440_v52  ;;  %v6460_v52 = vld [vmem:[%s21861_s5 + $0x390] sm:$0xff]  ;;  %v6461_v27 = vld [vmem:[%s21861_s5 + $0x398] sm:$0xff] }
 0x6af   : > { %15481 = vmatpush3.bf16.msra.mxu1 %v15478_v11  ;;  %v6455_v11 = vld [vmem:[%s21861_s5 + $0x368] sm:$0xff] }
 0x6b0   : > { %15483 = vmatprep.subr.bf16.mxu1 %v15482_v2  ;;  %v15518_v9 = vpack.c.bf16 %v6455_v11, %v6454_v1  ;;  %v6345_v11 = vld [vmem:[#allocation4 + $0x98] sm:$0x3] }
 0x6b3   : > { %15485 = vmatpush3.bf16.msra.mxu1 %v15482_v2 }
 0x6b4   : > { %15487 = vmatprep.subr.bf16.mxu1 %v15486_v61 }
 0x6b7   : > { %15489 = vmatpush3.bf16.msra.mxu1 %v15486_v61  ;;  %v15526_v61 = vpack.c.bf16 %v6459_v60, %v6458_v55  ;;  %v6484_v55 = vld [vmem:[%s21861_s5 + $0x450] sm:$0xff]  ;;  %v6485_v60 = vld [vmem:[%s21861_s5 + $0x458] sm:$0xff] }
 0x6b8   : > { %15491 = vmatprep.subr.bf16.mxu1 %v15490_v6 }
 0x6bb   : > { %15493 = vmatpush3.bf16.msra.mxu1 %v15490_v6  ;;  %v15530_v6 = vpack.c.bf16 %v6461_v27, %v6460_v52  ;;  %v6488_v52 = vld [vmem:[%s21861_s5 + $0x470] sm:$0xff] }
 0x6bc   : > { %15495 = vmatprep.subr.bf16.mxu1 %v15494_v50 }
 0x6be   : > { %14247 = vmatmul.mubr.f32.vlgmr.msra.gmra.mrb[64].mxu1 %v19856_v51 }
 0x6bf   : > { %14249 = vmatprep.mubr.f32.mxu1 %v19862_v37  ;;  %15497 = vmatpush3.bf16.msra.mxu1 %v15494_v50  ;;  %v15534_v50 = vpack.c.bf16 %v6463_v8, %v6462_v57  ;;  %v7638_v8 = vshra.s32 %v19162_v21, 5 }
 0x6c0   : > { %15499 = vmatprep.subr.bf16.mxu1 %v15498_v53 }
 0x6c2   : > { %14250 = vmatmul.mubr.f32.gmra.mrb[66].mxu1 %v19874_v4 }
 0x6c3   : > { %14252 = vmatprep.mubr.f32.mxu1 %v19880_v63  ;;  %15501 = vmatpush3.bf16.msra.mxu1 %v15498_v53  ;;  %v6467_v53 = vld [vmem:[%s21861_s5 + $0x3c8] sm:$0xff] }
 0x6c4   : > { %15503 = vmatprep.subr.bf16.mxu1 %v15502_v22 }
 0x6c6   : > { %14253 = vmatmul.mubr.f32.gmra.mrb[68].mxu1 %v19892_v12 }
 0x6c7   : > { %14255 = vmatprep.mubr.f32.mxu1 %v19896_v49  ;;  %15505 = vmatpush3.bf16.msra.mxu1 %v15502_v22  ;;  %v6471_v22 = vld [vmem:[%s21861_s5 + $0x3e8] sm:$0xff] }
 0x6c8   : > { %15507 = vmatprep.subr.bf16.mxu1 %v15506_v13 }
 0x6ca   : > { %14256 = vmatmul.mubr.f32.gmra.mrb[70].mxu1 %v20078_v44 }
 0x6cb   : > { %15509 = vmatpush3.bf16.msra.mxu1 %v15506_v13  ;;  %14290 = vmatprep.mubr.f32.mxu1 %v19660_v25  ;;  %v6457_v25 = vld [vmem:[%s21861_s5 + $0x378] sm:$0xff] }
 0x6cc   : > { %15511 = vmatprep.subr.bf16.mxu1 %v15510_v42  ;;  %v15522_v2 = vpack.c.bf16 %v6457_v25, %v6456_v26  ;;  %v6481_v26 = vld [vmem:[%s21861_s5 + $0x438] sm:$0xff]  ;;  %v6482_v25 = vld [vmem:[%s21861_s5 + $0x440] sm:$0xff] }
 0x6cf   : > { %15513 = vmatpush3.bf16.msra.mxu1 %v15510_v42  ;;  %v6477_v42 = vld [vmem:[%s21861_s5 + $0x418] sm:$0xff] }
 0x6d0   : > { %15515 = vmatprep.subr.bf16.mxu1 %v15514_v15  ;;  %v15562_v59 = vpack.c.bf16 %v6477_v42, %v6476_v10  ;;  %v7642_v10 = vshra.s32 %v19273_v35, 5  ;;  %v7674_v42 = vand.u32 15, %v19273_v35 }
 0x6d2   : > { %v7706_v35 = vshra.s32 %v7674_v42, 1 }
 0x6d3   : > { %15517 = vmatpush3.bf16.msra.mxu1 %v15514_v15  ;;  %v6479_v15 = vld [vmem:[%s21861_s5 + $0x428] sm:$0xff] }
 0x6d4   : > { %15519 = vmatprep.subr.bf16.mxu1 %v15518_v9  ;;  %v15566_v1 = vpack.c.bf16 %v6479_v15, %v6478_v45 }
 0x6d7   : > { %15521 = vmatpush3.bf16.msra.mxu1 %v15518_v9  ;;  %v6480_v9 = vld [vmem:[%s21861_s5 + $0x430] sm:$0xff] }
 0x6d8   : > { %15523 = vmatprep.subr.bf16.mxu1 %v15522_v2 }
 0x6db   : > { %15525 = vmatpush3.bf16.msra.mxu1 %v15522_v2  ;;  %v6483_v2 = vld [vmem:[%s21861_s5 + $0x448] sm:$0xff] }
 0x6dc   : > { %15527 = vmatprep.subr.bf16.mxu1 %v15526_v61 }
 0x6de   : > { %14291 = vmatmul.mubr.f32.vlgmr.msra.gmra.mrb[64].mxu1 %v19680_v32  ;;  %v15538_v32 = vpack.c.bf16 %v6465_v33, %v6464_v16 }
 0x6df   : > { %14293 = vmatprep.mubr.f32.mxu1 %v19700_v41  ;;  %15529 = vmatpush3.bf16.msra.mxu1 %v15526_v61  ;;  %v6466_v41 = vld [vmem:[%s21861_s5 + $0x3c0] sm:$0xff] }
 0x6e0   : > { %15531 = vmatprep.subr.bf16.mxu1 %v15530_v6 }
 0x6e2   : > { %14294 = vmatmul.mubr.f32.gmra.mrb[66].mxu1 %v19720_v34  ;;  %v15542_v34 = vpack.c.bf16 %v6467_v53, %v6466_v41 }
 0x6e3   : > { %14296 = vmatprep.mubr.f32.mxu1 %v19740_v62  ;;  %15533 = vmatpush3.bf16.msra.mxu1 %v15530_v6  ;;  %v6468_v62 = vld [vmem:[%s21861_s5 + $0x3d0] sm:$0xff]  ;;  %v7476_v6 = vrot.slane %v6345_v11, 2 }
 0x6e4   : > { %15535 = vmatprep.subr.bf16.mxu1 %v15534_v50 }
 0x6e5   : > { %v7477_v57 = vsel %vm1307_vm5, %v6749_v5, %v7476_v6  ;;  %v7640_v5 = vshra.s32 %v19252_v54, 5  ;;  %v7615_v6 = vadd.s32 72, %v19162_v21 }
 0x6e6   : > { %14297 = vmatmul.mubr.f32.gmra.mrb[68].mxu1 %v19756_v39  ;;  %v15546_v39 = vpack.c.bf16 %v6469_v18, %v6468_v62 }
 0x6e7   : > { %14299 = vmatprep.mubr.f32.mxu1 %v19954_v40  ;;  %15537 = vmatpush3.bf16.msra.mxu1 %v15534_v50  ;;  %v6470_v40 = vld [vmem:[%s21861_s5 + $0x3e0] sm:$0xff]  ;;  %v7736_v18 = vmul.u32 8, %v7640_v5  ;;  %v8311_v5 = vld [vmem:[%s21863_s7 + $0x48] sm:$0xff] }
 0x6e8   : > { %15539 = vmatprep.subr.bf16.mxu1 %v15538_v32  ;;  %v15550_v46 = vpack.c.bf16 %v6471_v22, %v6470_v40  ;;  %v7641_v22 = vshra.s32 %v19266_v28, 5 }
 0x6ea   : > { %14300 = vmatmul.mubr.f32.gmra.mrb[70].mxu1 %v20142_v7  ;;  %v7737_v15 = vmul.u32 8, %v7641_v22 }
 0x6eb   : > { %15541 = vmatpush3.bf16.msra.mxu1 %v15538_v32  ;;  %14334 = vmatprep.mubr.f32.mxu1 %v19671_v14  ;;  %v6473_v14 = vld [vmem:[%s21861_s5 + $0x3f8] sm:$0xff]  ;;  %v7703_v32 = vshra.s32 %v7671_v30, 1  ;;  %v8310_v30 = vld [vmem:[%s21863_s7 + $0x40] sm:$0xff] }
 0x6ec   : > { %15543 = vmatprep.subr.bf16.mxu1 %v15542_v34  ;;  %v15554_v13 = vpack.c.bf16 %v6473_v14, %v6472_v36 }
 0x6ef   : > { %15545 = vmatpush3.bf16.msra.mxu1 %v15542_v34 }
 0x6f0   : > { %15547 = vmatprep.subr.bf16.mxu1 %v15546_v39 }
 0x6f3   : > { %15549 = vmatpush3.bf16.msra.mxu1 %v15546_v39 }
 0x6f4   : > { %15551 = vmatprep.subr.bf16.mxu1 %v15550_v46 }
 0x6f7   : > { %15553 = vmatpush3.bf16.msra.mxu1 %v15550_v46 }
 0x6f8   : > { %15555 = vmatprep.subr.bf16.mxu1 %v15554_v13 }
 0x6fb   : > { %15557 = vmatpush3.bf16.msra.mxu1 %v15554_v13 }
 0x6fc   : > { %15559 = vmatprep.subr.bf16.mxu1 %v15558_v47 }
 0x6fe   : > { %14335 = vmatmul.mubr.f32.vlgmr.msra.gmra.mrb[64].mxu1 %v19691_v58  ;;  %v7359_v58 = vrot.slane %v6345_v11, 1 }
 0x6ff   : > { %14337 = vmatprep.mubr.f32.mxu1 %v19711_v19  ;;  %15561 = vmatpush3.bf16.msra.mxu1 %v15558_v47  ;;  %v15570_v19 = vpack.c.bf16 %v6481_v26, %v6480_v9  ;;  %v7643_v26 = vshra.s32 %v19286_v48, 5 }
 0x700   : > { %15563 = vmatprep.subr.bf16.mxu1 %v15562_v59 }
 0x702   : > { %14338 = vmatmul.mubr.f32.gmra.mrb[66].mxu1 %v19731_v31  ;;  %v7360_v31 = vsel %vm1060_vm4, %v6507_v20, %v7359_v58  ;;  %v6486_v20 = vld [vmem:[%s21861_s5 + $0x460] sm:$0xff]  ;;  %v7675_v58 = vand.u32 15, %v19286_v48  ;;  %v7614_v48 = vadd.s32 64, %v19162_v21 }
 0x703   : > { %14340 = vmatprep.mubr.f32.mxu1 %v19747_v56  ;;  %15565 = vmatpush3.bf16.msra.mxu1 %v15562_v59  ;;  %v15574_v56 = vpack.c.bf16 %v6483_v2, %v6482_v25  ;;  %v7738_v2 = vmul.u32 8, %v7642_v10 }
 0x704   : > { %15567 = vmatprep.subr.bf16.mxu1 %v15566_v1 }
 0x706   : > { %14341 = vmatmul.mubr.f32.gmra.mrb[68].mxu1 %v19763_v43  ;;  %v15578_v43 = vpack.c.bf16 %v6485_v60, %v6484_v55  ;;  %v7676_v60 = vand.u32 15, %v19306_v29 }
 0x707   : > { %14343 = vmatprep.mubr.f32.mxu1 %v20017_v0  ;;  %15569 = vmatpush3.bf16.msra.mxu1 %v15566_v1  ;;  %v6487_v0 = vld [vmem:[%s21861_s5 + $0x468] sm:$0xff] }
 0x708   : > { %15571 = vmatprep.subr.bf16.mxu1 %v15570_v19  ;;  %v15582_v61 = vpack.c.bf16 %v6487_v0, %v6486_v20 }
 0x70a   : > { %14344 = vmatmul.mubr.f32.gmra.mrb[70].mxu1 %v7360_v31 }
 0x70b   : > { %15573 = vmatpush3.bf16.msra.mxu1 %v15570_v19  ;;  %14378 = vmatprep.mubr.f32.mxu1 %v19856_v51  ;;  %v6489_v51 = vld [vmem:[%s21861_s5 + $0x478] sm:$0xff] }
 0x70c   : > { %15575 = vmatprep.subr.bf16.mxu1 %v15574_v56  ;;  %v15586_v27 = vpack.c.bf16 %v6489_v51, %v6488_v52 }
 0x70f   : > { %15577 = vmatpush3.bf16.msra.mxu1 %v15574_v56 }
 0x710   : > { %15579 = vmatprep.subr.bf16.mxu1 %v15578_v43 }
 0x713   : > { %15581 = vmatpush3.bf16.msra.mxu1 %v15578_v43 }
 0x714   : > { %15583 = vmatprep.subr.bf16.mxu1 %v15582_v61 }
 0x717   : > { %15585 = vmatpush3.bf16.msra.mxu1 %v15582_v61  ;;  %v7644_v61 = vshra.s32 %v19306_v29, 5  ;;  %v7677_v29 = vand.u32 15, %v19321_v38 }
 0x718   : > { %15587 = vmatprep.subr.bf16.mxu1 %v15586_v27 }
 0x71b   : > { %15589 = vmatpush3.bf16.msra.mxu1 %v15586_v27  ;;  %v7707_v27 = vshra.s32 %v7675_v58, 1 }
 0x71e   : > { %14379 = vmatmul.mubr.f32.vlgmr.msra.gmra.mrb[64].mxu1 %v19862_v37  ;;  %v7670_v37 = vand.u32 15, %v19162_v21 }
 0x71f   : > { %14381 = vmatprep.mubr.f32.mxu1 %v19874_v4  ;;  %v7734_v4 = vmul.u32 8, %v7638_v8 }
 0x720   : > { %v7702_v50 = vshra.s32 %v7670_v37, 1 }
 0x722   : > { %14382 = vmatmul.mubr.f32.gmra.mrb[66].mxu1 %v19880_v63  ;;  %v7766_v16 = vadd.s32 %v7734_v4, %v7702_v50  ;;  %v7770_v50 = vadd.s32 %v7738_v2, %v7706_v35  ;;  %v7739_v4 = vmul.u32 8, %v7643_v26 }
 0x723   : > { %14384 = vmatprep.mubr.f32.mxu1 %v19892_v12  ;;  %v7639_v12 = vshra.s32 %v19241_v3, 5  ;;  %v7673_v3 = vand.u32 15, %v19266_v28 }
 0x724   : > { %vm7798_vm3 = vcmp.eq.s32.totalorder %v19164_v24, %v7766_v16  ;;  %vm7802_vm9 = vcmp.eq.s32.totalorder %v19164_v24, %v7770_v50  ;;  %v7771_v22 = vadd.s32 %v7739_v4, %v7707_v27 }
 0x725   : > { %v11829_v63 = vsel %vm7798_vm3, 1.0, %v20142_v7  ;;  %v7735_v41 = vmul.u32 8, %v7639_v12  ;;  %v7705_v45 = vshra.s32 %v7673_v3, 1  ;;  %v7645_v12 = vshra.s32 %v19321_v38, 5 }
 0x726   : > { %14385 = vmatmul.mubr.f32.gmra.mrb[68].mxu1 %v19896_v49  ;;  %14406 = vmatprep.mubr.msk.f32.mxu0 %vm389_vm2, %v11829_v63  ;;  %v7672_v49 = vand.u32 15, %v19252_v54  ;;  %v7708_v63 = vshra.s32 %v7676_v60, 1  ;;  %v7709_v3 = vshra.s32 %v7677_v29, 1  ;;  %vm7803_vm10 = vcmp.eq.s32.totalorder %v19164_v24, %v7771_v22 }
 0x727   : > { %14387 = vmatprep.mubr.f32.mxu1 %v20078_v44  ;;  %v11828_v44 = vld [vmem:[%s21862_s6] ss:$0 sm:$0xff]  ;;  %v7767_v54 = vadd.s32 %v7735_v41, %v7703_v32  ;;  %v20248_v55 = vadd.s32 %v7737_v15, %v7705_v45  ;;  %v7678_v32 = vand.u32 15, %v7614_v48  ;;  %v7647_v41 = vshra.s32 %v7615_v6, 5 }
 0x728   : > { %v7704_v62 = vshra.s32 %v7672_v49, 1 }
 0x729   : > { %vm7799_vm6 = vcmp.eq.s32.totalorder %v19164_v24, %v7767_v54  ;;  %vm7801_vm8 = vcmp.eq.s32.totalorder %v19164_v24, %v20248_v55 }
 0x72a   : > { %14388 = vmatmul.mubr.f32.gmra.mrb[70].mxu1 %v7477_v57  ;;  %v7768_v17 = vadd.s32 %v7736_v18, %v7704_v62  ;;  %v20246_v56 = vsel %vm7799_vm6, 1.0, %v20142_v7  ;;  %v7616_v57 = vadd.s32 80, %v19162_v21  ;;  %v7617_v62 = vadd.s32 88, %v19162_v21 }
 0x72b   : > { %v11832_v26 = vsel %vm7801_vm8, 1.0, %v20142_v7 }
 0x72c   : > { %vm7800_vm7 = vcmp.eq.s32.totalorder %v19164_v24, %v7768_v17  ;;  %v7680_v18 = vand.u32 15, %v7616_v57  ;;  %v7649_v10 = vshra.s32 %v7617_v62, 5  ;;  %v7681_v42 = vand.u32 15, %v7617_v62 }
 0x72d   : > { %v11831_v0 = vsel %vm7800_vm7, 1.0, %v20142_v7 }
 0x7f1   : > { %v14380_v33 = vpop.f32.mrb[64].mxu1 }
 0x7f2   : > { %v7599_v53 = vadd.f32 %v14380_v33, %v11828_v44  ;;  %v7545_v34 = vpop.f32.mrb[65].mxu1  ;;  %v7740_v33 = vmul.u32 8, %v7644_v61 }
 0x7f3   : > { %v7598_v39 = vadd.f32 %v11828_v44, %v7545_v34  ;;  %v7648_v34 = vshra.s32 %v7616_v57, 5 }
 0x7f4   : > { %v7607_v40 = vmax.f32 %v7599_v53, 0.0  ;;  %v7679_v53 = vand.u32 15, %v7615_v6  ;;  %v7772_v54 = vadd.s32 %v7740_v33, %v7708_v63 }
 0x7f5   : > { %v7606_v46 = vmax.f32 %v7598_v39, 0.0  ;;  %v14383_v36 = vpop.f32.mrb[66].mxu1  ;;  %v7618_v39 = vadd.s32 96, %v19162_v21  ;;  %v7744_v45 = vmul.u32 8, %v7648_v34 }
 0x7f6   : > { %v7601_v14 = vadd.f32 %v14383_v36, %v11828_v44  ;;  %v7555_v13 = vpop.f32.mrb[67].mxu1  ;;  %v8313_v36 = vld [vmem:[%s21863_s7 + $0x58] sm:$0xff]  ;;  %vm7804_vm11 = vcmp.eq.s32.totalorder %v19164_v24, %v7772_v54 }
 0x7f7   : > { %v15590_v23 = vpack.c.bf16 %v7607_v40, %v7606_v46  ;;  %v7600_v47 = vadd.f32 %v11828_v44, %v7555_v13  ;;  %v15606_v40 = vpack.c.bf16 %v8311_v5, %v8310_v30  ;;  %v8312_v46 = vld [vmem:[%s21863_s7 + $0x50] sm:$0xff]  ;;  %v7710_v13 = vshra.s32 %v7678_v32, 1 }
 0x7f8   : > { %v7609_v59 = vmax.f32 %v7601_v14, 0.0  ;;  %v7741_v14 = vmul.u32 8, %v7645_v12  ;;  %v7682_v15 = vand.u32 15, %v7618_v39  ;;  %v11835_v27 = vsel %vm7804_vm11, 1.0, %v20142_v7 }
 0x7f9   : > { %v7608_v1 = vmax.f32 %v7600_v47, 0.0  ;;  %v14386_v11 = vpop.f32.mrb[68].mxu1  ;;  %15591 = vmatprep.subr.bf16.mxu0 %v15590_v23  ;;  %v7743_v47 = vmul.u32 8, %v7647_v41  ;;  %v7623_v5 = vadd.s32 136, %v19162_v21  ;;  %v7625_v32 = vadd.s32 152, %v19162_v21 }
 0x7fa   : > { %v7603_v28 = vadd.f32 %v14386_v11, %v11828_v44  ;;  %v7565_v9 = vpop.f32.mrb[69].mxu1  ;;  %15593 = vmatpush3.bf16.msra.mxu0 %v15590_v23  ;;  %v7711_v23 = vshra.s32 %v7679_v53, 1  ;;  %v7650_v11 = vshra.s32 %v7618_v39, 5  ;;  %v7773_v58 = vadd.s32 %v7741_v14, %v7709_v3 }
 0x7fb   : > { %v15594_v19 = vpack.c.bf16 %v7609_v59, %v7608_v1  ;;  %v7602_v25 = vadd.f32 %v11828_v44, %v7565_v9  ;;  %v7712_v59 = vshra.s32 %v7680_v18, 1  ;;  %v15610_v1 = vpack.c.bf16 %v8313_v36, %v8312_v46 }
 0x7fc   : > { %v7611_v31 = vmax.f32 %v7603_v28, 0.0  ;;  %v7619_v28 = vadd.s32 104, %v19162_v21  ;;  %v7620_v9 = vadd.s32 112, %v19162_v21  ;;  %v7775_v35 = vadd.s32 %v7743_v47, %v7711_v23 }
 0x7fd   : > { %v7610_v43 = vmax.f32 %v7602_v25, 0.0  ;;  %v14389_v20 = vpop.f32.mrb[70].mxu1  ;;  %15595 = vmatprep.subr.bf16.mxu0 %v15594_v19  ;;  %v7776_v2 = vadd.s32 %v7744_v45, %v7712_v59  ;;  %v7714_v60 = vshra.s32 %v7682_v15, 1  ;;  %v7746_v55 = vmul.u32 8, %v7650_v11 }
 0x7fe   : > { %v7605_v52 = vadd.f32 %v14389_v20, %v11828_v44  ;;  %v7575_v51 = vpop.f32.mrb[71].mxu1  ;;  %15597 = vmatpush3.bf16.msra.mxu0 %v15594_v19  ;;  %v11833_v19 = vsel %vm7802_vm9, 1.0, %v20142_v7  ;;  %v7683_v20 = vand.u32 15, %v7619_v28  ;;  %v7684_v61 = vand.u32 15, %v7620_v9 }
 0x7ff   : > { %v15598_v8 = vpack.c.bf16 %v7611_v31, %v7610_v43  ;;  %v7604_v37 = vadd.f32 %v11828_v44, %v7575_v51  ;;  %v7646_v44 = vshra.s32 %v7614_v48, 5  ;;  %v7713_v31 = vshra.s32 %v7681_v42, 1 }
 0x800   : > { %v7613_v16 = vmax.f32 %v7605_v52, 0.0  ;;  %v7651_v43 = vshra.s32 %v7619_v28, 5  ;;  %v7621_v48 = vadd.s32 120, %v19162_v21  ;;  %v7622_v52 = vadd.s32 128, %v19162_v21 }
 0x801   : > { %v7612_v49 = vmax.f32 %v7604_v37, 0.0  ;;  %15599 = vmatprep.subr.bf16.mxu0 %v15598_v8  ;;  %v7742_v17 = vmul.u32 8, %v7646_v44  ;;  %v11834_v51 = vsel %vm7803_vm10, 1.0, %v20142_v7  ;;  %vm7805_vm12 = vcmp.eq.s32.totalorder %v19164_v24, %v7773_v58 }
 0x802   : > { %15601 = vmatpush3.bf16.msra.mxu0 %v15598_v8  ;;  %vm7807_vm14 = vcmp.eq.s32.totalorder %v19164_v24, %v7775_v35  ;;  %vm7808_vm15 = vcmp.eq.s32.totalorder %v19164_v24, %v7776_v2  ;;  %v7778_v57 = vadd.s32 %v7746_v55, %v7714_v60  ;;  %v7715_v8 = vshra.s32 %v7683_v20, 1 }
 0x803   : > { %v15602_v38 = vpack.c.bf16 %v7613_v16, %v7612_v49  ;;  %v7774_v25 = vadd.s32 %v7742_v17, %v7710_v13  ;;  %v7747_v37 = vmul.u32 8, %v7651_v43  ;;  %v7716_v50 = vshra.s32 %v7684_v61, 1 }
 0x804   : > { %v7653_v16 = vshra.s32 %v7621_v48, 5  ;;  %v7685_v63 = vand.u32 15, %v7621_v48  ;;  %v7686_v12 = vand.u32 15, %v7622_v52  ;;  %v11836_v29 = vsel %vm7805_vm12, 1.0, %v20142_v7 }
 0x805   : > { %15603 = vmatprep.subr.bf16.mxu0 %v15602_v38  ;;  %vm7806_vm13 = vcmp.eq.s32.totalorder %v19164_v24, %v7774_v25  ;;  %v7654_v30 = vshra.s32 %v7622_v52, 5  ;;  %v7624_v49 = vadd.s32 144, %v19162_v21  ;;  %v11838_v44 = vsel %vm7807_vm14, 1.0, %v20142_v7 }
 0x806   : > { %15605 = vmatpush3.bf16.msra.mxu0 %v15602_v38  ;;  %v11837_v33 = vsel %vm7806_vm13, 1.0, %v20142_v7  ;;  %v11839_v41 = vsel %vm7808_vm15, 1.0, %v20142_v7  ;;  %vm7810_vm1 = vcmp.eq.s32.totalorder %v19164_v24, %v7778_v57  ;;  %v7779_v53 = vadd.s32 %v7747_v37, %v7715_v8 }
 0x807   : > { %15607 = vmatprep.subr.bf16.mxu0 %v15606_v40  ;;  %v7717_v62 = vshra.s32 %v7685_v63, 1  ;;  %v7749_v38 = vmul.u32 8, %v7653_v16  ;;  %v7718_v18 = vshra.s32 %v7686_v12, 1  ;;  %v7750_v39 = vmul.u32 8, %v7654_v30 }
 0x808   : > { %v7687_v22 = vand.u32 15, %v7623_v5  ;;  %v7688_v3 = vand.u32 15, %v7624_v49  ;;  %v7656_v46 = vshra.s32 %v7624_v49, 5  ;;  %v7657_v36 = vshra.s32 %v7625_v32, 5 }
 0x809   : > { %14407 = vmatmul.mubr.msk.f32.vlgmr.msra.gmra.mrb[32].mxu0 %vm389_vm2, %v20246_v56  ;;  %v7745_v56 = vmul.u32 8, %v7649_v10  ;;  %v7689_v54 = vand.u32 15, %v7625_v32  ;;  %v7626_v14 = vadd.s32 160, %v19162_v21  ;;  %v11841_v17 = vsel %vm7810_vm1, 1.0, %v20142_v7 }
 0x80a   : > { %14409 = vmatprep.mubr.msk.f32.mxu0 %vm389_vm2, %v11831_v0  ;;  %15609 = vmatpush3.bf16.msra.mxu0 %v15606_v40  ;;  %v7652_v0 = vshra.s32 %v7620_v9, 5  ;;  %v7655_v40 = vshra.s32 %v7623_v5, 5  ;;  %v7627_v23 = vadd.s32 168, %v19162_v21  ;;  %vm7811_vm3 = vcmp.eq.s32.totalorder %v19164_v24, %v7779_v53 }
 0x80b   : > { %15611 = vmatprep.subr.bf16.mxu0 %v15610_v1  ;;  %v7777_v6 = vadd.s32 %v7745_v56, %v7713_v31  ;;  %v7781_v47 = vadd.s32 %v7749_v38, %v7717_v62  ;;  %v7628_v10 = vadd.s32 176, %v19162_v21  ;;  %v7782_v42 = vadd.s32 %v7750_v39, %v7718_v18 }
 0x80c   : > { %v7748_v4 = vmul.u32 8, %v7652_v0  ;;  %v7719_v59 = vshra.s32 %v7687_v22, 1  ;;  %v7751_v45 = vmul.u32 8, %v7655_v40  ;;  %v7720_v15 = vshra.s32 %v7688_v3, 1 }
 0x80d   : > { %14410 = vmatmul.mubr.msk.f32.gmra.mrb[34].mxu0 %vm389_vm2, %v11832_v26  ;;  %vm7809_vm0 = vcmp.eq.s32.totalorder %v19164_v24, %v7777_v6  ;;  %v7721_v11 = vshra.s32 %v7689_v54, 1  ;;  %v7753_v28 = vmul.u32 8, %v7657_v36  ;;  %v7690_v9 = vand.u32 15, %v7626_v14 }
 0x80e   : > { %14412 = vmatprep.mubr.msk.f32.mxu0 %vm389_vm2, %v11833_v19  ;;  %15613 = vmatpush3.bf16.msra.mxu0 %v15610_v1  ;;  %v7780_v34 = vadd.s32 %v7748_v4, %v7716_v50  ;;  %v11840_v13 = vsel %vm7809_vm0, 1.0, %v20142_v7  ;;  %v7752_v1 = vmul.u32 8, %v7656_v46  ;;  %v7658_v26 = vshra.s32 %v7626_v14, 5 }
 0x80f   : > { %v7659_v58 = vshra.s32 %v7627_v23, 5  ;;  %v7691_v19 = vand.u32 15, %v7627_v23  ;;  %v7629_v25 = vadd.s32 184, %v19162_v21  ;;  %v11842_v35 = vsel %vm7811_vm3, 1.0, %v20142_v7 }
 0x810   : > { %vm7812_vm6 = vcmp.eq.s32.totalorder %v19164_v24, %v7780_v34  ;;  %v7660_v2 = vshra.s32 %v7628_v10, 5  ;;  %v7692_v31 = vand.u32 15, %v7628_v10  ;;  %vm7813_vm7 = vcmp.eq.s32.totalorder %v19164_v24, %v7781_v47 }
 0x811   : > { %14413 = vmatmul.mubr.msk.f32.gmra.mrb[36].mxu0 %vm389_vm2, %v11834_v51  ;;  %v11843_v56 = vsel %vm7812_vm6, 1.0, %v20142_v7  ;;  %vm7814_vm8 = vcmp.eq.s32.totalorder %v19164_v24, %v7782_v42  ;;  %v7783_v60 = vadd.s32 %v7751_v45, %v7719_v59  ;;  %v7784_v55 = vadd.s32 %v7752_v1, %v7720_v15 }
 0x812   : > { %14415 = vmatprep.mubr.msk.f32.mxu0 %vm389_vm2, %v11835_v27  ;;  %v7785_v43 = vadd.s32 %v7753_v28, %v7721_v11  ;;  %v7722_v20 = vshra.s32 %v7690_v9, 1  ;;  %v7630_v61 = vadd.s32 192, %v19162_v21  ;;  %v7754_v0 = vmul.u32 8, %v7658_v26 }
 0x813   : > { %v7723_v48 = vshra.s32 %v7691_v19, 1  ;;  %v7755_v52 = vmul.u32 8, %v7659_v58  ;;  %v7693_v51 = vand.u32 15, %v7629_v25  ;;  %v7724_v27 = vshra.s32 %v7692_v31, 1 }
 0x814   : > { %v7756_v6 = vmul.u32 8, %v7660_v2  ;;  %v7661_v57 = vshra.s32 %v7629_v25, 5  ;;  %v7631_v8 = vadd.s32 200, %v19162_v21  ;;  %v11844_v37 = vsel %vm7813_vm7, 1.0, %v20142_v7 }
 0x815   : > { %14416 = vmatmul.mubr.msk.f32.gmra.mrb[38].mxu0 %vm389_vm2, %v11836_v29  ;;  %v11845_v50 = vsel %vm7814_vm8, 1.0, %v20142_v7  ;;  %v7632_v4 = vadd.s32 208, %v19162_v21  ;;  %vm7815_vm9 = vcmp.eq.s32.totalorder %v19164_v24, %v7783_v60  ;;  %vm7816_vm10 = vcmp.eq.s32.totalorder %v19164_v24, %v7784_v55 }
 0x816   : > { %14418 = vmatprep.mubr.msk.f32.mxu0 %vm389_vm2, %v11837_v33  ;;  %v7662_v16 = vshra.s32 %v7630_v61, 5  ;;  %v7694_v63 = vand.u32 15, %v7630_v61  ;;  %vm7817_vm11 = vcmp.eq.s32.totalorder %v19164_v24, %v7785_v43  ;;  %v7786_v12 = vadd.s32 %v7754_v0, %v7722_v20 }
 0x817   : > { %v7787_v29 = vadd.s32 %v7755_v52, %v7723_v48  ;;  %v7725_v30 = vshra.s32 %v7693_v51, 1  ;;  %v7788_v5 = vadd.s32 %v7756_v6, %v7724_v27  ;;  %v7757_v49 = vmul.u32 8, %v7661_v57 }
 0x818   : > { %v7663_v33 = vshra.s32 %v7631_v8, 5  ;;  %v11846_v32 = vsel %vm7815_vm9, 1.0, %v20142_v7  ;;  %v7696_v53 = vand.u32 15, %v7632_v4  ;;  %v7633_v34 = vadd.s32 216, %v19162_v21 }
 0x819   : > { %14419 = vmatmul.mubr.msk.f32.gmra.mrb[40].mxu0 %vm389_vm2, %v11838_v44  ;;  %v7695_v44 = vand.u32 15, %v7631_v8  ;;  %v11847_v62 = vsel %vm7816_vm10, 1.0, %v20142_v7  ;;  %v7726_v38 = vshra.s32 %v7694_v63, 1  ;;  %v7758_v18 = vmul.u32 8, %v7662_v16 }
 0x81a   : > { %14421 = vmatprep.mubr.msk.f32.mxu0 %vm389_vm2, %v11839_v41  ;;  %v7664_v41 = vshra.s32 %v7632_v4, 5  ;;  %v11848_v39 = vsel %vm7817_vm11, 1.0, %v20142_v7  ;;  %vm7818_vm12 = vcmp.eq.s32.totalorder %v19164_v24, %v7786_v12  ;;  %vm7819_vm13 = vcmp.eq.s32.totalorder %v19164_v24, %v7787_v29 }
 0x81b   : > { %v7634_v40 = vadd.s32 224, %v19162_v21  ;;  %vm7820_vm14 = vcmp.eq.s32.totalorder %v19164_v24, %v7788_v5  ;;  %v7789_v22 = vadd.s32 %v7757_v49, %v7725_v30  ;;  %v7727_v3 = vshra.s32 %v7695_v44, 1  ;;  %v8314_v30 = vld [vmem:[%s21863_s7 + $0x60] sm:$0xff]  ;;  %v8315_v5 = vld [vmem:[%s21863_s7 + $0x68] sm:$0xff] }
 0x81c   : > { %v7759_v46 = vmul.u32 8, %v7663_v33  ;;  %v7728_v36 = vshra.s32 %v7696_v53, 1  ;;  %v7760_v54 = vmul.u32 8, %v7664_v41  ;;  %v7665_v14 = vshra.s32 %v7633_v34, 5  ;;  %v20431_v44 = vld [vmem:[#allocation5] sm:$0xff] }
 0x81d   : > { %14422 = vmatmul.mubr.msk.f32.gmra.mrb[42].mxu0 %vm389_vm2, %v11840_v13  ;;  %v7697_v13 = vand.u32 15, %v7633_v34  ;;  %v7790_v23 = vadd.s32 %v7758_v18, %v7726_v38  ;;  %v7635_v47 = vadd.s32 232, %v19162_v21  ;;  %v7666_v10 = vshra.s32 %v7634_v40, 5  ;;  %v20435_v41 = vld [vmem:[#allocation5 + $0x10] sm:$0x3] }
 0x81e   : > { %14424 = vmatprep.mubr.msk.f32.mxu0 %vm389_vm2, %v11841_v17  ;;  %v11849_v17 = vsel %vm7818_vm12, 1.0, %v20142_v7  ;;  %v7698_v42 = vand.u32 15, %v7634_v40  ;;  %v7636_v59 = vadd.s32 240, %v19162_v21  ;;  %v11850_v45 = vsel %vm7819_vm13, 1.0, %v20142_v7  ;;  %v8319_v40 = vld [vmem:[%s21863_s7 + $0x88] sm:$0xff] }
 0x81f   : > { %v11851_v15 = vsel %vm7820_vm14, 1.0, %v20142_v7  ;;  %vm7821_vm15 = vcmp.eq.s32.totalorder %v19164_v24, %v7789_v22  ;;  %v7791_v1 = vadd.s32 %v7759_v46, %v7727_v3  ;;  %v7792_v11 = vadd.s32 %v7760_v54, %v7728_v36  ;;  %v8320_v3 = vld [vmem:[%s21863_s7 + $0x90] sm:$0xff]  ;;  %v8321_v46 = vld [vmem:[%s21863_s7 + $0x98] sm:$0xff]  ;;  %v8322_v54 = vld [vmem:[%s21863_s7 + $0xa0] sm:$0xff] }
 0x820   : > { %v7729_v28 = vshra.s32 %v7697_v13, 1  ;;  %v7761_v9 = vmul.u32 8, %v7665_v14  ;;  %vm7822_vm0 = vcmp.eq.s32.totalorder %v19164_v24, %v7790_v23  ;;  %v7667_v26 = vshra.s32 %v7635_v47, 5  ;;  %v8323_v14 = vld [vmem:[%s21863_s7 + $0xa8] sm:$0xff]  ;;  %v8325_v23 = vld [vmem:[%s21863_s7 + $0xb8] sm:$0xff] }
 0x821   : > { %14425 = vmatmul.mubr.msk.f32.gmra.mrb[44].mxu0 %vm389_vm2, %v11842_v35  ;;  %v7699_v58 = vand.u32 15, %v7635_v47  ;;  %v7637_v19 = vadd.s32 248, %v19162_v21  ;;  %v7730_v25 = vshra.s32 %v7698_v42, 1  ;;  %v7762_v35 = vmul.u32 8, %v7666_v10  ;;  %v8302_v10 = vld [vmem:[%s21863_s7] sm:$0xff]  ;;  %v8303_v42 = vld [vmem:[%s21863_s7 + $0x8] sm:$0xff] }
 0x822   : > { %14427 = vmatprep.mubr.msk.f32.mxu0 %vm389_vm2, %v11843_v56  ;;  %v7668_v2 = vshra.s32 %v7636_v59, 5  ;;  %v7700_v31 = vand.u32 15, %v7636_v59  ;;  %v11852_v56 = vsel %vm7821_vm15, 1.0, %v20142_v7  ;;  %v11853_v60 = vsel %vm7822_vm0, 1.0, %v20142_v7  ;;  %v8326_v59 = vld [vmem:[%s21863_s7 + $0xc0] sm:$0xff] }
 0x823   : > { %vm7823_vm1 = vcmp.eq.s32.totalorder %v19164_v24, %v7791_v1  ;;  %vm7824_vm3 = vcmp.eq.s32.totalorder %v19164_v24, %v7792_v11  ;;  %v7793_v55 = vadd.s32 %v7761_v9, %v7729_v28  ;;  %v7731_v43 = vshra.s32 %v7699_v58, 1  ;;  %v8304_v11 = vld [vmem:[%s21863_s7 + $0x10] sm:$0xff]  ;;  %v8305_v28 = vld [vmem:[%s21863_s7 + $0x18] sm:$0xff]  ;;  %v8307_v58 = vld [vmem:[%s21863_s7 + $0x28] sm:$0xff] }
 0x824   : > { %v7763_v20 = vmul.u32 8, %v7667_v26  ;;  %v7669_v21 = vshra.s32 %v7637_v19, 5  ;;  %v7701_v61 = vand.u32 15, %v7637_v19  ;;  %v7794_v0 = vadd.s32 %v7762_v35, %v7730_v25  ;;  %v8306_v26 = vld [vmem:[%s21863_s7 + $0x20] sm:$0xff]  ;;  %v8308_v25 = vld [vmem:[%s21863_s7 + $0x30] sm:$0xff]  ;;  %v8309_v35 = vld [vmem:[%s21863_s7 + $0x38] sm:$0xff] }
 0x825   : > { %14428 = vmatmul.mubr.msk.f32.gmra.mrb[46].mxu0 %vm389_vm2, %v11844_v37  ;;  %v7732_v48 = vshra.s32 %v7700_v31, 1  ;;  %v7764_v52 = vmul.u32 8, %v7668_v2  ;;  %v11854_v51 = vsel %vm7823_vm1, 1.0, %v20142_v7  ;;  %v11855_v27 = vsel %vm7824_vm3, 1.0, %v20142_v7 }
 0x826   : > { %14430 = vmatprep.mubr.msk.f32.mxu0 %vm389_vm2, %v11845_v50  ;;  %vm7825_vm6 = vcmp.eq.s32.totalorder %v19164_v24, %v7793_v55  ;;  %v7795_v6 = vadd.s32 %v7763_v20, %v7731_v43  ;;  %v7733_v57 = vshra.s32 %v7701_v61, 1  ;;  %v7765_v8 = vmul.u32 8, %v7669_v21 }
 0x827   : > { %vm7826_vm7 = vcmp.eq.s32.totalorder %v19164_v24, %v7794_v0  ;;  %v7796_v37 = vadd.s32 %v7764_v52, %v7732_v48  ;;  %v11856_v50 = vsel %vm7825_vm6, 1.0, %v20142_v7  ;;  %v15614_v49 = vpack.c.bf16 %v8315_v5, %v8314_v30 }
 0x828   : > { %v11857_v4 = vsel %vm7826_vm7, 1.0, %v20142_v7  ;;  %vm7827_vm8 = vcmp.eq.s32.totalorder %v19164_v24, %v7795_v6  ;;  %v7797_v16 = vadd.s32 %v7765_v8, %v7733_v57  ;;  %v8423_v53 = vrot.slane %v20431_v44, 1 }
 0x829   : > { %14431 = vmatmul.mubr.msk.f32.gmra.mrb[48].mxu0 %vm389_vm2, %v11846_v32  ;;  %vm7828_vm9 = vcmp.eq.s32.totalorder %v19164_v24, %v7796_v37  ;;  %v11858_v63 = vsel %vm7827_vm8, 1.0, %v20142_v7  ;;  %15615 = vmatprep.subr.bf16.mxu0 %v15614_v49  ;;  %v20433_v32 = vld [vmem:[#allocation5 + $0x8] sm:$0xff]  ;;  %v20460_v36 = vpack.c.bf16 %v8321_v46, %v8320_v3  ;;  %v20470_v13 = vpack.c.bf16 %v8323_v14, %v8322_v54 }
 0x82a   : > { %14433 = vmatprep.mubr.msk.f32.mxu0 %vm389_vm2, %v11847_v62  ;;  %v11859_v12 = vsel %vm7828_vm9, 1.0, %v20142_v7  ;;  %vm7829_vm10 = vcmp.eq.s32.totalorder %v19164_v24, %v7797_v16  ;;  %15617 = vmatpush3.bf16.msra.mxu0 %v15614_v49  ;;  %v8316_v24 = vld [vmem:[%s21863_s7 + $0x70] sm:$0xff]  ;;  %v8424_v34 = vrot.slane %v20433_v32, 1  ;;  %v8426_v62 = vrot.slane %v20435_v41, 1 }
 0x82b   : > { %v11860_v29 = vsel %vm7829_vm10, 1.0, %v20142_v7  ;;  %v8317_v7 = vld [vmem:[%s21863_s7 + $0x78] sm:$0xff]  ;;  %v15626_v9 = vpack.c.bf16 %v8305_v28, %v8304_v11  ;;  %v15630_v19 = vpack.c.bf16 %v8307_v58, %v8306_v26  ;;  %v15634_v2 = vpack.c.bf16 %v8309_v35, %v8308_v25 }
 0x82c   : > { %v15618_v33 = vpack.c.bf16 %v8317_v7, %v8316_v24  ;;  %v8425_v38 = vsel %vm1060_vm4, %v8423_v53, %v8424_v34  ;;  %v8427_v18 = vsel %vm1060_vm4, %v8424_v34, %v8426_v62 }
 0x82d   : > { %14434 = vmatmul.mubr.msk.f32.gmra.mrb[50].mxu0 %vm389_vm2, %v11848_v39  ;;  %v8318_v39 = vld [vmem:[%s21863_s7 + $0x80] sm:$0xff] }
 0x82e   : > { %14436 = vmatprep.mubr.msk.f32.mxu0 %vm389_vm2, %v11849_v17  ;;  %15619 = vmatprep.subr.bf16.mxu0 %v15618_v33  ;;  %v20450_v22 = vpack.c.bf16 %v8319_v40, %v8318_v39  ;;  %v8324_v17 = vld [vmem:[%s21863_s7 + $0xb0] sm:$0xff] }
 0x82f   : > { %15621 = vmatpush3.bf16.msra.mxu0 %v15618_v33  ;;  %v20480_v47 = vpack.c.bf16 %v8325_v23, %v8324_v17 }
 0x830   : > { %15750 = vmatprep.subr.bf16.mxu1 %v20450_v22 }
 0x831   : > { %14437 = vmatmul.mubr.msk.f32.gmra.mrb[52].mxu0 %vm389_vm2, %v11850_v45  ;;  %15754 = vmatpush3.bf16.msra.mxu1 %v20450_v22  ;;  %v15622_v45 = vpack.c.bf16 %v8303_v42, %v8302_v10 }
 0x832   : > { %14439 = vmatprep.mubr.msk.f32.mxu0 %vm389_vm2, %v11851_v15  ;;  %15751 = vmatprep.subr.bf16.mxu1 %v20460_v36  ;;  %v8327_v15 = vld [vmem:[%s21863_s7 + $0xc8] sm:$0xff] }
 0x833   : > { %v20496_v1 = vpack.c.bf16 %v8327_v15, %v8326_v59  ;;  %15623 = vmatprep.subr.bf16.mxu0 %v15622_v45 }
 0x835   : > { %14440 = vmatmul.mubr.msk.f32.gmra.mrb[54].mxu0 %vm389_vm2, %v11852_v56  ;;  %15755 = vmatpush3.bf16.msra.mxu1 %v20460_v36 }
 0x836   : > { %14442 = vmatprep.mubr.msk.f32.mxu0 %vm389_vm2, %v11853_v60  ;;  %15752 = vmatprep.subr.bf16.mxu1 %v20470_v13 }
 0x839   : > { %14443 = vmatmul.mubr.msk.f32.gmra.mrb[56].mxu0 %vm389_vm2, %v11854_v51  ;;  %15756 = vmatpush3.bf16.msra.mxu1 %v20470_v13 }
 0x83a   : > { %14445 = vmatprep.mubr.msk.f32.mxu0 %vm389_vm2, %v11855_v27  ;;  %15753 = vmatprep.subr.bf16.mxu1 %v20480_v47 }
 0x83d   : > { %14446 = vmatmul.mubr.msk.f32.gmra.mrb[58].mxu0 %vm389_vm2, %v11856_v50  ;;  %15757 = vmatpush3.bf16.msra.mxu1 %v20480_v47 }
 0x83e   : > { %14448 = vmatprep.mubr.msk.f32.mxu0 %vm389_vm2, %v11857_v4  ;;  %15655 = vmatprep.subr.bf16.mxu1 %v20496_v1 }
 0x841   : > { %14449 = vmatmul.mubr.msk.f32.gmra.mrb[60].mxu0 %vm389_vm2, %v11858_v63 }
 0x842   : > { %14451 = vmatprep.mubr.msk.f32.mxu0 %vm389_vm2, %v11859_v12 }
 0x845   : > { %14452 = vmatmul.mubr.msk.f32.gmra.mrb[62].mxu0 %vm389_vm2, %v11860_v29 }
 0x846   : > { %14470 = vmatprep.mubr.msk.f32.mxu0 %vm389_vm2, %v8425_v38 }
 0x849   : > { %14471 = vmatmul.mubr.msk.f32.vlgmr.msra.gmra.mrb[64].mxu0 %vm389_vm2, %v8427_v18 }
 0x84a   : > { %15625 = vmatpush3.bf16.msra.mxu0 %v15622_v45 }
 0x84b   : > { %15627 = vmatprep.subr.bf16.mxu0 %v15626_v9 }
 0x84e   : > { %15629 = vmatpush3.bf16.msra.mxu0 %v15626_v9 }
 0x84f   : > { %15631 = vmatprep.subr.bf16.mxu0 %v15630_v19 }
 0x852   : > { %15633 = vmatpush3.bf16.msra.mxu0 %v15630_v19 }
 0x853   : > { %15635 = vmatprep.subr.bf16.mxu0 %v15634_v2 }
 0x856   : > { %15637 = vmatpush3.bf16.msra.mxu0 %v15634_v2 }
 0x857   : > { %15639 = vmatprep.subr.bf16.mxu0 %v20450_v22 }
 0x8dc   : > { %v14408_v31 = vpop.f32.mrb[32].mxu0 }
 0x8dd   : > { %8217 = vst.msk [vmem:[#allocation5 + $0x21] sm:$0xff] %vm389_vm2, %v14408_v31  ;;  %v8056_v56 = vpop.f32.mrb[33].mxu0 }
 0x8de   : > { %8216 = vst.msk [vmem:[#allocation5 + $0x19] sm:$0xff] %vm389_vm2, %v8056_v56 }
 0x8e0   : > { %v14411_v60 = vpop.f32.mrb[34].mxu0 }
 0x8e1   : > { %8219 = vst.msk [vmem:[#allocation5 + $0x39] sm:$0xff] %vm389_vm2, %v14411_v60  ;;  %v8066_v55 = vpop.f32.mrb[35].mxu0 }
 0x8e2   : > { %8218 = vst.msk [vmem:[#allocation5 + $0x31] sm:$0xff] %vm389_vm2, %v8066_v55 }
 0x8e4   : > { %v14414_v43 = vpop.f32.mrb[36].mxu0  ;;  %v20522_v20 = vld [vmem:[#allocation5 + $0x28] sm:$0x3] }
 0x8e5   : > { %8221 = vst.msk [vmem:[#allocation5 + $0x51] sm:$0xff] %vm389_vm2, %v14414_v43  ;;  %v8076_v21 = vpop.f32.mrb[37].mxu0  ;;  %v20525_v61 = vld [vmem:[#allocation5 + $0x18] sm:$0xff]  ;;  %v20527_v0 = vld [vmem:[#allocation5 + $0x20] sm:$0xff]  ;;  %v8431_v48 = vrot.slane %v20522_v20, 1 }
 0x8e6   : > { %8220 = vst.msk [vmem:[#allocation5 + $0x49] sm:$0xff] %vm389_vm2, %v8076_v21  ;;  %v8428_v52 = vrot.slane %v20525_v61, 1  ;;  %v8429_v51 = vrot.slane %v20527_v0, 1 }
 0x8e8   : > { %v14417_v27 = vpop.f32.mrb[38].mxu0  ;;  %v20534_v6 = vsel %vm1060_vm4, %v8428_v52, %v8429_v51  ;;  %v20537_v57 = vsel %vm1060_vm4, %v8429_v51, %v8431_v48  ;;  %v20539_v8 = vld [vmem:[#allocation5 + $0x40] sm:$0x3] }
 0x8e9   : > { %8223 = vst.msk [vmem:[#allocation5 + $0x69] sm:$0xff] %vm389_vm2, %v14417_v27  ;;  %v8086_v37 = vpop.f32.mrb[39].mxu0  ;;  %14473 = vmatprep.mubr.msk.f32.mxu0 %vm389_vm2, %v20534_v6  ;;  %v20544_v50 = vld [vmem:[#allocation5 + $0x30] sm:$0xff]  ;;  %v20546_v4 = vld [vmem:[#allocation5 + $0x38] sm:$0xff]  ;;  %v8436_v16 = vrot.slane %v20539_v8, 1 }
 0x8ea   : > { %8222 = vst.msk [vmem:[#allocation5 + $0x61] sm:$0xff] %vm389_vm2, %v8086_v37  ;;  %14474 = vmatmul.mubr.msk.f32.gmra.mrb[66].mxu0 %vm389_vm2, %v20537_v57  ;;  %v8433_v63 = vrot.slane %v20544_v50, 1  ;;  %v8434_v12 = vrot.slane %v20546_v4, 1 }
 0x8ec   : > { %v14420_v29 = vpop.f32.mrb[40].mxu0  ;;  %v20555_v30 = vsel %vm1060_vm4, %v8433_v63, %v8434_v12  ;;  %v20558_v5 = vsel %vm1060_vm4, %v8434_v12, %v8436_v16  ;;  %v20560_v49 = vld [vmem:[#allocation5 + $0x58] sm:$0x3] }
 0x8ed   : > { %8225 = vst.msk [vmem:[#allocation5 + $0x81] sm:$0xff] %vm389_vm2, %v14420_v29  ;;  %v8096_v24 = vpop.f32.mrb[41].mxu0  ;;  %14476 = vmatprep.mubr.msk.f32.mxu0 %vm389_vm2, %v20555_v30  ;;  %v20565_v7 = vld [vmem:[#allocation5 + $0x48] sm:$0xff]  ;;  %v20567_v33 = vld [vmem:[#allocation5 + $0x50] sm:$0xff]  ;;  %v8441_v53 = vrot.slane %v20560_v49, 1 }
 0x8ee   : > { %8224 = vst.msk [vmem:[#allocation5 + $0x79] sm:$0xff] %vm389_vm2, %v8096_v24  ;;  %14477 = vmatmul.mubr.msk.f32.gmra.mrb[68].mxu0 %vm389_vm2, %v20558_v5  ;;  %v8438_v34 = vrot.slane %v20565_v7, 1  ;;  %v8439_v62 = vrot.slane %v20567_v33, 1 }
 0x8f0   : > { %v14423_v38 = vpop.f32.mrb[42].mxu0  ;;  %v20576_v18 = vsel %vm1060_vm4, %v8438_v34, %v8439_v62  ;;  %v20579_v39 = vsel %vm1060_vm4, %v8439_v62, %v8441_v53  ;;  %v20581_v40 = vld [vmem:[#allocation5 + $0x70] sm:$0x3] }
 0x8f1   : > { %8227 = vst.msk [vmem:[#allocation5 + $0x99] sm:$0xff] %vm389_vm2, %v14423_v38  ;;  %v8106_v3 = vpop.f32.mrb[43].mxu0  ;;  %14479 = vmatprep.mubr.msk.f32.mxu0 %vm389_vm2, %v20576_v18  ;;  %v20586_v46 = vld [vmem:[#allocation5 + $0x60] sm:$0xff]  ;;  %v20588_v54 = vld [vmem:[#allocation5 + $0x68] sm:$0xff]  ;;  %v8446_v14 = vrot.slane %v20581_v40, 1 }
 0x8f2   : > { %8226 = vst.msk [vmem:[#allocation5 + $0x91] sm:$0xff] %vm389_vm2, %v8106_v3  ;;  %14480 = vmatmul.mubr.msk.f32.gmra.mrb[70].mxu0 %vm389_vm2, %v20579_v39  ;;  %v8443_v17 = vrot.slane %v20586_v46, 1  ;;  %v8444_v23 = vrot.slane %v20588_v54, 1 }
 0x8f4   : > { %v14426_v10 = vpop.f32.mrb[44].mxu0  ;;  %v20597_v42 = vsel %vm1060_vm4, %v8443_v17, %v8444_v23  ;;  %v20600_v59 = vsel %vm1060_vm4, %v8444_v23, %v8446_v14  ;;  %v20602_v45 = vld [vmem:[#allocation5 + $0x88] sm:$0x3] }
 0x8f5   : > { %22123 = vst [vmem:[#allocation13_spill] sm:$0xff] %v20600_v59  ;;  %22124 = vst [vmem:[#allocation14_spill] sm:$0xff] %v20602_v45  ;;  %v8116_v15 = vpop.f32.mrb[45].mxu0  ;;  %14482 = vmatprep.mubr.msk.f32.mxu0 %vm389_vm2, %v20597_v42  ;;  %v20607_v11 = vld [vmem:[#allocation5 + $0x78] sm:$0xff]  ;;  %v20609_v28 = vld [vmem:[#allocation5 + $0x80] sm:$0xff]  ;;  %v8451_v9 = vrot.slane %v20602_v45, 1 }
 0x8f6   : > { %8229 = vst.msk [vmem:[#allocation5 + $0xb1] sm:$0xff] %vm389_vm2, %v14426_v10  ;;  %8228 = vst.msk [vmem:[#allocation5 + $0xa9] sm:$0xff] %vm389_vm2, %v8116_v15  ;;  %14483 = vmatmul.mubr.msk.f32.gmra.mrb[72].mxu0 %vm389_vm2, %v20600_v59  ;;  %v8448_v26 = vrot.slane %v20607_v11, 1  ;;  %v8449_v58 = vrot.slane %v20609_v28, 1 }
 0x8f8   : > { %v14429_v19 = vpop.f32.mrb[46].mxu0  ;;  %v20618_v25 = vsel %vm1060_vm4, %v8448_v26, %v8449_v58  ;;  %v20621_v35 = vsel %vm1060_vm4, %v8449_v58, %v8451_v9  ;;  %v20623_v2 = vld [vmem:[#allocation5 + $0xa0] sm:$0x3] }
 0x8f9   : > { %22125 = vst [vmem:[#allocation29_spill] sm:$0xff] %v20618_v25  ;;  %22126 = vst [vmem:[#allocation30_spill] sm:$0xff] %v20621_v35  ;;  %v8126_v31 = vpop.f32.mrb[47].mxu0  ;;  %14485 = vmatprep.mubr.msk.f32.mxu0 %vm389_vm2, %v20618_v25  ;;  %v20628_v56 = vld [vmem:[#allocation5 + $0x90] sm:$0xff]  ;;  %v20630_v60 = vld [vmem:[#allocation5 + $0x98] sm:$0xff]  ;;  %v8456_v55 = vrot.slane %v20623_v2, 1 }
 0x8fa   : > { %22127 = vst [vmem:[#allocation34_spill] sm:$0xff] %v20623_v2  ;;  %8231 = vst.msk [vmem:[#allocation5 + $0xc9] sm:$0xff] %vm389_vm2, %v14429_v19  ;;  %14486 = vmatmul.mubr.msk.f32.gmra.mrb[74].mxu0 %vm389_vm2, %v20621_v35  ;;  %v8453_v43 = vrot.slane %v20628_v56, 1  ;;  %v8454_v21 = vrot.slane %v20630_v60, 1  ;;  %v8330_v2 = vld [vmem:[%s21863_s7 + $0xe0] sm:$0xff]  ;;  %v8332_v35 = vld [vmem:[%s21863_s7 + $0xf0] sm:$0xff] }
 0x8fb   : > { %8230 = vst.msk [vmem:[#allocation5 + $0xc1] sm:$0xff] %vm389_vm2, %v8126_v31 }
 0x8fc   : > { %v14432_v48 = vpop.f32.mrb[48].mxu0  ;;  %v20639_v52 = vsel %vm1060_vm4, %v8453_v43, %v8454_v21  ;;  %v20642_v51 = vsel %vm1060_vm4, %v8454_v21, %v8456_v55 }
 0x8fd   : > { %22128 = vst [vmem:[#allocation35_spill] sm:$0xff] %v20639_v52  ;;  %22129 = vst [vmem:[#allocation36_spill] sm:$0xff] %v20642_v51  ;;  %v20644_v27 = vld [vmem:[#allocation5 + $0xb8] sm:$0x3]  ;;  %v8136_v37 = vpop.f32.mrb[49].mxu0  ;;  %14488 = vmatprep.mubr.msk.f32.mxu0 %vm389_vm2, %v20639_v52  ;;  %v20649_v16 = vld [vmem:[#allocation5 + $0xa8] sm:$0xff] }
 0x8fe   : > { %22130 = vst [vmem:[#allocation37_spill] sm:$0xff] %v20644_v27  ;;  %8233 = vst.msk [vmem:[#allocation5 + $0xe1] sm:$0xff] %vm389_vm2, %v14432_v48  ;;  %v20651_v63 = vld [vmem:[#allocation5 + $0xb0] sm:$0xff]  ;;  %v8461_v12 = vrot.slane %v20644_v27, 1  ;;  %14489 = vmatmul.mubr.msk.f32.gmra.mrb[76].mxu0 %vm389_vm2, %v20642_v51  ;;  %v8458_v29 = vrot.slane %v20649_v16, 1 }
 0x8ff   : > { %8232 = vst.msk [vmem:[#allocation5 + $0xd9] sm:$0xff] %vm389_vm2, %v8136_v37  ;;  %v8459_v24 = vrot.slane %v20651_v63, 1 }
 0x900   : > { %v14435_v53 = vpop.f32.mrb[50].mxu0 }
 0x901   : > { %v20660_v34 = vsel %vm1060_vm4, %v8458_v29, %v8459_v24  ;;  %v20663_v62 = vsel %vm1060_vm4, %v8459_v24, %v8461_v12  ;;  %v20665_v38 = vld [vmem:[#allocation5 + $0xd0] sm:$0x3]  ;;  %8235 = vst.msk [vmem:[#allocation5 + $0xf9] sm:$0xff] %vm389_vm2, %v14435_v53  ;;  %v8146_v3 = vpop.f32.mrb[51].mxu0 }
 0x902   : > { %22131 = vst [vmem:[#allocation38_spill] sm:$0xff] %v20660_v34  ;;  %22132 = vst [vmem:[#allocation39_spill] sm:$0xff] %v20663_v62  ;;  %14491 = vmatprep.mubr.msk.f32.mxu0 %vm389_vm2, %v20660_v34  ;;  %v20670_v14 = vld [vmem:[#allocation5 + $0xc0] sm:$0xff]  ;;  %v20672_v17 = vld [vmem:[#allocation5 + $0xc8] sm:$0xff]  ;;  %v8466_v23 = vrot.slane %v20665_v38, 1 }
 0x903   : > { %22133 = vst [vmem:[#allocation40_spill] sm:$0xff] %v20665_v38  ;;  %8234 = vst.msk [vmem:[#allocation5 + $0xf1] sm:$0xff] %vm389_vm2, %v8146_v3  ;;  %14492 = vmatmul.mubr.msk.f32.gmra.mrb[78].mxu0 %vm389_vm2, %v20663_v62  ;;  %v8463_v10 = vrot.slane %v20670_v14, 1  ;;  %v8464_v15 = vrot.slane %v20672_v17, 1 }
 0x904   : > { %v14438_v9 = vpop.f32.mrb[52].mxu0 }
 0x905   : > { %v20681_v26 = vsel %vm1060_vm4, %v8463_v10, %v8464_v15  ;;  %v20684_v58 = vsel %vm1060_vm4, %v8464_v15, %v8466_v23  ;;  %v20686_v19 = vld [vmem:[#allocation5 + $0xe8] sm:$0x3]  ;;  %8237 = vst.msk [vmem:[#allocation5 + $0x111] sm:$0xff] %vm389_vm2, %v14438_v9  ;;  %v8156_v31 = vpop.f32.mrb[53].mxu0 }
 0x906   : > { %22134 = vst [vmem:[#allocation43_spill] sm:$0xff] %v20681_v26  ;;  %22135 = vst [vmem:[#allocation7_spill] sm:$0xff] %v20684_v58  ;;  %14494 = vmatprep.mubr.msk.f32.mxu0 %vm389_vm2, %v20681_v26  ;;  %v20691_v55 = vld [vmem:[#allocation5 + $0xd8] sm:$0xff]  ;;  %v20693_v43 = vld [vmem:[#allocation5 + $0xe0] sm:$0xff]  ;;  %v8471_v21 = vrot.slane %v20686_v19, 1 }
 0x907   : > { %22136 = vst [vmem:[#allocation8_spill] sm:$0xff] %v20686_v19  ;;  %8236 = vst.msk [vmem:[#allocation5 + $0x109] sm:$0xff] %vm389_vm2, %v8156_v31  ;;  %14495 = vmatmul.mubr.msk.f32.gmra.mrb[80].mxu0 %vm389_vm2, %v20684_v58  ;;  %v8468_v48 = vrot.slane %v20691_v55, 1  ;;  %v8469_v37 = vrot.slane %v20693_v43, 1 }
 0x908   : > { %v14441_v12 = vpop.f32.mrb[54].mxu0  ;;  %v20707_v53 = vld [vmem:[#allocation5 + $0x100] sm:$0x3] }
 0x909   : > { %v20702_v29 = vsel %vm1060_vm4, %v8468_v48, %v8469_v37  ;;  %v20705_v24 = vsel %vm1060_vm4, %v8469_v37, %v8471_v21  ;;  %22139 = vst [vmem:[#allocation15_spill] sm:$0xff] %v20707_v53  ;;  %8239 = vst.msk [vmem:[#allocation5 + $0x129] sm:$0xff] %vm389_vm2, %v14441_v12  ;;  %v8166_v3 = vpop.f32.mrb[55].mxu0  ;;  %v8476_v15 = vrot.slane %v20707_v53, 1 }
 0x90a   : > { %22137 = vst [vmem:[#allocation9_spill] sm:$0xff] %v20702_v29  ;;  %22138 = vst [vmem:[#allocation10_spill] sm:$0xff] %v20705_v24  ;;  %14497 = vmatprep.mubr.msk.f32.mxu0 %vm389_vm2, %v20702_v29  ;;  %v20712_v23 = vld [vmem:[#allocation5 + $0xf0] sm:$0xff]  ;;  %v20714_v10 = vld [vmem:[#allocation5 + $0xf8] sm:$0xff] }
 0x90b   : > { %8238 = vst.msk [vmem:[#allocation5 + $0x121] sm:$0xff] %vm389_vm2, %v8166_v3  ;;  %14498 = vmatmul.mubr.msk.f32.gmra.mrb[82].mxu0 %vm389_vm2, %v20705_v24  ;;  %v8473_v9 = vrot.slane %v20712_v23, 1  ;;  %v8474_v31 = vrot.slane %v20714_v10, 1 }
 0x90c   : > { %v14444_v21 = vpop.f32.mrb[56].mxu0  ;;  %v20728_v12 = vld [vmem:[#allocation5 + $0x118] sm:$0x3] }
 0x90d   : > { %v20723_v48 = vsel %vm1060_vm4, %v8473_v9, %v8474_v31  ;;  %v20726_v37 = vsel %vm1060_vm4, %v8474_v31, %v8476_v15  ;;  %22142 = vst [vmem:[#allocation18_spill] sm:$0xff] %v20728_v12  ;;  %8241 = vst.msk [vmem:[#allocation5 + $0x141] sm:$0xff] %vm389_vm2, %v14444_v21  ;;  %v8176_v53 = vpop.f32.mrb[57].mxu0  ;;  %v8481_v19 = vrot.slane %v20728_v12, 1  ;;  %v8328_v12 = vld [vmem:[%s21863_s7 + $0xd0] sm:$0xff] }
 0x90e   : > { %22140 = vst [vmem:[#allocation16_spill] sm:$0xff] %v20723_v48  ;;  %22141 = vst [vmem:[#allocation17_spill] sm:$0xff] %v20726_v37  ;;  %14500 = vmatprep.mubr.msk.f32.mxu0 %vm389_vm2, %v20723_v48  ;;  %v20733_v3 = vld [vmem:[#allocation5 + $0x108] sm:$0xff]  ;;  %v20735_v24 = vld [vmem:[#allocation5 + $0x110] sm:$0xff] }
 0x90f   : > { %8240 = vst.msk [vmem:[#allocation5 + $0x139] sm:$0xff] %vm389_vm2, %v8176_v53  ;;  %14501 = vmatmul.mubr.msk.f32.gmra.mrb[84].mxu0 %vm389_vm2, %v20726_v37  ;;  %v8478_v15 = vrot.slane %v20733_v3, 1  ;;  %v8479_v9 = vrot.slane %v20735_v24, 1  ;;  %v8329_v53 = vld [vmem:[%s21863_s7 + $0xd8] sm:$0xff] }
 0x910   : > { %v14447_v31 = vpop.f32.mrb[58].mxu0  ;;  %v8286_v29 = vld [vmem:[#allocation5 + $0x130] sm:$0x3] }
 0x911   : > { %v20744_v21 = vsel %vm1060_vm4, %v8478_v15, %v8479_v9  ;;  %v20747_v48 = vsel %vm1060_vm4, %v8479_v9, %v8481_v19  ;;  %8243 = vst.msk [vmem:[#allocation5 + $0x159] sm:$0xff] %vm389_vm2, %v14447_v31  ;;  %v8186_v37 = vpop.f32.mrb[59].mxu0  ;;  %v8486_v19 = vrot.slane %v8286_v29, 1  ;;  %v9144_v9 = vrot.slane %v8286_v29, 2 }
 0x912   : > { %22143 = vst [vmem:[#allocation19_spill] sm:$0xff] %v20744_v21  ;;  %22144 = vst [vmem:[#allocation20_spill] sm:$0xff] %v20747_v48  ;;  %14503 = vmatprep.mubr.msk.f32.mxu0 %vm389_vm2, %v20744_v21  ;;  %v20758_v15 = vld [vmem:[#allocation5 + $0x120] sm:$0xff]  ;;  %v20760_v58 = vld [vmem:[#allocation5 + $0x128] sm:$0xff]  ;;  %v15658_v21 = vpack.c.bf16 %v8329_v53, %v8328_v12 }
 0x913   : > { %8242 = vst.msk [vmem:[#allocation5 + $0x151] sm:$0xff] %vm389_vm2, %v8186_v37  ;;  %14504 = vmatmul.mubr.msk.f32.gmra.mrb[86].mxu0 %vm389_vm2, %v20747_v48  ;;  %v8483_v38 = vrot.slane %v20758_v15, 1  ;;  %v8484_v26 = vrot.slane %v20760_v58, 1  ;;  %v9141_v31 = vrot.slane %v20758_v15, 2  ;;  %v9142_v62 = vrot.slane %v20760_v58, 2  ;;  %v8331_v12 = vld [vmem:[%s21863_s7 + $0xe8] sm:$0xff] }
 0x914   : > { %v14450_v27 = vpop.f32.mrb[60].mxu0  ;;  %v8289_v51 = vld [vmem:[#allocation5 + $0x148] sm:$0x3] }
 0x915   : > { %v20770_v34 = vsel %vm1060_vm4, %v8483_v38, %v8484_v26  ;;  %v20773_v29 = vsel %vm1307_vm5, %v9141_v31, %v9142_v62  ;;  %v20776_v37 = vsel %vm1060_vm4, %v8484_v26, %v8486_v19  ;;  %v20779_v48 = vsel %vm1307_vm5, %v9142_v62, %v9144_v9  ;;  %8245 = vst.msk [vmem:[#allocation5 + $0x171] sm:$0xff] %vm389_vm2, %v14450_v27  ;;  %v8196_v38 = vpop.f32.mrb[61].mxu0 }
 0x916   : > { %22145 = vst [vmem:[#allocation21_spill] sm:$0xff] %v20770_v34  ;;  %22146 = vst [vmem:[#allocation22_spill] sm:$0xff] %v20773_v29  ;;  %14506 = vmatprep.mubr.msk.f32.mxu0 %vm389_vm2, %v20770_v34  ;;  %14634 = vmatprep.mubr.msk.f32.mxu1 %vm389_vm2, %v20773_v29  ;;  %v20792_v62 = vld [vmem:[#allocation5 + $0x138] sm:$0xff]  ;;  %v20794_v26 = vld [vmem:[#allocation5 + $0x140] sm:$0xff]  ;;  %v8491_v53 = vrot.slane %v8289_v51, 1  ;;  %v9149_v19 = vrot.slane %v8289_v51, 2  ;;  %v15662_v34 = vpack.c.bf16 %v8331_v12, %v8330_v2 }
 0x917   : > { %22147 = vst [vmem:[#allocation23_spill] sm:$0xff] %v20776_v37  ;;  %22148 = vst [vmem:[#allocation24_spill] sm:$0xff] %v20779_v48  ;;  %14507 = vmatmul.mubr.msk.f32.gmra.mrb[88].mxu0 %vm389_vm2, %v20776_v37  ;;  %14635 = vmatmul.mubr.msk.f32.vlgmr.msra.gmra.mrb[72].mxu1 %vm389_vm2, %v20779_v48  ;;  %v8488_v27 = vrot.slane %v20792_v62, 1  ;;  %v8489_v9 = vrot.slane %v20794_v26, 1  ;;  %v9146_v31 = vrot.slane %v20792_v62, 2  ;;  %v9147_v29 = vrot.slane %v20794_v26, 2 }
 0x918   : > { %8244 = vst.msk [vmem:[#allocation5 + $0x169] sm:$0xff] %vm389_vm2, %v8196_v38  ;;  %15657 = vmatpush3.bf16.msra.mxu1 %v20496_v1  ;;  %v8292_v52 = vld [vmem:[#allocation5 + $0x160] sm:$0x3]  ;;  %v8333_v1 = vld [vmem:[%s21863_s7 + $0xf8] sm:$0xff]  ;;  %v14453_v2 = vpop.f32.mrb[62].mxu0 }
 0x919   : > { %v20807_v51 = vsel %vm1060_vm4, %v8488_v27, %v8489_v9  ;;  %v20810_v38 = vsel %vm1307_vm5, %v9146_v31, %v9147_v29  ;;  %v20813_v37 = vsel %vm1060_vm4, %v8489_v9, %v8491_v53  ;;  %v20816_v48 = vsel %vm1307_vm5, %v9147_v29, %v9149_v19  ;;  %15659 = vmatprep.subr.bf16.mxu1 %v15658_v21  ;;  %v8206_v27 = vpop.f32.mrb[63].mxu0 }
 0x91a   : > { %22149 = vst [vmem:[#allocation25_spill] sm:$0xff] %v20807_v51  ;;  %22150 = vst [vmem:[#allocation26_spill] sm:$0xff] %v20810_v38  ;;  %14509 = vmatprep.mubr.msk.f32.mxu0 %vm389_vm2, %v20807_v51  ;;  %14637 = vmatprep.mubr.msk.f32.mxu1 %vm389_vm2, %v20810_v38  ;;  %v20828_v12 = vld [vmem:[#allocation5 + $0x150] sm:$0xff]  ;;  %v20830_v29 = vld [vmem:[#allocation5 + $0x158] sm:$0xff]  ;;  %v8496_v53 = vrot.slane %v8292_v52, 1  ;;  %v9154_v19 = vrot.slane %v8292_v52, 2  ;;  %v15666_v52 = vpack.c.bf16 %v8333_v1, %v8332_v35 }
 0x91b   : > { %22151 = vst [vmem:[#allocation27_spill] sm:$0xff] %v20813_v37  ;;  %22152 = vst [vmem:[#allocation28_spill] sm:$0xff] %v20816_v48  ;;  %14510 = vmatmul.mubr.msk.f32.gmra.mrb[90].mxu0 %vm389_vm2, %v20813_v37  ;;  %14638 = vmatmul.mubr.msk.f32.gmra.mrb[74].mxu1 %vm389_vm2, %v20816_v48  ;;  %v8493_v9 = vrot.slane %v20828_v12, 1  ;;  %v8494_v31 = vrot.slane %v20830_v29, 1  ;;  %v9151_v38 = vrot.slane %v20828_v12, 2  ;;  %v9152_v51 = vrot.slane %v20830_v29, 2 }
 0x91c   : > { %8247 = vst.msk [vmem:[#allocation5 + $0x189] sm:$0xff] %vm389_vm2, %v14453_v2  ;;  %8246 = vst.msk [vmem:[#allocation5 + $0x181] sm:$0xff] %vm389_vm2, %v8206_v27  ;;  %15661 = vmatpush3.bf16.msra.mxu1 %v15658_v21  ;;  %v8295_v25 = vld [vmem:[#allocation5 + $0x178] sm:$0x3]  ;;  %v8334_v27 = vld [vmem:[%s21863_s7 + $0x100] sm:$0xff] }
 0x91d   : > { %v20843_v2 = vsel %vm1060_vm4, %v8493_v9, %v8494_v31  ;;  %v20846_v37 = vsel %vm1307_vm5, %v9151_v38, %v9152_v51  ;;  %v20849_v48 = vsel %vm1060_vm4, %v8494_v31, %v8496_v53  ;;  %v20852_v45 = vsel %vm1307_vm5, %v9152_v51, %v9154_v19  ;;  %15663 = vmatprep.subr.bf16.mxu1 %v15662_v34  ;;  %v8335_v35 = vld [vmem:[%s21863_s7 + $0x108] sm:$0xff] }
 0x91e   : > { %22153 = vst [vmem:[#allocation6_spill] sm:$0xff] %v20843_v2  ;;  %22154 = vst [vmem:[#allocation11_spill] sm:$0xff] %v20846_v37  ;;  %14512 = vmatprep.mubr.msk.f32.mxu0 %vm389_vm2, %v20843_v2  ;;  %14640 = vmatprep.mubr.msk.f32.mxu1 %vm389_vm2, %v20846_v37  ;;  %v8501_v38 = vrot.slane %v8295_v25, 1  ;;  %v9159_v1 = vrot.slane %v8295_v25, 2  ;;  %v15670_v37 = vpack.c.bf16 %v8335_v35, %v8334_v27  ;;  %v8337_v27 = vld [vmem:[%s21863_s7 + $0x118] sm:$0xff] }
 0x91f   : > { %22155 = vst [vmem:[#allocation31_spill] sm:$0xff] %v20849_v48  ;;  %22156 = vst [vmem:[#allocation32_spill] sm:$0xff] %v20852_v45  ;;  %v20864_v21 = vld [vmem:[#allocation5 + $0x168] sm:$0xff]  ;;  %v20866_v51 = vld [vmem:[#allocation5 + $0x170] sm:$0xff]  ;;  %14513 = vmatmul.mubr.msk.f32.gmra.mrb[92].mxu0 %vm389_vm2, %v20849_v48  ;;  %14641 = vmatmul.mubr.msk.f32.gmra.mrb[76].mxu1 %vm389_vm2, %v20852_v45 }
 0x920   : > { %v8498_v53 = vrot.slane %v20864_v21, 1  ;;  %v8499_v19 = vrot.slane %v20866_v51, 1  ;;  %v9156_v9 = vrot.slane %v20864_v21, 2  ;;  %v9157_v31 = vrot.slane %v20866_v51, 2  ;;  %15665 = vmatpush3.bf16.msra.mxu1 %v15662_v34  ;;  %v8336_v34 = vld [vmem:[%s21863_s7 + $0x110] sm:$0xff] }
 0x921   : > { %15667 = vmatprep.subr.bf16.mxu1 %v15666_v52  ;;  %v15674_v35 = vpack.c.bf16 %v8337_v27, %v8336_v34  ;;  %v9084_v34 = vrot.slane %v20435_v41, 2  ;;  %v8345_v41 = vld [vmem:[%s21863_s7 + $0x158] sm:$0xff] }
 0x922   : > { %v20877_v2 = vsel %vm1060_vm4, %v8498_v53, %v8499_v19  ;;  %v20880_v25 = vsel %vm1307_vm5, %v9156_v9, %v9157_v31  ;;  %v20883_v48 = vsel %vm1060_vm4, %v8499_v19, %v8501_v38  ;;  %v20886_v45 = vsel %vm1307_vm5, %v9157_v31, %v9159_v1  ;;  %v8338_v38 = vld [vmem:[%s21863_s7 + $0x120] sm:$0xff]  ;;  %v8340_v53 = vld [vmem:[%s21863_s7 + $0x130] sm:$0xff]  ;;  %v8341_v19 = vld [vmem:[%s21863_s7 + $0x138] sm:$0xff] }
 0x923   : > { %22157 = vst [vmem:[#allocation33_spill] sm:$0xff] %v20877_v2  ;;  %22158 = vst [vmem:[#allocation41_spill] sm:$0xff] %v20880_v25  ;;  %14515 = vmatprep.mubr.msk.f32.mxu0 %vm389_vm2, %v20877_v2  ;;  %14643 = vmatprep.mubr.msk.f32.mxu1 %vm389_vm2, %v20880_v25  ;;  %v8343_v9 = vld [vmem:[%s21863_s7 + $0x148] sm:$0xff]  ;;  %v9082_v31 = vrot.slane %v20433_v32, 2 }
 0x924   : > { %22159 = vst [vmem:[#allocation42_spill] sm:$0xff] %v20886_v45  ;;  %14516 = vmatmul.mubr.msk.f32.gmra.mrb[94].mxu0 %vm389_vm2, %v20883_v48  ;;  %14644 = vmatmul.mubr.msk.f32.gmra.mrb[78].mxu1 %vm389_vm2, %v20886_v45 }
 0x925   : > { %15669 = vmatpush3.bf16.msra.mxu1 %v15666_v52  ;;  %14662 = vmatprep.mubr.msk.f32.mxu1 %vm389_vm2, %v20525_v61  ;;  %v8339_v52 = vld [vmem:[%s21863_s7 + $0x128] sm:$0xff] }
 0x926   : > { %14534 = vmatprep.mubr.msk.f32.mxu0 %vm389_vm2, %v20431_v44  ;;  %15671 = vmatprep.subr.bf16.mxu1 %v15670_v37  ;;  %v15678_v1 = vpack.c.bf16 %v8339_v52, %v8338_v38  ;;  %v8344_v38 = vld [vmem:[%s21863_s7 + $0x150] sm:$0xff]  ;;  %v9085_v52 = vsel %vm1307_vm5, %v9082_v31, %v9084_v34  ;;  %v9101_v34 = vrot.slane %v20586_v46, 2 }
 0x928   : > { %14535 = vmatmul.mubr.msk.f32.vlgmr.msra.gmra.mrb[64].mxu0 %vm389_vm2, %v20433_v32  ;;  %14663 = vmatmul.mubr.msk.f32.vlgmr.msra.gmra.mrb[80].mxu1 %vm389_vm2, %v20527_v0  ;;  %v9087_v32 = vrot.slane %v20527_v0, 2 }
 0x929   : > { %14537 = vmatprep.mubr.msk.f32.mxu0 %vm389_vm2, %v20525_v61  ;;  %14665 = vmatprep.mubr.msk.f32.mxu1 %vm389_vm2, %v20544_v50 }
 0x92a   : > { %15641 = vmatpush3.bf16.msra.mxu0 %v20450_v22  ;;  %15673 = vmatpush3.bf16.msra.mxu1 %v15670_v37  ;;  %v15682_v22 = vpack.c.bf16 %v8341_v19, %v8340_v53  ;;  %v8342_v37 = vld [vmem:[%s21863_s7 + $0x140] sm:$0xff]  ;;  %v9091_v53 = vrot.slane %v20544_v50, 2  ;;  %v9092_v19 = vrot.slane %v20546_v4, 2 }
 0x92b   : > { %15643 = vmatprep.subr.bf16.mxu0 %v20460_v36  ;;  %15675 = vmatprep.subr.bf16.mxu1 %v15674_v35 }
 0x92c   : > { %14538 = vmatmul.mubr.msk.f32.gmra.mrb[66].mxu0 %vm389_vm2, %v20527_v0  ;;  %14666 = vmatmul.mubr.msk.f32.gmra.mrb[82].mxu1 %vm389_vm2, %v20546_v4 }
 0x92d   : > { %14540 = vmatprep.mubr.msk.f32.mxu0 %vm389_vm2, %v20544_v50  ;;  %14668 = vmatprep.mubr.msk.f32.mxu1 %vm389_vm2, %v20565_v7  ;;  %v9094_v50 = vrot.slane %v20539_v8, 2  ;;  %v8349_v8 = vld [vmem:[%s21863_s7 + $0x178] sm:$0xff] }
 0x92e   : > { %15645 = vmatpush3.bf16.msra.mxu0 %v20460_v36  ;;  %15677 = vmatpush3.bf16.msra.mxu1 %v15674_v35  ;;  %v20954_v36 = vpack.c.bf16 %v8343_v9, %v8342_v37  ;;  %v21060_v35 = vld [vmem:[#allocation5 + $0x188] sm:$0xff]  ;;  %v9096_v37 = vrot.slane %v20565_v7, 2  ;;  %v9097_v9 = vrot.slane %v20567_v33, 2 }
 0x92f   : > { %15647 = vmatprep.subr.bf16.mxu0 %v20470_v13  ;;  %15679 = vmatprep.subr.bf16.mxu1 %v15678_v1 }
 0x930   : > { %14541 = vmatmul.mubr.msk.f32.gmra.mrb[68].mxu0 %vm389_vm2, %v20546_v4  ;;  %14669 = vmatmul.mubr.msk.f32.gmra.mrb[84].mxu1 %vm389_vm2, %v20567_v33 }
 0x931   : > { %14543 = vmatprep.mubr.msk.f32.mxu0 %vm389_vm2, %v20565_v7  ;;  %14671 = vmatprep.mubr.msk.f32.mxu1 %vm389_vm2, %v20586_v46  ;;  %v9099_v7 = vrot.slane %v20560_v49, 2  ;;  %v8351_v49 = vld [vmem:[%s21863_s7 + $0x188] sm:$0xff] }
 0x932   : > { %15649 = vmatpush3.bf16.msra.mxu0 %v20470_v13  ;;  %15681 = vmatpush3.bf16.msra.mxu1 %v15678_v1  ;;  %v21046_v13 = vld [vmem:[#allocation5 + $0x180] sm:$0xff]  ;;  %v9089_v1 = vrot.slane %v20522_v20, 2  ;;  %v8347_v20 = vld [vmem:[%s21863_s7 + $0x168] sm:$0xff] }
 0x933   : > { %15651 = vmatprep.subr.bf16.mxu0 %v20480_v47  ;;  %15683 = vmatprep.subr.bf16.mxu1 %v15682_v22 }
 0x934   : > { %14544 = vmatmul.mubr.msk.f32.gmra.mrb[70].mxu0 %vm389_vm2, %v20567_v33  ;;  %14672 = vmatmul.mubr.msk.f32.gmra.mrb[86].mxu1 %vm389_vm2, %v20588_v54 }
 0x935   : > { %14546 = vmatprep.mubr.msk.f32.mxu0 %vm389_vm2, %v20586_v46  ;;  %14674 = vmatprep.mubr.msk.f32.mxu1 %vm389_vm2, %v20607_v11  ;;  %v9104_v46 = vrot.slane %v20581_v40, 2  ;;  %v22160_v40 = vld [vmem:[#allocation29_spill] sm:$0xff] }
 0x936   : > { %15653 = vmatpush3.bf16.msra.mxu0 %v20480_v47  ;;  %15685 = vmatpush3.bf16.msra.mxu1 %v15682_v22  ;;  %v9081_v47 = vrot.slane %v20431_v44, 2  ;;  %v9086_v44 = vrot.slane %v20525_v61, 2  ;;  %v15690_v61 = vpack.c.bf16 %v8345_v41, %v8344_v38  ;;  %v21107_v22 = vsel %vm1307_vm5, %v9091_v53, %v9092_v19 }
 0x937   : > { %15687 = vmatprep.subr.bf16.mxu1 %v20954_v36  ;;  %v9106_v41 = vrot.slane %v20607_v11, 2 }
 0x938   : > { %14547 = vmatmul.mubr.msk.f32.gmra.mrb[72].mxu0 %vm389_vm2, %v20588_v54  ;;  %14675 = vmatmul.mubr.msk.f32.gmra.mrb[88].mxu1 %vm389_vm2, %v20609_v28  ;;  %v9083_v27 = vsel %vm1307_vm5, %v9081_v47, %v9082_v31  ;;  %v21083_v0 = vsel %vm1307_vm5, %v9086_v44, %v9087_v32  ;;  %v21122_v47 = vsel %vm1307_vm5, %v9092_v19, %v9094_v50  ;;  %v8350_v44 = vld [vmem:[%s21863_s7 + $0x180] sm:$0xff]  ;;  %v22162_v19 = vld [vmem:[#allocation30_spill] sm:$0xff]  ;;  %v9112_v50 = vrot.slane %v20630_v60, 2 }
 0x939   : > { %14549 = vmatprep.mubr.msk.f32.mxu0 %vm389_vm2, %v20607_v11  ;;  %14677 = vmatprep.mubr.msk.f32.mxu1 %vm389_vm2, %v20628_v56  ;;  %v21130_v31 = vsel %vm1307_vm5, %v9096_v37, %v9097_v9 }
 0x93c   : > { %14550 = vmatmul.mubr.msk.f32.gmra.mrb[74].mxu0 %vm389_vm2, %v20609_v28  ;;  %14678 = vmatmul.mubr.msk.f32.gmra.mrb[90].mxu1 %vm389_vm2, %v20630_v60 }
 0x93d   : > { %14552 = vmatprep.mubr.msk.f32.mxu0 %vm389_vm2, %v20628_v56  ;;  %14680 = vmatprep.mubr.msk.f32.mxu1 %vm389_vm2, %v20649_v16 }
 0x940   : > { %14553 = vmatmul.mubr.msk.f32.gmra.mrb[76].mxu0 %vm389_vm2, %v20630_v60  ;;  %14681 = vmatmul.mubr.msk.f32.gmra.mrb[92].mxu1 %vm389_vm2, %v20651_v63 }
 0x941   : > { %14555 = vmatprep.mubr.msk.f32.mxu0 %vm389_vm2, %v20649_v16  ;;  %14683 = vmatprep.mubr.msk.f32.mxu1 %vm389_vm2, %v20670_v14 }
 0x944   : > { %14556 = vmatmul.mubr.msk.f32.gmra.mrb[78].mxu0 %vm389_vm2, %v20651_v63  ;;  %14684 = vmatmul.mubr.msk.f32.gmra.mrb[94].mxu1 %vm389_vm2, %v20672_v17 }
 0x945   : > { %14558 = vmatprep.mubr.msk.f32.mxu0 %vm389_vm2, %v20670_v14  ;;  %14686 = vmatprep.mubr.msk.f32.mxu1 %vm389_vm2, %v20691_v55 }
 0x948   : > { %14559 = vmatmul.mubr.msk.f32.gmra.mrb[80].mxu0 %vm389_vm2, %v20672_v17  ;;  %14687 = vmatmul.mubr.msk.f32.gmra.mrb[96].mxu1 %vm389_vm2, %v20693_v43 }
 0x949   : > { %14561 = vmatprep.mubr.msk.f32.mxu0 %vm389_vm2, %v20691_v55  ;;  %14689 = vmatprep.mubr.msk.f32.mxu1 %vm389_vm2, %v20712_v23 }
 0x94c   : > { %14562 = vmatmul.mubr.msk.f32.gmra.mrb[82].mxu0 %vm389_vm2, %v20693_v43  ;;  %14690 = vmatmul.mubr.msk.f32.gmra.mrb[98].mxu1 %vm389_vm2, %v20714_v10 }
 0x94d   : > { %14564 = vmatprep.mubr.msk.f32.mxu0 %vm389_vm2, %v20712_v23  ;;  %14692 = vmatprep.mubr.msk.f32.mxu1 %vm389_vm2, %v20733_v3 }
 0x950   : > { %14565 = vmatmul.mubr.msk.f32.gmra.mrb[84].mxu0 %vm389_vm2, %v20714_v10  ;;  %14693 = vmatmul.mubr.msk.f32.gmra.mrb[100].mxu1 %vm389_vm2, %v20735_v24 }
 0x951   : > { %14567 = vmatprep.mubr.msk.f32.mxu0 %vm389_vm2, %v20733_v3  ;;  %14695 = vmatprep.mubr.msk.f32.mxu1 %vm389_vm2, %v20758_v15 }
 0x954   : > { %14568 = vmatmul.mubr.msk.f32.gmra.mrb[86].mxu0 %vm389_vm2, %v20735_v24  ;;  %14696 = vmatmul.mubr.msk.f32.gmra.mrb[102].mxu1 %vm389_vm2, %v20760_v58 }
 0x955   : > { %14570 = vmatprep.mubr.msk.f32.mxu0 %vm389_vm2, %v20758_v15  ;;  %14698 = vmatprep.mubr.msk.f32.mxu1 %vm389_vm2, %v20792_v62 }
 0x958   : > { %14571 = vmatmul.mubr.msk.f32.gmra.mrb[88].mxu0 %vm389_vm2, %v20760_v58  ;;  %14699 = vmatmul.mubr.msk.f32.gmra.mrb[72].mxu1 %vm389_vm2, %v20794_v26 }
 0x959   : > { %14573 = vmatprep.mubr.msk.f32.mxu0 %vm389_vm2, %v20792_v62  ;;  %14701 = vmatprep.mubr.msk.f32.mxu1 %vm389_vm2, %v20828_v12 }
 0x95c   : > { %14574 = vmatmul.mubr.msk.f32.gmra.mrb[90].mxu0 %vm389_vm2, %v20794_v26  ;;  %14702 = vmatmul.mubr.msk.f32.gmra.mrb[74].mxu1 %vm389_vm2, %v20830_v29 }
 0x95d   : > { %14576 = vmatprep.mubr.msk.f32.mxu0 %vm389_vm2, %v20828_v12  ;;  %14704 = vmatprep.mubr.msk.f32.mxu1 %vm389_vm2, %v20864_v21 }
 0x960   : > { %14577 = vmatmul.mubr.msk.f32.gmra.mrb[92].mxu0 %vm389_vm2, %v20830_v29  ;;  %14705 = vmatmul.mubr.msk.f32.gmra.mrb[76].mxu1 %vm389_vm2, %v20866_v51 }
 0x961   : > { %14579 = vmatprep.mubr.msk.f32.mxu0 %vm389_vm2, %v20864_v21  ;;  %14707 = vmatprep.mubr.msk.f32.mxu1 %vm389_vm2, %v21046_v13 }
 0x964   : > { %14580 = vmatmul.mubr.msk.f32.gmra.mrb[94].mxu0 %vm389_vm2, %v20866_v51  ;;  %14708 = vmatmul.mubr.msk.f32.gmra.mrb[78].mxu1 %vm389_vm2, %v21060_v35 }
 0x965   : > { %14726 = vmatprep.mubr.msk.f32.mxu1 %vm389_vm2, %v20534_v6  ;;  %14598 = vmatprep.mubr.msk.f32.mxu0 %vm389_vm2, %v9083_v27  ;;  %v8346_v6 = vld [vmem:[%s21863_s7 + $0x160] sm:$0xff]  ;;  %v9102_v27 = vrot.slane %v20588_v54, 2  ;;  %v21148_v54 = vpack.c.bf16 %v8351_v49, %v8350_v44  ;;  %v22167_v49 = vld [vmem:[#allocation37_spill] sm:$0xff] }
 0x966   : > { %v15694_v4 = vpack.c.bf16 %v8347_v20, %v8346_v6  ;;  %v9111_v20 = vrot.slane %v20628_v56, 2 }
 0x967   : > { %v21155_v38 = vsel %vm1307_vm5, %v9101_v34, %v9102_v27  ;;  %v9117_v34 = vrot.slane %v20651_v63, 2 }
 0x968   : > { %14599 = vmatmul.mubr.msk.f32.vlgmr.msra.gmra.mrb[64].mxu0 %vm389_vm2, %v9085_v52  ;;  %14727 = vmatmul.mubr.msk.f32.vlgmr.msra.gmra.mrb[80].mxu1 %vm389_vm2, %v20537_v57  ;;  %v21099_v57 = vsel %vm1307_vm5, %v9087_v32, %v9089_v1  ;;  %v21145_v32 = vsel %vm1307_vm5, %v9097_v9, %v9099_v7  ;;  %v9107_v52 = vrot.slane %v20609_v28, 2  ;;  %v21164_v1 = vsel %vm1307_vm5, %v9102_v27, %v9104_v46  ;;  %v22164_v9 = vld [vmem:[#allocation34_spill] sm:$0xff] }
 0x969   : > { %14601 = vmatprep.mubr.msk.f32.mxu0 %vm389_vm2, %v21083_v0  ;;  %14729 = vmatprep.mubr.msk.f32.mxu1 %vm389_vm2, %v20555_v30  ;;  %v21190_v7 = vsel %vm1307_vm5, %v9111_v20, %v9112_v50  ;;  %v22166_v27 = vld [vmem:[#allocation38_spill] sm:$0xff]  ;;  %v9119_v46 = vrot.slane %v22167_v49, 2  ;;  %v22169_v20 = vld [vmem:[#allocation43_spill] sm:$0xff] }
 0x96a   : > { %15689 = vmatpush3.bf16.msra.mxu1 %v20954_v36  ;;  %v8348_v36 = vld [vmem:[%s21863_s7 + $0x170] sm:$0xff]  ;;  %v21173_v6 = vsel %vm1307_vm5, %v9106_v41, %v9107_v52  ;;  %v22168_v41 = vld [vmem:[#allocation39_spill] sm:$0xff] }
 0x96b   : > { %15691 = vmatprep.subr.bf16.mxu1 %v15690_v61  ;;  %v15698_v33 = vpack.c.bf16 %v8349_v8, %v8348_v36  ;;  %v9114_v36 = vrot.slane %v22164_v9, 2  ;;  %v22165_v8 = vld [vmem:[#allocation36_spill] sm:$0xff] }
 0x96c   : > { %14602 = vmatmul.mubr.msk.f32.gmra.mrb[66].mxu0 %vm389_vm2, %v21099_v57  ;;  %14730 = vmatmul.mubr.msk.f32.gmra.mrb[82].mxu1 %vm389_vm2, %v20558_v5  ;;  %v22170_v9 = vld [vmem:[#allocation40_spill] sm:$0xff] }
 0x96d   : > { %14604 = vmatprep.mubr.msk.f32.mxu0 %vm389_vm2, %v21107_v22  ;;  %14732 = vmatprep.mubr.msk.f32.mxu1 %vm389_vm2, %v20576_v18  ;;  %v21199_v44 = vsel %vm1307_vm5, %v9112_v50, %v9114_v36  ;;  %v21216_v50 = vsel %vm1307_vm5, %v9117_v34, %v9119_v46  ;;  %v9124_v36 = vrot.slane %v22170_v9, 2  ;;  %v22173_v9 = vld [vmem:[#allocation8_spill] sm:$0xff] }
 0x96e   : > { %15693 = vmatpush3.bf16.msra.mxu1 %v15690_v61  ;;  %v22161_v61 = vld [vmem:[#allocation14_spill] sm:$0xff] }
 0x96f   : > { %15695 = vmatprep.subr.bf16.mxu1 %v15694_v4  ;;  %v9109_v53 = vrot.slane %v22161_v61, 2  ;;  %v9121_v61 = vrot.slane %v20670_v14, 2 }
 0x970   : > { %14605 = vmatmul.mubr.msk.f32.gmra.mrb[68].mxu0 %vm389_vm2, %v21122_v47  ;;  %14733 = vmatmul.mubr.msk.f32.gmra.mrb[84].mxu1 %vm389_vm2, %v20579_v39 }
 0x971   : > { %14607 = vmatprep.mubr.msk.f32.mxu0 %vm389_vm2, %v21130_v31  ;;  %14735 = vmatprep.mubr.msk.f32.mxu1 %vm389_vm2, %v20597_v42  ;;  %v21182_v37 = vsel %vm1307_vm5, %v9107_v52, %v9109_v53  ;;  %v9122_v53 = vrot.slane %v20672_v17, 2 }
 0x972   : > { %15697 = vmatpush3.bf16.msra.mxu1 %v15694_v4  ;;  %v22163_v4 = vld [vmem:[#allocation35_spill] sm:$0xff] }
 0x973   : > { %15699 = vmatprep.subr.bf16.mxu1 %v15698_v33  ;;  %v21224_v49 = vsel %vm1307_vm5, %v9121_v61, %v9122_v53  ;;  %v21233_v46 = vsel %vm1307_vm5, %v9122_v53, %v9124_v36  ;;  %v22174_v61 = vld [vmem:[#allocation10_spill] sm:$0xff]  ;;  %v22175_v53 = vld [vmem:[#allocation16_spill] sm:$0xff] }
 0x974   : > { %14608 = vmatmul.mubr.msk.f32.gmra.mrb[70].mxu0 %vm389_vm2, %v21145_v32  ;;  %14736 = vmatmul.mubr.msk.f32.gmra.mrb[86].mxu1 %vm389_vm2, %v20600_v59  ;;  %v22181_v59 = vld [vmem:[#allocation21_spill] sm:$0xff] }
 0x975   : > { %14610 = vmatprep.mubr.msk.f32.mxu0 %vm389_vm2, %v21155_v38  ;;  %14738 = vmatprep.mubr.msk.f32.mxu1 %vm389_vm2, %v22160_v40  ;;  %v9137_v40 = vrot.slane %v20735_v24, 2 }
 0x976   : > { %15701 = vmatpush3.bf16.msra.mxu1 %v15698_v33  ;;  %v9116_v33 = vrot.slane %v20649_v16, 2 }
 0x977   : > { %15703 = vmatprep.subr.bf16.mxu1 %v21148_v54 }
 0x978   : > { %14611 = vmatmul.mubr.msk.f32.gmra.mrb[72].mxu0 %vm389_vm2, %v21164_v1  ;;  %14739 = vmatmul.mubr.msk.f32.gmra.mrb[88].mxu1 %vm389_vm2, %v22162_v19  ;;  %v21207_v52 = vsel %vm1307_vm5, %v9116_v33, %v9117_v34  ;;  %v22171_v33 = vld [vmem:[#allocation7_spill] sm:$0xff]  ;;  %v22172_v34 = vld [vmem:[#allocation9_spill] sm:$0xff]  ;;  %v9136_v19 = vrot.slane %v20733_v3, 2 }
 0x979   : > { %14613 = vmatprep.mubr.msk.f32.mxu0 %vm389_vm2, %v21173_v6  ;;  %14741 = vmatprep.mubr.msk.f32.mxu1 %vm389_vm2, %v22163_v4  ;;  %v9132_v4 = vrot.slane %v20714_v10, 2 }
 0x97c   : > { %14614 = vmatmul.mubr.msk.f32.gmra.mrb[74].mxu0 %vm389_vm2, %v21182_v37  ;;  %14742 = vmatmul.mubr.msk.f32.gmra.mrb[90].mxu1 %vm389_vm2, %v22165_v8  ;;  %v9131_v8 = vrot.slane %v20712_v23, 2 }
 0x97d   : > { %14616 = vmatprep.mubr.msk.f32.mxu0 %vm389_vm2, %v21190_v7  ;;  %14744 = vmatprep.mubr.msk.f32.mxu1 %vm389_vm2, %v22166_v27  ;;  %v9127_v27 = vrot.slane %v20693_v43, 2 }
 0x980   : > { %14617 = vmatmul.mubr.msk.f32.gmra.mrb[76].mxu0 %vm389_vm2, %v21199_v44  ;;  %14745 = vmatmul.mubr.msk.f32.gmra.mrb[92].mxu1 %vm389_vm2, %v22168_v41  ;;  %v9126_v41 = vrot.slane %v20691_v55, 2 }
 0x981   : > { %14619 = vmatprep.mubr.msk.f32.mxu0 %vm389_vm2, %v21207_v52  ;;  %14747 = vmatprep.mubr.msk.f32.mxu1 %vm389_vm2, %v22169_v20  ;;  %v9129_v20 = vrot.slane %v22173_v9, 2  ;;  %v22176_v9 = vld [vmem:[#allocation15_spill] sm:$0xff] }
 0x983   : > { %v21250_v36 = vsel %vm1307_vm5, %v9127_v27, %v9129_v20 }
 0x984   : > { %14620 = vmatmul.mubr.msk.f32.gmra.mrb[78].mxu0 %vm389_vm2, %v21216_v50  ;;  %14748 = vmatmul.mubr.msk.f32.gmra.mrb[94].mxu1 %vm389_vm2, %v22171_v33  ;;  %v21241_v33 = vsel %vm1307_vm5, %v9126_v41, %v9127_v27  ;;  %v22177_v41 = vld [vmem:[#allocation17_spill] sm:$0xff]  ;;  %v22178_v27 = vld [vmem:[#allocation19_spill] sm:$0xff] }
 0x985   : > { %14622 = vmatprep.mubr.msk.f32.mxu0 %vm389_vm2, %v21224_v49  ;;  %14750 = vmatprep.mubr.msk.f32.mxu1 %vm389_vm2, %v22172_v34  ;;  %v9134_v34 = vrot.slane %v22176_v9, 2  ;;  %v22179_v9 = vld [vmem:[#allocation18_spill] sm:$0xff] }
 0x987   : > { %v21267_v20 = vsel %vm1307_vm5, %v9132_v4, %v9134_v34  ;;  %v22182_v34 = vld [vmem:[#allocation23_spill] sm:$0xff] }
 0x988   : > { %14623 = vmatmul.mubr.msk.f32.gmra.mrb[80].mxu0 %vm389_vm2, %v21233_v46  ;;  %14751 = vmatmul.mubr.msk.f32.gmra.mrb[96].mxu1 %vm389_vm2, %v22174_v61  ;;  %v21258_v61 = vsel %vm1307_vm5, %v9131_v8, %v9132_v4  ;;  %v22180_v8 = vld [vmem:[#allocation20_spill] sm:$0xff] }
 0x989   : > { %14625 = vmatprep.mubr.msk.f32.mxu0 %vm389_vm2, %v21241_v33  ;;  %14753 = vmatprep.mubr.msk.f32.mxu1 %vm389_vm2, %v22175_v53  ;;  %v9139_v53 = vrot.slane %v22179_v9, 2  ;;  %v22183_v9 = vld [vmem:[#allocation25_spill] sm:$0xff] }
 0x98b   : > { %v21282_v4 = vsel %vm1307_vm5, %v9137_v40, %v9139_v53  ;;  %v22186_v53 = vld [vmem:[#allocation31_spill] sm:$0xff] }
 0x98c   : > { %14626 = vmatmul.mubr.msk.f32.gmra.mrb[82].mxu0 %vm389_vm2, %v21250_v36  ;;  %14754 = vmatmul.mubr.msk.f32.gmra.mrb[98].mxu1 %vm389_vm2, %v22177_v41  ;;  %v21275_v41 = vsel %vm1307_vm5, %v9136_v19, %v9137_v40  ;;  %v22184_v19 = vld [vmem:[#allocation27_spill] sm:$0xff]  ;;  %v9747_v40 = vrot.slane %v21060_v35, 1 }
 0x98d   : > { %14628 = vmatprep.mubr.msk.f32.mxu0 %vm389_vm2, %v21258_v61  ;;  %14756 = vmatprep.mubr.msk.f32.mxu1 %vm389_vm2, %v22178_v27  ;;  %v21298_v27 = vld [vmem:[#allocation5 + $0x190] sm:$0x3] }
 0x990   : > { %14629 = vmatmul.mubr.msk.f32.gmra.mrb[84].mxu0 %vm389_vm2, %v21267_v20  ;;  %14757 = vmatmul.mubr.msk.f32.gmra.mrb[100].mxu1 %vm389_vm2, %v22180_v8  ;;  %v22185_v8 = vld [vmem:[#allocation6_spill] sm:$0xff] }
 0x991   : > { %14631 = vmatprep.mubr.msk.f32.mxu0 %vm389_vm2, %v21275_v41  ;;  %14759 = vmatprep.mubr.msk.f32.mxu1 %vm389_vm2, %v22181_v59  ;;  %v9746_v59 = vrot.slane %v21046_v13, 1 }
 0x994   : > { %14632 = vmatmul.mubr.msk.f32.gmra.mrb[86].mxu0 %vm389_vm2, %v21282_v4  ;;  %14760 = vmatmul.mubr.msk.f32.gmra.mrb[102].mxu1 %vm389_vm2, %v22182_v34 }
 0x995   : > { %14762 = vmatprep.mubr.msk.f32.mxu1 %vm389_vm2, %v22183_v9  ;;  %v9749_v9 = vrot.slane %v21298_v27, 1 }
 0x998   : > { %14763 = vmatmul.mubr.msk.f32.gmra.mrb[72].mxu1 %vm389_vm2, %v22184_v19  ;;  %v21306_v19 = vsel %vm1060_vm4, %v9746_v59, %v9747_v40 }
 0x999   : > { %14765 = vmatprep.mubr.msk.f32.mxu1 %vm389_vm2, %v22185_v8  ;;  %v21311_v8 = vsel %vm1060_vm4, %v9747_v40, %v9749_v9  ;;  %v8354_v9 = vld [vmem:[%s21863_s7 + $0x1a0] sm:$0xff]  ;;  %v8355_v40 = vld [vmem:[%s21863_s7 + $0x1a8] sm:$0xff] }
 0x99a   : > { %22187 = vst [vmem:[#allocation44_spill] sm:$0xff] %v21311_v8 }
 0x99c   : > { %14766 = vmatmul.mubr.msk.f32.gmra.mrb[74].mxu1 %vm389_vm2, %v22186_v53  ;;  %v8352_v53 = vld [vmem:[%s21863_s7 + $0x190] sm:$0xff] }
 0x99d   : > { %14768 = vmatprep.mubr.msk.f32.mxu1 %vm389_vm2, %v20877_v2  ;;  %v8353_v2 = vld [vmem:[%s21863_s7 + $0x198] sm:$0xff] }
 0x99e   : > { %v15706_v59 = vpack.c.bf16 %v8353_v2, %v8352_v53  ;;  %v8356_v2 = vld [vmem:[%s21863_s7 + $0x1b0] sm:$0xff]  ;;  %v8359_v53 = vld [vmem:[%s21863_s7 + $0x1c8] sm:$0xff] }
 0x9a0   : > { %14769 = vmatmul.mubr.msk.f32.gmra.mrb[76].mxu1 %vm389_vm2, %v20883_v48 }
 0x9a1   : > { %14771 = vmatprep.mubr.msk.f32.mxu1 %vm389_vm2, %v21306_v19 }
 0x9a4   : > { %14772 = vmatmul.mubr.msk.f32.gmra.mrb[78].mxu1 %vm389_vm2, %v21311_v8  ;;  %v15710_v8 = vpack.c.bf16 %v8355_v40, %v8354_v9  ;;  %v22190_v40 = vld [vmem:[#allocation26_spill] sm:$0xff] }
 0x9a5   : > { %14790 = vmatprep.mubr.msk.f32.mxu1 %vm389_vm2, %v21083_v0  ;;  %v8357_v0 = vld [vmem:[%s21863_s7 + $0x1b8] sm:$0xff] }
 0x9a8   : > { %14791 = vmatmul.mubr.msk.f32.vlgmr.msra.gmra.mrb[80].mxu1 %vm389_vm2, %v21099_v57  ;;  %v15714_v57 = vpack.c.bf16 %v8357_v0, %v8356_v2  ;;  %v22191_v2 = vld [vmem:[#allocation28_spill] sm:$0xff]  ;;  %v22192_v0 = vld [vmem:[#allocation11_spill] sm:$0xff] }
 0x9a9   : > { %14793 = vmatprep.mubr.msk.f32.mxu1 %vm389_vm2, %v21107_v22  ;;  %15705 = vmatpush3.bf16.msra.mxu1 %v21148_v54  ;;  %v8358_v54 = vld [vmem:[%s21863_s7 + $0x1c0] sm:$0xff] }
 0x9aa   : > { %15707 = vmatprep.subr.bf16.mxu1 %v15706_v59  ;;  %v15718_v9 = vpack.c.bf16 %v8359_v53, %v8358_v54  ;;  %v10013_v54 = vrot.slane %v21060_v35, 2  ;;  %v22193_v53 = vld [vmem:[#allocation32_spill] sm:$0xff] }
 0x9ac   : > { %14794 = vmatmul.mubr.msk.f32.gmra.mrb[82].mxu1 %vm389_vm2, %v21122_v47 }
 0x9ad   : > { %14796 = vmatprep.mubr.msk.f32.mxu1 %vm389_vm2, %v21130_v31  ;;  %15709 = vmatpush3.bf16.msra.mxu1 %v15706_v59  ;;  %v22189_v59 = vld [vmem:[#allocation24_spill] sm:$0xff] }
 0x9ae   : > { %15711 = vmatprep.subr.bf16.mxu1 %v15710_v8 }
 0x9b0   : > { %14797 = vmatmul.mubr.msk.f32.gmra.mrb[84].mxu1 %vm389_vm2, %v21145_v32 }
 0x9b1   : > { %14799 = vmatprep.mubr.msk.f32.mxu1 %vm389_vm2, %v21155_v38  ;;  %15713 = vmatpush3.bf16.msra.mxu1 %v15710_v8  ;;  %v22188_v8 = vld [vmem:[#allocation22_spill] sm:$0xff] }
 0x9b2   : > { %15715 = vmatprep.subr.bf16.mxu1 %v15714_v57 }
 0x9b4   : > { %14800 = vmatmul.mubr.msk.f32.gmra.mrb[86].mxu1 %vm389_vm2, %v21164_v1 }
 0x9b5   : > { %14802 = vmatprep.mubr.msk.f32.mxu1 %vm389_vm2, %v21173_v6  ;;  %15717 = vmatpush3.bf16.msra.mxu1 %v15714_v57  ;;  %v10012_v57 = vrot.slane %v21046_v13, 2 }
 0x9b6   : > { %15719 = vmatprep.subr.bf16.mxu1 %v15718_v9 }
 0x9b8   : > { %14803 = vmatmul.mubr.msk.f32.gmra.mrb[88].mxu1 %vm389_vm2, %v21182_v37 }
 0x9b9   : > { %14805 = vmatprep.mubr.msk.f32.mxu1 %vm389_vm2, %v21190_v7 }
 0x9bc   : > { %14806 = vmatmul.mubr.msk.f32.gmra.mrb[90].mxu1 %vm389_vm2, %v21199_v44 }
 0x9bd   : > { %14808 = vmatprep.mubr.msk.f32.mxu1 %vm389_vm2, %v21207_v52 }
 0x9c0   : > { %14809 = vmatmul.mubr.msk.f32.gmra.mrb[92].mxu1 %vm389_vm2, %v21216_v50 }
 0x9c1   : > { %14811 = vmatprep.mubr.msk.f32.mxu1 %vm389_vm2, %v21224_v49 }
 0x9c4   : > { %14812 = vmatmul.mubr.msk.f32.gmra.mrb[94].mxu1 %vm389_vm2, %v21233_v46 }
 0x9c5   : > { %14814 = vmatprep.mubr.msk.f32.mxu1 %vm389_vm2, %v21241_v33 }
 0x9c8   : > { %14815 = vmatmul.mubr.msk.f32.gmra.mrb[96].mxu1 %vm389_vm2, %v21250_v36 }
 0x9c9   : > { %14817 = vmatprep.mubr.msk.f32.mxu1 %vm389_vm2, %v21258_v61 }
 0x9cc   : > { %14818 = vmatmul.mubr.msk.f32.gmra.mrb[98].mxu1 %vm389_vm2, %v21267_v20 }
 0x9cd   : > { %14820 = vmatprep.mubr.msk.f32.mxu1 %vm389_vm2, %v21275_v41 }
 0x9d0   : > { %14821 = vmatmul.mubr.msk.f32.gmra.mrb[100].mxu1 %vm389_vm2, %v21282_v4 }
 0x9d1   : > { %14823 = vmatprep.mubr.msk.f32.mxu1 %vm389_vm2, %v22188_v8 }
 0x9d4   : > { %14824 = vmatmul.mubr.msk.f32.gmra.mrb[102].mxu1 %vm389_vm2, %v22189_v59  ;;  %v10015_v59 = vrot.slane %v21298_v27, 2  ;;  %v8361_v27 = vld [vmem:[%s21863_s7 + $0x1d8] sm:$0xff] }
 0x9d5   : > { %14826 = vmatprep.mubr.msk.f32.mxu1 %vm389_vm2, %v22190_v40  ;;  %v16533_v40 = vld [vmem:[#allocation5 + $0x60] sm:$0xff] }
 0x9d8   : > { %14827 = vmatmul.mubr.msk.f32.gmra.mrb[72].mxu1 %vm389_vm2, %v22191_v2  ;;  %v21404_v2 = vsel %vm1307_vm5, %v10012_v57, %v10013_v54 }
 0x9d9   : > { %14829 = vmatprep.mubr.msk.f32.mxu1 %vm389_vm2, %v22192_v0  ;;  %22194 = vst [vmem:[#allocation45_spill] sm:$0xff] %v21404_v2  ;;  %v21409_v0 = vsel %vm1307_vm5, %v10013_v54, %v10015_v59  ;;  %v8362_v59 = vld [vmem:[%s21863_s7 + $0x1e0] sm:$0xff]  ;;  %v8363_v54 = vld [vmem:[%s21863_s7 + $0x1e8] sm:$0xff] }
 0x9da   : > { %22195 = vst [vmem:[#allocation46_spill] sm:$0xff] %v21409_v0 }
 0x9dc   : > { %14830 = vmatmul.mubr.msk.f32.gmra.mrb[74].mxu1 %vm389_vm2, %v22193_v53  ;;  %v8360_v53 = vld [vmem:[%s21863_s7 + $0x1d0] sm:$0xff] }
 0x9dd   : > { %14832 = vmatprep.mubr.msk.f32.mxu1 %vm389_vm2, %v20880_v25  ;;  %v15722_v57 = vpack.c.bf16 %v8361_v27, %v8360_v53  ;;  %v16531_v25 = vld [vmem:[#allocation5 + $0x48] sm:$0xff]  ;;  %v8365_v53 = vld [vmem:[%s21863_s7 + $0x1f8] sm:$0xff]  ;;  %v16532_v27 = vld [vmem:[#allocation5 + $0x50] sm:$0xff] }
 0x9e0   : > { %14833 = vmatmul.mubr.msk.f32.gmra.mrb[76].mxu1 %vm389_vm2, %v20886_v45  ;;  %v16529_v45 = vld [vmem:[#allocation5 + $0x30] sm:$0xff] }
 0x9e1   : > { %14835 = vmatprep.mubr.msk.f32.mxu1 %vm389_vm2, %v21404_v2  ;;  %v16530_v2 = vld [vmem:[#allocation5 + $0x38] sm:$0xff] }
 0x9e4   : > { %14836 = vmatmul.mubr.msk.f32.gmra.mrb[78].mxu1 %vm389_vm2, %v21409_v0  ;;  %v15726_v0 = vpack.c.bf16 %v8363_v54, %v8362_v59  ;;  %v16534_v59 = vld [vmem:[#allocation5 + $0x68] sm:$0xff]  ;;  %v22204_v54 = vld [vmem:[#allocation7_spill] sm:$0xff] }
 0x9e5   : > { %14854 = vmatprep.mubr.msk.f32.mxu1 %vm389_vm2, %v16529_v45  ;;  %v8364_v45 = vld [vmem:[%s21863_s7 + $0x1f0] sm:$0xff] }
 0x9e8   : > { %14855 = vmatmul.mubr.msk.f32.vlgmr.msra.gmra.mrb[80].mxu1 %vm389_vm2, %v16530_v2  ;;  %v8367_v2 = vld [vmem:[%s21863_s7 + $0x208] sm:$0xff] }
 0x9e9   : > { %14857 = vmatprep.mubr.msk.f32.mxu1 %vm389_vm2, %v16531_v25  ;;  %15721 = vmatpush3.bf16.msra.mxu1 %v15718_v9  ;;  %v15730_v25 = vpack.c.bf16 %v8365_v53, %v8364_v45  ;;  %v8366_v9 = vld [vmem:[%s21863_s7 + $0x200] sm:$0xff]  ;;  %v22205_v45 = vld [vmem:[#allocation9_spill] sm:$0xff] }
 0x9ea   : > { %15723 = vmatprep.subr.bf16.mxu1 %v15722_v57 }
 0x9ec   : > { %14858 = vmatmul.mubr.msk.f32.gmra.mrb[82].mxu1 %vm389_vm2, %v16532_v27 }
 0x9ed   : > { %14860 = vmatprep.mubr.msk.f32.mxu1 %vm389_vm2, %v16533_v40  ;;  %15725 = vmatpush3.bf16.msra.mxu1 %v15722_v57  ;;  %v15734_v40 = vpack.c.bf16 %v8367_v2, %v8366_v9  ;;  %v22207_v9 = vld [vmem:[#allocation16_spill] sm:$0xff] }
 0x9ee   : > { %15727 = vmatprep.subr.bf16.mxu1 %v15726_v0 }
 0x9f0   : > { %14861 = vmatmul.mubr.msk.f32.gmra.mrb[84].mxu1 %vm389_vm2, %v16534_v59 }
 0x9f1   : > { %14863 = vmatprep.mubr.msk.f32.mxu1 %vm389_vm2, %v20607_v11  ;;  %15729 = vmatpush3.bf16.msra.mxu1 %v15726_v0  ;;  %v21489_v11 = vld [vmem:[#allocation5 + $0x198] sm:$0xff] }
 0x9f2   : > { %15731 = vmatprep.subr.bf16.mxu1 %v15730_v25 }
 0x9f4   : > { %14864 = vmatmul.mubr.msk.f32.gmra.mrb[86].mxu1 %vm389_vm2, %v20609_v28  ;;  %v21495_v28 = vld [vmem:[#allocation5 + $0x1a0] sm:$0xff] }
 0x9f5   : > { %14866 = vmatprep.mubr.msk.f32.mxu1 %vm389_vm2, %v20628_v56  ;;  %15733 = vmatpush3.bf16.msra.mxu1 %v15730_v25  ;;  %v8368_v56 = vld [vmem:[%s21863_s7 + $0x210] sm:$0xff] }
 0x9f6   : > { %15735 = vmatprep.subr.bf16.mxu1 %v15734_v40  ;;  %v22206_v25 = vld [vmem:[#allocation10_spill] sm:$0xff] }
 0x9f8   : > { %14867 = vmatmul.mubr.msk.f32.gmra.mrb[88].mxu1 %vm389_vm2, %v20630_v60  ;;  %v8369_v60 = vld [vmem:[%s21863_s7 + $0x218] sm:$0xff] }
 0x9f9   : > { %14869 = vmatprep.mubr.msk.f32.mxu1 %vm389_vm2, %v20649_v16  ;;  %v15738_v16 = vpack.c.bf16 %v8369_v60, %v8368_v56  ;;  %v22209_v56 = vld [vmem:[#allocation19_spill] sm:$0xff] }
 0x9fc   : > { %14870 = vmatmul.mubr.msk.f32.gmra.mrb[90].mxu1 %vm389_vm2, %v20651_v63  ;;  %v8370_v63 = vld [vmem:[%s21863_s7 + $0x220] sm:$0xff] }
 0x9fd   : > { %14872 = vmatprep.mubr.msk.f32.mxu1 %vm389_vm2, %v20670_v14  ;;  %v8371_v14 = vld [vmem:[%s21863_s7 + $0x228] sm:$0xff] }
 0xa00   : > { %14873 = vmatmul.mubr.msk.f32.gmra.mrb[92].mxu1 %vm389_vm2, %v20672_v17  ;;  %v15742_v17 = vpack.c.bf16 %v8371_v14, %v8370_v63  ;;  %v22210_v63 = vld [vmem:[#allocation20_spill] sm:$0xff]  ;;  %v22211_v14 = vld [vmem:[#allocation21_spill] sm:$0xff] }
 0xa01   : > { %14875 = vmatprep.mubr.msk.f32.mxu1 %vm389_vm2, %v20691_v55  ;;  %v8373_v55 = vld [vmem:[%s21863_s7 + $0x238] sm:$0xff] }
 0xa04   : > { %14876 = vmatmul.mubr.msk.f32.gmra.mrb[94].mxu1 %vm389_vm2, %v20693_v43 }
 0xa05   : > { %14878 = vmatprep.mubr.msk.f32.mxu1 %vm389_vm2, %v20712_v23  ;;  %v22196_v23 = vld [vmem:[#allocation13_spill] sm:$0xff] }
 0xa08   : > { %14879 = vmatmul.mubr.msk.f32.gmra.mrb[96].mxu1 %vm389_vm2, %v20714_v10  ;;  %v22197_v10 = vld [vmem:[#allocation29_spill] sm:$0xff] }
 0xa09   : > { %14881 = vmatprep.mubr.msk.f32.mxu1 %vm389_vm2, %v20733_v3 }
 0xa0c   : > { %14882 = vmatmul.mubr.msk.f32.gmra.mrb[98].mxu1 %vm389_vm2, %v20735_v24 }
 0xa0d   : > { %14884 = vmatprep.mubr.msk.f32.mxu1 %vm389_vm2, %v20758_v15  ;;  %v22199_v15 = vld [vmem:[#allocation35_spill] sm:$0xff] }
 0xa10   : > { %14885 = vmatmul.mubr.msk.f32.gmra.mrb[100].mxu1 %vm389_vm2, %v20760_v58 }
 0xa11   : > { %14887 = vmatprep.mubr.msk.f32.mxu1 %vm389_vm2, %v20792_v62 }
 0xa14   : > { %14888 = vmatmul.mubr.msk.f32.gmra.mrb[102].mxu1 %vm389_vm2, %v20794_v26 }
 0xa15   : > { %14890 = vmatprep.mubr.msk.f32.mxu1 %vm389_vm2, %v20828_v12  ;;  %v22200_v12 = vld [vmem:[#allocation36_spill] sm:$0xff] }
 0xa18   : > { %14891 = vmatmul.mubr.msk.f32.gmra.mrb[72].mxu1 %vm389_vm2, %v20830_v29  ;;  %v22201_v29 = vld [vmem:[#allocation38_spill] sm:$0xff] }
 0xa19   : > { %14893 = vmatprep.mubr.msk.f32.mxu1 %vm389_vm2, %v20864_v21 }
 0xa1c   : > { %14894 = vmatmul.mubr.msk.f32.gmra.mrb[74].mxu1 %vm389_vm2, %v20866_v51  ;;  %v22202_v51 = vld [vmem:[#allocation39_spill] sm:$0xff] }
 0xa1d   : > { %14896 = vmatprep.mubr.msk.f32.mxu1 %vm389_vm2, %v21046_v13 }
 0xa20   : > { %14897 = vmatmul.mubr.msk.f32.gmra.mrb[76].mxu1 %vm389_vm2, %v21060_v35  ;;  %v22203_v35 = vld [vmem:[#allocation43_spill] sm:$0xff] }
 0xa21   : > { %14899 = vmatprep.mubr.msk.f32.mxu1 %vm389_vm2, %v21489_v11 }
 0xa24   : > { %14900 = vmatmul.mubr.msk.f32.gmra.mrb[78].mxu1 %vm389_vm2, %v21495_v28 }
 0xa25   : > { %14918 = vmatprep.mubr.msk.f32.mxu1 %vm389_vm2, %v20555_v30  ;;  %v8372_v30 = vld [vmem:[%s21863_s7 + $0x230] sm:$0xff] }
 0xa28   : > { %14919 = vmatmul.mubr.msk.f32.vlgmr.msra.gmra.mrb[80].mxu1 %vm389_vm2, %v20558_v5  ;;  %v15746_v5 = vpack.c.bf16 %v8373_v55, %v8372_v30  ;;  %v22212_v55 = vld [vmem:[#allocation25_spill] sm:$0xff] }
 0xa29   : > { %14921 = vmatprep.mubr.msk.f32.mxu1 %vm389_vm2, %v20576_v18  ;;  %15737 = vmatpush3.bf16.msra.mxu1 %v15734_v40  ;;  %v22208_v40 = vld [vmem:[#allocation17_spill] sm:$0xff] }
 0xa2a   : > { %15739 = vmatprep.subr.bf16.mxu1 %v15738_v16 }
 0xa2b   : > { %v21517_v58 = vpop.f32.mrb[88].mxu0 }
 0xa2c   : > { %v21525_v43 = vpop.f32.mrb[89].mxu0  ;;  %14922 = vmatmul.mubr.msk.f32.gmra.mrb[82].mxu1 %vm389_vm2, %v20579_v39 }
 0xa2d   : > { %14924 = vmatprep.mubr.msk.f32.mxu1 %vm389_vm2, %v20597_v42  ;;  %15741 = vmatpush3.bf16.msra.mxu1 %v15738_v16  ;;  %v22198_v42 = vld [vmem:[#allocation30_spill] sm:$0xff] }
 0xa2e   : > { %15743 = vmatprep.subr.bf16.mxu1 %v15742_v17 }
 0xa2f   : > { %v21531_v18 = vpop.f32.mrb[90].mxu0 }
 0xa30   : > { %v21533_v24 = vpop.f32.mrb[91].mxu0  ;;  %14925 = vmatmul.mubr.msk.f32.gmra.mrb[84].mxu1 %vm389_vm2, %v22196_v23 }
 0xa31   : > { %14927 = vmatprep.mubr.msk.f32.mxu1 %vm389_vm2, %v22197_v10  ;;  %15745 = vmatpush3.bf16.msra.mxu1 %v15742_v17  ;;  %v22213_v10 = vld [vmem:[#allocation27_spill] sm:$0xff] }
 0xa32   : > { %15747 = vmatprep.subr.bf16.mxu1 %v15746_v5 }
 0xa33   : > { %v21539_v3 = vpop.f32.mrb[92].mxu0 }
 0xa34   : > { %v21541_v39 = vpop.f32.mrb[93].mxu0  ;;  %14928 = vmatmul.mubr.msk.f32.gmra.mrb[86].mxu1 %vm389_vm2, %v22198_v42  ;;  %v22214_v42 = vld [vmem:[#allocation6_spill] sm:$0xff] }
 0xa35   : > { %14930 = vmatprep.mubr.msk.f32.mxu1 %vm389_vm2, %v22199_v15  ;;  %15749 = vmatpush3.bf16.msra.mxu1 %v15746_v5 }
 0xa37   : > { %v21547_v62 = vpop.f32.mrb[94].mxu0 }
 0xa38   : > { %v21549_v26 = vpop.f32.mrb[95].mxu0  ;;  %14931 = vmatmul.mubr.msk.f32.gmra.mrb[88].mxu1 %vm389_vm2, %v22200_v12 }
 0xa39   : > { %14933 = vmatprep.mubr.msk.f32.mxu1 %vm389_vm2, %v22201_v29  ;;  %v22215_v29 = vld [vmem:[#allocation31_spill] sm:$0xff] }
 0xa3b   : > { %v21555_v21 = vpop.f32.mrb[64].mxu0 }
 0xa3c   : > { %14934 = vmatmul.mubr.msk.f32.gmra.mrb[90].mxu1 %vm389_vm2, %v22202_v51  ;;  %v21559_v13 = vpop.f32.mrb[65].mxu0  ;;  %v10542_v51 = vrot.slane %v21489_v11, 1 }
 0xa3d   : > { %14936 = vmatprep.mubr.msk.f32.mxu1 %vm389_vm2, %v22203_v35  ;;  %v10543_v35 = vrot.slane %v21495_v28, 1 }
 0xa3f   : > { %v21563_v0 = vpop.f32.mrb[66].mxu0 }
 0xa40   : > { %v21565_v57 = vpop.f32.mrb[67].mxu0  ;;  %14937 = vmatmul.mubr.msk.f32.gmra.mrb[92].mxu1 %vm389_vm2, %v22204_v54  ;;  %v8301_v54 = vld [vmem:[#allocation5 + $0x1a8] sm:$0x3] }
 0xa41   : > { %14939 = vmatprep.mubr.msk.f32.mxu1 %vm389_vm2, %v22205_v45 }
 0xa43   : > { %v21571_v53 = vpop.f32.mrb[68].mxu0 }
 0xa44   : > { %v21573_v27 = vpop.f32.mrb[69].mxu0  ;;  %14940 = vmatmul.mubr.msk.f32.gmra.mrb[94].mxu1 %vm389_vm2, %v22206_v25 }
 0xa45   : > { %14942 = vmatprep.mubr.msk.f32.mxu1 %vm389_vm2, %v22207_v9  ;;  %v10545_v9 = vrot.slane %v8301_v54, 1 }
 0xa47   : > { %v21579_v2 = vpop.f32.mrb[70].mxu0 }
 0xa48   : > { %v21581_v59 = vpop.f32.mrb[71].mxu0  ;;  %14943 = vmatmul.mubr.msk.f32.gmra.mrb[96].mxu1 %vm389_vm2, %v22208_v40  ;;  %v10544_v40 = vsel %vm1060_vm4, %v10542_v51, %v10543_v35 }
 0xa49   : > { %14945 = vmatprep.mubr.msk.f32.mxu1 %vm389_vm2, %v22209_v56 }
 0xa4b   : > { %v21587_v60 = vpop.f32.mrb[72].mxu0 }
 0xa4c   : > { %v21589_v16 = vpop.f32.mrb[73].mxu0  ;;  %14946 = vmatmul.mubr.msk.f32.gmra.mrb[98].mxu1 %vm389_vm2, %v22210_v63 }
 0xa4d   : > { %14948 = vmatprep.mubr.msk.f32.mxu1 %vm389_vm2, %v22211_v14  ;;  %v22217_v14 = vld [vmem:[#allocation44_spill] sm:$0xff] }
 0xa4f   : > { %v21595_v17 = vpop.f32.mrb[74].mxu0 }
 0xa50   : > { %v21597_v30 = vpop.f32.mrb[75].mxu0  ;;  %14949 = vmatmul.mubr.msk.f32.gmra.mrb[100].mxu1 %vm389_vm2, %v22182_v34  ;;  %v22216_v34 = vld [vmem:[#allocation33_spill] sm:$0xff] }
 0xa51   : > { %14951 = vmatprep.mubr.msk.f32.mxu1 %vm389_vm2, %v22212_v55  ;;  %v10546_v55 = vsel %vm1060_vm4, %v10543_v35, %v10545_v9 }
 0xa53   : > { %v21603_v5 = vpop.f32.mrb[76].mxu0 }
 0xa54   : > { %v21605_v23 = vpop.f32.mrb[77].mxu0  ;;  %14952 = vmatmul.mubr.msk.f32.gmra.mrb[102].mxu1 %vm389_vm2, %v22213_v10 }
 0xa55   : > { %14954 = vmatprep.mubr.msk.f32.mxu1 %vm389_vm2, %v22214_v42 }
 0xa57   : > { %v21611_v15 = vpop.f32.mrb[78].mxu0 }
 0xa58   : > { %v21613_v12 = vpop.f32.mrb[79].mxu0  ;;  %14955 = vmatmul.mubr.msk.f32.gmra.mrb[72].mxu1 %vm389_vm2, %v22215_v29 }
 0xa59   : > { %14957 = vmatprep.mubr.msk.f32.mxu1 %vm389_vm2, %v22216_v34 }
 0xa5b   : > { %v21621_v45 = vpop.f32.mrb[80].mxu0 }
 0xa5c   : > { %v21623_v25 = vpop.f32.mrb[81].mxu0  ;;  %14958 = vmatmul.mubr.msk.f32.gmra.mrb[74].mxu1 %vm389_vm2, %v20883_v48 }
 0xa5d   : > { %14960 = vmatprep.mubr.msk.f32.mxu1 %vm389_vm2, %v21306_v19 }
 0xa5f   : > { %v21630_v56 = vpop.f32.mrb[82].mxu0 }
 0xa60   : > { %v21632_v63 = vpop.f32.mrb[83].mxu0  ;;  %14961 = vmatmul.mubr.msk.f32.gmra.mrb[76].mxu1 %vm389_vm2, %v22217_v14 }
 0xa61   : > { %14963 = vmatprep.mubr.msk.f32.mxu1 %vm389_vm2, %v10544_v40 }
 0xa63   : > { %v21638_v10 = vpop.f32.mrb[84].mxu0 }
 0xa64   : > { %v21640_v48 = vpop.f32.mrb[85].mxu0  ;;  %14964 = vmatmul.mubr.msk.f32.gmra.mrb[78].mxu1 %vm389_vm2, %v10546_v55 }
 0xa65   : > { %14982 = vmatprep.mubr.msk.f32.mxu1 %vm389_vm2, %v21107_v22  ;;  %v22218_v22 = vld [vmem:[#allocation24_spill] sm:$0xff] }
 0xa67   : > { %v21645_v19 = vpop.f32.mrb[86].mxu0 }
 0xa68   : > { %v21647_v42 = vpop.f32.mrb[87].mxu0  ;;  %14983 = vmatmul.mubr.msk.f32.vlgmr.msra.gmra.mrb[80].mxu1 %vm389_vm2, %v21122_v47  ;;  %v22219_v47 = vld [vmem:[#allocation26_spill] sm:$0xff] }
 0xa69   : > { %14985 = vmatprep.mubr.msk.f32.mxu1 %vm389_vm2, %v21130_v31  ;;  %v22220_v31 = vld [vmem:[#allocation28_spill] sm:$0xff] }
 0xa6c   : > { %14986 = vmatmul.mubr.msk.f32.gmra.mrb[82].mxu1 %vm389_vm2, %v21145_v32  ;;  %v22221_v32 = vld [vmem:[#allocation11_spill] sm:$0xff] }
 0xa6d   : > { %14988 = vmatprep.mubr.msk.f32.mxu1 %vm389_vm2, %v21155_v38  ;;  %v22222_v38 = vld [vmem:[#allocation32_spill] sm:$0xff] }
 0xa70   : > { %14989 = vmatmul.mubr.msk.f32.gmra.mrb[84].mxu1 %vm389_vm2, %v21164_v1  ;;  %v22223_v1 = vld [vmem:[#allocation41_spill] sm:$0xff] }
 0xa71   : > { %14991 = vmatprep.mubr.msk.f32.mxu1 %vm389_vm2, %v21173_v6  ;;  %v10808_v6 = vrot.slane %v21489_v11, 2 }
 0xa74   : > { %14992 = vmatmul.mubr.msk.f32.gmra.mrb[86].mxu1 %vm389_vm2, %v21182_v37  ;;  %v10809_v37 = vrot.slane %v21495_v28, 2 }
 0xa75   : > { %14994 = vmatprep.mubr.msk.f32.mxu1 %vm389_vm2, %v21190_v7  ;;  %v22224_v7 = vld [vmem:[#allocation42_spill] sm:$0xff] }
 0xa78   : > { %14995 = vmatmul.mubr.msk.f32.gmra.mrb[88].mxu1 %vm389_vm2, %v21199_v44  ;;  %v22225_v44 = vld [vmem:[#allocation45_spill] sm:$0xff] }
 0xa79   : > { %14997 = vmatprep.mubr.msk.f32.mxu1 %vm389_vm2, %v21207_v52  ;;  %v10811_v52 = vrot.slane %v8301_v54, 2 }
 0xa7c   : > { %14998 = vmatmul.mubr.msk.f32.gmra.mrb[90].mxu1 %vm389_vm2, %v21216_v50  ;;  %v10810_v50 = vsel %vm1307_vm5, %v10808_v6, %v10809_v37 }
 0xa7d   : > { %15000 = vmatprep.mubr.msk.f32.mxu1 %vm389_vm2, %v21224_v49  ;;  %v10812_v49 = vsel %vm1307_vm5, %v10809_v37, %v10811_v52 }
 0xa80   : > { %15001 = vmatmul.mubr.msk.f32.gmra.mrb[92].mxu1 %vm389_vm2, %v21233_v46  ;;  %v21716_v46 = vld [vmem:[%s21864_s8] ss:$0 sm:$0xff] }
 0xa81   : > { %15003 = vmatprep.mubr.msk.f32.mxu1 %vm389_vm2, %v21241_v33  ;;  %v22226_v33 = vld [vmem:[#allocation46_spill] sm:$0xff] }
 0xa84   : > { %15004 = vmatmul.mubr.msk.f32.gmra.mrb[94].mxu1 %vm389_vm2, %v21250_v36 }
 0xa85   : > { %15006 = vmatprep.mubr.msk.f32.mxu1 %vm389_vm2, %v21258_v61 }
 0xa88   : > { %15007 = vmatmul.mubr.msk.f32.gmra.mrb[96].mxu1 %vm389_vm2, %v21267_v20 }
 0xa89   : > { %15009 = vmatprep.mubr.msk.f32.mxu1 %vm389_vm2, %v21275_v41 }
 0xa8c   : > { %15010 = vmatmul.mubr.msk.f32.gmra.mrb[98].mxu1 %vm389_vm2, %v21282_v4 }
 0xa8d   : > { %15012 = vmatprep.mubr.msk.f32.mxu1 %vm389_vm2, %v22188_v8 }
 0xa90   : > { %15013 = vmatmul.mubr.msk.f32.gmra.mrb[100].mxu1 %vm389_vm2, %v22218_v22 }
 0xa91   : > { %15015 = vmatprep.mubr.msk.f32.mxu1 %vm389_vm2, %v22219_v47 }
 0xa94   : > { %15016 = vmatmul.mubr.msk.f32.gmra.mrb[102].mxu1 %vm389_vm2, %v22220_v31 }
 0xa95   : > { %15018 = vmatprep.mubr.msk.f32.mxu1 %vm389_vm2, %v22221_v32 }
 0xa98   : > { %15019 = vmatmul.mubr.msk.f32.gmra.mrb[72].mxu1 %vm389_vm2, %v22222_v38 }
 0xa99   : > { %15021 = vmatprep.mubr.msk.f32.mxu1 %vm389_vm2, %v22223_v1 }
 0xa9c   : > { %15022 = vmatmul.mubr.msk.f32.gmra.mrb[74].mxu1 %vm389_vm2, %v22224_v7 }
 0xa9d   : > { %15024 = vmatprep.mubr.msk.f32.mxu1 %vm389_vm2, %v22225_v44 }
 0xaa0   : > { %15025 = vmatmul.mubr.msk.f32.gmra.mrb[76].mxu1 %vm389_vm2, %v22226_v33 }
 0xaa1   : > { %15027 = vmatprep.mubr.msk.f32.mxu1 %vm389_vm2, %v10810_v50 }
 0xaa4   : > { %15028 = vmatmul.mubr.msk.f32.gmra.mrb[78].mxu1 %vm389_vm2, %v10812_v49  ;;  %vm11304_vm2 = vcmask 23552  }
 0xb3b   : > { %v14984_v61 = vpop.f32.mrb[80].mxu1 }
 0xb3c   : > { %v15758_v36 = vadd.f32 %v14984_v61, %v21555_v21  ;;  %v10883_v41 = vpop.f32.mrb[81].mxu1 }
 0xb3d   : > { %v15759_v20 = vadd.f32 %v10883_v41, %v21559_v13 }
 0xb3e   : > { %v11081_v4 = vadd.f32 %v15758_v36, %v21716_v46 }
 0xb3f   : > { %v11080_v8 = vadd.f32 %v15759_v20, %v21716_v46  ;;  %v14987_v11 = vpop.f32.mrb[82].mxu1 }
 0xb40   : > { %v12183_v28 = vmul.f32 -1.442695, %v11081_v4  ;;  %v15760_v29 = vadd.f32 %v14987_v11, %v21563_v0  ;;  %v10893_v34 = vpop.f32.mrb[83].mxu1 }
 0xb41   : > { %v12182_v51 = vmul.f32 -1.442695, %v11080_v8  ;;  %v15761_v35 = vadd.f32 %v10893_v34, %v21565_v57 }
 0xb42   : > { %16347 = vpow2.f32 %v12183_v28  ;;  %v11083_v54 = vadd.f32 %v15760_v29, %v21716_v46 }
 0xb43   : > { %16349 = vpow2.f32 %v12182_v51  ;;  %v11082_v21 = vadd.f32 %v15761_v35, %v21716_v46  ;;  %v14990_v9 = vpop.f32.mrb[84].mxu1 }
 0xb44   : > { %v12185_v13 = vmul.f32 -1.442695, %v11083_v54  ;;  %v15762_v40 = vadd.f32 %v14990_v9, %v21571_v53  ;;  %v10903_v14 = vpop.f32.mrb[85].mxu1 }
 0xb45   : > { %v12184_v55 = vmul.f32 -1.442695, %v11082_v21  ;;  %v15763_v22 = vadd.f32 %v10903_v14, %v21573_v27 }
 0xb46   : > { %16351 = vpow2.f32 %v12185_v13  ;;  %v11085_v0 = vadd.f32 %v15762_v40, %v21716_v46 }
 0xb47   : > { %16353 = vpow2.f32 %v12184_v55  ;;  %v11084_v57 = vadd.f32 %v15763_v22, %v21716_v46  ;;  %v14993_v47 = vpop.f32.mrb[86].mxu1 }
 0xb48   : > { %v12187_v31 = vmul.f32 -1.442695, %v11085_v0  ;;  %v15764_v32 = vadd.f32 %v14993_v47, %v21579_v2  ;;  %v10913_v38 = vpop.f32.mrb[87].mxu1 }
 0xb49   : > { %v12186_v1 = vmul.f32 -1.442695, %v11084_v57  ;;  %v15765_v6 = vadd.f32 %v10913_v38, %v21581_v59 }
 0xb4a   : > { %16355 = vpow2.f32 %v12187_v31  ;;  %v11087_v53 = vadd.f32 %v15764_v32, %v21716_v46 }
 0xb4b   : > { %16357 = vpow2.f32 %v12186_v1  ;;  %v11086_v27 = vadd.f32 %v15765_v6, %v21716_v46  ;;  %v14996_v37 = vpop.f32.mrb[88].mxu1 }
 0xb4c   : > { %v16348_v7 = vpop.eup %16347  ;;  %v12189_v44 = vmul.f32 -1.442695, %v11087_v53  ;;  %v15766_v52 = vadd.f32 %v14996_v37, %v21587_v60  ;;  %v10923_v50 = vpop.f32.mrb[89].mxu1 }
 0xb4d   : > { %v16350_v33 = vpop.eup %16349  ;;  %v11209_v49 = vadd.f32 1.0, %v16348_v7  ;;  %v12188_v61 = vmul.f32 -1.442695, %v11086_v27  ;;  %v15767_v2 = vadd.f32 %v10923_v50, %v21589_v16 }
 0xb4e   : > { %v11208_v36 = vadd.f32 1.0, %v16350_v33  ;;  %16359 = vpow2.f32 %v12189_v44  ;;  %v11089_v59 = vadd.f32 %v15766_v52, %v21716_v46 }
 0xb4f   : > { %16361 = vrcp.f32 %v11209_v49  ;;  %v11088_v41 = vadd.f32 %v15767_v2, %v21716_v46  ;;  %v14999_v20 = vpop.f32.mrb[90].mxu1 }
 0xb50   : > { %v16352_v4 = vpop.eup %16351  ;;  %16363 = vrcp.f32 %v11208_v36  ;;  %v12191_v8 = vmul.f32 -1.442695, %v11089_v59  ;;  %v15768_v11 = vadd.f32 %v14999_v20, %v21595_v17  ;;  %v10933_v60 = vpop.f32.mrb[91].mxu1 }
 0xb51   : > { %v16354_v28 = vpop.eup %16353  ;;  %v11211_v29 = vadd.f32 1.0, %v16352_v4  ;;  %16365 = vpow2.f32 %v12188_v61  ;;  %v12190_v34 = vmul.f32 -1.442695, %v11088_v41  ;;  %v15769_v16 = vadd.f32 %v10933_v60, %v21597_v30 }
 0xb52   : > { %v11210_v51 = vadd.f32 1.0, %v16354_v28  ;;  %16367 = vpow2.f32 %v12191_v8  ;;  %v11091_v35 = vadd.f32 %v15768_v11, %v21716_v46 }
 0xb53   : > { %16369 = vrcp.f32 %v11211_v29  ;;  %v11090_v54 = vadd.f32 %v15769_v16, %v21716_v46  ;;  %v15002_v21 = vpop.f32.mrb[92].mxu1 }
 0xb54   : > { %v16356_v9 = vpop.eup %16355  ;;  %16371 = vrcp.f32 %v11210_v51  ;;  %v12193_v13 = vmul.f32 -1.442695, %v11091_v35  ;;  %v15770_v17 = vadd.f32 %v15002_v21, %v21603_v5  ;;  %v10943_v40 = vpop.f32.mrb[93].mxu1 }
 0xb55   : > { %v16358_v14 = vpop.eup %16357  ;;  %v11213_v55 = vadd.f32 1.0, %v16356_v9  ;;  %16373 = vpow2.f32 %v12190_v34  ;;  %v12192_v22 = vmul.f32 -1.442695, %v11090_v54  ;;  %v15771_v30 = vadd.f32 %v10943_v40, %v21605_v23 }
 0xb56   : > { %v11212_v0 = vadd.f32 1.0, %v16358_v14  ;;  %16375 = vpow2.f32 %v12193_v13  ;;  %v11093_v57 = vadd.f32 %v15770_v17, %v21716_v46 }
 0xb57   : > { %16377 = vrcp.f32 %v11213_v55  ;;  %v11092_v5 = vadd.f32 %v15771_v30, %v21716_v46  ;;  %v15005_v47 = vpop.f32.mrb[94].mxu1 }
 0xb58   : > { %v16360_v31 = vpop.eup %16359  ;;  %16379 = vrcp.f32 %v11212_v0  ;;  %v12195_v23 = vmul.f32 -1.442695, %v11093_v57  ;;  %v15772_v32 = vadd.f32 %v15005_v47, %v21611_v15  ;;  %v10953_v38 = vpop.f32.mrb[95].mxu1 }
 0xb59   : > { %v16362_v1 = vpop.eup %16361  ;;  %v11215_v6 = vadd.f32 1.0, %v16360_v31  ;;  %16381 = vpow2.f32 %v12192_v22  ;;  %v12194_v53 = vmul.f32 -1.442695, %v11092_v5  ;;  %v15773_v27 = vadd.f32 %v10953_v38, %v21613_v12 }
 0xb5a   : > { %v16364_v37 = vpop.eup %16363  ;;  %11306 = vst.msk [vmem:[%s21750_s11 + $0x8] sm:$0xff] %vm11304_vm2, %v16362_v1  ;;  %16383 = vpow2.f32 %v12195_v23  ;;  %v11095_v7 = vadd.f32 %v15772_v32, %v21716_v46 }
 0xb5b   : > { %v16366_v44 = vpop.eup %16365  ;;  %11305 = vst.msk [vmem:[%s21750_s11] sm:$0xff] %vm11304_vm2, %v16364_v37  ;;  %16385 = vrcp.f32 %v11215_v6  ;;  %v11094_v15 = vadd.f32 %v15773_v27, %v21716_v46  ;;  %v15008_v52 = vpop.f32.mrb[96].mxu1 }
 0xb5c   : > { %v16368_v50 = vpop.eup %16367  ;;  %v11214_v33 = vadd.f32 1.0, %v16366_v44  ;;  %16387 = vpow2.f32 %v12194_v53  ;;  %v12197_v49 = vmul.f32 -1.442695, %v11095_v7  ;;  %v15774_v12 = vadd.f32 %v15008_v52, %v21621_v45  ;;  %v10963_v61 = vpop.f32.mrb[97].mxu1 }
 0xb5d   : > { %v16370_v2 = vpop.eup %16369  ;;  %v11217_v36 = vadd.f32 1.0, %v16368_v50  ;;  %v12196_v59 = vmul.f32 -1.442695, %v11094_v15  ;;  %v15775_v41 = vadd.f32 %v10963_v61, %v21623_v25 }
 0xb5e   : > { %v16372_v20 = vpop.eup %16371  ;;  %11308 = vst.msk [vmem:[%s21750_s11 + $0x18] sm:$0xff] %vm11304_vm2, %v16370_v2  ;;  %16389 = vrcp.f32 %v11214_v33  ;;  %v11097_v4 = vadd.f32 %v15774_v12, %v21716_v46 }
 0xb5f   : > { %v16374_v8 = vpop.eup %16373  ;;  %11307 = vst.msk [vmem:[%s21750_s11 + $0x10] sm:$0xff] %vm11304_vm2, %v16372_v20  ;;  %16391 = vrcp.f32 %v11217_v36  ;;  %v11096_v11 = vadd.f32 %v15775_v41, %v21716_v46  ;;  %v15011_v45 = vpop.f32.mrb[98].mxu1 }
 0xb60   : > { %v16376_v60 = vpop.eup %16375  ;;  %v11216_v28 = vadd.f32 1.0, %v16374_v8  ;;  %16393 = vpow2.f32 %v12197_v49  ;;  %v12199_v29 = vmul.f32 -1.442695, %v11097_v4  ;;  %v15776_v25 = vadd.f32 %v15011_v45, %v21630_v56  ;;  %v10973_v34 = vpop.f32.mrb[99].mxu1 }
 0xb61   : > { %v16378_v16 = vpop.eup %16377  ;;  %v11219_v51 = vadd.f32 1.0, %v16376_v60  ;;  %16395 = vpow2.f32 %v12196_v59  ;;  %v12198_v35 = vmul.f32 -1.442695, %v11096_v11  ;;  %v15777_v54 = vadd.f32 %v10973_v34, %v21632_v63 }
 0xb62   : > { %v16380_v21 = vpop.eup %16379  ;;  %11310 = vst.msk [vmem:[%s21750_s11 + $0x28] sm:$0xff] %vm11304_vm2, %v16378_v16  ;;  %16397 = vrcp.f32 %v11216_v28  ;;  %v11099_v9 = vadd.f32 %v15776_v25, %v21716_v46 }
 0xb63   : > { %v16382_v13 = vpop.eup %16381  ;;  %11309 = vst.msk [vmem:[%s21750_s11 + $0x20] sm:$0xff] %vm11304_vm2, %v16380_v21  ;;  %16399 = vrcp.f32 %v11219_v51  ;;  %v11098_v56 = vadd.f32 %v15777_v54, %v21716_v46  ;;  %v15014_v17 = vpop.f32.mrb[100].mxu1 }
 0xb64   : > { %v16384_v40 = vpop.eup %16383  ;;  %v11218_v14 = vadd.f32 1.0, %v16382_v13  ;;  %16401 = vpow2.f32 %v12199_v29  ;;  %v12201_v55 = vmul.f32 -1.442695, %v11099_v9  ;;  %v15778_v63 = vadd.f32 %v15014_v17, %v21638_v10  ;;  %v10983_v22 = vpop.f32.mrb[101].mxu1 }
 0xb65   : > { %v16386_v30 = vpop.eup %16385  ;;  %v11221_v0 = vadd.f32 1.0, %v16384_v40  ;;  %16403 = vpow2.f32 %v12198_v35  ;;  %v15779_v57 = vadd.f32 %v10983_v22, %v21640_v48  ;;  %v12200_v47 = vmul.f32 -1.442695, %v11098_v56 }
 0xb66   : > { %v16388_v5 = vpop.eup %16387  ;;  %11312 = vst.msk [vmem:[%s21750_s11 + $0x38] sm:$0xff] %vm11304_vm2, %v16386_v30  ;;  %16405 = vrcp.f32 %v11218_v14  ;;  %v11101_v31 = vadd.f32 %v15778_v63, %v21716_v46 }
 0xb67   : > { %16407 = vrcp.f32 %v11221_v0  ;;  %v11220_v23 = vadd.f32 1.0, %v16388_v5  ;;  %v11100_v32 = vadd.f32 %v15779_v57, %v21716_v46  ;;  %v15017_v10 = vpop.f32.mrb[102].mxu1 }
 0xb68   : > { %v16390_v38 = vpop.eup %16389  ;;  %16409 = vpow2.f32 %v12201_v55  ;;  %v12203_v1 = vmul.f32 -1.442695, %v11101_v31  ;;  %v15780_v6 = vadd.f32 %v15017_v10, %v21645_v19  ;;  %v10993_v48 = vpop.f32.mrb[103].mxu1 }
 0xb69   : > { %v16392_v53 = vpop.eup %16391  ;;  %11311 = vst.msk [vmem:[%s21750_s11 + $0x30] sm:$0xff] %vm11304_vm2, %v16390_v38  ;;  %16411 = vrcp.f32 %v11220_v23  ;;  %v12202_v27 = vmul.f32 -1.442695, %v11100_v32  ;;  %v15781_v37 = vadd.f32 %v10993_v48, %v21647_v42 }
 0xb6a   : > { %v16394_v7 = vpop.eup %16393  ;;  %11314 = vst.msk [vmem:[%s21750_s11 + $0x48] sm:$0xff] %vm11304_vm2, %v16392_v53  ;;  %16413 = vpow2.f32 %v12200_v47  ;;  %v11103_v44 = vadd.f32 %v15780_v6, %v21716_v46 }
 0xb6b   : > { %v16396_v15 = vpop.eup %16395  ;;  %v11223_v52 = vadd.f32 1.0, %v16394_v7  ;;  %16415 = vpow2.f32 %v12203_v1  ;;  %v11102_v19 = vadd.f32 %v15781_v37, %v21716_v46  ;;  %v15020_v50 = vpop.f32.mrb[72].mxu1 }
 0xb6c   : > { %v16398_v33 = vpop.eup %16397  ;;  %v11222_v49 = vadd.f32 1.0, %v16396_v15  ;;  %16417 = vpow2.f32 %v12202_v27  ;;  %v12205_v12 = vmul.f32 -1.442695, %v11103_v44  ;;  %v15782_v42 = vadd.f32 %v15020_v50, %v21517_v58  ;;  %v11003_v61 = vpop.f32.mrb[73].mxu1 }
 0xb6d   : > { %v16400_v2 = vpop.eup %16399  ;;  %11313 = vst.msk [vmem:[%s21750_s11 + $0x40] sm:$0xff] %vm11304_vm2, %v16398_v33  ;;  %16419 = vrcp.f32 %v11223_v52  ;;  %v12204_v36 = vmul.f32 -1.442695, %v11102_v19  ;;  %v15783_v59 = vadd.f32 %v11003_v61, %v21525_v43 }
 0xb6e   : > { %v16402_v41 = vpop.eup %16401  ;;  %11316 = vst.msk [vmem:[%s21750_s11 + $0x58] sm:$0xff] %vm11304_vm2, %v16400_v2  ;;  %16421 = vrcp.f32 %v11222_v49  ;;  %v11105_v20 = vadd.f32 %v15782_v42, %v21716_v46 }
 0xb6f   : > { %v16404_v4 = vpop.eup %16403  ;;  %v11225_v8 = vadd.f32 1.0, %v16402_v41  ;;  %16423 = vpow2.f32 %v12205_v12  ;;  %v11104_v58 = vadd.f32 %v15783_v59, %v21716_v46  ;;  %v15023_v11 = vpop.f32.mrb[74].mxu1 }
 0xb70   : > { %v16406_v45 = vpop.eup %16405  ;;  %v11224_v60 = vadd.f32 1.0, %v16404_v4  ;;  %16425 = vpow2.f32 %v12204_v36  ;;  %v12207_v28 = vmul.f32 -1.442695, %v11105_v20  ;;  %v15784_v43 = vadd.f32 %v15023_v11, %v21531_v18  ;;  %v11013_v29 = vpop.f32.mrb[75].mxu1 }
 0xb71   : > { %v16408_v25 = vpop.eup %16407  ;;  %11315 = vst.msk [vmem:[%s21750_s11 + $0x50] sm:$0xff] %vm11304_vm2, %v16406_v45  ;;  %16427 = vrcp.f32 %v11225_v8  ;;  %v12206_v34 = vmul.f32 -1.442695, %v11104_v58  ;;  %v15785_v16 = vadd.f32 %v11013_v29, %v21533_v24 }
 0xb72   : > { %v16410_v51 = vpop.eup %16409  ;;  %11318 = vst.msk [vmem:[%s21750_s11 + $0x68] sm:$0xff] %vm11304_vm2, %v16408_v25  ;;  %16429 = vrcp.f32 %v11224_v60  ;;  %v11107_v35 = vadd.f32 %v15784_v43, %v21716_v46 }
 0xb73   : > { %v16412_v54 = vpop.eup %16411  ;;  %v11227_v21 = vadd.f32 1.0, %v16410_v51  ;;  %16431 = vpow2.f32 %v12207_v28  ;;  %v11106_v18 = vadd.f32 %v15785_v16, %v21716_v46  ;;  %v15026_v9 = vpop.f32.mrb[76].mxu1 }
 0xb74   : > { %v16414_v13 = vpop.eup %16413  ;;  %11317 = vst.msk [vmem:[%s21750_s11 + $0x60] sm:$0xff] %vm11304_vm2, %v16412_v54  ;;  %16433 = vpow2.f32 %v12206_v34  ;;  %v12209_v56 = vmul.f32 -1.442695, %v11107_v35  ;;  %v15786_v17 = vadd.f32 %v15026_v9, %v21539_v3  ;;  %v11023_v24 = vpop.f32.mrb[77].mxu1 }
 0xb75   : > { %v16416_v40 = vpop.eup %16415  ;;  %16435 = vrcp.f32 %v11227_v21  ;;  %v11226_v14 = vadd.f32 1.0, %v16414_v13  ;;  %v15787_v55 = vadd.f32 %v11023_v24, %v21541_v39  ;;  %v12208_v30 = vmul.f32 -1.442695, %v11106_v18 }
 0xb76   : > { %v16418_v63 = vpop.eup %16417  ;;  %v11229_v22 = vadd.f32 1.0, %v16416_v40  ;;  %16437 = vpow2.f32 %v12209_v56  ;;  %v11109_v0 = vadd.f32 %v15786_v17, %v21716_v46 }
 0xb77   : > { %v16420_v57 = vpop.eup %16419  ;;  %16439 = vrcp.f32 %v11226_v14  ;;  %v11228_v5 = vadd.f32 1.0, %v16418_v63  ;;  %v11108_v47 = vadd.f32 %v15787_v55, %v21716_v46  ;;  %v15029_v3 = vpop.f32.mrb[78].mxu1 }
 0xb78   : > { %v16422_v31 = vpop.eup %16421  ;;  %11320 = vst.msk [vmem:[%s21750_s11 + $0x78] sm:$0xff] %vm11304_vm2, %v16420_v57  ;;  %16441 = vrcp.f32 %v11229_v22  ;;  %v12211_v23 = vmul.f32 -1.442695, %v11109_v0  ;;  %v15788_v39 = vadd.f32 %v15029_v3, %v21547_v62  ;;  %v11033_v32 = vpop.f32.mrb[79].mxu1 }
 0xb79   : > { %v16424_v10 = vpop.eup %16423  ;;  %11319 = vst.msk [vmem:[%s21750_s11 + $0x70] sm:$0xff] %vm11304_vm2, %v16422_v31  ;;  %16443 = vrcp.f32 %v11228_v5  ;;  %v15789_v38 = vadd.f32 %v11033_v32, %v21549_v26  ;;  %v12210_v48 = vmul.f32 -1.442695, %v11108_v47 }
 0xb7a   : > { %v16426_v1 = vpop.eup %16425  ;;  %v11231_v6 = vadd.f32 1.0, %v16424_v10  ;;  %16445 = vpow2.f32 %v12208_v30  ;;  %v11111_v53 = vadd.f32 %v15788_v39, %v21716_v46 }
 0xb7b   : > { %v16428_v27 = vpop.eup %16427  ;;  %v11230_v37 = vadd.f32 1.0, %v16426_v1  ;;  %16447 = vpow2.f32 %v12211_v23  ;;  %v11110_v62 = vadd.f32 %v15789_v38, %v21716_v46 }
 0xb7c   : > { %v16430_v7 = vpop.eup %16429  ;;  %11322 = vst.msk [vmem:[%s21750_s11 + $0x88] sm:$0xff] %vm11304_vm2, %v16428_v27  ;;  %16449 = vrcp.f32 %v11231_v6  ;;  %v12213_v44 = vmul.f32 -1.442695, %v11111_v53 }
 0xb7d   : > { %v16432_v15 = vpop.eup %16431  ;;  %11321 = vst.msk [vmem:[%s21750_s11 + $0x80] sm:$0xff] %vm11304_vm2, %v16430_v7  ;;  %16451 = vrcp.f32 %v11230_v37  ;;  %v12212_v19 = vmul.f32 -1.442695, %v11110_v62 }
 0xb7e   : > { %v16434_v26 = vpop.eup %16433  ;;  %v11233_v52 = vadd.f32 1.0, %v16432_v15  ;;  %16453 = vpow2.f32 %v12210_v48 }
 0xb7f   : > { %v16436_v50 = vpop.eup %16435  ;;  %v11232_v33 = vadd.f32 1.0, %v16434_v26  ;;  %16455 = vpow2.f32 %v12213_v44 }
 0xb80   : > { %v16438_v46 = vpop.eup %16437  ;;  %11324 = vst.msk [vmem:[%s21750_s11 + $0x98] sm:$0xff] %vm11304_vm2, %v16436_v50  ;;  %16457 = vrcp.f32 %v11233_v52 }
 0xb81   : > { %v16440_v49 = vpop.eup %16439  ;;  %16459 = vrcp.f32 %v11232_v33  ;;  %v11235_v12 = vadd.f32 1.0, %v16438_v46 }
 0xb82   : > { %v16442_v42 = vpop.eup %16441  ;;  %11323 = vst.msk [vmem:[%s21750_s11 + $0x90] sm:$0xff] %vm11304_vm2, %v16440_v49  ;;  %16461 = vpow2.f32 %v12212_v19 }
 0xb83   : > { %v16444_v61 = vpop.eup %16443  ;;  %11326 = vst.msk [vmem:[%s21750_s11 + $0xa8] sm:$0xff] %vm11304_vm2, %v16442_v42  ;;  %16463 = vrcp.f32 %v11235_v12 }
 0xb84   : > { %v16446_v2 = vpop.eup %16445  ;;  %11325 = vst.msk [vmem:[%s21750_s11 + $0xa0] sm:$0xff] %vm11304_vm2, %v16444_v61 }
 0xb85   : > { %v16448_v36 = vpop.eup %16447  ;;  %v11234_v59 = vadd.f32 1.0, %v16446_v2 }
 0xb86   : > { %v16450_v41 = vpop.eup %16449  ;;  %v11237_v20 = vadd.f32 1.0, %v16448_v36 }
 0xb87   : > { %v16452_v4 = vpop.eup %16451  ;;  %11328 = vst.msk [vmem:[%s21750_s11 + $0xb8] sm:$0xff] %vm11304_vm2, %v16450_v41  ;;  %16465 = vrcp.f32 %v11234_v59 }
 0xb88   : > { %v16454_v8 = vpop.eup %16453  ;;  %11327 = vst.msk [vmem:[%s21750_s11 + $0xb0] sm:$0xff] %vm11304_vm2, %v16452_v4  ;;  %16467 = vrcp.f32 %v11237_v20 }
 0xb89   : > { %v16456_v58 = vpop.eup %16455  ;;  %v11236_v11 = vadd.f32 1.0, %v16454_v8 }
 0xb8a   : > { %v16458_v45 = vpop.eup %16457  ;;  %v11239_v60 = vadd.f32 1.0, %v16456_v58 }
 0xb8b   : > { %v16460_v28 = vpop.eup %16459  ;;  %11330 = vst.msk [vmem:[%s21750_s11 + $0xc8] sm:$0xff] %vm11304_vm2, %v16458_v45  ;;  %16469 = vrcp.f32 %v11236_v11 }
 0xb8c   : > { %v16462_v43 = vpop.eup %16461  ;;  %11329 = vst.msk [vmem:[%s21750_s11 + $0xc0] sm:$0xff] %vm11304_vm2, %v16460_v28  ;;  %16471 = vrcp.f32 %v11239_v60 }
 0xb8d   : > { %v16464_v29 = vpop.eup %16463  ;;  %v11238_v25 = vadd.f32 1.0, %v16462_v43 }
 0xb8e   : > { %11332 = vst.msk [vmem:[%s21750_s11 + $0xd8] sm:$0xff] %vm11304_vm2, %v16464_v29 }
 0xb8f   : > { %16473 = vrcp.f32 %v11238_v25 }
 0xb91   : > { %v16466_v34 = vpop.eup %16465 }
 0xb92   : > { %v16468_v16 = vpop.eup %16467  ;;  %11331 = vst.msk [vmem:[%s21750_s11 + $0xd0] sm:$0xff] %vm11304_vm2, %v16466_v34 }
 0xb93   : > { %11334 = vst.msk [vmem:[%s21750_s11 + $0xe8] sm:$0xff] %vm11304_vm2, %v16468_v16 }
 0xb95   : > { %v16470_v51 = vpop.eup %16469 }
 0xb96   : > { %v16472_v35 = vpop.eup %16471  ;;  %11333 = vst.msk [vmem:[%s21750_s11 + $0xe0] sm:$0xff] %vm11304_vm2, %v16470_v51 }
 0xb97   : > { %11336 = vst.msk [vmem:[%s21750_s11 + $0xf8] sm:$0xff] %vm11304_vm2, %v16472_v35 }
 0xb99   : > { %v16474_v54 = vpop.eup %16473 }
 0xb9a   : > { %11335 = vst.msk [vmem:[%s21750_s11 + $0xf0] sm:$0xff] %vm11304_vm2, %v16474_v54 }
 0xb9b PF: > { %s19_s30 = sadd.s32 1, %s16541_s30  }
 0xb9c   : > { %p16_p4 = scmp.ge.s32.totalorder %s19_s30, 4  }
 0xb9e   :  { %18 = sbr.rel (!%p16_p4) target bundleno = 1 (0x1), region = 90 }

</bundles_post_ra>
